<compile_context>
chip_gen: v7x
topology: tpu7x:2x2x1
jax: 0.10.0
libtpu: 0.0.40
codegen_flags: <defaults>
</compile_context>

<pallas_src>
import math

import jax
import jax.numpy as jnp
from jax import lax
from jax.experimental import pallas as pl
from jax.experimental.pallas import tpu as pltpu


def _num_tensorcores():
    try:
        return max(1, int(getattr(jax.devices()[0], "num_cores", 1) or 1))
    except Exception:
        return 1


# ----------------------------------------------------------------------------
# Fused kernel (per grid step = one batch block x one time tile):
#   x_ref     : (tile_T, rows, C)      feat_v tile, lane-dense, time-major
#   steps_ref : (rows, 1) int32        per-sample selected timestep
#   wih0_ref  : (C, 4H)   b0_ref: (1, 4H)
#   wcomb_ref : (2H, 8H)               [Whh0^T | Wih1^T ; 0 | Whh1^T]
#   b1_ref    : (1, 4H)
#   wlin_ref  : (H, H)    blin_ref: (1, H)
#   out_ref   : (rows, H)
# scratch (persist across grid steps):
#   gx0_ref   : (tile_T, rows, 4H) f32   hoisted layer-0 input projection
#   h01_ref   : (rows, 2H) wd            packed [h0 | h1]
#   c0_ref, c1_ref, sel_ref : (rows, H) f32
# ----------------------------------------------------------------------------
def _sar_encoder_kernel(x_ref, steps_ref, wih0_ref, b0_ref, wcomb_ref, b1_ref,
                        wlin_ref, blin_ref, out_ref,
                        gx0_ref, h01_ref, c0_ref, c1_ref, sel_ref):
    tile_T, rows, C = x_ref.shape
    H4 = b0_ref.shape[1]
    H = H4 // 4

    t_blk = pl.program_id(1)
    n_blk = pl.num_programs(1)

    # ---- init persistent state at the first time tile of this batch block ----
    @pl.when(t_blk == 0)
    def _():
        h01_ref[...] = jnp.zeros_like(h01_ref)
        c0_ref[...] = jnp.zeros_like(c0_ref)
        c1_ref[...] = jnp.zeros_like(c1_ref)
        sel_ref[...] = jnp.zeros_like(sel_ref)

    # ---- hoisted layer-0 input projection: ONE MXU matmul per tile ----
    x_all = x_ref[...].reshape(tile_T * rows, C)
    gx0 = (jnp.dot(x_all, wih0_ref[...], preferred_element_type=jnp.float32)
           + b0_ref[...])
    gx0_ref[...] = gx0.reshape(tile_T, rows, H4)

    wcomb = wcomb_ref[...]
    b1 = b1_ref[...]
    steps = steps_ref[...]
    base_t = t_blk * tile_T

    def gate_split(g):
        # PyTorch gate order: i, f, g, o
        return (jax.nn.sigmoid(g[:, 0 * H:1 * H]),
                jax.nn.sigmoid(g[:, 1 * H:2 * H]),
                jnp.tanh(g[:, 2 * H:3 * H]),
                jax.nn.sigmoid(g[:, 3 * H:4 * H]))

    # ---- skewed (wavefront) recurrence, fully unrolled over the tile:
    #      local step t computes layer-0 step (base_t+t) and layer-1 step
    #      (base_t+t-1) with a single fused matmul on [h0 ; h1] @ wcomb ----
    for t in range(tile_T):
        tg = base_t + t
        gall = jnp.dot(h01_ref[...], wcomb, preferred_element_type=jnp.float32)
        g0 = gall[:, :H4] + gx0_ref[t]
        g1 = gall[:, H4:] + b1

        i0, f0, gg0, o0 = gate_split(g0)
        c0n = f0 * c0_ref[...] + i0 * gg0
        h0n = o0 * jnp.tanh(c0n)

        i1, f1, gg1, o1 = gate_split(g1)
        c1n = f1 * c1_ref[...] + i1 * gg1
        h1n = o1 * jnp.tanh(c1n)
        if t == 0:
            # at global step 0 there is no pending layer-1 step: keep zeros
            valid1 = (tg > 0).astype(jnp.float32)
            c1n = c1n * valid1
            h1n = h1n * valid1

        # per-sample valid-step selection of the layer-1 output
        sel_ref[...] = jnp.where(steps == tg - 1, h1n, sel_ref[...])

        c0_ref[...] = c0n
        c1_ref[...] = c1n
        h01_ref[:, :H] = h0n.astype(h01_ref.dtype)
        h01_ref[:, H:] = h1n.astype(h01_ref.dtype)

    # ---- last time tile: drain the pending layer-1 step, final select, Linear ----
    @pl.when(t_blk == n_blk - 1)
    def _():
        gall = jnp.dot(h01_ref[...], wcomb, preferred_element_type=jnp.float32)
        g1 = gall[:, H4:] + b1
        i1, f1, gg1, o1 = gate_split(g1)
        c1f = f1 * c1_ref[...] + i1 * gg1
        h1f = o1 * jnp.tanh(c1f)
        last_t = n_blk * tile_T - 1
        sel = jnp.where(steps == last_t, h1f, sel_ref[...])
        out_ref[...] = (jnp.dot(sel.astype(wlin_ref.dtype), wlin_ref[...],
                                preferred_element_type=jnp.float32)
                        + blin_ref[...]).astype(out_ref.dtype)


# ----------------------------------------------------------------------------
# Wrapper: layout plumbing, padding, param prep, grid/BlockSpecs, pallas_call
# ----------------------------------------------------------------------------
def sar_encoder_forward(feat, params, valid_ratios=None,
                        weight_dtype=jnp.float32, tile_t=8):
    N, C, Himg, W = feat.shape
    T = W
    H = params["w_hh_l0"].shape[1]
    H4 = 4 * H
    wd = jnp.dtype(weight_dtype)

    # per-sample selected timestep (PyTorch: min(T, ceil(T*r)) - 1; a negative
    # python index wraps to the last step)
    if valid_ratios is None:
        steps = jnp.full((N,), T - 1, jnp.int32)
    else:
        vr = jnp.asarray(valid_ratios, jnp.float32)
        steps = jnp.minimum(T, jnp.ceil(T * vr).astype(jnp.int32)) - 1
        steps = jnp.where(steps < 0, T - 1, steps)

    # layout plumbing in XLA: H max-pool + time-major, lane-dense (C last)
    x = jnp.transpose(jnp.max(feat, axis=2), (2, 0, 1)).astype(wd)   # (T, N, C)

    # batch padding to the sublane tile; optional split across TensorCores
    row_tile = 16 if wd == jnp.dtype(jnp.bfloat16) else 8
    Np = max(row_tile, ((N + row_tile - 1) // row_tile) * row_tile)
    batch_blocks = 1
    if _num_tensorcores() >= 2 and Np >= 2 * row_tile:
        batch_blocks = 2
        Np = ((Np + 2 * row_tile - 1) // (2 * row_tile)) * (2 * row_tile)
    rows = Np // batch_blocks

    # time padding to a whole number of tiles (padded steps never match `steps`)
    tile_T = max(1, min(int(tile_t), T))
    Tpad = ((T + tile_T - 1) // tile_T) * tile_T
    n_t = Tpad // tile_T

    if Tpad != T or Np != N:
        x = jnp.pad(x, ((0, Tpad - T), (0, Np - N), (0, 0)))
        steps = jnp.pad(steps, (0, Np - N), constant_values=T - 1)
    steps2d = steps.reshape(Np, 1).astype(jnp.int32)

    # ---- weights ----
    wih0_t = params["w_ih_l0"].T.astype(wd)                                # (C, 4H)
    b0 = (params["b_ih_l0"] + params["b_hh_l0"]).reshape(1, H4).astype(jnp.float32)
    # block-concatenated recurrent weight: [h0 | h1] @ wcomb -> [g0_rec | g1]
    wcomb = jnp.zeros((2 * H, 8 * H), jnp.float32)
    wcomb = wcomb.at[:H, :H4].set(params["w_hh_l0"].T)
    wcomb = wcomb.at[:H, H4:].set(params["w_ih_l1"].T)
    wcomb = wcomb.at[H:, H4:].set(params["w_hh_l1"].T)
    wcomb = wcomb.astype(wd)
    b1 = (params["b_ih_l1"] + params["b_hh_l1"]).reshape(1, H4).astype(jnp.float32)
    wlin_t = params["w_lin"].T.astype(wd)                                  # (H, H)
    blin = params["b_lin"].reshape(1, H).astype(jnp.float32)

    # ---- grid / specs ----
    grid = (batch_blocks, n_t)
    in_specs = [
        pl.BlockSpec((tile_T, rows, C), lambda b, t: (t, b, 0)),   # feat_v tile
        pl.BlockSpec((rows, 1), lambda b, t: (b, 0)),              # steps
        pl.BlockSpec((C, H4), lambda b, t: (0, 0)),                # wih0^T
        pl.BlockSpec((1, H4), lambda b, t: (0, 0)),                # b0
        pl.BlockSpec((2 * H, 8 * H), lambda b, t: (0, 0)),         # wcomb
        pl.BlockSpec((1, H4), lambda b, t: (0, 0)),                # b1
        pl.BlockSpec((H, H), lambda b, t: (0, 0)),                 # wlin^T
        pl.BlockSpec((1, H), lambda b, t: (0, 0)),                 # blin
    ]
    out_specs = pl.BlockSpec((rows, H), lambda b, t: (b, 0))
    scratch_shapes = [
        pltpu.VMEM((tile_T, rows, H4), jnp.float32),   # gx0
        pltpu.VMEM((rows, 2 * H), wd),                 # packed [h0 | h1]
        pltpu.VMEM((rows, H), jnp.float32),            # c0
        pltpu.VMEM((rows, H), jnp.float32),            # c1
        pltpu.VMEM((rows, H), jnp.float32),            # sel
    ]

    # ---- explicit VMEM budget (blocks double-buffered + weights + scratch) ----
    def _nbytes(a):
        return int(a.size) * jnp.dtype(a.dtype).itemsize

    weight_bytes = sum(_nbytes(a) for a in (wih0_t, b0, wcomb, b1, wlin_t, blin))
    in_block_bytes = tile_T * rows * C * wd.itemsize + rows * 4
    scratch_bytes = (tile_T * rows * H4 * 4 + rows * 2 * H * wd.itemsize
                     + 3 * rows * H * 4)
    out_block_bytes = rows * H * 4
    needed = 2 * (in_block_bytes + weight_bytes + out_block_bytes) + scratch_bytes
    vmem_limit = max(needed + (8 << 20), 32 << 20)
    if vmem_limit > (48 << 20):          # only exceed 48 MiB for genuinely large
        vmem_limit = min(vmem_limit, 100 << 20)   # shapes (v5e/v6e: 128 MiB VMEM)

    cost = pl.CostEstimate(
        flops=int(2 * Tpad * Np * C * H4                       # input projection
                  + 2 * (Tpad + 1) * Np * (2 * H) * (8 * H)    # fused recurrence
                  + 2 * Np * H * H),                           # final linear
        transcendentals=int(10 * Tpad * Np * H),
        bytes_accessed=int(_nbytes(x) + _nbytes(steps2d) + weight_bytes
                           + Np * H * 4),
    )

    out = pl.pallas_call(
        _sar_encoder_kernel,
        out_shape=jax.ShapeDtypeStruct((Np, H), jnp.float32),
        grid_spec=pltpu.PrefetchScalarGridSpec(
            num_scalar_prefetch=0,
            grid=grid,
            in_specs=in_specs,
            out_specs=out_specs,
            scratch_shapes=scratch_shapes),
        compiler_params=pltpu.CompilerParams(
            dimension_semantics=("parallel", "arbitrary"),
            vmem_limit_bytes=int(vmem_limit)),
        cost_estimate=cost,
    )(x, steps2d, wih0_t, b0, wcomb, b1, wlin_t, blin)

    return out[:N]


# ----------------------------------------------------------------------------
# Parameter construction (deterministic, PyTorch-default-style uniform init)
# ----------------------------------------------------------------------------
def init_params(key, d_model, d_enc):
    k = 1.0 / math.sqrt(d_enc)
    keys = jax.random.split(key, 10)
    u = lambda kk, shape, s: jax.random.uniform(kk, shape, jnp.float32, -s, s)
    return {
        "w_ih_l0": u(keys[0], (4 * d_enc, d_model), k),
        "w_hh_l0": u(keys[1], (4 * d_enc, d_enc), k),
        "b_ih_l0": u(keys[2], (4 * d_enc,), k),
        "b_hh_l0": u(keys[3], (4 * d_enc,), k),
        "w_ih_l1": u(keys[4], (4 * d_enc, d_enc), k),
        "w_hh_l1": u(keys[5], (4 * d_enc, d_enc), k),
        "b_ih_l1": u(keys[6], (4 * d_enc,), k),
        "b_hh_l1": u(keys[7], (4 * d_enc,), k),
        "w_lin": u(keys[8], (d_enc, d_enc), k),
        "b_lin": u(keys[9], (d_enc,), k),
    }


# ----------------------------------------------------------------------------
# Pure-JAX reference (mirrors PyTorch semantics) for verification
# ----------------------------------------------------------------------------
def _ref_forward(feat, params, valid_ratios=None):
    feat_v = jnp.max(feat, axis=2)                 # (N, C, W)
    feat_v = jnp.transpose(feat_v, (0, 2, 1))      # (N, T, C)
    N, T, _ = feat_v.shape
    Hdim = params["w_hh_l0"].shape[1]

    def cell(carry, x, wih, whh, bih, bhh):
        h, c = carry
        gates = x @ wih.T + h @ whh.T + bih + bhh
        i = jax.nn.sigmoid(gates[:, 0 * Hdim:1 * Hdim])
        f = jax.nn.sigmoid(gates[:, 1 * Hdim:2 * Hdim])
        g = jnp.tanh(gates[:, 2 * Hdim:3 * Hdim])
        o = jax.nn.sigmoid(gates[:, 3 * Hdim:4 * Hdim])
        c_new = f * c + i * g
        h_new = o * jnp.tanh(c_new)
        return (h_new, c_new), h_new

    def run_layer(x_seq, wih, whh, bih, bhh):
        init = (jnp.zeros((N, Hdim), jnp.float32), jnp.zeros((N, Hdim), jnp.float32))
        _, hs = lax.scan(lambda c, x: cell(c, x, wih, whh, bih, bhh), init,
                         jnp.transpose(x_seq, (1, 0, 2)))
        return jnp.transpose(hs, (1, 0, 2))

    h1 = run_layer(feat_v, params["w_ih_l0"], params["w_hh_l0"],
                   params["b_ih_l0"], params["b_hh_l0"])
    h2 = run_layer(h1, params["w_ih_l1"], params["w_hh_l1"],
                   params["b_ih_l1"], params["b_hh_l1"])

    if valid_ratios is not None:
        steps = jnp.minimum(
            T, jnp.ceil(T * jnp.asarray(valid_ratios, jnp.float32)).astype(jnp.int32)
        ) - 1
        valid_hf = h2[jnp.arange(N), steps]
    else:
        valid_hf = h2[:, -1, :]
    return valid_hf @ params["w_lin"].T + params["b_lin"]


if __name__ == "__main__":
    # Small, lane/sublane-friendly shapes: batch=2 (padded internally),
    # d_model=128, H_img=4, W(=T)=8, d_enc=128.
    N, d_model, Himg, Wimg = 2, 128, 4, 8
    d_enc = 128

    key = jax.random.PRNGKey(0)
    k_feat, k_param = jax.random.split(key)
    feat = jax.random.normal(k_feat, (N, d_model, Himg, Wimg), jnp.float32)
    params = init_params(k_param, d_model, d_enc)

    # Path 1: valid_ratios=None (select last timestep), f32
    out = jax.block_until_ready(sar_encoder_forward(feat, params, valid_ratios=None))
    ref = _ref_forward(feat, params, valid_ratios=None)
    assert out.shape == (N, d_enc)
    assert jnp.allclose(out, ref, atol=1e-4, rtol=1e-4)

    # Path 2: valid_ratios given (in-kernel per-sample step selection), f32
    vr = [0.5, 1.0]
    out2 = jax.block_until_ready(sar_encoder_forward(feat, params, valid_ratios=vr))
    ref2 = _ref_forward(feat, params, valid_ratios=vr)
    assert jnp.allclose(out2, ref2, atol=1e-4, rtol=1e-4)

    # Path 3: bf16 weights/activations (loose tolerance: bf16 recurrent state)
    out3 = jax.block_until_ready(
        sar_encoder_forward(feat, params, valid_ratios=vr,
                            weight_dtype=jnp.bfloat16))
    assert out3.shape == (N, d_enc)
    assert bool(jnp.all(jnp.isfinite(out3)))
    assert jnp.allclose(out3, ref2, atol=1e-1, rtol=1e-1)

    print("KERNEL_OK")
</pallas_src>

<mosaic_0001>
module attributes {stable_mosaic.version = 11 : i64} {
  func.func @_sar_encoder_kernel(%arg0: i32, %arg1: i32, %arg2: memref<8x8x128xf32, #tpu.memory_space<vmem>>, %arg3: memref<8x1xi32, #tpu.memory_space<vmem>>, %arg4: memref<128x512xf32, #tpu.memory_space<vmem>>, %arg5: memref<1x512xf32, #tpu.memory_space<vmem>>, %arg6: memref<256x1024xf32, #tpu.memory_space<vmem>>, %arg7: memref<1x512xf32, #tpu.memory_space<vmem>>, %arg8: memref<128x128xf32, #tpu.memory_space<vmem>>, %arg9: memref<1x128xf32, #tpu.memory_space<vmem>>, %arg10: memref<8x128xf32, #tpu.memory_space<vmem>>, %arg11: memref<8x8x512xf32, #tpu.memory_space<vmem>>, %arg12: memref<8x256xf32, #tpu.memory_space<vmem>>, %arg13: memref<8x128xf32, #tpu.memory_space<vmem>>, %arg14: memref<8x128xf32, #tpu.memory_space<vmem>>, %arg15: memref<8x128xf32, #tpu.memory_space<vmem>>) attributes {dimension_semantics = [#tpu.dimension_semantics<parallel>, #tpu.dimension_semantics<arbitrary>], iteration_bounds = array<i64: 1, 1>, scalar_prefetch = 0 : i64, scratch_operands = 5 : i64, tpu.core_type = #tpu.core_type<tc>, window_params = [{transform_indices = @transform_0, window_bounds = array<i64: 8, 8, 128>}, {transform_indices = @transform_1, window_bounds = array<i64: 8, 1>}, {pipeline_mode = #tpu.pipeline_mode<synchronous>, transform_indices = @transform_2, window_bounds = array<i64: 128, 512>}, {pipeline_mode = #tpu.pipeline_mode<synchronous>, transform_indices = @transform_3, window_bounds = array<i64: 1, 512>}, {pipeline_mode = #tpu.pipeline_mode<synchronous>, transform_indices = @transform_4, window_bounds = array<i64: 256, 1024>}, {pipeline_mode = #tpu.pipeline_mode<synchronous>, transform_indices = @transform_5, window_bounds = array<i64: 1, 512>}, {pipeline_mode = #tpu.pipeline_mode<synchronous>, transform_indices = @transform_6, window_bounds = array<i64: 128, 128>}, {pipeline_mode = #tpu.pipeline_mode<synchronous>, transform_indices = @transform_7, window_bounds = array<i64: 1, 128>}, {transform_indices = @transform_8, window_bounds = array<i64: 8, 128>}]} {
    %c0_i32 = arith.constant 0 : i32
    %0 = arith.cmpi eq, %arg1, %c0_i32 : i32
    %1 = arith.extui %0 : i1 to i32
    %c0_i32_0 = arith.constant 0 : i32
    %2 = arith.cmpi ne, %1, %c0_i32_0 : i32
    scf.if %2 {
      %cst_244 = arith.constant 0.000000e+00 : f32
      %618 = vector.broadcast %cst_244 : f32 to vector<8x256xf32>
      %c0_245 = arith.constant 0 : index
      %c0_246 = arith.constant 0 : index
      %619 = vector.load %arg12[%c0_245, %c0_246] : memref<8x256xf32, #tpu.memory_space<vmem>>, vector<8x256xf32>
      tpu.vector_store %arg12[%c0_245, %c0_246], %618 {strides = array<i32>} : memref<8x256xf32, #tpu.memory_space<vmem>>, vector<8x256xf32>,
      %cst_247 = arith.constant 0.000000e+00 : f32
      %620 = vector.broadcast %cst_247 : f32 to vector<8x128xf32>
      %c0_248 = arith.constant 0 : index
      %c0_249 = arith.constant 0 : index
      %621 = vector.load %arg13[%c0_248, %c0_249] : memref<8x128xf32, #tpu.memory_space<vmem>>, vector<8x128xf32>
      tpu.vector_store %arg13[%c0_248, %c0_249], %620 {strides = array<i32>} : memref<8x128xf32, #tpu.memory_space<vmem>>, vector<8x128xf32>,
      %cst_250 = arith.constant 0.000000e+00 : f32
      %622 = vector.broadcast %cst_250 : f32 to vector<8x128xf32>
      %c0_251 = arith.constant 0 : index
      %c0_252 = arith.constant 0 : index
      %623 = vector.load %arg14[%c0_251, %c0_252] : memref<8x128xf32, #tpu.memory_space<vmem>>, vector<8x128xf32>
      tpu.vector_store %arg14[%c0_251, %c0_252], %622 {strides = array<i32>} : memref<8x128xf32, #tpu.memory_space<vmem>>, vector<8x128xf32>,
      %cst_253 = arith.constant 0.000000e+00 : f32
      %624 = vector.broadcast %cst_253 : f32 to vector<8x128xf32>
      %c0_254 = arith.constant 0 : index
      %c0_255 = arith.constant 0 : index
      %625 = vector.load %arg15[%c0_254, %c0_255] : memref<8x128xf32, #tpu.memory_space<vmem>>, vector<8x128xf32>
      tpu.vector_store %arg15[%c0_254, %c0_255], %624 {strides = array<i32>} : memref<8x128xf32, #tpu.memory_space<vmem>>, vector<8x128xf32>,
    } else {
    }
    %c0 = arith.constant 0 : index
    %c0_1 = arith.constant 0 : index
    %c0_2 = arith.constant 0 : index
    %3 = vector.load %arg2[%c0, %c0_1, %c0_2] : memref<8x8x128xf32, #tpu.memory_space<vmem>>, vector<8x8x128xf32>
    %4 = vector.shape_cast %3 : vector<8x8x128xf32> to vector<64x128xf32>
    %c0_3 = arith.constant 0 : index
    %c0_4 = arith.constant 0 : index
    %5 = vector.load %arg4[%c0_3, %c0_4] : memref<128x512xf32, #tpu.memory_space<vmem>>, vector<128x512xf32>
    %cst = arith.constant dense<0.000000e+00> : vector<64x512xf32>
    %6 = tpu.matmul %4, %5, %cst {dimension_numbers = #tpu.dot_dimension_numbers<[1], [0], [0], [1], [0, 0, 1, 1], [], []>} : vector<64x128xf32>, vector<128x512xf32>, vector<64x512xf32> -> vector<64x512xf32>
    %c0_5 = arith.constant 0 : index
    %c0_6 = arith.constant 0 : index
    %7 = vector.load %arg5[%c0_5, %c0_6] : memref<1x512xf32, #tpu.memory_space<vmem>>, vector<1x512xf32>
    %8 = vector.broadcast %7 : vector<1x512xf32> to vector<64x512xf32>
    %9 = arith.addf %6, %8 : vector<64x512xf32>
    %10 = vector.shape_cast %9 : vector<64x512xf32> to vector<8x8x512xf32>
    %c0_7 = arith.constant 0 : index
    %c0_8 = arith.constant 0 : index
    %c0_9 = arith.constant 0 : index
    %11 = vector.load %arg11[%c0_7, %c0_8, %c0_9] : memref<8x8x512xf32, #tpu.memory_space<vmem>>, vector<8x8x512xf32>
    tpu.vector_store %arg11[%c0_7, %c0_8, %c0_9], %10 {strides = array<i32>} : memref<8x8x512xf32, #tpu.memory_space<vmem>>, vector<8x8x512xf32>,
    %c0_10 = arith.constant 0 : index
    %c0_11 = arith.constant 0 : index
    %12 = vector.load %arg6[%c0_10, %c0_11] : memref<256x1024xf32, #tpu.memory_space<vmem>>, vector<256x1024xf32>
    %c0_12 = arith.constant 0 : index
    %c0_13 = arith.constant 0 : index
    %13 = vector.load %arg7[%c0_12, %c0_13] : memref<1x512xf32, #tpu.memory_space<vmem>>, vector<1x512xf32>
    %c0_14 = arith.constant 0 : index
    %c0_15 = arith.constant 0 : index
    %14 = vector.load %arg3[%c0_14, %c0_15] : memref<8x1xi32, #tpu.memory_space<vmem>>, vector<8x1xi32>
    %c8_i32 = arith.constant 8 : i32
    %15 = arith.muli %arg1, %c8_i32 : i32
    %c0_i32_16 = arith.constant 0 : i32
    %16 = arith.addi %15, %c0_i32_16 : i32
    %c0_17 = arith.constant 0 : index
    %c0_18 = arith.constant 0 : index
    %17 = vector.load %arg12[%c0_17, %c0_18] : memref<8x256xf32, #tpu.memory_space<vmem>>, vector<8x256xf32>
    %cst_19 = arith.constant dense<0.000000e+00> : vector<8x1024xf32>
    %18 = tpu.matmul %17, %12, %cst_19 {dimension_numbers = #tpu.dot_dimension_numbers<[1], [0], [0], [1], [0, 0, 1, 1], [], []>} : vector<8x256xf32>, vector<256x1024xf32>, vector<8x1024xf32> -> vector<8x1024xf32>
    %19 = vector.extract_strided_slice %18 {offsets = [0, 0], sizes = [8, 512], strides = [1, 1]} : vector<8x1024xf32> to vector<8x512xf32>
    %c0_20 = arith.constant 0 : index
    %c0_21 = arith.constant 0 : index
    %c0_22 = arith.constant 0 : index
    %20 = vector.load %arg11[%c0_20, %c0_21, %c0_22] : memref<8x8x512xf32, #tpu.memory_space<vmem>>, vector<1x8x512xf32>
    %21 = vector.shape_cast %20 : vector<1x8x512xf32> to vector<8x512xf32>
    %22 = arith.addf %19, %21 : vector<8x512xf32>
    %23 = vector.extract_strided_slice %18 {offsets = [0, 512], sizes = [8, 512], strides = [1, 1]} : vector<8x1024xf32> to vector<8x512xf32>
    %24 = vector.broadcast %13 : vector<1x512xf32> to vector<8x512xf32>
    %25 = arith.addf %23, %24 : vector<8x512xf32>
    %26 = vector.extract_strided_slice %22 {offsets = [0, 0], sizes = [8, 128], strides = [1, 1]} : vector<8x512xf32> to vector<8x128xf32>
    %27 = arith.negf %26 : vector<8x128xf32>
    %28 = math.exp %27 : vector<8x128xf32>
    %cst_23 = arith.constant 1.000000e+00 : f32
    %29 = vector.broadcast %cst_23 : f32 to vector<8x128xf32>
    %30 = arith.addf %29, %28 : vector<8x128xf32>
    %31 = arith.divf %29, %30 : vector<8x128xf32>
    %32 = vector.extract_strided_slice %22 {offsets = [0, 128], sizes = [8, 128], strides = [1, 1]} : vector<8x512xf32> to vector<8x128xf32>
    %33 = arith.negf %32 : vector<8x128xf32>
    %34 = math.exp %33 : vector<8x128xf32>
    %cst_24 = arith.constant 1.000000e+00 : f32
    %35 = vector.broadcast %cst_24 : f32 to vector<8x128xf32>
    %36 = arith.addf %35, %34 : vector<8x128xf32>
    %37 = arith.divf %35, %36 : vector<8x128xf32>
    %38 = vector.extract_strided_slice %22 {offsets = [0, 256], sizes = [8, 128], strides = [1, 1]} : vector<8x512xf32> to vector<8x128xf32>
    %39 = math.tanh %38 : vector<8x128xf32>
    %40 = vector.extract_strided_slice %22 {offsets = [0, 384], sizes = [8, 128], strides = [1, 1]} : vector<8x512xf32> to vector<8x128xf32>
    %41 = arith.negf %40 : vector<8x128xf32>
    %42 = math.exp %41 : vector<8x128xf32>
    %cst_25 = arith.constant 1.000000e+00 : f32
    %43 = vector.broadcast %cst_25 : f32 to vector<8x128xf32>
    %44 = arith.addf %43, %42 : vector<8x128xf32>
    %45 = arith.divf %43, %44 : vector<8x128xf32>
    %c0_26 = arith.constant 0 : index
    %c0_27 = arith.constant 0 : index
    %46 = vector.load %arg13[%c0_26, %c0_27] : memref<8x128xf32, #tpu.memory_space<vmem>>, vector<8x128xf32>
    %47 = arith.mulf %37, %46 : vector<8x128xf32>
    %48 = arith.mulf %31, %39 : vector<8x128xf32>
    %49 = arith.addf %47, %48 : vector<8x128xf32>
    %50 = math.tanh %49 : vector<8x128xf32>
    %51 = arith.mulf %45, %50 : vector<8x128xf32>
    %52 = vector.extract_strided_slice %25 {offsets = [0, 0], sizes = [8, 128], strides = [1, 1]} : vector<8x512xf32> to vector<8x128xf32>
    %53 = arith.negf %52 : vector<8x128xf32>
    %54 = math.exp %53 : vector<8x128xf32>
    %cst_28 = arith.constant 1.000000e+00 : f32
    %55 = vector.broadcast %cst_28 : f32 to vector<8x128xf32>
    %56 = arith.addf %55, %54 : vector<8x128xf32>
    %57 = arith.divf %55, %56 : vector<8x128xf32>
    %58 = vector.extract_strided_slice %25 {offsets = [0, 128], sizes = [8, 128], strides = [1, 1]} : vector<8x512xf32> to vector<8x128xf32>
    %59 = arith.negf %58 : vector<8x128xf32>
    %60 = math.exp %59 : vector<8x128xf32>
    %cst_29 = arith.constant 1.000000e+00 : f32
    %61 = vector.broadcast %cst_29 : f32 to vector<8x128xf32>
    %62 = arith.addf %61, %60 : vector<8x128xf32>
    %63 = arith.divf %61, %62 : vector<8x128xf32>
    %64 = vector.extract_strided_slice %25 {offsets = [0, 256], sizes = [8, 128], strides = [1, 1]} : vector<8x512xf32> to vector<8x128xf32>
    %65 = math.tanh %64 : vector<8x128xf32>
    %66 = vector.extract_strided_slice %25 {offsets = [0, 384], sizes = [8, 128], strides = [1, 1]} : vector<8x512xf32> to vector<8x128xf32>
    %67 = arith.negf %66 : vector<8x128xf32>
    %68 = math.exp %67 : vector<8x128xf32>
    %cst_30 = arith.constant 1.000000e+00 : f32
    %69 = vector.broadcast %cst_30 : f32 to vector<8x128xf32>
    %70 = arith.addf %69, %68 : vector<8x128xf32>
    %71 = arith.divf %69, %70 : vector<8x128xf32>
    %c0_31 = arith.constant 0 : index
    %c0_32 = arith.constant 0 : index
    %72 = vector.load %arg14[%c0_31, %c0_32] : memref<8x128xf32, #tpu.memory_space<vmem>>, vector<8x128xf32>
    %73 = arith.mulf %63, %72 : vector<8x128xf32>
    %74 = arith.mulf %57, %65 : vector<8x128xf32>
    %75 = arith.addf %73, %74 : vector<8x128xf32>
    %76 = math.tanh %75 : vector<8x128xf32>
    %77 = arith.mulf %71, %76 : vector<8x128xf32>
    %c0_i32_33 = arith.constant 0 : i32
    %78 = arith.cmpi sgt, %16, %c0_i32_33 : i32
    %79 = arith.extui %78 : i1 to i32
    %80 = arith.sitofp %79 : i32 to f32
    %81 = vector.broadcast %80 : f32 to vector<8x128xf32>
    %82 = arith.mulf %75, %81 : vector<8x128xf32>
    %83 = vector.broadcast %80 : f32 to vector<8x128xf32>
    %84 = arith.mulf %77, %83 : vector<8x128xf32>
    %c1_i32 = arith.constant 1 : i32
    %85 = arith.subi %16, %c1_i32 : i32
    %86 = vector.broadcast %85 : i32 to vector<8x1xi32>
    %87 = arith.cmpi eq, %14, %86 : vector<8x1xi32>
    %c0_34 = arith.constant 0 : index
    %c0_35 = arith.constant 0 : index
    %88 = vector.load %arg15[%c0_34, %c0_35] : memref<8x128xf32, #tpu.memory_space<vmem>>, vector<8x128xf32>
    %89 = vector.shape_cast %87 : vector<8x1xi1> to vector<8x1xi1>
    %90 = vector.broadcast %89 : vector<8x1xi1> to vector<8x128xi1>
    %91 = arith.select %90, %84, %88 : vector<8x128xi1>, vector<8x128xf32>
    %c0_36 = arith.constant 0 : index
    %c0_37 = arith.constant 0 : index
    %92 = vector.load %arg15[%c0_36, %c0_37] : memref<8x128xf32, #tpu.memory_space<vmem>>, vector<8x128xf32>
    tpu.vector_store %arg15[%c0_36, %c0_37], %91 {strides = array<i32>} : memref<8x128xf32, #tpu.memory_space<vmem>>, vector<8x128xf32>,
    %c0_38 = arith.constant 0 : index
    %c0_39 = arith.constant 0 : index
    %93 = vector.load %arg13[%c0_38, %c0_39] : memref<8x128xf32, #tpu.memory_space<vmem>>, vector<8x128xf32>
    tpu.vector_store %arg13[%c0_38, %c0_39], %49 {strides = array<i32>} : memref<8x128xf32, #tpu.memory_space<vmem>>, vector<8x128xf32>,
    %c0_40 = arith.constant 0 : index
    %c0_41 = arith.constant 0 : index
    %94 = vector.load %arg14[%c0_40, %c0_41] : memref<8x128xf32, #tpu.memory_space<vmem>>, vector<8x128xf32>
    tpu.vector_store %arg14[%c0_40, %c0_41], %82 {strides = array<i32>} : memref<8x128xf32, #tpu.memory_space<vmem>>, vector<8x128xf32>,
    %c0_42 = arith.constant 0 : index
    %c0_43 = arith.constant 0 : index
    %95 = vector.load %arg12[%c0_42, %c0_43] : memref<8x256xf32, #tpu.memory_space<vmem>>, vector<8x128xf32>
    tpu.vector_store %arg12[%c0_42, %c0_43], %51 {strides = array<i32>} : memref<8x256xf32, #tpu.memory_space<vmem>>, vector<8x128xf32>,
    %c0_44 = arith.constant 0 : index
    %c128 = arith.constant 128 : index
    %96 = vector.load %arg12[%c0_44, %c128] : memref<8x256xf32, #tpu.memory_space<vmem>>, vector<8x128xf32>
    tpu.vector_store %arg12[%c0_44, %c128], %84 {strides = array<i32>} : memref<8x256xf32, #tpu.memory_space<vmem>>, vector<8x128xf32>,
    %c1_i32_45 = arith.constant 1 : i32
    %97 = arith.addi %15, %c1_i32_45 : i32
    %c0_46 = arith.constant 0 : index
    %c0_47 = arith.constant 0 : index
    %98 = vector.load %arg12[%c0_46, %c0_47] : memref<8x256xf32, #tpu.memory_space<vmem>>, vector<8x256xf32>
    %cst_48 = arith.constant dense<0.000000e+00> : vector<8x1024xf32>
    %99 = tpu.matmul %98, %12, %cst_48 {dimension_numbers = #tpu.dot_dimension_numbers<[1], [0], [0], [1], [0, 0, 1, 1], [], []>} : vector<8x256xf32>, vector<256x1024xf32>, vector<8x1024xf32> -> vector<8x1024xf32>
    %100 = vector.extract_strided_slice %99 {offsets = [0, 0], sizes = [8, 512], strides = [1, 1]} : vector<8x1024xf32> to vector<8x512xf32>
    %c1 = arith.constant 1 : index
    %c0_49 = arith.constant 0 : index
    %c0_50 = arith.constant 0 : index
    %101 = vector.load %arg11[%c1, %c0_49, %c0_50] : memref<8x8x512xf32, #tpu.memory_space<vmem>>, vector<1x8x512xf32>
    %102 = vector.shape_cast %101 : vector<1x8x512xf32> to vector<8x512xf32>
    %103 = arith.addf %100, %102 : vector<8x512xf32>
    %104 = vector.extract_strided_slice %99 {offsets = [0, 512], sizes = [8, 512], strides = [1, 1]} : vector<8x1024xf32> to vector<8x512xf32>
    %105 = vector.broadcast %13 : vector<1x512xf32> to vector<8x512xf32>
    %106 = arith.addf %104, %105 : vector<8x512xf32>
    %107 = vector.extract_strided_slice %103 {offsets = [0, 0], sizes = [8, 128], strides = [1, 1]} : vector<8x512xf32> to vector<8x128xf32>
    %108 = arith.negf %107 : vector<8x128xf32>
    %109 = math.exp %108 : vector<8x128xf32>
    %cst_51 = arith.constant 1.000000e+00 : f32
    %110 = vector.broadcast %cst_51 : f32 to vector<8x128xf32>
    %111 = arith.addf %110, %109 : vector<8x128xf32>
    %112 = arith.divf %110, %111 : vector<8x128xf32>
    %113 = vector.extract_strided_slice %103 {offsets = [0, 128], sizes = [8, 128], strides = [1, 1]} : vector<8x512xf32> to vector<8x128xf32>
    %114 = arith.negf %113 : vector<8x128xf32>
    %115 = math.exp %114 : vector<8x128xf32>
    %cst_52 = arith.constant 1.000000e+00 : f32
    %116 = vector.broadcast %cst_52 : f32 to vector<8x128xf32>
    %117 = arith.addf %116, %115 : vector<8x128xf32>
    %118 = arith.divf %116, %117 : vector<8x128xf32>
    %119 = vector.extract_strided_slice %103 {offsets = [0, 256], sizes = [8, 128], strides = [1, 1]} : vector<8x512xf32> to vector<8x128xf32>
    %120 = math.tanh %119 : vector<8x128xf32>
    %121 = vector.extract_strided_slice %103 {offsets = [0, 384], sizes = [8, 128], strides = [1, 1]} : vector<8x512xf32> to vector<8x128xf32>
    %122 = arith.negf %121 : vector<8x128xf32>
    %123 = math.exp %122 : vector<8x128xf32>
    %cst_53 = arith.constant 1.000000e+00 : f32
    %124 = vector.broadcast %cst_53 : f32 to vector<8x128xf32>
    %125 = arith.addf %124, %123 : vector<8x128xf32>
    %126 = arith.divf %124, %125 : vector<8x128xf32>
    %c0_54 = arith.constant 0 : index
    %c0_55 = arith.constant 0 : index
    %127 = vector.load %arg13[%c0_54, %c0_55] : memref<8x128xf32, #tpu.memory_space<vmem>>, vector<8x128xf32>
    %128 = arith.mulf %118, %127 : vector<8x128xf32>
    %129 = arith.mulf %112, %120 : vector<8x128xf32>
    %130 = arith.addf %128, %129 : vector<8x128xf32>
    %131 = math.tanh %130 : vector<8x128xf32>
    %132 = arith.mulf %126, %131 : vector<8x128xf32>
    %133 = vector.extract_strided_slice %106 {offsets = [0, 0], sizes = [8, 128], strides = [1, 1]} : vector<8x512xf32> to vector<8x128xf32>
    %134 = arith.negf %133 : vector<8x128xf32>
    %135 = math.exp %134 : vector<8x128xf32>
    %cst_56 = arith.constant 1.000000e+00 : f32
    %136 = vector.broadcast %cst_56 : f32 to vector<8x128xf32>
    %137 = arith.addf %136, %135 : vector<8x128xf32>
    %138 = arith.divf %136, %137 : vector<8x128xf32>
    %139 = vector.extract_strided_slice %106 {offsets = [0, 128], sizes = [8, 128], strides = [1, 1]} : vector<8x512xf32> to vector<8x128xf32>
    %140 = arith.negf %139 : vector<8x128xf32>
    %141 = math.exp %140 : vector<8x128xf32>
    %cst_57 = arith.constant 1.000000e+00 : f32
    %142 = vector.broadcast %cst_57 : f32 to vector<8x128xf32>
    %143 = arith.addf %142, %141 : vector<8x128xf32>
    %144 = arith.divf %142, %143 : vector<8x128xf32>
    %145 = vector.extract_strided_slice %106 {offsets = [0, 256], sizes = [8, 128], strides = [1, 1]} : vector<8x512xf32> to vector<8x128xf32>
    %146 = math.tanh %145 : vector<8x128xf32>
    %147 = vector.extract_strided_slice %106 {offsets = [0, 384], sizes = [8, 128], strides = [1, 1]} : vector<8x512xf32> to vector<8x128xf32>
    %148 = arith.negf %147 : vector<8x128xf32>
    %149 = math.exp %148 : vector<8x128xf32>
    %cst_58 = arith.constant 1.000000e+00 : f32
    %150 = vector.broadcast %cst_58 : f32 to vector<8x128xf32>
    %151 = arith.addf %150, %149 : vector<8x128xf32>
    %152 = arith.divf %150, %151 : vector<8x128xf32>
    %c0_59 = arith.constant 0 : index
    %c0_60 = arith.constant 0 : index
    %153 = vector.load %arg14[%c0_59, %c0_60] : memref<8x128xf32, #tpu.memory_space<vmem>>, vector<8x128xf32>
    %154 = arith.mulf %144, %153 : vector<8x128xf32>
    %155 = arith.mulf %138, %146 : vector<8x128xf32>
    %156 = arith.addf %154, %155 : vector<8x128xf32>
    %157 = math.tanh %156 : vector<8x128xf32>
    %158 = arith.mulf %152, %157 : vector<8x128xf32>
    %c1_i32_61 = arith.constant 1 : i32
    %159 = arith.subi %97, %c1_i32_61 : i32
    %160 = vector.broadcast %159 : i32 to vector<8x1xi32>
    %161 = arith.cmpi eq, %14, %160 : vector<8x1xi32>
    %c0_62 = arith.constant 0 : index
    %c0_63 = arith.constant 0 : index
    %162 = vector.load %arg15[%c0_62, %c0_63] : memref<8x128xf32, #tpu.memory_space<vmem>>, vector<8x128xf32>
    %163 = vector.shape_cast %161 : vector<8x1xi1> to vector<8x1xi1>
    %164 = vector.broadcast %163 : vector<8x1xi1> to vector<8x128xi1>
    %165 = arith.select %164, %158, %162 : vector<8x128xi1>, vector<8x128xf32>
    %c0_64 = arith.constant 0 : index
    %c0_65 = arith.constant 0 : index
    %166 = vector.load %arg15[%c0_64, %c0_65] : memref<8x128xf32, #tpu.memory_space<vmem>>, vector<8x128xf32>
    tpu.vector_store %arg15[%c0_64, %c0_65], %165 {strides = array<i32>} : memref<8x128xf32, #tpu.memory_space<vmem>>, vector<8x128xf32>,
    %c0_66 = arith.constant 0 : index
    %c0_67 = arith.constant 0 : index
    %167 = vector.load %arg13[%c0_66, %c0_67] : memref<8x128xf32, #tpu.memory_space<vmem>>, vector<8x128xf32>
    tpu.vector_store %arg13[%c0_66, %c0_67], %130 {strides = array<i32>} : memref<8x128xf32, #tpu.memory_space<vmem>>, vector<8x128xf32>,
    %c0_68 = arith.constant 0 : index
    %c0_69 = arith.constant 0 : index
    %168 = vector.load %arg14[%c0_68, %c0_69] : memref<8x128xf32, #tpu.memory_space<vmem>>, vector<8x128xf32>
    tpu.vector_store %arg14[%c0_68, %c0_69], %156 {strides = array<i32>} : memref<8x128xf32, #tpu.memory_space<vmem>>, vector<8x128xf32>,
    %c0_70 = arith.constant 0 : index
    %c0_71 = arith.constant 0 : index
    %169 = vector.load %arg12[%c0_70, %c0_71] : memref<8x256xf32, #tpu.memory_space<vmem>>, vector<8x128xf32>
    tpu.vector_store %arg12[%c0_70, %c0_71], %132 {strides = array<i32>} : memref<8x256xf32, #tpu.memory_space<vmem>>, vector<8x128xf32>,
    %c0_72 = arith.constant 0 : index
    %c128_73 = arith.constant 128 : index
    %170 = vector.load %arg12[%c0_72, %c128_73] : memref<8x256xf32, #tpu.memory_space<vmem>>, vector<8x128xf32>
    tpu.vector_store %arg12[%c0_72, %c128_73], %158 {strides = array<i32>} : memref<8x256xf32, #tpu.memory_space<vmem>>, vector<8x128xf32>,
    %c2_i32 = arith.constant 2 : i32
    %171 = arith.addi %15, %c2_i32 : i32
    %c0_74 = arith.constant 0 : index
    %c0_75 = arith.constant 0 : index
    %172 = vector.load %arg12[%c0_74, %c0_75] : memref<8x256xf32, #tpu.memory_space<vmem>>, vector<8x256xf32>
    %cst_76 = arith.constant dense<0.000000e+00> : vector<8x1024xf32>
    %173 = tpu.matmul %172, %12, %cst_76 {dimension_numbers = #tpu.dot_dimension_numbers<[1], [0], [0], [1], [0, 0, 1, 1], [], []>} : vector<8x256xf32>, vector<256x1024xf32>, vector<8x1024xf32> -> vector<8x1024xf32>
    %174 = vector.extract_strided_slice %173 {offsets = [0, 0], sizes = [8, 512], strides = [1, 1]} : vector<8x1024xf32> to vector<8x512xf32>
    %c2 = arith.constant 2 : index
    %c0_77 = arith.constant 0 : index
    %c0_78 = arith.constant 0 : index
    %175 = vector.load %arg11[%c2, %c0_77, %c0_78] : memref<8x8x512xf32, #tpu.memory_space<vmem>>, vector<1x8x512xf32>
    %176 = vector.shape_cast %175 : vector<1x8x512xf32> to vector<8x512xf32>
    %177 = arith.addf %174, %176 : vector<8x512xf32>
    %178 = vector.extract_strided_slice %173 {offsets = [0, 512], sizes = [8, 512], strides = [1, 1]} : vector<8x1024xf32> to vector<8x512xf32>
    %179 = vector.broadcast %13 : vector<1x512xf32> to vector<8x512xf32>
    %180 = arith.addf %178, %179 : vector<8x512xf32>
    %181 = vector.extract_strided_slice %177 {offsets = [0, 0], sizes = [8, 128], strides = [1, 1]} : vector<8x512xf32> to vector<8x128xf32>
    %182 = arith.negf %181 : vector<8x128xf32>
    %183 = math.exp %182 : vector<8x128xf32>
    %cst_79 = arith.constant 1.000000e+00 : f32
    %184 = vector.broadcast %cst_79 : f32 to vector<8x128xf32>
    %185 = arith.addf %184, %183 : vector<8x128xf32>
    %186 = arith.divf %184, %185 : vector<8x128xf32>
    %187 = vector.extract_strided_slice %177 {offsets = [0, 128], sizes = [8, 128], strides = [1, 1]} : vector<8x512xf32> to vector<8x128xf32>
    %188 = arith.negf %187 : vector<8x128xf32>
    %189 = math.exp %188 : vector<8x128xf32>
    %cst_80 = arith.constant 1.000000e+00 : f32
    %190 = vector.broadcast %cst_80 : f32 to vector<8x128xf32>
    %191 = arith.addf %190, %189 : vector<8x128xf32>
    %192 = arith.divf %190, %191 : vector<8x128xf32>
    %193 = vector.extract_strided_slice %177 {offsets = [0, 256], sizes = [8, 128], strides = [1, 1]} : vector<8x512xf32> to vector<8x128xf32>
    %194 = math.tanh %193 : vector<8x128xf32>
    %195 = vector.extract_strided_slice %177 {offsets = [0, 384], sizes = [8, 128], strides = [1, 1]} : vector<8x512xf32> to vector<8x128xf32>
    %196 = arith.negf %195 : vector<8x128xf32>
    %197 = math.exp %196 : vector<8x128xf32>
    %cst_81 = arith.constant 1.000000e+00 : f32
    %198 = vector.broadcast %cst_81 : f32 to vector<8x128xf32>
    %199 = arith.addf %198, %197 : vector<8x128xf32>
    %200 = arith.divf %198, %199 : vector<8x128xf32>
    %c0_82 = arith.constant 0 : index
    %c0_83 = arith.constant 0 : index
    %201 = vector.load %arg13[%c0_82, %c0_83] : memref<8x128xf32, #tpu.memory_space<vmem>>, vector<8x128xf32>
    %202 = arith.mulf %192, %201 : vector<8x128xf32>
    %203 = arith.mulf %186, %194 : vector<8x128xf32>
    %204 = arith.addf %202, %203 : vector<8x128xf32>
    %205 = math.tanh %204 : vector<8x128xf32>
    %206 = arith.mulf %200, %205 : vector<8x128xf32>
    %207 = vector.extract_strided_slice %180 {offsets = [0, 0], sizes = [8, 128], strides = [1, 1]} : vector<8x512xf32> to vector<8x128xf32>
    %208 = arith.negf %207 : vector<8x128xf32>
    %209 = math.exp %208 : vector<8x128xf32>
    %cst_84 = arith.constant 1.000000e+00 : f32
    %210 = vector.broadcast %cst_84 : f32 to vector<8x128xf32>
    %211 = arith.addf %210, %209 : vector<8x128xf32>
    %212 = arith.divf %210, %211 : vector<8x128xf32>
    %213 = vector.extract_strided_slice %180 {offsets = [0, 128], sizes = [8, 128], strides = [1, 1]} : vector<8x512xf32> to vector<8x128xf32>
    %214 = arith.negf %213 : vector<8x128xf32>
    %215 = math.exp %214 : vector<8x128xf32>
    %cst_85 = arith.constant 1.000000e+00 : f32
    %216 = vector.broadcast %cst_85 : f32 to vector<8x128xf32>
    %217 = arith.addf %216, %215 : vector<8x128xf32>
    %218 = arith.divf %216, %217 : vector<8x128xf32>
    %219 = vector.extract_strided_slice %180 {offsets = [0, 256], sizes = [8, 128], strides = [1, 1]} : vector<8x512xf32> to vector<8x128xf32>
    %220 = math.tanh %219 : vector<8x128xf32>
    %221 = vector.extract_strided_slice %180 {offsets = [0, 384], sizes = [8, 128], strides = [1, 1]} : vector<8x512xf32> to vector<8x128xf32>
    %222 = arith.negf %221 : vector<8x128xf32>
    %223 = math.exp %222 : vector<8x128xf32>
    %cst_86 = arith.constant 1.000000e+00 : f32
    %224 = vector.broadcast %cst_86 : f32 to vector<8x128xf32>
    %225 = arith.addf %224, %223 : vector<8x128xf32>
    %226 = arith.divf %224, %225 : vector<8x128xf32>
    %c0_87 = arith.constant 0 : index
    %c0_88 = arith.constant 0 : index
    %227 = vector.load %arg14[%c0_87, %c0_88] : memref<8x128xf32, #tpu.memory_space<vmem>>, vector<8x128xf32>
    %228 = arith.mulf %218, %227 : vector<8x128xf32>
    %229 = arith.mulf %212, %220 : vector<8x128xf32>
    %230 = arith.addf %228, %229 : vector<8x128xf32>
    %231 = math.tanh %230 : vector<8x128xf32>
    %232 = arith.mulf %226, %231 : vector<8x128xf32>
    %c1_i32_89 = arith.constant 1 : i32
    %233 = arith.subi %171, %c1_i32_89 : i32
    %234 = vector.broadcast %233 : i32 to vector<8x1xi32>
    %235 = arith.cmpi eq, %14, %234 : vector<8x1xi32>
    %c0_90 = arith.constant 0 : index
    %c0_91 = arith.constant 0 : index
    %236 = vector.load %arg15[%c0_90, %c0_91] : memref<8x128xf32, #tpu.memory_space<vmem>>, vector<8x128xf32>
    %237 = vector.shape_cast %235 : vector<8x1xi1> to vector<8x1xi1>
    %238 = vector.broadcast %237 : vector<8x1xi1> to vector<8x128xi1>
    %239 = arith.select %238, %232, %236 : vector<8x128xi1>, vector<8x128xf32>
    %c0_92 = arith.constant 0 : index
    %c0_93 = arith.constant 0 : index
    %240 = vector.load %arg15[%c0_92, %c0_93] : memref<8x128xf32, #tpu.memory_space<vmem>>, vector<8x128xf32>
    tpu.vector_store %arg15[%c0_92, %c0_93], %239 {strides = array<i32>} : memref<8x128xf32, #tpu.memory_space<vmem>>, vector<8x128xf32>,
    %c0_94 = arith.constant 0 : index
    %c0_95 = arith.constant 0 : index
    %241 = vector.load %arg13[%c0_94, %c0_95] : memref<8x128xf32, #tpu.memory_space<vmem>>, vector<8x128xf32>
    tpu.vector_store %arg13[%c0_94, %c0_95], %204 {strides = array<i32>} : memref<8x128xf32, #tpu.memory_space<vmem>>, vector<8x128xf32>,
    %c0_96 = arith.constant 0 : index
    %c0_97 = arith.constant 0 : index
    %242 = vector.load %arg14[%c0_96, %c0_97] : memref<8x128xf32, #tpu.memory_space<vmem>>, vector<8x128xf32>
    tpu.vector_store %arg14[%c0_96, %c0_97], %230 {strides = array<i32>} : memref<8x128xf32, #tpu.memory_space<vmem>>, vector<8x128xf32>,
    %c0_98 = arith.constant 0 : index
    %c0_99 = arith.constant 0 : index
    %243 = vector.load %arg12[%c0_98, %c0_99] : memref<8x256xf32, #tpu.memory_space<vmem>>, vector<8x128xf32>
    tpu.vector_store %arg12[%c0_98, %c0_99], %206 {strides = array<i32>} : memref<8x256xf32, #tpu.memory_space<vmem>>, vector<8x128xf32>,
    %c0_100 = arith.constant 0 : index
    %c128_101 = arith.constant 128 : index
    %244 = vector.load %arg12[%c0_100, %c128_101] : memref<8x256xf32, #tpu.memory_space<vmem>>, vector<8x128xf32>
    tpu.vector_store %arg12[%c0_100, %c128_101], %232 {strides = array<i32>} : memref<8x256xf32, #tpu.memory_space<vmem>>, vector<8x128xf32>,
    %c3_i32 = arith.constant 3 : i32
    %245 = arith.addi %15, %c3_i32 : i32
    %c0_102 = arith.constant 0 : index
    %c0_103 = arith.constant 0 : index
    %246 = vector.load %arg12[%c0_102, %c0_103] : memref<8x256xf32, #tpu.memory_space<vmem>>, vector<8x256xf32>
    %cst_104 = arith.constant dense<0.000000e+00> : vector<8x1024xf32>
    %247 = tpu.matmul %246, %12, %cst_104 {dimension_numbers = #tpu.dot_dimension_numbers<[1], [0], [0], [1], [0, 0, 1, 1], [], []>} : vector<8x256xf32>, vector<256x1024xf32>, vector<8x1024xf32> -> vector<8x1024xf32>
    %248 = vector.extract_strided_slice %247 {offsets = [0, 0], sizes = [8, 512], strides = [1, 1]} : vector<8x1024xf32> to vector<8x512xf32>
    %c3 = arith.constant 3 : index
    %c0_105 = arith.constant 0 : index
    %c0_106 = arith.constant 0 : index
    %249 = vector.load %arg11[%c3, %c0_105, %c0_106] : memref<8x8x512xf32, #tpu.memory_space<vmem>>, vector<1x8x512xf32>
    %250 = vector.shape_cast %249 : vector<1x8x512xf32> to vector<8x512xf32>
    %251 = arith.addf %248, %250 : vector<8x512xf32>
    %252 = vector.extract_strided_slice %247 {offsets = [0, 512], sizes = [8, 512], strides = [1, 1]} : vector<8x1024xf32> to vector<8x512xf32>
    %253 = vector.broadcast %13 : vector<1x512xf32> to vector<8x512xf32>
    %254 = arith.addf %252, %253 : vector<8x512xf32>
    %255 = vector.extract_strided_slice %251 {offsets = [0, 0], sizes = [8, 128], strides = [1, 1]} : vector<8x512xf32> to vector<8x128xf32>
    %256 = arith.negf %255 : vector<8x128xf32>
    %257 = math.exp %256 : vector<8x128xf32>
    %cst_107 = arith.constant 1.000000e+00 : f32
    %258 = vector.broadcast %cst_107 : f32 to vector<8x128xf32>
    %259 = arith.addf %258, %257 : vector<8x128xf32>
    %260 = arith.divf %258, %259 : vector<8x128xf32>
    %261 = vector.extract_strided_slice %251 {offsets = [0, 128], sizes = [8, 128], strides = [1, 1]} : vector<8x512xf32> to vector<8x128xf32>
    %262 = arith.negf %261 : vector<8x128xf32>
    %263 = math.exp %262 : vector<8x128xf32>
    %cst_108 = arith.constant 1.000000e+00 : f32
    %264 = vector.broadcast %cst_108 : f32 to vector<8x128xf32>
    %265 = arith.addf %264, %263 : vector<8x128xf32>
    %266 = arith.divf %264, %265 : vector<8x128xf32>
    %267 = vector.extract_strided_slice %251 {offsets = [0, 256], sizes = [8, 128], strides = [1, 1]} : vector<8x512xf32> to vector<8x128xf32>
    %268 = math.tanh %267 : vector<8x128xf32>
    %269 = vector.extract_strided_slice %251 {offsets = [0, 384], sizes = [8, 128], strides = [1, 1]} : vector<8x512xf32> to vector<8x128xf32>
    %270 = arith.negf %269 : vector<8x128xf32>
    %271 = math.exp %270 : vector<8x128xf32>
    %cst_109 = arith.constant 1.000000e+00 : f32
    %272 = vector.broadcast %cst_109 : f32 to vector<8x128xf32>
    %273 = arith.addf %272, %271 : vector<8x128xf32>
    %274 = arith.divf %272, %273 : vector<8x128xf32>
    %c0_110 = arith.constant 0 : index
    %c0_111 = arith.constant 0 : index
    %275 = vector.load %arg13[%c0_110, %c0_111] : memref<8x128xf32, #tpu.memory_space<vmem>>, vector<8x128xf32>
    %276 = arith.mulf %266, %275 : vector<8x128xf32>
    %277 = arith.mulf %260, %268 : vector<8x128xf32>
    %278 = arith.addf %276, %277 : vector<8x128xf32>
    %279 = math.tanh %278 : vector<8x128xf32>
    %280 = arith.mulf %274, %279 : vector<8x128xf32>
    %281 = vector.extract_strided_slice %254 {offsets = [0, 0], sizes = [8, 128], strides = [1, 1]} : vector<8x512xf32> to vector<8x128xf32>
    %282 = arith.negf %281 : vector<8x128xf32>
    %283 = math.exp %282 : vector<8x128xf32>
    %cst_112 = arith.constant 1.000000e+00 : f32
    %284 = vector.broadcast %cst_112 : f32 to vector<8x128xf32>
    %285 = arith.addf %284, %283 : vector<8x128xf32>
    %286 = arith.divf %284, %285 : vector<8x128xf32>
    %287 = vector.extract_strided_slice %254 {offsets = [0, 128], sizes = [8, 128], strides = [1, 1]} : vector<8x512xf32> to vector<8x128xf32>
    %288 = arith.negf %287 : vector<8x128xf32>
    %289 = math.exp %288 : vector<8x128xf32>
    %cst_113 = arith.constant 1.000000e+00 : f32
    %290 = vector.broadcast %cst_113 : f32 to vector<8x128xf32>
    %291 = arith.addf %290, %289 : vector<8x128xf32>
    %292 = arith.divf %290, %291 : vector<8x128xf32>
    %293 = vector.extract_strided_slice %254 {offsets = [0, 256], sizes = [8, 128], strides = [1, 1]} : vector<8x512xf32> to vector<8x128xf32>
    %294 = math.tanh %293 : vector<8x128xf32>
    %295 = vector.extract_strided_slice %254 {offsets = [0, 384], sizes = [8, 128], strides = [1, 1]} : vector<8x512xf32> to vector<8x128xf32>
    %296 = arith.negf %295 : vector<8x128xf32>
    %297 = math.exp %296 : vector<8x128xf32>
    %cst_114 = arith.constant 1.000000e+00 : f32
    %298 = vector.broadcast %cst_114 : f32 to vector<8x128xf32>
    %299 = arith.addf %298, %297 : vector<8x128xf32>
    %300 = arith.divf %298, %299 : vector<8x128xf32>
    %c0_115 = arith.constant 0 : index
    %c0_116 = arith.constant 0 : index
    %301 = vector.load %arg14[%c0_115, %c0_116] : memref<8x128xf32, #tpu.memory_space<vmem>>, vector<8x128xf32>
    %302 = arith.mulf %292, %301 : vector<8x128xf32>
    %303 = arith.mulf %286, %294 : vector<8x128xf32>
    %304 = arith.addf %302, %303 : vector<8x128xf32>
    %305 = math.tanh %304 : vector<8x128xf32>
    %306 = arith.mulf %300, %305 : vector<8x128xf32>
    %c1_i32_117 = arith.constant 1 : i32
    %307 = arith.subi %245, %c1_i32_117 : i32
    %308 = vector.broadcast %307 : i32 to vector<8x1xi32>
    %309 = arith.cmpi eq, %14, %308 : vector<8x1xi32>
    %c0_118 = arith.constant 0 : index
    %c0_119 = arith.constant 0 : index
    %310 = vector.load %arg15[%c0_118, %c0_119] : memref<8x128xf32, #tpu.memory_space<vmem>>, vector<8x128xf32>
    %311 = vector.shape_cast %309 : vector<8x1xi1> to vector<8x1xi1>
    %312 = vector.broadcast %311 : vector<8x1xi1> to vector<8x128xi1>
    %313 = arith.select %312, %306, %310 : vector<8x128xi1>, vector<8x128xf32>
    %c0_120 = arith.constant 0 : index
    %c0_121 = arith.constant 0 : index
    %314 = vector.load %arg15[%c0_120, %c0_121] : memref<8x128xf32, #tpu.memory_space<vmem>>, vector<8x128xf32>
    tpu.vector_store %arg15[%c0_120, %c0_121], %313 {strides = array<i32>} : memref<8x128xf32, #tpu.memory_space<vmem>>, vector<8x128xf32>,
    %c0_122 = arith.constant 0 : index
    %c0_123 = arith.constant 0 : index
    %315 = vector.load %arg13[%c0_122, %c0_123] : memref<8x128xf32, #tpu.memory_space<vmem>>, vector<8x128xf32>
    tpu.vector_store %arg13[%c0_122, %c0_123], %278 {strides = array<i32>} : memref<8x128xf32, #tpu.memory_space<vmem>>, vector<8x128xf32>,
    %c0_124 = arith.constant 0 : index
    %c0_125 = arith.constant 0 : index
    %316 = vector.load %arg14[%c0_124, %c0_125] : memref<8x128xf32, #tpu.memory_space<vmem>>, vector<8x128xf32>
    tpu.vector_store %arg14[%c0_124, %c0_125], %304 {strides = array<i32>} : memref<8x128xf32, #tpu.memory_space<vmem>>, vector<8x128xf32>,
    %c0_126 = arith.constant 0 : index
    %c0_127 = arith.constant 0 : index
    %317 = vector.load %arg12[%c0_126, %c0_127] : memref<8x256xf32, #tpu.memory_space<vmem>>, vector<8x128xf32>
    tpu.vector_store %arg12[%c0_126, %c0_127], %280 {strides = array<i32>} : memref<8x256xf32, #tpu.memory_space<vmem>>, vector<8x128xf32>,
    %c0_128 = arith.constant 0 : index
    %c128_129 = arith.constant 128 : index
    %318 = vector.load %arg12[%c0_128, %c128_129] : memref<8x256xf32, #tpu.memory_space<vmem>>, vector<8x128xf32>
    tpu.vector_store %arg12[%c0_128, %c128_129], %306 {strides = array<i32>} : memref<8x256xf32, #tpu.memory_space<vmem>>, vector<8x128xf32>,
    %c4_i32 = arith.constant 4 : i32
    %319 = arith.addi %15, %c4_i32 : i32
    %c0_130 = arith.constant 0 : index
    %c0_131 = arith.constant 0 : index
    %320 = vector.load %arg12[%c0_130, %c0_131] : memref<8x256xf32, #tpu.memory_space<vmem>>, vector<8x256xf32>
    %cst_132 = arith.constant dense<0.000000e+00> : vector<8x1024xf32>
    %321 = tpu.matmul %320, %12, %cst_132 {dimension_numbers = #tpu.dot_dimension_numbers<[1], [0], [0], [1], [0, 0, 1, 1], [], []>} : vector<8x256xf32>, vector<256x1024xf32>, vector<8x1024xf32> -> vector<8x1024xf32>
    %322 = vector.extract_strided_slice %321 {offsets = [0, 0], sizes = [8, 512], strides = [1, 1]} : vector<8x1024xf32> to vector<8x512xf32>
    %c4 = arith.constant 4 : index
    %c0_133 = arith.constant 0 : index
    %c0_134 = arith.constant 0 : index
    %323 = vector.load %arg11[%c4, %c0_133, %c0_134] : memref<8x8x512xf32, #tpu.memory_space<vmem>>, vector<1x8x512xf32>
    %324 = vector.shape_cast %323 : vector<1x8x512xf32> to vector<8x512xf32>
    %325 = arith.addf %322, %324 : vector<8x512xf32>
    %326 = vector.extract_strided_slice %321 {offsets = [0, 512], sizes = [8, 512], strides = [1, 1]} : vector<8x1024xf32> to vector<8x512xf32>
    %327 = vector.broadcast %13 : vector<1x512xf32> to vector<8x512xf32>
    %328 = arith.addf %326, %327 : vector<8x512xf32>
    %329 = vector.extract_strided_slice %325 {offsets = [0, 0], sizes = [8, 128], strides = [1, 1]} : vector<8x512xf32> to vector<8x128xf32>
    %330 = arith.negf %329 : vector<8x128xf32>
    %331 = math.exp %330 : vector<8x128xf32>
    %cst_135 = arith.constant 1.000000e+00 : f32
    %332 = vector.broadcast %cst_135 : f32 to vector<8x128xf32>
    %333 = arith.addf %332, %331 : vector<8x128xf32>
    %334 = arith.divf %332, %333 : vector<8x128xf32>
    %335 = vector.extract_strided_slice %325 {offsets = [0, 128], sizes = [8, 128], strides = [1, 1]} : vector<8x512xf32> to vector<8x128xf32>
    %336 = arith.negf %335 : vector<8x128xf32>
    %337 = math.exp %336 : vector<8x128xf32>
    %cst_136 = arith.constant 1.000000e+00 : f32
    %338 = vector.broadcast %cst_136 : f32 to vector<8x128xf32>
    %339 = arith.addf %338, %337 : vector<8x128xf32>
    %340 = arith.divf %338, %339 : vector<8x128xf32>
    %341 = vector.extract_strided_slice %325 {offsets = [0, 256], sizes = [8, 128], strides = [1, 1]} : vector<8x512xf32> to vector<8x128xf32>
    %342 = math.tanh %341 : vector<8x128xf32>
    %343 = vector.extract_strided_slice %325 {offsets = [0, 384], sizes = [8, 128], strides = [1, 1]} : vector<8x512xf32> to vector<8x128xf32>
    %344 = arith.negf %343 : vector<8x128xf32>
    %345 = math.exp %344 : vector<8x128xf32>
    %cst_137 = arith.constant 1.000000e+00 : f32
    %346 = vector.broadcast %cst_137 : f32 to vector<8x128xf32>
    %347 = arith.addf %346, %345 : vector<8x128xf32>
    %348 = arith.divf %346, %347 : vector<8x128xf32>
    %c0_138 = arith.constant 0 : index
    %c0_139 = arith.constant 0 : index
    %349 = vector.load %arg13[%c0_138, %c0_139] : memref<8x128xf32, #tpu.memory_space<vmem>>, vector<8x128xf32>
    %350 = arith.mulf %340, %349 : vector<8x128xf32>
    %351 = arith.mulf %334, %342 : vector<8x128xf32>
    %352 = arith.addf %350, %351 : vector<8x128xf32>
    %353 = math.tanh %352 : vector<8x128xf32>
    %354 = arith.mulf %348, %353 : vector<8x128xf32>
    %355 = vector.extract_strided_slice %328 {offsets = [0, 0], sizes = [8, 128], strides = [1, 1]} : vector<8x512xf32> to vector<8x128xf32>
    %356 = arith.negf %355 : vector<8x128xf32>
    %357 = math.exp %356 : vector<8x128xf32>
    %cst_140 = arith.constant 1.000000e+00 : f32
    %358 = vector.broadcast %cst_140 : f32 to vector<8x128xf32>
    %359 = arith.addf %358, %357 : vector<8x128xf32>
    %360 = arith.divf %358, %359 : vector<8x128xf32>
    %361 = vector.extract_strided_slice %328 {offsets = [0, 128], sizes = [8, 128], strides = [1, 1]} : vector<8x512xf32> to vector<8x128xf32>
    %362 = arith.negf %361 : vector<8x128xf32>
    %363 = math.exp %362 : vector<8x128xf32>
    %cst_141 = arith.constant 1.000000e+00 : f32
    %364 = vector.broadcast %cst_141 : f32 to vector<8x128xf32>
    %365 = arith.addf %364, %363 : vector<8x128xf32>
    %366 = arith.divf %364, %365 : vector<8x128xf32>
    %367 = vector.extract_strided_slice %328 {offsets = [0, 256], sizes = [8, 128], strides = [1, 1]} : vector<8x512xf32> to vector<8x128xf32>
    %368 = math.tanh %367 : vector<8x128xf32>
    %369 = vector.extract_strided_slice %328 {offsets = [0, 384], sizes = [8, 128], strides = [1, 1]} : vector<8x512xf32> to vector<8x128xf32>
    %370 = arith.negf %369 : vector<8x128xf32>
    %371 = math.exp %370 : vector<8x128xf32>
    %cst_142 = arith.constant 1.000000e+00 : f32
    %372 = vector.broadcast %cst_142 : f32 to vector<8x128xf32>
    %373 = arith.addf %372, %371 : vector<8x128xf32>
    %374 = arith.divf %372, %373 : vector<8x128xf32>
    %c0_143 = arith.constant 0 : index
    %c0_144 = arith.constant 0 : index
    %375 = vector.load %arg14[%c0_143, %c0_144] : memref<8x128xf32, #tpu.memory_space<vmem>>, vector<8x128xf32>
    %376 = arith.mulf %366, %375 : vector<8x128xf32>
    %377 = arith.mulf %360, %368 : vector<8x128xf32>
    %378 = arith.addf %376, %377 : vector<8x128xf32>
    %379 = math.tanh %378 : vector<8x128xf32>
    %380 = arith.mulf %374, %379 : vector<8x128xf32>
    %c1_i32_145 = arith.constant 1 : i32
    %381 = arith.subi %319, %c1_i32_145 : i32
    %382 = vector.broadcast %381 : i32 to vector<8x1xi32>
    %383 = arith.cmpi eq, %14, %382 : vector<8x1xi32>
    %c0_146 = arith.constant 0 : index
    %c0_147 = arith.constant 0 : index
    %384 = vector.load %arg15[%c0_146, %c0_147] : memref<8x128xf32, #tpu.memory_space<vmem>>, vector<8x128xf32>
    %385 = vector.shape_cast %383 : vector<8x1xi1> to vector<8x1xi1>
    %386 = vector.broadcast %385 : vector<8x1xi1> to vector<8x128xi1>
    %387 = arith.select %386, %380, %384 : vector<8x128xi1>, vector<8x128xf32>
    %c0_148 = arith.constant 0 : index
    %c0_149 = arith.constant 0 : index
    %388 = vector.load %arg15[%c0_148, %c0_149] : memref<8x128xf32, #tpu.memory_space<vmem>>, vector<8x128xf32>
    tpu.vector_store %arg15[%c0_148, %c0_149], %387 {strides = array<i32>} : memref<8x128xf32, #tpu.memory_space<vmem>>, vector<8x128xf32>,
    %c0_150 = arith.constant 0 : index
    %c0_151 = arith.constant 0 : index
    %389 = vector.load %arg13[%c0_150, %c0_151] : memref<8x128xf32, #tpu.memory_space<vmem>>, vector<8x128xf32>
    tpu.vector_store %arg13[%c0_150, %c0_151], %352 {strides = array<i32>} : memref<8x128xf32, #tpu.memory_space<vmem>>, vector<8x128xf32>,
    %c0_152 = arith.constant 0 : index
    %c0_153 = arith.constant 0 : index
    %390 = vector.load %arg14[%c0_152, %c0_153] : memref<8x128xf32, #tpu.memory_space<vmem>>, vector<8x128xf32>
    tpu.vector_store %arg14[%c0_152, %c0_153], %378 {strides = array<i32>} : memref<8x128xf32, #tpu.memory_space<vmem>>, vector<8x128xf32>,
    %c0_154 = arith.constant 0 : index
    %c0_155 = arith.constant 0 : index
    %391 = vector.load %arg12[%c0_154, %c0_155] : memref<8x256xf32, #tpu.memory_space<vmem>>, vector<8x128xf32>
    tpu.vector_store %arg12[%c0_154, %c0_155], %354 {strides = array<i32>} : memref<8x256xf32, #tpu.memory_space<vmem>>, vector<8x128xf32>,
    %c0_156 = arith.constant 0 : index
    %c128_157 = arith.constant 128 : index
    %392 = vector.load %arg12[%c0_156, %c128_157] : memref<8x256xf32, #tpu.memory_space<vmem>>, vector<8x128xf32>
    tpu.vector_store %arg12[%c0_156, %c128_157], %380 {strides = array<i32>} : memref<8x256xf32, #tpu.memory_space<vmem>>, vector<8x128xf32>,
    %c5_i32 = arith.constant 5 : i32
    %393 = arith.addi %15, %c5_i32 : i32
    %c0_158 = arith.constant 0 : index
    %c0_159 = arith.constant 0 : index
    %394 = vector.load %arg12[%c0_158, %c0_159] : memref<8x256xf32, #tpu.memory_space<vmem>>, vector<8x256xf32>
    %cst_160 = arith.constant dense<0.000000e+00> : vector<8x1024xf32>
    %395 = tpu.matmul %394, %12, %cst_160 {dimension_numbers = #tpu.dot_dimension_numbers<[1], [0], [0], [1], [0, 0, 1, 1], [], []>} : vector<8x256xf32>, vector<256x1024xf32>, vector<8x1024xf32> -> vector<8x1024xf32>
    %396 = vector.extract_strided_slice %395 {offsets = [0, 0], sizes = [8, 512], strides = [1, 1]} : vector<8x1024xf32> to vector<8x512xf32>
    %c5 = arith.constant 5 : index
    %c0_161 = arith.constant 0 : index
    %c0_162 = arith.constant 0 : index
    %397 = vector.load %arg11[%c5, %c0_161, %c0_162] : memref<8x8x512xf32, #tpu.memory_space<vmem>>, vector<1x8x512xf32>
    %398 = vector.shape_cast %397 : vector<1x8x512xf32> to vector<8x512xf32>
    %399 = arith.addf %396, %398 : vector<8x512xf32>
    %400 = vector.extract_strided_slice %395 {offsets = [0, 512], sizes = [8, 512], strides = [1, 1]} : vector<8x1024xf32> to vector<8x512xf32>
    %401 = vector.broadcast %13 : vector<1x512xf32> to vector<8x512xf32>
    %402 = arith.addf %400, %401 : vector<8x512xf32>
    %403 = vector.extract_strided_slice %399 {offsets = [0, 0], sizes = [8, 128], strides = [1, 1]} : vector<8x512xf32> to vector<8x128xf32>
    %404 = arith.negf %403 : vector<8x128xf32>
    %405 = math.exp %404 : vector<8x128xf32>
    %cst_163 = arith.constant 1.000000e+00 : f32
    %406 = vector.broadcast %cst_163 : f32 to vector<8x128xf32>
    %407 = arith.addf %406, %405 : vector<8x128xf32>
    %408 = arith.divf %406, %407 : vector<8x128xf32>
    %409 = vector.extract_strided_slice %399 {offsets = [0, 128], sizes = [8, 128], strides = [1, 1]} : vector<8x512xf32> to vector<8x128xf32>
    %410 = arith.negf %409 : vector<8x128xf32>
    %411 = math.exp %410 : vector<8x128xf32>
    %cst_164 = arith.constant 1.000000e+00 : f32
    %412 = vector.broadcast %cst_164 : f32 to vector<8x128xf32>
    %413 = arith.addf %412, %411 : vector<8x128xf32>
    %414 = arith.divf %412, %413 : vector<8x128xf32>
    %415 = vector.extract_strided_slice %399 {offsets = [0, 256], sizes = [8, 128], strides = [1, 1]} : vector<8x512xf32> to vector<8x128xf32>
    %416 = math.tanh %415 : vector<8x128xf32>
    %417 = vector.extract_strided_slice %399 {offsets = [0, 384], sizes = [8, 128], strides = [1, 1]} : vector<8x512xf32> to vector<8x128xf32>
    %418 = arith.negf %417 : vector<8x128xf32>
    %419 = math.exp %418 : vector<8x128xf32>
    %cst_165 = arith.constant 1.000000e+00 : f32
    %420 = vector.broadcast %cst_165 : f32 to vector<8x128xf32>
    %421 = arith.addf %420, %419 : vector<8x128xf32>
    %422 = arith.divf %420, %421 : vector<8x128xf32>
    %c0_166 = arith.constant 0 : index
    %c0_167 = arith.constant 0 : index
    %423 = vector.load %arg13[%c0_166, %c0_167] : memref<8x128xf32, #tpu.memory_space<vmem>>, vector<8x128xf32>
    %424 = arith.mulf %414, %423 : vector<8x128xf32>
    %425 = arith.mulf %408, %416 : vector<8x128xf32>
    %426 = arith.addf %424, %425 : vector<8x128xf32>
    %427 = math.tanh %426 : vector<8x128xf32>
    %428 = arith.mulf %422, %427 : vector<8x128xf32>
    %429 = vector.extract_strided_slice %402 {offsets = [0, 0], sizes = [8, 128], strides = [1, 1]} : vector<8x512xf32> to vector<8x128xf32>
    %430 = arith.negf %429 : vector<8x128xf32>
    %431 = math.exp %430 : vector<8x128xf32>
    %cst_168 = arith.constant 1.000000e+00 : f32
    %432 = vector.broadcast %cst_168 : f32 to vector<8x128xf32>
    %433 = arith.addf %432, %431 : vector<8x128xf32>
    %434 = arith.divf %432, %433 : vector<8x128xf32>
    %435 = vector.extract_strided_slice %402 {offsets = [0, 128], sizes = [8, 128], strides = [1, 1]} : vector<8x512xf32> to vector<8x128xf32>
    %436 = arith.negf %435 : vector<8x128xf32>
    %437 = math.exp %436 : vector<8x128xf32>
    %cst_169 = arith.constant 1.000000e+00 : f32
    %438 = vector.broadcast %cst_169 : f32 to vector<8x128xf32>
    %439 = arith.addf %438, %437 : vector<8x128xf32>
    %440 = arith.divf %438, %439 : vector<8x128xf32>
    %441 = vector.extract_strided_slice %402 {offsets = [0, 256], sizes = [8, 128], strides = [1, 1]} : vector<8x512xf32> to vector<8x128xf32>
    %442 = math.tanh %441 : vector<8x128xf32>
    %443 = vector.extract_strided_slice %402 {offsets = [0, 384], sizes = [8, 128], strides = [1, 1]} : vector<8x512xf32> to vector<8x128xf32>
    %444 = arith.negf %443 : vector<8x128xf32>
    %445 = math.exp %444 : vector<8x128xf32>
    %cst_170 = arith.constant 1.000000e+00 : f32
    %446 = vector.broadcast %cst_170 : f32 to vector<8x128xf32>
    %447 = arith.addf %446, %445 : vector<8x128xf32>
    %448 = arith.divf %446, %447 : vector<8x128xf32>
    %c0_171 = arith.constant 0 : index
    %c0_172 = arith.constant 0 : index
    %449 = vector.load %arg14[%c0_171, %c0_172] : memref<8x128xf32, #tpu.memory_space<vmem>>, vector<8x128xf32>
    %450 = arith.mulf %440, %449 : vector<8x128xf32>
    %451 = arith.mulf %434, %442 : vector<8x128xf32>
    %452 = arith.addf %450, %451 : vector<8x128xf32>
    %453 = math.tanh %452 : vector<8x128xf32>
    %454 = arith.mulf %448, %453 : vector<8x128xf32>
    %c1_i32_173 = arith.constant 1 : i32
    %455 = arith.subi %393, %c1_i32_173 : i32
    %456 = vector.broadcast %455 : i32 to vector<8x1xi32>
    %457 = arith.cmpi eq, %14, %456 : vector<8x1xi32>
    %c0_174 = arith.constant 0 : index
    %c0_175 = arith.constant 0 : index
    %458 = vector.load %arg15[%c0_174, %c0_175] : memref<8x128xf32, #tpu.memory_space<vmem>>, vector<8x128xf32>
    %459 = vector.shape_cast %457 : vector<8x1xi1> to vector<8x1xi1>
    %460 = vector.broadcast %459 : vector<8x1xi1> to vector<8x128xi1>
    %461 = arith.select %460, %454, %458 : vector<8x128xi1>, vector<8x128xf32>
    %c0_176 = arith.constant 0 : index
    %c0_177 = arith.constant 0 : index
    %462 = vector.load %arg15[%c0_176, %c0_177] : memref<8x128xf32, #tpu.memory_space<vmem>>, vector<8x128xf32>
    tpu.vector_store %arg15[%c0_176, %c0_177], %461 {strides = array<i32>} : memref<8x128xf32, #tpu.memory_space<vmem>>, vector<8x128xf32>,
    %c0_178 = arith.constant 0 : index
    %c0_179 = arith.constant 0 : index
    %463 = vector.load %arg13[%c0_178, %c0_179] : memref<8x128xf32, #tpu.memory_space<vmem>>, vector<8x128xf32>
    tpu.vector_store %arg13[%c0_178, %c0_179], %426 {strides = array<i32>} : memref<8x128xf32, #tpu.memory_space<vmem>>, vector<8x128xf32>,
    %c0_180 = arith.constant 0 : index
    %c0_181 = arith.constant 0 : index
    %464 = vector.load %arg14[%c0_180, %c0_181] : memref<8x128xf32, #tpu.memory_space<vmem>>, vector<8x128xf32>
    tpu.vector_store %arg14[%c0_180, %c0_181], %452 {strides = array<i32>} : memref<8x128xf32, #tpu.memory_space<vmem>>, vector<8x128xf32>,
    %c0_182 = arith.constant 0 : index
    %c0_183 = arith.constant 0 : index
    %465 = vector.load %arg12[%c0_182, %c0_183] : memref<8x256xf32, #tpu.memory_space<vmem>>, vector<8x128xf32>
    tpu.vector_store %arg12[%c0_182, %c0_183], %428 {strides = array<i32>} : memref<8x256xf32, #tpu.memory_space<vmem>>, vector<8x128xf32>,
    %c0_184 = arith.constant 0 : index
    %c128_185 = arith.constant 128 : index
    %466 = vector.load %arg12[%c0_184, %c128_185] : memref<8x256xf32, #tpu.memory_space<vmem>>, vector<8x128xf32>
    tpu.vector_store %arg12[%c0_184, %c128_185], %454 {strides = array<i32>} : memref<8x256xf32, #tpu.memory_space<vmem>>, vector<8x128xf32>,
    %c6_i32 = arith.constant 6 : i32
    %467 = arith.addi %15, %c6_i32 : i32
    %c0_186 = arith.constant 0 : index
    %c0_187 = arith.constant 0 : index
    %468 = vector.load %arg12[%c0_186, %c0_187] : memref<8x256xf32, #tpu.memory_space<vmem>>, vector<8x256xf32>
    %cst_188 = arith.constant dense<0.000000e+00> : vector<8x1024xf32>
    %469 = tpu.matmul %468, %12, %cst_188 {dimension_numbers = #tpu.dot_dimension_numbers<[1], [0], [0], [1], [0, 0, 1, 1], [], []>} : vector<8x256xf32>, vector<256x1024xf32>, vector<8x1024xf32> -> vector<8x1024xf32>
    %470 = vector.extract_strided_slice %469 {offsets = [0, 0], sizes = [8, 512], strides = [1, 1]} : vector<8x1024xf32> to vector<8x512xf32>
    %c6 = arith.constant 6 : index
    %c0_189 = arith.constant 0 : index
    %c0_190 = arith.constant 0 : index
    %471 = vector.load %arg11[%c6, %c0_189, %c0_190] : memref<8x8x512xf32, #tpu.memory_space<vmem>>, vector<1x8x512xf32>
    %472 = vector.shape_cast %471 : vector<1x8x512xf32> to vector<8x512xf32>
    %473 = arith.addf %470, %472 : vector<8x512xf32>
    %474 = vector.extract_strided_slice %469 {offsets = [0, 512], sizes = [8, 512], strides = [1, 1]} : vector<8x1024xf32> to vector<8x512xf32>
    %475 = vector.broadcast %13 : vector<1x512xf32> to vector<8x512xf32>
    %476 = arith.addf %474, %475 : vector<8x512xf32>
    %477 = vector.extract_strided_slice %473 {offsets = [0, 0], sizes = [8, 128], strides = [1, 1]} : vector<8x512xf32> to vector<8x128xf32>
    %478 = arith.negf %477 : vector<8x128xf32>
    %479 = math.exp %478 : vector<8x128xf32>
    %cst_191 = arith.constant 1.000000e+00 : f32
    %480 = vector.broadcast %cst_191 : f32 to vector<8x128xf32>
    %481 = arith.addf %480, %479 : vector<8x128xf32>
    %482 = arith.divf %480, %481 : vector<8x128xf32>
    %483 = vector.extract_strided_slice %473 {offsets = [0, 128], sizes = [8, 128], strides = [1, 1]} : vector<8x512xf32> to vector<8x128xf32>
    %484 = arith.negf %483 : vector<8x128xf32>
    %485 = math.exp %484 : vector<8x128xf32>
    %cst_192 = arith.constant 1.000000e+00 : f32
    %486 = vector.broadcast %cst_192 : f32 to vector<8x128xf32>
    %487 = arith.addf %486, %485 : vector<8x128xf32>
    %488 = arith.divf %486, %487 : vector<8x128xf32>
    %489 = vector.extract_strided_slice %473 {offsets = [0, 256], sizes = [8, 128], strides = [1, 1]} : vector<8x512xf32> to vector<8x128xf32>
    %490 = math.tanh %489 : vector<8x128xf32>
    %491 = vector.extract_strided_slice %473 {offsets = [0, 384], sizes = [8, 128], strides = [1, 1]} : vector<8x512xf32> to vector<8x128xf32>
    %492 = arith.negf %491 : vector<8x128xf32>
    %493 = math.exp %492 : vector<8x128xf32>
    %cst_193 = arith.constant 1.000000e+00 : f32
    %494 = vector.broadcast %cst_193 : f32 to vector<8x128xf32>
    %495 = arith.addf %494, %493 : vector<8x128xf32>
    %496 = arith.divf %494, %495 : vector<8x128xf32>
    %c0_194 = arith.constant 0 : index
    %c0_195 = arith.constant 0 : index
    %497 = vector.load %arg13[%c0_194, %c0_195] : memref<8x128xf32, #tpu.memory_space<vmem>>, vector<8x128xf32>
    %498 = arith.mulf %488, %497 : vector<8x128xf32>
    %499 = arith.mulf %482, %490 : vector<8x128xf32>
    %500 = arith.addf %498, %499 : vector<8x128xf32>
    %501 = math.tanh %500 : vector<8x128xf32>
    %502 = arith.mulf %496, %501 : vector<8x128xf32>
    %503 = vector.extract_strided_slice %476 {offsets = [0, 0], sizes = [8, 128], strides = [1, 1]} : vector<8x512xf32> to vector<8x128xf32>
    %504 = arith.negf %503 : vector<8x128xf32>
    %505 = math.exp %504 : vector<8x128xf32>
    %cst_196 = arith.constant 1.000000e+00 : f32
    %506 = vector.broadcast %cst_196 : f32 to vector<8x128xf32>
    %507 = arith.addf %506, %505 : vector<8x128xf32>
    %508 = arith.divf %506, %507 : vector<8x128xf32>
    %509 = vector.extract_strided_slice %476 {offsets = [0, 128], sizes = [8, 128], strides = [1, 1]} : vector<8x512xf32> to vector<8x128xf32>
    %510 = arith.negf %509 : vector<8x128xf32>
    %511 = math.exp %510 : vector<8x128xf32>
    %cst_197 = arith.constant 1.000000e+00 : f32
    %512 = vector.broadcast %cst_197 : f32 to vector<8x128xf32>
    %513 = arith.addf %512, %511 : vector<8x128xf32>
    %514 = arith.divf %512, %513 : vector<8x128xf32>
    %515 = vector.extract_strided_slice %476 {offsets = [0, 256], sizes = [8, 128], strides = [1, 1]} : vector<8x512xf32> to vector<8x128xf32>
    %516 = math.tanh %515 : vector<8x128xf32>
    %517 = vector.extract_strided_slice %476 {offsets = [0, 384], sizes = [8, 128], strides = [1, 1]} : vector<8x512xf32> to vector<8x128xf32>
    %518 = arith.negf %517 : vector<8x128xf32>
    %519 = math.exp %518 : vector<8x128xf32>
    %cst_198 = arith.constant 1.000000e+00 : f32
    %520 = vector.broadcast %cst_198 : f32 to vector<8x128xf32>
    %521 = arith.addf %520, %519 : vector<8x128xf32>
    %522 = arith.divf %520, %521 : vector<8x128xf32>
    %c0_199 = arith.constant 0 : index
    %c0_200 = arith.constant 0 : index
    %523 = vector.load %arg14[%c0_199, %c0_200] : memref<8x128xf32, #tpu.memory_space<vmem>>, vector<8x128xf32>
    %524 = arith.mulf %514, %523 : vector<8x128xf32>
    %525 = arith.mulf %508, %516 : vector<8x128xf32>
    %526 = arith.addf %524, %525 : vector<8x128xf32>
    %527 = math.tanh %526 : vector<8x128xf32>
    %528 = arith.mulf %522, %527 : vector<8x128xf32>
    %c1_i32_201 = arith.constant 1 : i32
    %529 = arith.subi %467, %c1_i32_201 : i32
    %530 = vector.broadcast %529 : i32 to vector<8x1xi32>
    %531 = arith.cmpi eq, %14, %530 : vector<8x1xi32>
    %c0_202 = arith.constant 0 : index
    %c0_203 = arith.constant 0 : index
    %532 = vector.load %arg15[%c0_202, %c0_203] : memref<8x128xf32, #tpu.memory_space<vmem>>, vector<8x128xf32>
    %533 = vector.shape_cast %531 : vector<8x1xi1> to vector<8x1xi1>
    %534 = vector.broadcast %533 : vector<8x1xi1> to vector<8x128xi1>
    %535 = arith.select %534, %528, %532 : vector<8x128xi1>, vector<8x128xf32>
    %c0_204 = arith.constant 0 : index
    %c0_205 = arith.constant 0 : index
    %536 = vector.load %arg15[%c0_204, %c0_205] : memref<8x128xf32, #tpu.memory_space<vmem>>, vector<8x128xf32>
    tpu.vector_store %arg15[%c0_204, %c0_205], %535 {strides = array<i32>} : memref<8x128xf32, #tpu.memory_space<vmem>>, vector<8x128xf32>,
    %c0_206 = arith.constant 0 : index
    %c0_207 = arith.constant 0 : index
    %537 = vector.load %arg13[%c0_206, %c0_207] : memref<8x128xf32, #tpu.memory_space<vmem>>, vector<8x128xf32>
    tpu.vector_store %arg13[%c0_206, %c0_207], %500 {strides = array<i32>} : memref<8x128xf32, #tpu.memory_space<vmem>>, vector<8x128xf32>,
    %c0_208 = arith.constant 0 : index
    %c0_209 = arith.constant 0 : index
    %538 = vector.load %arg14[%c0_208, %c0_209] : memref<8x128xf32, #tpu.memory_space<vmem>>, vector<8x128xf32>
    tpu.vector_store %arg14[%c0_208, %c0_209], %526 {strides = array<i32>} : memref<8x128xf32, #tpu.memory_space<vmem>>, vector<8x128xf32>,
    %c0_210 = arith.constant 0 : index
    %c0_211 = arith.constant 0 : index
    %539 = vector.load %arg12[%c0_210, %c0_211] : memref<8x256xf32, #tpu.memory_space<vmem>>, vector<8x128xf32>
    tpu.vector_store %arg12[%c0_210, %c0_211], %502 {strides = array<i32>} : memref<8x256xf32, #tpu.memory_space<vmem>>, vector<8x128xf32>,
    %c0_212 = arith.constant 0 : index
    %c128_213 = arith.constant 128 : index
    %540 = vector.load %arg12[%c0_212, %c128_213] : memref<8x256xf32, #tpu.memory_space<vmem>>, vector<8x128xf32>
    tpu.vector_store %arg12[%c0_212, %c128_213], %528 {strides = array<i32>} : memref<8x256xf32, #tpu.memory_space<vmem>>, vector<8x128xf32>,
    %c7_i32 = arith.constant 7 : i32
    %541 = arith.addi %15, %c7_i32 : i32
    %c0_214 = arith.constant 0 : index
    %c0_215 = arith.constant 0 : index
    %542 = vector.load %arg12[%c0_214, %c0_215] : memref<8x256xf32, #tpu.memory_space<vmem>>, vector<8x256xf32>
    %cst_216 = arith.constant dense<0.000000e+00> : vector<8x1024xf32>
    %543 = tpu.matmul %542, %12, %cst_216 {dimension_numbers = #tpu.dot_dimension_numbers<[1], [0], [0], [1], [0, 0, 1, 1], [], []>} : vector<8x256xf32>, vector<256x1024xf32>, vector<8x1024xf32> -> vector<8x1024xf32>
    %544 = vector.extract_strided_slice %543 {offsets = [0, 0], sizes = [8, 512], strides = [1, 1]} : vector<8x1024xf32> to vector<8x512xf32>
    %c7 = arith.constant 7 : index
    %c0_217 = arith.constant 0 : index
    %c0_218 = arith.constant 0 : index
    %545 = vector.load %arg11[%c7, %c0_217, %c0_218] : memref<8x8x512xf32, #tpu.memory_space<vmem>>, vector<1x8x512xf32>
    %546 = vector.shape_cast %545 : vector<1x8x512xf32> to vector<8x512xf32>
    %547 = arith.addf %544, %546 : vector<8x512xf32>
    %548 = vector.extract_strided_slice %543 {offsets = [0, 512], sizes = [8, 512], strides = [1, 1]} : vector<8x1024xf32> to vector<8x512xf32>
    %549 = vector.broadcast %13 : vector<1x512xf32> to vector<8x512xf32>
    %550 = arith.addf %548, %549 : vector<8x512xf32>
    %551 = vector.extract_strided_slice %547 {offsets = [0, 0], sizes = [8, 128], strides = [1, 1]} : vector<8x512xf32> to vector<8x128xf32>
    %552 = arith.negf %551 : vector<8x128xf32>
    %553 = math.exp %552 : vector<8x128xf32>
    %cst_219 = arith.constant 1.000000e+00 : f32
    %554 = vector.broadcast %cst_219 : f32 to vector<8x128xf32>
    %555 = arith.addf %554, %553 : vector<8x128xf32>
    %556 = arith.divf %554, %555 : vector<8x128xf32>
    %557 = vector.extract_strided_slice %547 {offsets = [0, 128], sizes = [8, 128], strides = [1, 1]} : vector<8x512xf32> to vector<8x128xf32>
    %558 = arith.negf %557 : vector<8x128xf32>
    %559 = math.exp %558 : vector<8x128xf32>
    %cst_220 = arith.constant 1.000000e+00 : f32
    %560 = vector.broadcast %cst_220 : f32 to vector<8x128xf32>
    %561 = arith.addf %560, %559 : vector<8x128xf32>
    %562 = arith.divf %560, %561 : vector<8x128xf32>
    %563 = vector.extract_strided_slice %547 {offsets = [0, 256], sizes = [8, 128], strides = [1, 1]} : vector<8x512xf32> to vector<8x128xf32>
    %564 = math.tanh %563 : vector<8x128xf32>
    %565 = vector.extract_strided_slice %547 {offsets = [0, 384], sizes = [8, 128], strides = [1, 1]} : vector<8x512xf32> to vector<8x128xf32>
    %566 = arith.negf %565 : vector<8x128xf32>
    %567 = math.exp %566 : vector<8x128xf32>
    %cst_221 = arith.constant 1.000000e+00 : f32
    %568 = vector.broadcast %cst_221 : f32 to vector<8x128xf32>
    %569 = arith.addf %568, %567 : vector<8x128xf32>
    %570 = arith.divf %568, %569 : vector<8x128xf32>
    %c0_222 = arith.constant 0 : index
    %c0_223 = arith.constant 0 : index
    %571 = vector.load %arg13[%c0_222, %c0_223] : memref<8x128xf32, #tpu.memory_space<vmem>>, vector<8x128xf32>
    %572 = arith.mulf %562, %571 : vector<8x128xf32>
    %573 = arith.mulf %556, %564 : vector<8x128xf32>
    %574 = arith.addf %572, %573 : vector<8x128xf32>
    %575 = math.tanh %574 : vector<8x128xf32>
    %576 = arith.mulf %570, %575 : vector<8x128xf32>
    %577 = vector.extract_strided_slice %550 {offsets = [0, 0], sizes = [8, 128], strides = [1, 1]} : vector<8x512xf32> to vector<8x128xf32>
    %578 = arith.negf %577 : vector<8x128xf32>
    %579 = math.exp %578 : vector<8x128xf32>
    %cst_224 = arith.constant 1.000000e+00 : f32
    %580 = vector.broadcast %cst_224 : f32 to vector<8x128xf32>
    %581 = arith.addf %580, %579 : vector<8x128xf32>
    %582 = arith.divf %580, %581 : vector<8x128xf32>
    %583 = vector.extract_strided_slice %550 {offsets = [0, 128], sizes = [8, 128], strides = [1, 1]} : vector<8x512xf32> to vector<8x128xf32>
    %584 = arith.negf %583 : vector<8x128xf32>
    %585 = math.exp %584 : vector<8x128xf32>
    %cst_225 = arith.constant 1.000000e+00 : f32
    %586 = vector.broadcast %cst_225 : f32 to vector<8x128xf32>
    %587 = arith.addf %586, %585 : vector<8x128xf32>
    %588 = arith.divf %586, %587 : vector<8x128xf32>
    %589 = vector.extract_strided_slice %550 {offsets = [0, 256], sizes = [8, 128], strides = [1, 1]} : vector<8x512xf32> to vector<8x128xf32>
    %590 = math.tanh %589 : vector<8x128xf32>
    %591 = vector.extract_strided_slice %550 {offsets = [0, 384], sizes = [8, 128], strides = [1, 1]} : vector<8x512xf32> to vector<8x128xf32>
    %592 = arith.negf %591 : vector<8x128xf32>
    %593 = math.exp %592 : vector<8x128xf32>
    %cst_226 = arith.constant 1.000000e+00 : f32
    %594 = vector.broadcast %cst_226 : f32 to vector<8x128xf32>
    %595 = arith.addf %594, %593 : vector<8x128xf32>
    %596 = arith.divf %594, %595 : vector<8x128xf32>
    %c0_227 = arith.constant 0 : index
    %c0_228 = arith.constant 0 : index
    %597 = vector.load %arg14[%c0_227, %c0_228] : memref<8x128xf32, #tpu.memory_space<vmem>>, vector<8x128xf32>
    %598 = arith.mulf %588, %597 : vector<8x128xf32>
    %599 = arith.mulf %582, %590 : vector<8x128xf32>
    %600 = arith.addf %598, %599 : vector<8x128xf32>
    %601 = math.tanh %600 : vector<8x128xf32>
    %602 = arith.mulf %596, %601 : vector<8x128xf32>
    %c1_i32_229 = arith.constant 1 : i32
    %603 = arith.subi %541, %c1_i32_229 : i32
    %604 = vector.broadcast %603 : i32 to vector<8x1xi32>
    %605 = arith.cmpi eq, %14, %604 : vector<8x1xi32>
    %c0_230 = arith.constant 0 : index
    %c0_231 = arith.constant 0 : index
    %606 = vector.load %arg15[%c0_230, %c0_231] : memref<8x128xf32, #tpu.memory_space<vmem>>, vector<8x128xf32>
    %607 = vector.shape_cast %605 : vector<8x1xi1> to vector<8x1xi1>
    %608 = vector.broadcast %607 : vector<8x1xi1> to vector<8x128xi1>
    %609 = arith.select %608, %602, %606 : vector<8x128xi1>, vector<8x128xf32>
    %c0_232 = arith.constant 0 : index
    %c0_233 = arith.constant 0 : index
    %610 = vector.load %arg15[%c0_232, %c0_233] : memref<8x128xf32, #tpu.memory_space<vmem>>, vector<8x128xf32>
    tpu.vector_store %arg15[%c0_232, %c0_233], %609 {strides = array<i32>} : memref<8x128xf32, #tpu.memory_space<vmem>>, vector<8x128xf32>,
    %c0_234 = arith.constant 0 : index
    %c0_235 = arith.constant 0 : index
    %611 = vector.load %arg13[%c0_234, %c0_235] : memref<8x128xf32, #tpu.memory_space<vmem>>, vector<8x128xf32>
    tpu.vector_store %arg13[%c0_234, %c0_235], %574 {strides = array<i32>} : memref<8x128xf32, #tpu.memory_space<vmem>>, vector<8x128xf32>,
    %c0_236 = arith.constant 0 : index
    %c0_237 = arith.constant 0 : index
    %612 = vector.load %arg14[%c0_236, %c0_237] : memref<8x128xf32, #tpu.memory_space<vmem>>, vector<8x128xf32>
    tpu.vector_store %arg14[%c0_236, %c0_237], %600 {strides = array<i32>} : memref<8x128xf32, #tpu.memory_space<vmem>>, vector<8x128xf32>,
    %c0_238 = arith.constant 0 : index
    %c0_239 = arith.constant 0 : index
    %613 = vector.load %arg12[%c0_238, %c0_239] : memref<8x256xf32, #tpu.memory_space<vmem>>, vector<8x128xf32>
    tpu.vector_store %arg12[%c0_238, %c0_239], %576 {strides = array<i32>} : memref<8x256xf32, #tpu.memory_space<vmem>>, vector<8x128xf32>,
    %c0_240 = arith.constant 0 : index
    %c128_241 = arith.constant 128 : index
    %614 = vector.load %arg12[%c0_240, %c128_241] : memref<8x256xf32, #tpu.memory_space<vmem>>, vector<8x128xf32>
    tpu.vector_store %arg12[%c0_240, %c128_241], %602 {strides = array<i32>} : memref<8x256xf32, #tpu.memory_space<vmem>>, vector<8x128xf32>,
    %c0_i32_242 = arith.constant 0 : i32
    %615 = arith.cmpi eq, %arg1, %c0_i32_242 : i32
    %616 = arith.extui %615 : i1 to i32
    %c0_i32_243 = arith.constant 0 : i32
    %617 = arith.cmpi ne, %616, %c0_i32_243 : i32
    scf.if %617 {
      %c0_244 = arith.constant 0 : index
      %c0_245 = arith.constant 0 : index
      %618 = vector.load %arg12[%c0_244, %c0_245] : memref<8x256xf32, #tpu.memory_space<vmem>>, vector<8x256xf32>
      %cst_246 = arith.constant dense<0.000000e+00> : vector<8x1024xf32>
      %619 = tpu.matmul %618, %12, %cst_246 {dimension_numbers = #tpu.dot_dimension_numbers<[1], [0], [0], [1], [0, 0, 1, 1], [], []>} : vector<8x256xf32>, vector<256x1024xf32>, vector<8x1024xf32> -> vector<8x1024xf32>
      %620 = vector.extract_strided_slice %619 {offsets = [0, 512], sizes = [8, 512], strides = [1, 1]} : vector<8x1024xf32> to vector<8x512xf32>
      %621 = vector.broadcast %13 : vector<1x512xf32> to vector<8x512xf32>
      %622 = arith.addf %620, %621 : vector<8x512xf32>
      %623 = vector.extract_strided_slice %622 {offsets = [0, 0], sizes = [8, 128], strides = [1, 1]} : vector<8x512xf32> to vector<8x128xf32>
      %624 = arith.negf %623 : vector<8x128xf32>
      %625 = math.exp %624 : vector<8x128xf32>
      %cst_247 = arith.constant 1.000000e+00 : f32
      %626 = vector.broadcast %cst_247 : f32 to vector<8x128xf32>
      %627 = arith.addf %626, %625 : vector<8x128xf32>
      %628 = arith.divf %626, %627 : vector<8x128xf32>
      %629 = vector.extract_strided_slice %622 {offsets = [0, 128], sizes = [8, 128], strides = [1, 1]} : vector<8x512xf32> to vector<8x128xf32>
      %630 = arith.negf %629 : vector<8x128xf32>
      %631 = math.exp %630 : vector<8x128xf32>
      %cst_248 = arith.constant 1.000000e+00 : f32
      %632 = vector.broadcast %cst_248 : f32 to vector<8x128xf32>
      %633 = arith.addf %632, %631 : vector<8x128xf32>
      %634 = arith.divf %632, %633 : vector<8x128xf32>
      %635 = vector.extract_strided_slice %622 {offsets = [0, 256], sizes = [8, 128], strides = [1, 1]} : vector<8x512xf32> to vector<8x128xf32>
      %636 = math.tanh %635 : vector<8x128xf32>
      %637 = vector.extract_strided_slice %622 {offsets = [0, 384], sizes = [8, 128], strides = [1, 1]} : vector<8x512xf32> to vector<8x128xf32>
      %638 = arith.negf %637 : vector<8x128xf32>
      %639 = math.exp %638 : vector<8x128xf32>
      %cst_249 = arith.constant 1.000000e+00 : f32
      %640 = vector.broadcast %cst_249 : f32 to vector<8x128xf32>
      %641 = arith.addf %640, %639 : vector<8x128xf32>
      %642 = arith.divf %640, %641 : vector<8x128xf32>
      %c0_250 = arith.constant 0 : index
      %c0_251 = arith.constant 0 : index
      %643 = vector.load %arg14[%c0_250, %c0_251] : memref<8x128xf32, #tpu.memory_space<vmem>>, vector<8x128xf32>
      %644 = arith.mulf %634, %643 : vector<8x128xf32>
      %645 = arith.mulf %628, %636 : vector<8x128xf32>
      %646 = arith.addf %644, %645 : vector<8x128xf32>
      %647 = math.tanh %646 : vector<8x128xf32>
      %648 = arith.mulf %642, %647 : vector<8x128xf32>
      %c7_i32_252 = arith.constant 7 : i32
      %649 = vector.broadcast %c7_i32_252 : i32 to vector<8x1xi32>
      %650 = arith.cmpi eq, %14, %649 : vector<8x1xi32>
      %c0_253 = arith.constant 0 : index
      %c0_254 = arith.constant 0 : index
      %651 = vector.load %arg15[%c0_253, %c0_254] : memref<8x128xf32, #tpu.memory_space<vmem>>, vector<8x128xf32>
      %652 = vector.shape_cast %650 : vector<8x1xi1> to vector<8x1xi1>
      %653 = vector.broadcast %652 : vector<8x1xi1> to vector<8x128xi1>
      %654 = arith.select %653, %648, %651 : vector<8x128xi1>, vector<8x128xf32>
      %c0_255 = arith.constant 0 : index
      %c0_256 = arith.constant 0 : index
      %655 = vector.load %arg8[%c0_255, %c0_256] : memref<128x128xf32, #tpu.memory_space<vmem>>, vector<128x128xf32>
      %cst_257 = arith.constant dense<0.000000e+00> : vector<8x128xf32>
      %656 = tpu.matmul %654, %655, %cst_257 {dimension_numbers = #tpu.dot_dimension_numbers<[1], [0], [0], [1], [0, 0, 1, 1], [], []>} : vector<8x128xf32>, vector<128x128xf32>, vector<8x128xf32> -> vector<8x128xf32>
      %c0_258 = arith.constant 0 : index
      %c0_259 = arith.constant 0 : index
      %657 = vector.load %arg9[%c0_258, %c0_259] : memref<1x128xf32, #tpu.memory_space<vmem>>, vector<1x128xf32>
      %658 = vector.broadcast %657 : vector<1x128xf32> to vector<8x128xf32>
      %659 = arith.addf %656, %658 : vector<8x128xf32>
      %c0_260 = arith.constant 0 : index
      %c0_261 = arith.constant 0 : index
      %660 = vector.load %arg10[%c0_260, %c0_261] : memref<8x128xf32, #tpu.memory_space<vmem>>, vector<8x128xf32>
      tpu.vector_store %arg10[%c0_260, %c0_261], %659 {strides = array<i32>} : memref<8x128xf32, #tpu.memory_space<vmem>>, vector<8x128xf32>,
    } else {
    }
    return
  }
  func.func @transform_0(%arg0: i32, %arg1: i32) -> (i32, i32, i32) {
    %c0_i32 = arith.constant 0 : i32
    %c0_i32_0 = arith.constant 0 : i32
    return %arg1, %arg0, %c0_i32 : i32, i32, i32
  }
  func.func @transform_1(%arg0: i32, %arg1: i32) -> (i32, i32) {
    %c0_i32 = arith.constant 0 : i32
    %c0_i32_0 = arith.constant 0 : i32
    return %arg0, %c0_i32 : i32, i32
  }
  func.func @transform_2(%arg0: i32, %arg1: i32) -> (i32, i32) {
    %c0_i32 = arith.constant 0 : i32
    %c0_i32_0 = arith.constant 0 : i32
    %c0_i32_1 = arith.constant 0 : i32
    return %c0_i32, %c0_i32_0 : i32, i32
  }
  func.func @transform_3(%arg0: i32, %arg1: i32) -> (i32, i32) {
    %c0_i32 = arith.constant 0 : i32
    %c0_i32_0 = arith.constant 0 : i32
    %c0_i32_1 = arith.constant 0 : i32
    return %c0_i32, %c0_i32_0 : i32, i32
  }
  func.func @transform_4(%arg0: i32, %arg1: i32) -> (i32, i32) {
    %c0_i32 = arith.constant 0 : i32
    %c0_i32_0 = arith.constant 0 : i32
    %c0_i32_1 = arith.constant 0 : i32
    return %c0_i32, %c0_i32_0 : i32, i32
  }
  func.func @transform_5(%arg0: i32, %arg1: i32) -> (i32, i32) {
    %c0_i32 = arith.constant 0 : i32
    %c0_i32_0 = arith.constant 0 : i32
    %c0_i32_1 = arith.constant 0 : i32
    return %c0_i32, %c0_i32_0 : i32, i32
  }
  func.func @transform_6(%arg0: i32, %arg1: i32) -> (i32, i32) {
    %c0_i32 = arith.constant 0 : i32
    %c0_i32_0 = arith.constant 0 : i32
    %c0_i32_1 = arith.constant 0 : i32
    return %c0_i32, %c0_i32_0 : i32, i32
  }
  func.func @transform_7(%arg0: i32, %arg1: i32) -> (i32, i32) {
    %c0_i32 = arith.constant 0 : i32
    %c0_i32_0 = arith.constant 0 : i32
    %c0_i32_1 = arith.constant 0 : i32
    return %c0_i32, %c0_i32_0 : i32, i32
  }
  func.func @transform_8(%arg0: i32, %arg1: i32) -> (i32, i32) {
    %c0_i32 = arith.constant 0 : i32
    %c0_i32_0 = arith.constant 0 : i32
    return %arg0, %c0_i32 : i32, i32
  }
}

</mosaic_0001>

<bundles_post_ra>
// kernel: tpu_custom_call.1
= control target key start
LH: loop header
LB: loop body
LE: loop exit
PB: predicated region body
PF: predicated region fallthrough
CT: control target
= control target key end

     0   :  { %13 = vsyncpa [#allocation8], 0  ;;  %s8531_s0 = inlined_call_operand.hbm [shape: f32[8,8,128], index: 0, kind: input, shape index: {}]   ;;  %s8532_s1 = inlined_call_operand.vmem [shape: s32[8,1], index: 1, kind: input, shape index: {}]   ;;  %s8533_s2 = inlined_call_operand.hbm [shape: f32[128,512], index: 2, kind: input, shape index: {}]   ;;  %s8534_s3 = inlined_call_operand.vmem [shape: f32[1,512], index: 3, kind: input, shape index: {}]   ;;  %s8535_s4 = inlined_call_operand.hbm [shape: f32[256,1024], index: 4, kind: input, shape index: {}]   ;;  %s8536_s5 = inlined_call_operand.vmem [shape: f32[1,512], index: 5, kind: input, shape index: {}]   ;;  %s8537_s6 = inlined_call_operand.hbm [shape: f32[128,128], index: 6, kind: input, shape index: {}]   ;;  %s8538_s7 = inlined_call_operand.vmem [shape: f32[1,128], index: 7, kind: input, shape index: {}]   ;;  %s8539_s8 = inlined_call_operand.hbm [shape: f32[8,128], index: 8, kind: output, shape index: {}]  }
   0x1   :  { %14 = vsyncpa [#allocation11], 0 }
   0x2   :  { %15 = vsyncpa [#allocation14], 0 }
   0x3   :  { %16 = vsyncpa [#allocation9], 0  ;;  %s6778_s27 = smov [#allocation10]   ;;  %s6660_s9 = scalar_lea.hbm %s8533_s2, 8192 }
   0x4   :  { %s36_s28 = sshll.u32 %s6778_s27, 4  ;;  %p6661_p0 = scmp.ne.s32.totalorder %s8533_s2, %s6660_s9  ;;  %s37_s28 = int_to_ptr.vmem [resolvable:$true] %s36_s28 }
   0x5   :  { %p6664_p1 = scmp.lt.u32.totalorder %s6660_s9, %s8533_s2 }
   0x7   :  { %p6666_p2 = pnand %p6664_p1, %p6661_p0 }
   0x9   :  { %6669 = shalt.err (!%p6666_p2)
}
   0xa   :  { %s6670_s14 = scalar_lea.vmem %s37_s28, 8192  ;;  %p6675_p4 = scmp.lt.s32.totalorder %s37_s28, %s37_s28 }
   0xb   :  { %p6671_p3 = scmp.ne.s32.totalorder %s37_s28, %s6670_s14  ;;  %p6676_p5 = scmp.lt.s32.totalorder %s6670_s14, %s6670_s14 }
   0xd   :  { %p6677_p6 = por %p6676_p5, %p6675_p4 }
   0xf   :  { %p6678_p7 = pnand %p6677_p6, %p6671_p3 }
  0x11   :  { %6681 = shalt.err (!%p6678_p7)
}
  0x12   :  { %s6779_s15 = smov 512   ;;  %s6780_s16 = smov 32  }
  0x13   :  { %42 = dma.hbm_to_vmem [thread:$0]  %s8533_s2, 8192, %s37_s28, [#allocation11], %s6779_s15, %s6779_s15, %s6780_s16  }
  0x14   :  { %s6781_s19 = smov [#allocation7]   ;;  %s6682_s23 = scalar_lea.hbm %s8531_s0, 1024 }
  0x15   :  { %s22_s20 = sshll.u32 %s6781_s19, 4  ;;  %p6683_p8 = scmp.ne.s32.totalorder %s8531_s0, %s6682_s23  ;;  %s23_s20 = int_to_ptr.vmem [resolvable:$true] %s22_s20 }
  0x16   :  { %p6686_p9 = scmp.lt.u32.totalorder %s6682_s23, %s8531_s0 }
  0x18   :  { %p6688_p10 = pnand %p6686_p9, %p6683_p8 }
  0x1a   :  { %6691 = shalt.err (!%p6688_p10)
}
  0x1b   :  { %s6692_s29 = scalar_lea.vmem %s23_s20, 1024  ;;  %p6697_p12 = scmp.lt.s32.totalorder %s23_s20, %s23_s20 }
  0x1c   :  { %p6693_p11 = scmp.ne.s32.totalorder %s23_s20, %s6692_s29  ;;  %p6698_p13 = scmp.lt.s32.totalorder %s6692_s29, %s6692_s29 }
  0x1e   :  { %p6699_p0 = por %p6698_p13, %p6697_p12 }
  0x20   :  { %p6700_p1 = pnand %p6699_p0, %p6693_p11 }
  0x22   :  { %6703 = shalt.err (!%p6700_p1)
}
  0x23   :  { %s6782_s2 = smov 128   ;;  %s6783_s28 = smov 8  }
  0x24   :  { %28 = dma.hbm_to_vmem [thread:$0]  %s8531_s0, 1024, %s23_s20, [#allocation8], %s6782_s2, %s6782_s2, %s6783_s28  }
  0x25   :  { %s6784_s10 = smov [#allocation12]   ;;  %s6704_s14 = scalar_lea.hbm %s8535_s4, 32768 }
  0x26   :  { %s50_s11 = sshll.u32 %s6784_s10, 4  ;;  %p6705_p2 = scmp.ne.s32.totalorder %s8535_s4, %s6704_s14  ;;  %s51_s11 = int_to_ptr.vmem [resolvable:$true] %s50_s11 }
  0x27   :  { %p6708_p3 = scmp.lt.u32.totalorder %s6704_s14, %s8535_s4 }
  0x29   :  { %p6710_p4 = pnand %p6708_p3, %p6705_p2 }
  0x2b   :  { %6713 = shalt.err (!%p6710_p4)
}
  0x2c   :  { %s6714_s19 = scalar_lea.vmem %s51_s11, 32768  ;;  %p6719_p6 = scmp.lt.s32.totalorder %s51_s11, %s51_s11 }
  0x2d   :  { %p6715_p5 = scmp.ne.s32.totalorder %s51_s11, %s6714_s19  ;;  %p6720_p7 = scmp.lt.s32.totalorder %s6714_s19, %s6714_s19 }
  0x2f   :  { %p6721_p8 = por %p6720_p7, %p6719_p6 }
  0x31   :  { %p6722_p9 = pnand %p6721_p8, %p6715_p5 }
  0x33   :  { %6725 = shalt.err (!%p6722_p9)
}
  0x34   :  { %s6785_s0 = smov 1024   ;;  %s6786_s20 = smov 64  }
  0x35   :  { %56 = dma.hbm_to_vmem [thread:$0]  %s8535_s4, 32768, %s51_s11, [#allocation11], %s6785_s0, %s6785_s0, %s6786_s20  }
  0x36   :  { %s6787_s23 = smov [#allocation13]   ;;  %s6726_s27 = scalar_lea.hbm %s8537_s6, 2048 }
  0x37   :  { %s64_s24 = sshll.u32 %s6787_s23, 4  ;;  %p6727_p10 = scmp.ne.s32.totalorder %s8537_s6, %s6726_s27  ;;  %s65_s24 = int_to_ptr.vmem [resolvable:$true] %s64_s24 }
  0x38   :  { %p6730_p11 = scmp.lt.u32.totalorder %s6726_s27, %s8537_s6 }
  0x3a   :  { %p6732_p12 = pnand %p6730_p11, %p6727_p10 }
  0x3c   :  { %6735 = shalt.err (!%p6732_p12)
}
  0x3d   :  { %s6736_s12 = scalar_lea.vmem %s65_s24, 2048  ;;  %p6741_p0 = scmp.lt.s32.totalorder %s65_s24, %s65_s24 }
  0x3e   :  { %p6737_p13 = scmp.ne.s32.totalorder %s65_s24, %s6736_s12  ;;  %p6742_p1 = scmp.lt.s32.totalorder %s6736_s12, %s6736_s12 }
  0x40   :  { %p6743_p2 = por %p6742_p1, %p6741_p0 }
  0x42   :  { %p6744_p3 = pnand %p6743_p2, %p6737_p13 }
  0x44   :  { %6747 = shalt.err (!%p6744_p3)
}
  0x45   :  { %70 = dma.hbm_to_vmem [thread:$0]  %s8537_s6, 2048, %s65_s24, [#allocation14], %s6782_s2, %s6782_s2, %s6783_s28  }
  0x46   :  { %6770 = dma.done.wait [#allocation8], 1024  }
  0x47   :  { %6771 = vsyncadd [#allocation8], 4294966272 }
  0x48   :  { %6772 = dma.done.wait [#allocation11], 40960  }
  0x49   :  { %6773 = vsyncadd [#allocation11], 4294926336 }
  0x4a   :  { %6774 = dma.done.wait [#allocation14], 2048  }
  0x4b   :  { %6775 = vsyncadd [#allocation14], 4294965248  ;;  %v8542_v0 = vmov 0.0   ;;  %v103_v1 = vld [vmem:[#allocation10 + $0x8] sm:$0xff]  ;;  %v105_v3 = vld [vmem:[#allocation10 + $0x18] sm:$0xff]  ;;  %s6792_s19 = smov [#allocation15]  }
  0x4c   :  { %252 = vmatprep.mubr.f32.mxu0 %v8542_v0  ;;  %365 = vmatprep.mubr.f32.mxu1 %v8542_v0  ;;  %v107_v2 = vld [vmem:[#allocation10 + $0x28] sm:$0xff]  ;;  %v109_v5 = vld [vmem:[#allocation10 + $0x38] sm:$0xff]  ;;  %v102_v6 = vld [vmem:[#allocation10] sm:$0xff]  ;;  %s3926_s0 = sshll.u32 %s6792_s19, 4  ;;  %s3927_s0 = int_to_ptr.vmem [resolvable:$true] %s3926_s0 }
  0x4d   :  { %v4041_v4 = vpack.c.bf16 %v107_v2, %v103_v1  ;;  %v106_v7 = vld [vmem:[#allocation10 + $0x20] sm:$0xff]  ;;  %v4073_v8 = vpack.c.bf16 %v109_v5, %v105_v3  ;;  %v104_v10 = vld [vmem:[#allocation10 + $0x10] sm:$0xff]  ;;  %v111_v12 = vld [vmem:[#allocation10 + $0x48] sm:$0xff]  ;;  %s6748_s20 = scalar_lea.vmem %s3927_s0, 128  ;;  %p6753_p5 = scmp.lt.s32.totalorder %s3927_s0, %s3927_s0 }
  0x4e   :  { %v4043_v9 = vpack.c.bf16 %v106_v7, %v102_v6  ;;  %v108_v11 = vld [vmem:[#allocation10 + $0x30] sm:$0xff]  ;;  %v115_v14 = vld [vmem:[#allocation10 + $0x68] sm:$0xff]  ;;  %v113_v15 = vld [vmem:[#allocation10 + $0x58] sm:$0xff]  ;;  %p6749_p4 = scmp.ne.s32.totalorder %s3927_s0, %s6748_s20  ;;  %p6754_p6 = scmp.lt.s32.totalorder %s6748_s20, %s6748_s20 }
  0x4f   :  { %4042 = vmatprep.subr.bf16.mxu0 %v4041_v4  ;;  %v4075_v13 = vpack.c.bf16 %v108_v11, %v104_v10  ;;  %v117_v16 = vld [vmem:[#allocation10 + $0x78] sm:$0xff]  ;;  %4074 = vmatprep.subr.bf16.mxu1 %v4073_v8  ;;  %v4045_v17 = vpack.c.bf16 %v115_v14, %v111_v12  ;;  %v110_v19 = vld [vmem:[#allocation10 + $0x40] sm:$0xff]  ;;  %v112_v21 = vld [vmem:[#allocation10 + $0x50] sm:$0xff] }
  0x50   :  { %4044 = vmatpush1.bf16.msra.mxu0 %v4043_v9  ;;  %v4077_v18 = vpack.c.bf16 %v117_v16, %v113_v15  ;;  %v114_v20 = vld [vmem:[#allocation10 + $0x60] sm:$0xff]  ;;  %v116_v23 = vld [vmem:[#allocation10 + $0x70] sm:$0xff]  ;;  %v119_v24 = vld [vmem:[#allocation10 + $0x88] sm:$0xff]  ;;  %p6755_p7 = por %p6754_p6, %p6753_p5 }
  0x51   :  { %4076 = vmatpush1.bf16.msra.mxu1 %v4075_v13  ;;  %v4047_v22 = vpack.c.bf16 %v114_v20, %v110_v19  ;;  %v123_v25 = vld [vmem:[#allocation10 + $0xa8] sm:$0xff]  ;;  %4046 = vmatprep.subr.bf16.mxu0 %v4045_v17  ;;  %v4079_v26 = vpack.c.bf16 %v116_v23, %v112_v21  ;;  %v121_v28 = vld [vmem:[#allocation10 + $0x98] sm:$0xff]  ;;  %v118_v30 = vld [vmem:[#allocation10 + $0x80] sm:$0xff] }
  0x52   :  { %4078 = vmatprep.subr.bf16.mxu1 %v4077_v18  ;;  %v4049_v27 = vpack.c.bf16 %v123_v25, %v119_v24  ;;  %v125_v29 = vld [vmem:[#allocation10 + $0xb8] sm:$0xff]  ;;  %v122_v32 = vld [vmem:[#allocation10 + $0xa0] sm:$0xff]  ;;  %v120_v33 = vld [vmem:[#allocation10 + $0x90] sm:$0xff]  ;;  %p6756_p8 = pnand %p6755_p7, %p6749_p4 }
  0x53   :  { %v4081_v31 = vpack.c.bf16 %v125_v29, %v121_v28  ;;  %v124_v34 = vld [vmem:[#allocation10 + $0xb0] sm:$0xff]  ;;  %v4051_v35 = vpack.c.bf16 %v122_v32, %v118_v30  ;;  %v127_v36 = vld [vmem:[#allocation10 + $0xc8] sm:$0xff]  ;;  %v129_v38 = vld [vmem:[#allocation10 + $0xd8] sm:$0xff] }
  0x54   :  { %4048 = vmatpush1.bf16.msra.mxu0 %v4047_v22  ;;  %v131_v37 = vld [vmem:[#allocation10 + $0xe8] sm:$0xff]  ;;  %v4083_v39 = vpack.c.bf16 %v124_v34, %v120_v33  ;;  %v133_v41 = vld [vmem:[#allocation10 + $0xf8] sm:$0xff]  ;;  %v126_v42 = vld [vmem:[#allocation10 + $0xc0] sm:$0xff] }
  0x55   :  { %4080 = vmatpush1.bf16.msra.mxu1 %v4079_v26  ;;  %4050 = vmatprep.subr.bf16.mxu0 %v4049_v27  ;;  %v4053_v40 = vpack.c.bf16 %v131_v37, %v127_v36  ;;  %v130_v43 = vld [vmem:[#allocation10 + $0xe0] sm:$0xff]  ;;  %v4085_v44 = vpack.c.bf16 %v133_v41, %v129_v38  ;;  %v128_v45 = vld [vmem:[#allocation10 + $0xd0] sm:$0xff]  ;;  %v135_v47 = vld [vmem:[#allocation10 + $0x108] sm:$0xff] }
  0x56   :  { %4082 = vmatprep.subr.bf16.mxu1 %v4081_v31  ;;  %v132_v46 = vld [vmem:[#allocation10 + $0xf0] sm:$0xff]  ;;  %v139_v48 = vld [vmem:[#allocation10 + $0x128] sm:$0xff]  ;;  %v137_v49 = vld [vmem:[#allocation10 + $0x118] sm:$0xff]  ;;  %v4055_v51 = vpack.c.bf16 %v130_v43, %v126_v42 }
  0x57   :  { %v141_v50 = vld [vmem:[#allocation10 + $0x138] sm:$0xff]  ;;  %v4087_v52 = vpack.c.bf16 %v132_v46, %v128_v45  ;;  %v4057_v53 = vpack.c.bf16 %v139_v48, %v135_v47  ;;  %v134_v54 = vld [vmem:[#allocation10 + $0x100] sm:$0xff]  ;;  %v136_v56 = vld [vmem:[#allocation10 + $0x110] sm:$0xff] }
  0x58   :  { %4052 = vmatpush1.bf16.msra.mxu0 %v4051_v35  ;;  %v138_v55 = vld [vmem:[#allocation10 + $0x120] sm:$0xff]  ;;  %v4089_v57 = vpack.c.bf16 %v141_v50, %v137_v49  ;;  %v140_v58 = vld [vmem:[#allocation10 + $0x130] sm:$0xff]  ;;  %v143_v59 = vld [vmem:[#allocation10 + $0x148] sm:$0xff] }
  0x59   :  { %4084 = vmatpush1.bf16.msra.mxu1 %v4083_v39  ;;  %4054 = vmatprep.subr.bf16.mxu0 %v4053_v40  ;;  %v147_v60 = vld [vmem:[#allocation10 + $0x168] sm:$0xff]  ;;  %v145_v61 = vld [vmem:[#allocation10 + $0x158] sm:$0xff]  ;;  %v4059_v63 = vpack.c.bf16 %v138_v55, %v134_v54  ;;  %v4091_v1 = vpack.c.bf16 %v140_v58, %v136_v56  ;;  %v142_v3 = vld [vmem:[#allocation10 + $0x140] sm:$0xff] }
  0x5a   :  { %4086 = vmatprep.subr.bf16.mxu1 %v4085_v44  ;;  %v149_v62 = vld [vmem:[#allocation10 + $0x178] sm:$0xff]  ;;  %v4061_v2 = vpack.c.bf16 %v147_v60, %v143_v59  ;;  %v146_v4 = vld [vmem:[#allocation10 + $0x160] sm:$0xff]  ;;  %v144_v5 = vld [vmem:[#allocation10 + $0x150] sm:$0xff] }
  0x5b   :  { %v4093_v6 = vpack.c.bf16 %v149_v62, %v145_v61  ;;  %v148_v7 = vld [vmem:[#allocation10 + $0x170] sm:$0xff]  ;;  %v151_v8 = vld [vmem:[#allocation10 + $0x188] sm:$0xff]  ;;  %v153_v10 = vld [vmem:[#allocation10 + $0x198] sm:$0xff]  ;;  %v4063_v12 = vpack.c.bf16 %v146_v4, %v142_v3 }
  0x5c   :  { %4056 = vmatpush1.bf16.msra.mxu0 %v4055_v51  ;;  %v155_v9 = vld [vmem:[#allocation10 + $0x1a8] sm:$0xff]  ;;  %v157_v11 = vld [vmem:[#allocation10 + $0x1b8] sm:$0xff]  ;;  %v4095_v13 = vpack.c.bf16 %v148_v7, %v144_v5  ;;  %v150_v15 = vld [vmem:[#allocation10 + $0x180] sm:$0xff] }
  0x5d   :  { %4088 = vmatpush1.bf16.msra.mxu1 %v4087_v52  ;;  %4058 = vmatprep.subr.bf16.mxu0 %v4057_v53  ;;  %v4065_v14 = vpack.c.bf16 %v155_v9, %v151_v8  ;;  %v154_v16 = vld [vmem:[#allocation10 + $0x1a0] sm:$0xff]  ;;  %v152_v17 = vld [vmem:[#allocation10 + $0x190] sm:$0xff]  ;;  %v4097_v18 = vpack.c.bf16 %v157_v11, %v153_v10  ;;  %v159_v20 = vld [vmem:[#allocation10 + $0x1c8] sm:$0xff]  ;;  %v8540_v10 = vmov 0  }
  0x5e   :  { %4090 = vmatprep.subr.bf16.mxu1 %v4089_v57  ;;  %v156_v19 = vld [vmem:[#allocation10 + $0x1b0] sm:$0xff]  ;;  %v163_v21 = vld [vmem:[#allocation10 + $0x1e8] sm:$0xff]  ;;  %v161_v22 = vld [vmem:[#allocation10 + $0x1d8] sm:$0xff]  ;;  %v4067_v24 = vpack.c.bf16 %v154_v16, %v150_v15  ;;  %6384 = vset.pattern.permute.xlu0 %v8540_v10 }
  0x5f   :  { %v165_v23 = vld [vmem:[#allocation10 + $0x1f8] sm:$0xff]  ;;  %v4099_v25 = vpack.c.bf16 %v156_v19, %v152_v17  ;;  %v4069_v26 = vpack.c.bf16 %v163_v21, %v159_v20  ;;  %v158_v27 = vld [vmem:[#allocation10 + $0x1c0] sm:$0xff]  ;;  %v160_v29 = vld [vmem:[#allocation10 + $0x1d0] sm:$0xff]  ;;  %6385 = vset.pattern.permute.xlu1 %v8540_v10 }
  0x60   :  { %4060 = vmatpush1.bf16.msra.mxu0 %v4059_v63  ;;  %v162_v28 = vld [vmem:[#allocation10 + $0x1e0] sm:$0xff]  ;;  %v4101_v30 = vpack.c.bf16 %v165_v23, %v161_v22  ;;  %v164_v31 = vld [vmem:[#allocation10 + $0x1f0] sm:$0xff]  ;;  %v447_v32 = vld [vmem:[#allocation12 + $0x8] sm:$0xff] }
  0x61   :  { %4092 = vmatpush1.bf16.msra.mxu1 %v4091_v1  ;;  %4062 = vmatprep.subr.bf16.mxu0 %v4061_v2  ;;  %v455_v33 = vld [vmem:[#allocation12 + $0x48] sm:$0xff]  ;;  %v449_v34 = vld [vmem:[#allocation12 + $0x18] sm:$0xff]  ;;  %v4071_v36 = vpack.c.bf16 %v162_v28, %v158_v27  ;;  %v4103_v37 = vpack.c.bf16 %v164_v31, %v160_v29  ;;  %v446_v39 = vld [vmem:[#allocation12] sm:$0xff] }
  0x62   :  { %4094 = vmatprep.subr.bf16.mxu1 %v4093_v6  ;;  %v457_v35 = vld [vmem:[#allocation12 + $0x58] sm:$0xff]  ;;  %v6894_v38 = vpack.c.bf16 %v455_v33, %v447_v32  ;;  %v454_v40 = vld [vmem:[#allocation12 + $0x40] sm:$0xff]  ;;  %v448_v41 = vld [vmem:[#allocation12 + $0x10] sm:$0xff] }
  0x63   :  { %v6896_v42 = vpack.c.bf16 %v457_v35, %v449_v34  ;;  %v456_v43 = vld [vmem:[#allocation12 + $0x50] sm:$0xff]  ;;  %v463_v44 = vld [vmem:[#allocation12 + $0x88] sm:$0xff]  ;;  %v465_v46 = vld [vmem:[#allocation12 + $0x98] sm:$0xff]  ;;  %v6898_v49 = vpack.c.bf16 %v454_v40, %v446_v39 }
  0x64   :  { %4064 = vmatpush1.bf16.msra.mxu0 %v4063_v12  ;;  %8845 = vst [vmem:[#allocation20_spill] sm:$0xff] %v6894_v38  ;;  %v471_v45 = vld [vmem:[#allocation12 + $0xc8] sm:$0xff]  ;;  %v473_v47 = vld [vmem:[#allocation12 + $0xd8] sm:$0xff]  ;;  %v94_v48 = vld [vmem:[#allocation7] sm:$0xff]  ;;  %v6901_v50 = vpack.c.bf16 %v456_v43, %v448_v41 }
  0x65   :  { %4096 = vmatpush1.bf16.msra.mxu1 %v4095_v13  ;;  %4066 = vmatprep.subr.bf16.mxu0 %v4065_v14  ;;  %8846 = vst [vmem:[#allocation21_spill] sm:$0xff] %v6896_v42  ;;  %8847 = vst [vmem:[#allocation22_spill] sm:$0xff] %v6898_v49  ;;  %v6903_v51 = vpack.c.bf16 %v471_v45, %v463_v44  ;;  %v462_v52 = vld [vmem:[#allocation12 + $0x80] sm:$0xff]  ;;  %v464_v54 = vld [vmem:[#allocation12 + $0x90] sm:$0xff]  ;;  %v6906_v55 = vpack.c.bf16 %v473_v47, %v465_v46 }
  0x66   :  { %4098 = vmatprep.subr.bf16.mxu1 %v4097_v18  ;;  %8848 = vst [vmem:[#allocation23_spill] sm:$0xff] %v6901_v50  ;;  %v470_v53 = vld [vmem:[#allocation12 + $0xc0] sm:$0xff]  ;;  %v472_v56 = vld [vmem:[#allocation12 + $0xd0] sm:$0xff]  ;;  %v479_v57 = vld [vmem:[#allocation12 + $0x108] sm:$0xff] }
  0x67   :  { %8849 = vst [vmem:[#allocation24_spill] sm:$0xff] %v6903_v51  ;;  %8850 = vst [vmem:[#allocation25_spill] sm:$0xff] %v6906_v55  ;;  %v487_v58 = vld [vmem:[#allocation12 + $0x148] sm:$0xff]  ;;  %v481_v59 = vld [vmem:[#allocation12 + $0x118] sm:$0xff]  ;;  %v6909_v61 = vpack.c.bf16 %v470_v53, %v462_v52  ;;  %v6913_v62 = vpack.c.bf16 %v472_v56, %v464_v54 }
  0x68   :  { %4068 = vmatpush1.bf16.msra.mxu0 %v4067_v24  ;;  %v489_v60 = vld [vmem:[#allocation12 + $0x158] sm:$0xff]  ;;  %v6915_v63 = vpack.c.bf16 %v487_v58, %v479_v57  ;;  %v478_v1 = vld [vmem:[#allocation12 + $0x100] sm:$0xff]  ;;  %v480_v3 = vld [vmem:[#allocation12 + $0x110] sm:$0xff] }
  0x69   :  { %4100 = vmatpush1.bf16.msra.mxu1 %v4099_v25  ;;  %4070 = vmatprep.subr.bf16.mxu0 %v4069_v26  ;;  %8851 = vst [vmem:[#allocation26_spill] sm:$0xff] %v6909_v61  ;;  %8852 = vst [vmem:[#allocation27_spill] sm:$0xff] %v6913_v62  ;;  %v486_v2 = vld [vmem:[#allocation12 + $0x140] sm:$0xff]  ;;  %v6918_v4 = vpack.c.bf16 %v489_v60, %v481_v59  ;;  %v488_v5 = vld [vmem:[#allocation12 + $0x150] sm:$0xff] }
  0x6a   :  { %4102 = vmatprep.subr.bf16.mxu1 %v4101_v30  ;;  %8853 = vst [vmem:[#allocation28_spill] sm:$0xff] %v6915_v63  ;;  %v495_v6 = vld [vmem:[#allocation12 + $0x188] sm:$0xff]  ;;  %v497_v8 = vld [vmem:[#allocation12 + $0x198] sm:$0xff]  ;;  %v6924_v11 = vpack.c.bf16 %v486_v2, %v478_v1  ;;  %v6929_v12 = vpack.c.bf16 %v488_v5, %v480_v3  ;;  %v494_v14 = vld [vmem:[#allocation12 + $0x180] sm:$0xff] }
  0x6b   :  { %8854 = vst [vmem:[#allocation29_spill] sm:$0xff] %v6918_v4  ;;  %v503_v7 = vld [vmem:[#allocation12 + $0x1c8] sm:$0xff]  ;;  %v505_v9 = vld [vmem:[#allocation12 + $0x1d8] sm:$0xff]  ;;  %v502_v15 = vld [vmem:[#allocation12 + $0x1c0] sm:$0xff] }
  0x6c   :  { %4072 = vmatpush1.bf16.msra.mxu0 %v4071_v36  ;;  %8855 = vst [vmem:[#allocation30_spill] sm:$0xff] %v6924_v11  ;;  %8856 = vst [vmem:[#allocation31_spill] sm:$0xff] %v6929_v12  ;;  %v6931_v13 = vpack.c.bf16 %v503_v7, %v495_v6  ;;  %v496_v16 = vld [vmem:[#allocation12 + $0x190] sm:$0xff]  ;;  %v6934_v17 = vpack.c.bf16 %v505_v9, %v497_v8  ;;  %v511_v19 = vld [vmem:[#allocation12 + $0x208] sm:$0xff]  ;;  %v6937_v23 = vpack.c.bf16 %v502_v15, %v494_v14 }
  0x6d   :  { %4104 = vmatpush1.bf16.msra.mxu1 %v4103_v37  ;;  %4106 = vmatprep.subr.bf16.mxu0 %v6894_v38  ;;  %v504_v18 = vld [vmem:[#allocation12 + $0x1d0] sm:$0xff]  ;;  %v519_v20 = vld [vmem:[#allocation12 + $0x248] sm:$0xff]  ;;  %v513_v21 = vld [vmem:[#allocation12 + $0x218] sm:$0xff] }
  0x6e   :  { %4170 = vmatprep.subr.bf16.mxu1 %v6896_v42  ;;  %8857 = vst [vmem:[#allocation32_spill] sm:$0xff] %v6931_v13  ;;  %8858 = vst [vmem:[#allocation33_spill] sm:$0xff] %v6934_v17  ;;  %v521_v22 = vld [vmem:[#allocation12 + $0x258] sm:$0xff]  ;;  %v510_v24 = vld [vmem:[#allocation12 + $0x200] sm:$0xff]  ;;  %v6941_v25 = vpack.c.bf16 %v504_v18, %v496_v16  ;;  %v6943_v26 = vpack.c.bf16 %v519_v20, %v511_v19 }
  0x6f   :  { %253 = vmatmul.mubr.f32.vlgmr.msra.gmra.mrb[0].mxu0 %v94_v48  ;;  %8859 = vst [vmem:[#allocation34_spill] sm:$0xff] %v6937_v23  ;;  %v518_v27 = vld [vmem:[#allocation12 + $0x240] sm:$0xff]  ;;  %v512_v28 = vld [vmem:[#allocation12 + $0x210] sm:$0xff]  ;;  %v95_v29 = vld [vmem:[#allocation7 + $0x8] sm:$0xff]  ;;  %v6946_v30 = vpack.c.bf16 %v521_v22, %v513_v21 }
  0x70   :  { %366 = vmatmul.mubr.f32.vlgmr.msra.gmra.mrb[0].mxu1 %v94_v48  ;;  %4108 = vmatpush1.bf16.msra.mxu0 %v6898_v49  ;;  %8860 = vst [vmem:[#allocation35_spill] sm:$0xff] %v6941_v25  ;;  %8861 = vst [vmem:[#allocation36_spill] sm:$0xff] %v6943_v26  ;;  %v520_v31 = vld [vmem:[#allocation12 + $0x250] sm:$0xff]  ;;  %v527_v32 = vld [vmem:[#allocation12 + $0x288] sm:$0xff]  ;;  %v6950_v36 = vpack.c.bf16 %v518_v27, %v510_v24 }
  0x71   :  { %4172 = vmatpush1.bf16.msra.mxu1 %v6901_v50  ;;  %4110 = vmatprep.subr.bf16.mxu0 %v6903_v51  ;;  %8862 = vst [vmem:[#allocation37_spill] sm:$0xff] %v6946_v30  ;;  %v535_v33 = vld [vmem:[#allocation12 + $0x2c8] sm:$0xff]  ;;  %v529_v34 = vld [vmem:[#allocation12 + $0x298] sm:$0xff]  ;;  %v96_v37 = vld [vmem:[#allocation7 + $0x10] sm:$0xff]  ;;  %v6955_v39 = vpack.c.bf16 %v520_v31, %v512_v28 }
  0x72   :  { %4174 = vmatprep.subr.bf16.mxu1 %v6906_v55  ;;  %258 = vmatprep.mubr.f32.mxu0 %v8542_v0  ;;  %v537_v35 = vld [vmem:[#allocation12 + $0x2d8] sm:$0xff]  ;;  %8863 = vst [vmem:[#allocation38_spill] sm:$0xff] %v6950_v36  ;;  %v6957_v40 = vpack.c.bf16 %v535_v33, %v527_v32  ;;  %v526_v41 = vld [vmem:[#allocation12 + $0x280] sm:$0xff]  ;;  %v528_v44 = vld [vmem:[#allocation12 + $0x290] sm:$0xff] }
  0x73   :  { %371 = vmatprep.mubr.f32.mxu1 %v8542_v0  ;;  %259 = vmatmul.mubr.f32.gmra.mrb[2].mxu0 %v95_v29  ;;  %8864 = vst [vmem:[#allocation39_spill] sm:$0xff] %v6955_v39  ;;  %v534_v43 = vld [vmem:[#allocation12 + $0x2c0] sm:$0xff]  ;;  %v6960_v45 = vpack.c.bf16 %v537_v35, %v529_v34  ;;  %v536_v46 = vld [vmem:[#allocation12 + $0x2d0] sm:$0xff]  ;;  %v543_v47 = vld [vmem:[#allocation12 + $0x308] sm:$0xff] }
  0x74   :  { %4112 = vmatpush1.bf16.msra.mxu0 %v6909_v61  ;;  %372 = vmatmul.mubr.f32.gmra.mrb[2].mxu1 %v95_v29  ;;  %8865 = vst [vmem:[#allocation40_spill] sm:$0xff] %v6957_v40  ;;  %v551_v48 = vld [vmem:[#allocation12 + $0x348] sm:$0xff]  ;;  %v545_v52 = vld [vmem:[#allocation12 + $0x318] sm:$0xff]  ;;  %v6964_v56 = vpack.c.bf16 %v534_v43, %v526_v41  ;;  %v6969_v57 = vpack.c.bf16 %v536_v46, %v528_v44  ;;  %v542_v59 = vld [vmem:[#allocation12 + $0x300] sm:$0xff] }
  0x75   :  { %4176 = vmatpush1.bf16.msra.mxu1 %v6913_v62  ;;  %4114 = vmatprep.subr.bf16.mxu0 %v6915_v63  ;;  %8866 = vst [vmem:[#allocation41_spill] sm:$0xff] %v6960_v45  ;;  %v553_v53 = vld [vmem:[#allocation12 + $0x358] sm:$0xff]  ;;  %v6971_v58 = vpack.c.bf16 %v551_v48, %v543_v47  ;;  %v550_v60 = vld [vmem:[#allocation12 + $0x340] sm:$0xff]  ;;  %v544_v1 = vld [vmem:[#allocation12 + $0x310] sm:$0xff] }
  0x76   :  { %4178 = vmatprep.subr.bf16.mxu1 %v6918_v4  ;;  %264 = vmatprep.mubr.f32.mxu0 %v8542_v0  ;;  %v97_v54 = vld [vmem:[#allocation7 + $0x18] sm:$0xff]  ;;  %8867 = vst [vmem:[#allocation42_spill] sm:$0xff] %v6964_v56  ;;  %8868 = vst [vmem:[#allocation43_spill] sm:$0xff] %v6969_v57  ;;  %v6974_v2 = vpack.c.bf16 %v553_v53, %v545_v52  ;;  %v552_v3 = vld [vmem:[#allocation12 + $0x350] sm:$0xff]  ;;  %v6978_v14 = vpack.c.bf16 %v550_v60, %v542_v59 }
  0x77   :  { %377 = vmatprep.mubr.f32.mxu1 %v8542_v0  ;;  %265 = vmatmul.mubr.f32.gmra.mrb[4].mxu0 %v96_v37  ;;  %8869 = vst [vmem:[#allocation44_spill] sm:$0xff] %v6971_v58  ;;  %v559_v5 = vld [vmem:[#allocation12 + $0x388] sm:$0xff]  ;;  %v561_v7 = vld [vmem:[#allocation12 + $0x398] sm:$0xff]  ;;  %v98_v9 = vld [vmem:[#allocation7 + $0x20] sm:$0xff]  ;;  %v6983_v15 = vpack.c.bf16 %v552_v3, %v544_v1 }
  0x78   :  { %4116 = vmatpush1.bf16.msra.mxu0 %v6924_v11  ;;  %378 = vmatmul.mubr.f32.gmra.mrb[4].mxu1 %v96_v37  ;;  %8870 = vst [vmem:[#allocation45_spill] sm:$0xff] %v6974_v2  ;;  %v567_v6 = vld [vmem:[#allocation12 + $0x3c8] sm:$0xff]  ;;  %v569_v8 = vld [vmem:[#allocation12 + $0x3d8] sm:$0xff]  ;;  %8871 = vst [vmem:[#allocation46_spill] sm:$0xff] %v6978_v14 }
  0x79   :  { %4180 = vmatpush1.bf16.msra.mxu1 %v6929_v12  ;;  %4118 = vmatprep.subr.bf16.mxu0 %v6931_v13  ;;  %8872 = vst [vmem:[#allocation47_spill] sm:$0xff] %v6983_v15  ;;  %v6985_v16 = vpack.c.bf16 %v567_v6, %v559_v5  ;;  %v558_v18 = vld [vmem:[#allocation12 + $0x380] sm:$0xff]  ;;  %v560_v20 = vld [vmem:[#allocation12 + $0x390] sm:$0xff]  ;;  %v6988_v21 = vpack.c.bf16 %v569_v8, %v561_v7  ;;  %v575_v24 = vld [vmem:[#allocation12 + $0x408] sm:$0xff] }
  0x7a   :  { %4182 = vmatprep.subr.bf16.mxu1 %v6934_v17  ;;  %270 = vmatprep.mubr.f32.mxu0 %v8542_v0  ;;  %v566_v19 = vld [vmem:[#allocation12 + $0x3c0] sm:$0xff]  ;;  %v568_v22 = vld [vmem:[#allocation12 + $0x3d0] sm:$0xff]  ;;  %v583_v27 = vld [vmem:[#allocation12 + $0x448] sm:$0xff] }
  0x7b   :  { %383 = vmatprep.mubr.f32.mxu1 %v8542_v0  ;;  %271 = vmatmul.mubr.f32.gmra.mrb[6].mxu0 %v97_v54  ;;  %8873 = vst [vmem:[#allocation48_spill] sm:$0xff] %v6985_v16  ;;  %8874 = vst [vmem:[#allocation49_spill] sm:$0xff] %v6988_v21  ;;  %v577_v28 = vld [vmem:[#allocation12 + $0x418] sm:$0xff]  ;;  %v99_v31 = vld [vmem:[#allocation7 + $0x28] sm:$0xff]  ;;  %v6992_v32 = vpack.c.bf16 %v566_v19, %v558_v18  ;;  %v6997_v33 = vpack.c.bf16 %v568_v22, %v560_v20 }
  0x7c   :  { %4120 = vmatpush1.bf16.msra.mxu0 %v6937_v23  ;;  %384 = vmatmul.mubr.f32.gmra.mrb[6].mxu1 %v97_v54  ;;  %v585_v29 = vld [vmem:[#allocation12 + $0x458] sm:$0xff]  ;;  %v6999_v34 = vpack.c.bf16 %v583_v27, %v575_v24  ;;  %v574_v35 = vld [vmem:[#allocation12 + $0x400] sm:$0xff]  ;;  %v576_v41 = vld [vmem:[#allocation12 + $0x410] sm:$0xff] }
  0x7d   :  { %4184 = vmatpush1.bf16.msra.mxu1 %v6941_v25  ;;  %4122 = vmatprep.subr.bf16.mxu0 %v6943_v26  ;;  %8875 = vst [vmem:[#allocation50_spill] sm:$0xff] %v6992_v32  ;;  %8876 = vst [vmem:[#allocation51_spill] sm:$0xff] %v6997_v33  ;;  %v582_v37 = vld [vmem:[#allocation12 + $0x440] sm:$0xff]  ;;  %v7002_v43 = vpack.c.bf16 %v585_v29, %v577_v28  ;;  %v584_v44 = vld [vmem:[#allocation12 + $0x450] sm:$0xff] }
  0x7e   :  { %4186 = vmatprep.subr.bf16.mxu1 %v6946_v30  ;;  %276 = vmatprep.mubr.f32.mxu0 %v8542_v0  ;;  %8877 = vst [vmem:[#allocation52_spill] sm:$0xff] %v6999_v34  ;;  %v591_v46 = vld [vmem:[#allocation12 + $0x488] sm:$0xff]  ;;  %v593_v48 = vld [vmem:[#allocation12 + $0x498] sm:$0xff]  ;;  %v100_v53 = vld [vmem:[#allocation7 + $0x30] sm:$0xff]  ;;  %v7006_v54 = vpack.c.bf16 %v582_v37, %v574_v35  ;;  %v7011_v59 = vpack.c.bf16 %v584_v44, %v576_v41 }
  0x7f   :  { %389 = vmatprep.mubr.f32.mxu1 %v8542_v0  ;;  %277 = vmatmul.mubr.f32.gmra.mrb[8].mxu0 %v98_v9  ;;  %8878 = vst [vmem:[#allocation53_spill] sm:$0xff] %v7002_v43  ;;  %v599_v47 = vld [vmem:[#allocation12 + $0x4c8] sm:$0xff]  ;;  %v601_v52 = vld [vmem:[#allocation12 + $0x4d8] sm:$0xff]  ;;  %v590_v1 = vld [vmem:[#allocation12 + $0x480] sm:$0xff] }
  0x80   :  { %4124 = vmatpush1.bf16.msra.mxu0 %v6950_v36  ;;  %390 = vmatmul.mubr.f32.gmra.mrb[8].mxu1 %v98_v9  ;;  %8879 = vst [vmem:[#allocation54_spill] sm:$0xff] %v7006_v54  ;;  %8880 = vst [vmem:[#allocation55_spill] sm:$0xff] %v7011_v59  ;;  %v7013_v60 = vpack.c.bf16 %v599_v47, %v591_v46  ;;  %v598_v3 = vld [vmem:[#allocation12 + $0x4c0] sm:$0xff]  ;;  %v592_v5 = vld [vmem:[#allocation12 + $0x490] sm:$0xff]  ;;  %v7016_v6 = vpack.c.bf16 %v601_v52, %v593_v48 }
  0x81   :  { %4188 = vmatpush1.bf16.msra.mxu1 %v6955_v39  ;;  %4126 = vmatprep.subr.bf16.mxu0 %v6957_v40  ;;  %v600_v7 = vld [vmem:[#allocation12 + $0x4d0] sm:$0xff]  ;;  %v607_v8 = vld [vmem:[#allocation12 + $0x508] sm:$0xff]  ;;  %v609_v18 = vld [vmem:[#allocation12 + $0x518] sm:$0xff]  ;;  %v7020_v22 = vpack.c.bf16 %v598_v3, %v590_v1 }
  0x82   :  { %4190 = vmatprep.subr.bf16.mxu1 %v6960_v45  ;;  %282 = vmatprep.mubr.f32.mxu0 %v8542_v0  ;;  %8881 = vst [vmem:[#allocation56_spill] sm:$0xff] %v7013_v60  ;;  %8882 = vst [vmem:[#allocation57_spill] sm:$0xff] %v7016_v6  ;;  %v615_v9 = vld [vmem:[#allocation12 + $0x548] sm:$0xff]  ;;  %v617_v19 = vld [vmem:[#allocation12 + $0x558] sm:$0xff]  ;;  %v7025_v24 = vpack.c.bf16 %v600_v7, %v592_v5 }
  0x83   :  { %395 = vmatprep.mubr.f32.mxu1 %v8542_v0  ;;  %283 = vmatmul.mubr.f32.gmra.mrb[10].mxu0 %v99_v31  ;;  %v101_v20 = vld [vmem:[#allocation7 + $0x38] sm:$0xff]  ;;  %8883 = vst [vmem:[#allocation58_spill] sm:$0xff] %v7020_v22  ;;  %v7027_v27 = vpack.c.bf16 %v615_v9, %v607_v8  ;;  %v606_v28 = vld [vmem:[#allocation12 + $0x500] sm:$0xff]  ;;  %v7030_v35 = vpack.c.bf16 %v617_v19, %v609_v18  ;;  %v616_v37 = vld [vmem:[#allocation12 + $0x550] sm:$0xff] }
  0x84   :  { %4128 = vmatpush1.bf16.msra.mxu0 %v6964_v56  ;;  %396 = vmatmul.mubr.f32.gmra.mrb[10].mxu1 %v99_v31  ;;  %8884 = vst [vmem:[#allocation59_spill] sm:$0xff] %v7025_v24  ;;  %v614_v29 = vld [vmem:[#allocation12 + $0x540] sm:$0xff]  ;;  %v608_v31 = vld [vmem:[#allocation12 + $0x510] sm:$0xff]  ;;  %v623_v41 = vld [vmem:[#allocation12 + $0x588] sm:$0xff] }
  0x85   :  { %4192 = vmatpush1.bf16.msra.mxu1 %v6969_v57  ;;  %4130 = vmatprep.subr.bf16.mxu0 %v6971_v58  ;;  %8885 = vst [vmem:[#allocation60_spill] sm:$0xff] %v7027_v27  ;;  %8886 = vst [vmem:[#allocation61_spill] sm:$0xff] %v7030_v35  ;;  %v631_v44 = vld [vmem:[#allocation12 + $0x5c8] sm:$0xff]  ;;  %v625_v46 = vld [vmem:[#allocation12 + $0x598] sm:$0xff]  ;;  %v7034_v48 = vpack.c.bf16 %v614_v29, %v606_v28  ;;  %v7039_v52 = vpack.c.bf16 %v616_v37, %v608_v31 }
  0x86   :  { %4194 = vmatprep.subr.bf16.mxu1 %v6974_v2  ;;  %288 = vmatprep.mubr.f32.mxu0 %v8542_v0  ;;  %v633_v47 = vld [vmem:[#allocation12 + $0x5d8] sm:$0xff]  ;;  %v622_v1 = vld [vmem:[#allocation12 + $0x580] sm:$0xff]  ;;  %v624_v5 = vld [vmem:[#allocation12 + $0x590] sm:$0xff] }
  0x87   :  { %401 = vmatprep.mubr.f32.mxu1 %v8542_v0  ;;  %289 = vmatmul.mubr.f32.gmra.mrb[12].mxu0 %v100_v53  ;;  %8887 = vst [vmem:[#allocation62_spill] sm:$0xff] %v7034_v48  ;;  %8888 = vst [vmem:[#allocation63_spill] sm:$0xff] %v7039_v52  ;;  %v630_v3 = vld [vmem:[#allocation12 + $0x5c0] sm:$0xff]  ;;  %v7044_v7 = vpack.c.bf16 %v633_v47, %v625_v46  ;;  %v632_v8 = vld [vmem:[#allocation12 + $0x5d0] sm:$0xff] }
  0x88   :  { %4132 = vmatpush1.bf16.msra.mxu0 %v6978_v14  ;;  %402 = vmatmul.mubr.f32.gmra.mrb[12].mxu1 %v100_v53  ;;  %v7041_v53 = vpack.c.bf16 %v631_v44, %v623_v41  ;;  %v639_v9 = vld [vmem:[#allocation12 + $0x608] sm:$0xff]  ;;  %v641_v19 = vld [vmem:[#allocation12 + $0x618] sm:$0xff]  ;;  %v7047_v28 = vpack.c.bf16 %v630_v3, %v622_v1  ;;  %v7051_v29 = vpack.c.bf16 %v632_v8, %v624_v5  ;;  %v638_v37 = vld [vmem:[#allocation12 + $0x600] sm:$0xff] }
  0x89   :  { %4196 = vmatpush1.bf16.msra.mxu1 %v6983_v15  ;;  %4134 = vmatprep.subr.bf16.mxu0 %v6985_v16  ;;  %8890 = vst [vmem:[#allocation65_spill] sm:$0xff] %v7044_v7  ;;  %v647_v18 = vld [vmem:[#allocation12 + $0x648] sm:$0xff]  ;;  %v646_v41 = vld [vmem:[#allocation12 + $0x640] sm:$0xff]  ;;  %v640_v44 = vld [vmem:[#allocation12 + $0x610] sm:$0xff] }
  0x8a   :  { %4198 = vmatprep.subr.bf16.mxu1 %v6988_v21  ;;  %294 = vmatprep.mubr.f32.mxu0 %v8542_v0  ;;  %8889 = vst [vmem:[#allocation64_spill] sm:$0xff] %v7041_v53  ;;  %8891 = vst [vmem:[#allocation66_spill] sm:$0xff] %v7047_v28  ;;  %v7053_v31 = vpack.c.bf16 %v647_v18, %v639_v9  ;;  %v648_v47 = vld [vmem:[#allocation12 + $0x650] sm:$0xff]  ;;  %v655_v10 = vld [vmem:[#allocation12 + $0x688] sm:$0xff] }
  0x8b   :  { %407 = vmatprep.mubr.f32.mxu1 %v8542_v0  ;;  %295 = vmatmul.mubr.f32.gmra.mrb[14].mxu0 %v101_v20  ;;  %8892 = vst [vmem:[#allocation67_spill] sm:$0xff] %v7051_v29  ;;  %v657_v1 = vld [vmem:[#allocation12 + $0x698] sm:$0xff]  ;;  %v7063_v5 = vpack.c.bf16 %v648_v47, %v640_v44  ;;  %v654_v9 = vld [vmem:[#allocation12 + $0x680] sm:$0xff] }
  0x8c   :  { %4136 = vmatpush1.bf16.msra.mxu0 %v6992_v32  ;;  %408 = vmatmul.mubr.f32.gmra.mrb[14].mxu1 %v101_v20  ;;  %v649_v20 = vld [vmem:[#allocation12 + $0x658] sm:$0xff]  ;;  %8893 = vst [vmem:[#allocation68_spill] sm:$0xff] %v7053_v31  ;;  %v662_v18 = vld [vmem:[#allocation12 + $0x6c0] sm:$0xff] }
  0x8d   :  { %4200 = vmatpush1.bf16.msra.mxu1 %v6997_v33  ;;  %4138 = vmatprep.subr.bf16.mxu0 %v6999_v34  ;;  %v7056_v46 = vpack.c.bf16 %v649_v20, %v641_v19  ;;  %v665_v3 = vld [vmem:[#allocation12 + $0x6d8] sm:$0xff]  ;;  %8896 = vst [vmem:[#allocation71_spill] sm:$0xff] %v7063_v5  ;;  %v656_v19 = vld [vmem:[#allocation12 + $0x690] sm:$0xff]  ;;  %v670_v44 = vld [vmem:[#allocation12 + $0x700] sm:$0xff] }
  0x8e   :  { %4202 = vmatprep.subr.bf16.mxu1 %v7002_v43  ;;  %771 = vmatprep.mubr.f32.mxu0 %v8542_v0  ;;  %v7068_v20 = vpack.c.bf16 %v665_v3, %v657_v1  ;;  %v678_v47 = vld [vmem:[#allocation12 + $0x740] sm:$0xff]  ;;  %v672_v1 = vld [vmem:[#allocation12 + $0x710] sm:$0xff] }
  0x8f   :  { %842 = vmatprep.mubr.f32.mxu1 %v8542_v0  ;;  %8894 = vst [vmem:[#allocation69_spill] sm:$0xff] %v7056_v46  ;;  %v663_v0 = vld [vmem:[#allocation12 + $0x6c8] sm:$0xff] }
  0x90   :  { %4140 = vmatpush1.bf16.msra.mxu0 %v7006_v54  ;;  %v7065_v8 = vpack.c.bf16 %v663_v0, %v655_v10  ;;  %8898 = vst [vmem:[#allocation73_spill] sm:$0xff] %v7068_v20 }
  0x91   :  { %4204 = vmatpush1.bf16.msra.mxu1 %v7011_v59  ;;  %4142 = vmatprep.subr.bf16.mxu0 %v7013_v60 }
  0x92   :  { %4206 = vmatprep.subr.bf16.mxu1 %v7016_v6  ;;  %8897 = vst [vmem:[#allocation72_spill] sm:$0xff] %v7065_v8 }
  0x94   :  { %4144 = vmatpush1.bf16.msra.mxu0 %v7020_v22 }
  0x95   :  { %4208 = vmatpush1.bf16.msra.mxu1 %v7025_v24  ;;  %4146 = vmatprep.subr.bf16.mxu0 %v7027_v27 }
  0x96   :  { %4210 = vmatprep.subr.bf16.mxu1 %v7030_v35 }
  0x98   :  { %4148 = vmatpush1.bf16.msra.mxu0 %v7034_v48  ;;  %v484_v48 = vld [vmem:[#allocation12 + $0x130] sm:$0xff] }
  0x99   :  { %4212 = vmatpush1.bf16.msra.mxu1 %v7039_v52  ;;  %4150 = vmatprep.subr.bf16.mxu0 %v7041_v53  ;;  %v7059_v52 = vpack.c.bf16 %v646_v41, %v638_v37  ;;  %v671_v53 = vld [vmem:[#allocation12 + $0x708] sm:$0xff]  ;;  %v673_v37 = vld [vmem:[#allocation12 + $0x718] sm:$0xff] }
  0x9a   :  { %4214 = vmatprep.subr.bf16.mxu1 %v7044_v7  ;;  %v664_v7 = vld [vmem:[#allocation12 + $0x6d0] sm:$0xff]  ;;  %v681_v41 = vld [vmem:[#allocation12 + $0x758] sm:$0xff] }
  0x9b   :  { %8895 = vst [vmem:[#allocation70_spill] sm:$0xff] %v7059_v52  ;;  %v7075_v0 = vpack.c.bf16 %v664_v7, %v656_v19  ;;  %v7080_v3 = vpack.c.bf16 %v681_v41, %v673_v37  ;;  %v694_v19 = vld [vmem:[#allocation12 + $0x7c0] sm:$0xff]  ;;  %v688_v37 = vld [vmem:[#allocation12 + $0x790] sm:$0xff] }
  0x9c   :  { %4152 = vmatpush1.bf16.msra.mxu0 %v7047_v28  ;;  %v679_v28 = vld [vmem:[#allocation12 + $0x748] sm:$0xff] }
  0x9d   :  { %4216 = vmatpush1.bf16.msra.mxu1 %v7051_v29  ;;  %4154 = vmatprep.subr.bf16.mxu0 %v7053_v31  ;;  %v7071_v29 = vpack.c.bf16 %v662_v18, %v654_v9  ;;  %8900 = vst [vmem:[#allocation75_spill] sm:$0xff] %v7075_v0  ;;  %v7077_v10 = vpack.c.bf16 %v679_v28, %v671_v53  ;;  %8902 = vst [vmem:[#allocation77_spill] sm:$0xff] %v7080_v3  ;;  %v687_v31 = vld [vmem:[#allocation12 + $0x788] sm:$0xff]  ;;  %v689_v9 = vld [vmem:[#allocation12 + $0x798] sm:$0xff] }
  0x9e   :  { %4218 = vmatprep.subr.bf16.mxu1 %v7056_v46  ;;  %v680_v46 = vld [vmem:[#allocation12 + $0x750] sm:$0xff]  ;;  %v697_v18 = vld [vmem:[#allocation12 + $0x7d8] sm:$0xff]  ;;  %v686_v28 = vld [vmem:[#allocation12 + $0x780] sm:$0xff] }
  0x9f   :  { %8899 = vst [vmem:[#allocation74_spill] sm:$0xff] %v7071_v29  ;;  %8901 = vst [vmem:[#allocation76_spill] sm:$0xff] %v7077_v10  ;;  %v7087_v53 = vpack.c.bf16 %v680_v46, %v672_v1  ;;  %v7092_v41 = vpack.c.bf16 %v697_v18, %v689_v9  ;;  %v450_v46 = vld [vmem:[#allocation12 + $0x20] sm:$0xff]  ;;  %v467_v9 = vld [vmem:[#allocation12 + $0xa8] sm:$0xff] }
  0xa0   :  { %4156 = vmatpush1.bf16.msra.mxu0 %v7059_v52  ;;  %v695_v52 = vld [vmem:[#allocation12 + $0x7c8] sm:$0xff]  ;;  %v458_v1 = vld [vmem:[#allocation12 + $0x60] sm:$0xff] }
  0xa1   :  { %4220 = vmatpush1.bf16.msra.mxu1 %v7063_v5  ;;  %4158 = vmatprep.subr.bf16.mxu0 %v7065_v8  ;;  %v7083_v5 = vpack.c.bf16 %v678_v47, %v670_v44  ;;  %8904 = vst [vmem:[#allocation79_spill] sm:$0xff] %v7087_v53  ;;  %v7089_v7 = vpack.c.bf16 %v695_v52, %v687_v31  ;;  %8906 = vst [vmem:[#allocation81_spill] sm:$0xff] %v7092_v41  ;;  %v451_v8 = vld [vmem:[#allocation12 + $0x28] sm:$0xff]  ;;  %v453_v44 = vld [vmem:[#allocation12 + $0x38] sm:$0xff] }
  0xa2   :  { %4222 = vmatprep.subr.bf16.mxu1 %v7068_v20  ;;  %v696_v20 = vld [vmem:[#allocation12 + $0x7d0] sm:$0xff]  ;;  %v461_v47 = vld [vmem:[#allocation12 + $0x78] sm:$0xff]  ;;  %v475_v18 = vld [vmem:[#allocation12 + $0xe8] sm:$0xff] }
  0xa3   :  { %8903 = vst [vmem:[#allocation78_spill] sm:$0xff] %v7083_v5  ;;  %8905 = vst [vmem:[#allocation80_spill] sm:$0xff] %v7089_v7  ;;  %v7099_v52 = vpack.c.bf16 %v696_v20, %v688_v37  ;;  %v474_v20 = vld [vmem:[#allocation12 + $0xe0] sm:$0xff]  ;;  %v483_v37 = vld [vmem:[#allocation12 + $0x128] sm:$0xff] }
  0xa4   :  { %4160 = vmatpush1.bf16.msra.mxu0 %v7071_v29  ;;  %v459_v29 = vld [vmem:[#allocation12 + $0x68] sm:$0xff] }
  0xa5   :  { %4224 = vmatpush1.bf16.msra.mxu1 %v7075_v0  ;;  %4162 = vmatprep.subr.bf16.mxu0 %v7077_v10  ;;  %v7095_v0 = vpack.c.bf16 %v694_v19, %v686_v28  ;;  %8908 = vst [vmem:[#allocation83_spill] sm:$0xff] %v7099_v52  ;;  %v7101_v31 = vpack.c.bf16 %v459_v29, %v451_v8  ;;  %v452_v10 = vld [vmem:[#allocation12 + $0x30] sm:$0xff]  ;;  %v469_v28 = vld [vmem:[#allocation12 + $0xb8] sm:$0xff]  ;;  %v466_v8 = vld [vmem:[#allocation12 + $0xa0] sm:$0xff] }
  0xa6   :  { %4226 = vmatprep.subr.bf16.mxu1 %v7080_v3  ;;  %v7104_v3 = vpack.c.bf16 %v461_v47, %v453_v44  ;;  %v477_v19 = vld [vmem:[#allocation12 + $0xf8] sm:$0xff]  ;;  %v7111_v29 = vpack.c.bf16 %v475_v18, %v467_v9  ;;  %v491_v44 = vld [vmem:[#allocation12 + $0x168] sm:$0xff]  ;;  %v7121_v9 = vpack.c.bf16 %v474_v20, %v466_v8  ;;  %v490_v18 = vld [vmem:[#allocation12 + $0x160] sm:$0xff] }
  0xa7   :  { %8907 = vst [vmem:[#allocation82_spill] sm:$0xff] %v7095_v0  ;;  %8909 = vst [vmem:[#allocation84_spill] sm:$0xff] %v7101_v31  ;;  %v7116_v47 = vpack.c.bf16 %v477_v19, %v469_v28  ;;  %v499_v28 = vld [vmem:[#allocation12 + $0x1a8] sm:$0xff]  ;;  %v501_v8 = vld [vmem:[#allocation12 + $0x1b8] sm:$0xff] }
  0xa8   :  { %4164 = vmatpush1.bf16.msra.mxu0 %v7083_v5  ;;  %8910 = vst [vmem:[#allocation85_spill] sm:$0xff] %v7104_v3  ;;  %v460_v5 = vld [vmem:[#allocation12 + $0x70] sm:$0xff]  ;;  %8912 = vst [vmem:[#allocation87_spill] sm:$0xff] %v7111_v29  ;;  %v509_v20 = vld [vmem:[#allocation12 + $0x1f8] sm:$0xff] }
  0xa9   :  { %4228 = vmatpush1.bf16.msra.mxu1 %v7087_v53  ;;  %4166 = vmatprep.subr.bf16.mxu0 %v7089_v7  ;;  %v7107_v53 = vpack.c.bf16 %v458_v1, %v450_v46  ;;  %8914 = vst [vmem:[#allocation89_spill] sm:$0xff] %v7116_v47  ;;  %v468_v7 = vld [vmem:[#allocation12 + $0xb0] sm:$0xff]  ;;  %v8915_v46 = vmov 0.0   ;;  %v485_v1 = vld [vmem:[#allocation12 + $0x138] sm:$0xff]  ;;  %8916 = vst [vmem:[#allocation90_spill] sm:$0xff] %v7121_v9 }
  0xaa   :  { %4230 = vmatprep.subr.bf16.mxu1 %v7092_v41  ;;  %v7113_v41 = vpack.c.bf16 %v460_v5, %v452_v10  ;;  %v7124_v5 = vpack.c.bf16 %v491_v44, %v483_v37  ;;  %v482_v10 = vld [vmem:[#allocation12 + $0x120] sm:$0xff] }
  0xab   :  { %8911 = vst [vmem:[#allocation86_spill] sm:$0xff] %v7107_v53  ;;  %v7135_v37 = vpack.c.bf16 %v490_v18, %v482_v10  ;;  %v506_v44 = vld [vmem:[#allocation12 + $0x1e0] sm:$0xff]  ;;  %v517_v10 = vld [vmem:[#allocation12 + $0x238] sm:$0xff] }
  0xac   :  { %4168 = vmatpush1.bf16.msra.mxu0 %v7095_v0  ;;  %8913 = vst [vmem:[#allocation88_spill] sm:$0xff] %v7113_v41  ;;  %v476_v0 = vld [vmem:[#allocation12 + $0xf0] sm:$0xff]  ;;  %8917 = vst [vmem:[#allocation91_spill] sm:$0xff] %v7124_v5  ;;  %v525_v18 = vld [vmem:[#allocation12 + $0x278] sm:$0xff] }
  0xad   :  { %4232 = vmatpush1.bf16.msra.mxu1 %v7099_v52  ;;  %4234 = vmatprep.subr.bf16.mxu0 %v7101_v31  ;;  %v493_v52 = vld [vmem:[#allocation12 + $0x178] sm:$0xff]  ;;  %v7127_v19 = vpack.c.bf16 %v476_v0, %v468_v7  ;;  %8920 = vst [vmem:[#allocation94_spill] sm:$0xff] %v7135_v37  ;;  %v498_v7 = vld [vmem:[#allocation12 + $0x1a0] sm:$0xff] }
  0xae   :  { %4298 = vmatprep.subr.bf16.mxu1 %v7104_v3  ;;  %v507_v3 = vld [vmem:[#allocation12 + $0x1e8] sm:$0xff]  ;;  %v7130_v31 = vpack.c.bf16 %v493_v52, %v485_v1 }
  0xaf   :  { %772 = vmatmul.mubr.f32.vlgmr.msra.gmra.mrb[0].mxu0 %v8915_v46  ;;  %8918 = vst [vmem:[#allocation92_spill] sm:$0xff] %v7127_v19  ;;  %v7138_v0 = vpack.c.bf16 %v507_v3, %v499_v28  ;;  %v515_v52 = vld [vmem:[#allocation12 + $0x228] sm:$0xff]  ;;  %v7147_v3 = vpack.c.bf16 %v506_v44, %v498_v7  ;;  %v514_v28 = vld [vmem:[#allocation12 + $0x220] sm:$0xff]  ;;  %v7161_v7 = vpack.c.bf16 %v525_v18, %v517_v10  ;;  %v516_v44 = vld [vmem:[#allocation12 + $0x230] sm:$0xff] }
  0xb0   :  { %843 = vmatmul.mubr.f32.vlgmr.msra.gmra.mrb[0].mxu1 %v8915_v46  ;;  %4236 = vmatpush1.bf16.msra.mxu0 %v7107_v53  ;;  %8919 = vst [vmem:[#allocation93_spill] sm:$0xff] %v7130_v31  ;;  %v492_v53 = vld [vmem:[#allocation12 + $0x170] sm:$0xff]  ;;  %v538_v10 = vld [vmem:[#allocation12 + $0x2e0] sm:$0xff]  ;;  %v547_v18 = vld [vmem:[#allocation12 + $0x328] sm:$0xff] }
  0xb1   :  { %4238 = vmatprep.subr.bf16.mxu0 %v7111_v29  ;;  %4300 = vmatpush1.bf16.msra.mxu1 %v7113_v41  ;;  %8921 = vst [vmem:[#allocation95_spill] sm:$0xff] %v7138_v0  ;;  %v7141_v1 = vpack.c.bf16 %v492_v53, %v484_v48  ;;  %v7144_v29 = vpack.c.bf16 %v509_v20, %v501_v8  ;;  %v500_v41 = vld [vmem:[#allocation12 + $0x1b0] sm:$0xff]  ;;  %8924 = vst [vmem:[#allocation98_spill] sm:$0xff] %v7147_v3  ;;  %v522_v48 = vld [vmem:[#allocation12 + $0x260] sm:$0xff] }
  0xb2   :  { %4302 = vmatprep.subr.bf16.mxu1 %v7116_v47  ;;  %913 = vmatprep.mubr.f32.mxu0 %v8915_v46  ;;  %v523_v47 = vld [vmem:[#allocation12 + $0x268] sm:$0xff]  ;;  %v7158_v8 = vld [vmem:[%s8532_s1] sm:$0xff]  ;;  %8928 = vst [vmem:[#allocation102_spill] sm:$0xff] %v7161_v7 }
  0xb3   :  { %984 = vmatprep.mubr.f32.mxu1 %v8915_v46  ;;  %8922 = vst [vmem:[#allocation96_spill] sm:$0xff] %v7141_v1  ;;  %8923 = vst [vmem:[#allocation97_spill] sm:$0xff] %v7144_v29  ;;  %v531_v53 = vld [vmem:[#allocation12 + $0x2a8] sm:$0xff]  ;;  %vm1082_vm0 = vcmp.eq.s32.totalorder %v7158_v8, 4294967295 }
  0xb4   :  { %4240 = vmatpush1.bf16.msra.mxu0 %v7121_v9  ;;  %v508_v9 = vld [vmem:[#allocation12 + $0x1f0] sm:$0xff]  ;;  %8927 = vst [vmem:[#allocation101_spill] sm:$0xff] %v7158_v8  ;;  %v539_v20 = vld [vmem:[#allocation12 + $0x2e8] sm:$0xff] }
  0xb5   :  { %4242 = vmatprep.subr.bf16.mxu0 %v7124_v5  ;;  %4304 = vmatpush1.bf16.msra.mxu1 %v7127_v19  ;;  %v7150_v5 = vpack.c.bf16 %v523_v47, %v515_v52  ;;  %v533_v47 = vld [vmem:[#allocation12 + $0x2b8] sm:$0xff]  ;;  %v555_v8 = vld [vmem:[#allocation12 + $0x368] sm:$0xff] }
  0xb6   :  { %4306 = vmatprep.subr.bf16.mxu1 %v7130_v31  ;;  %v7153_v31 = vpack.c.bf16 %v508_v9, %v500_v41  ;;  %v541_v52 = vld [vmem:[#allocation12 + $0x2f8] sm:$0xff]  ;;  %v7166_v41 = vpack.c.bf16 %v522_v48, %v514_v28  ;;  %v7169_v9 = vpack.c.bf16 %v539_v20, %v531_v53  ;;  %v540_v28 = vld [vmem:[#allocation12 + $0x2f0] sm:$0xff]  ;;  %v7181_v20 = vpack.c.bf16 %v555_v8, %v547_v18 }
  0xb7   :  { %8925 = vst [vmem:[#allocation99_spill] sm:$0xff] %v7150_v5  ;;  %v549_v48 = vld [vmem:[#allocation12 + $0x338] sm:$0xff] }
  0xb8   :  { %4244 = vmatpush1.bf16.msra.mxu0 %v7135_v37  ;;  %8926 = vst [vmem:[#allocation100_spill] sm:$0xff] %v7153_v31  ;;  %v8929_v37 = vmov 0   ;;  %8930 = vst [vmem:[#allocation103_spill] sm:$0xff] %v7166_v41 }
  0xb9   :  { %4246 = vmatprep.subr.bf16.mxu0 %v7138_v0  ;;  %4308 = vmatpush1.bf16.msra.mxu1 %v7141_v1  ;;  %v524_v0 = vld [vmem:[#allocation12 + $0x270] sm:$0xff]  ;;  %v1084_v1 = vsel %vm1082_vm0, 1, %v8929_v37  ;;  %8931 = vst [vmem:[#allocation104_spill] sm:$0xff] %v7169_v9  ;;  %v7175_v37 = vpack.c.bf16 %v541_v52, %v533_v47  ;;  %8935 = vst [vmem:[#allocation108_spill] sm:$0xff] %v7181_v20  ;;  %v571_v47 = vld [vmem:[#allocation12 + $0x3e8] sm:$0xff] }
  0xba   :  { %4310 = vmatprep.subr.bf16.mxu1 %v7144_v29  ;;  %1086 = vperm.xlu0 %6384, %v1084_v1   ;;  %v530_v29 = vld [vmem:[#allocation12 + $0x2a0] sm:$0xff]  ;;  %v7172_v19 = vpack.c.bf16 %v524_v0, %v516_v44  ;;  %v557_v1 = vld [vmem:[#allocation12 + $0x378] sm:$0xff]  ;;  %v563_v44 = vld [vmem:[#allocation12 + $0x3a8] sm:$0xff] }
  0xbb   :  { %8933 = vst [vmem:[#allocation106_spill] sm:$0xff] %v7175_v37  ;;  %v7178_v53 = vpack.c.bf16 %v538_v10, %v530_v29  ;;  %v554_v0 = vld [vmem:[#allocation12 + $0x360] sm:$0xff]  ;;  %v7187_v52 = vpack.c.bf16 %v557_v1, %v549_v48  ;;  %v565_v29 = vld [vmem:[#allocation12 + $0x3b8] sm:$0xff]  ;;  %v7193_v18 = vpack.c.bf16 %v571_v47, %v563_v44  ;;  %v587_v48 = vld [vmem:[#allocation12 + $0x468] sm:$0xff] }
  0xbc   :  { %4248 = vmatpush1.bf16.msra.mxu0 %v7147_v3  ;;  %8932 = vst [vmem:[#allocation105_spill] sm:$0xff] %v7172_v19  ;;  %v532_v3 = vld [vmem:[#allocation12 + $0x2b0] sm:$0xff]  ;;  %v573_v10 = vld [vmem:[#allocation12 + $0x3f8] sm:$0xff] }
  0xbd   :  { %4250 = vmatprep.subr.bf16.mxu0 %v7150_v5  ;;  %4312 = vmatpush1.bf16.msra.mxu1 %v7153_v31  ;;  %8934 = vst [vmem:[#allocation107_spill] sm:$0xff] %v7178_v53  ;;  %v546_v5 = vld [vmem:[#allocation12 + $0x320] sm:$0xff]  ;;  %8937 = vst [vmem:[#allocation110_spill] sm:$0xff] %v7187_v52  ;;  %v548_v31 = vld [vmem:[#allocation12 + $0x330] sm:$0xff]  ;;  %v7199_v1 = vpack.c.bf16 %v573_v10, %v565_v29 }
  0xbe   :  { %4314 = vmatprep.subr.bf16.mxu1 %v7161_v7  ;;  %v7184_v7 = vpack.c.bf16 %v540_v28, %v532_v3  ;;  %v7190_v8 = vpack.c.bf16 %v554_v0, %v546_v5  ;;  %8939 = vst [vmem:[#allocation112_spill] sm:$0xff] %v7193_v18  ;;  %v570_v3 = vld [vmem:[#allocation12 + $0x3e0] sm:$0xff]  ;;  %v579_v28 = vld [vmem:[#allocation12 + $0x428] sm:$0xff]  ;;  %v581_v5 = vld [vmem:[#allocation12 + $0x438] sm:$0xff] }
  0xbf   :  { %8941 = vst [vmem:[#allocation114_spill] sm:$0xff] %v7199_v1  ;;  %v589_v0 = vld [vmem:[#allocation12 + $0x478] sm:$0xff]  ;;  %v7205_v47 = vpack.c.bf16 %v587_v48, %v579_v28  ;;  %v603_v29 = vld [vmem:[#allocation12 + $0x4e8] sm:$0xff] }
  0xc0   :  { %4252 = vmatpush1.bf16.msra.mxu0 %v7166_v41  ;;  %8936 = vst [vmem:[#allocation109_spill] sm:$0xff] %v7184_v7  ;;  %v556_v41 = vld [vmem:[#allocation12 + $0x370] sm:$0xff]  ;;  %8938 = vst [vmem:[#allocation111_spill] sm:$0xff] %v7190_v8  ;;  %v7211_v10 = vpack.c.bf16 %v589_v0, %v581_v5  ;;  %v619_v5 = vld [vmem:[#allocation12 + $0x568] sm:$0xff] }
  0xc1   :  { %4254 = vmatprep.subr.bf16.mxu0 %v7169_v9  ;;  %4316 = vmatpush1.bf16.msra.mxu1 %v7172_v19  ;;  %v562_v9 = vld [vmem:[#allocation12 + $0x3a0] sm:$0xff]  ;;  %v564_v19 = vld [vmem:[#allocation12 + $0x3b0] sm:$0xff]  ;;  %8943 = vst [vmem:[#allocation116_spill] sm:$0xff] %v7205_v47 }
  0xc2   :  { %4318 = vmatprep.subr.bf16.mxu1 %v7175_v37  ;;  %v7196_v37 = vpack.c.bf16 %v556_v41, %v548_v31  ;;  %v7202_v44 = vpack.c.bf16 %v570_v3, %v562_v9  ;;  %v586_v31 = vld [vmem:[#allocation12 + $0x460] sm:$0xff]  ;;  %v595_v41 = vld [vmem:[#allocation12 + $0x4a8] sm:$0xff]  ;;  %8945 = vst [vmem:[#allocation118_spill] sm:$0xff] %v7211_v10  ;;  %v597_v9 = vld [vmem:[#allocation12 + $0x4b8] sm:$0xff] }
  0xc3   :  { %v605_v3 = vld [vmem:[#allocation12 + $0x4f8] sm:$0xff]  ;;  %v7217_v48 = vpack.c.bf16 %v603_v29, %v595_v41 }
  0xc4   :  { %4256 = vmatpush1.bf16.msra.mxu0 %v7178_v53  ;;  %8940 = vst [vmem:[#allocation113_spill] sm:$0xff] %v7196_v37  ;;  %v572_v53 = vld [vmem:[#allocation12 + $0x3f0] sm:$0xff]  ;;  %8942 = vst [vmem:[#allocation115_spill] sm:$0xff] %v7202_v44  ;;  %v7223_v0 = vpack.c.bf16 %v605_v3, %v597_v9  ;;  %v635_v9 = vld [vmem:[#allocation12 + $0x5e8] sm:$0xff] }
  0xc5   :  { %4258 = vmatprep.subr.bf16.mxu0 %v7181_v20  ;;  %4320 = vmatpush1.bf16.msra.mxu1 %v7184_v7  ;;  %v578_v20 = vld [vmem:[#allocation12 + $0x420] sm:$0xff]  ;;  %v580_v7 = vld [vmem:[#allocation12 + $0x430] sm:$0xff]  ;;  %8947 = vst [vmem:[#allocation120_spill] sm:$0xff] %v7217_v48 }
  0xc6   :  { %4322 = vmatprep.subr.bf16.mxu1 %v7187_v52  ;;  %v7208_v52 = vpack.c.bf16 %v572_v53, %v564_v19  ;;  %v7214_v28 = vpack.c.bf16 %v586_v31, %v578_v20  ;;  %v602_v19 = vld [vmem:[#allocation12 + $0x4e0] sm:$0xff]  ;;  %v611_v53 = vld [vmem:[#allocation12 + $0x528] sm:$0xff]  ;;  %8949 = vst [vmem:[#allocation122_spill] sm:$0xff] %v7223_v0  ;;  %v613_v20 = vld [vmem:[#allocation12 + $0x538] sm:$0xff] }
  0xc7   :  { %v621_v31 = vld [vmem:[#allocation12 + $0x578] sm:$0xff]  ;;  %v7229_v29 = vpack.c.bf16 %v619_v5, %v611_v53 }
  0xc8   :  { %4260 = vmatpush1.bf16.msra.mxu0 %v7190_v8  ;;  %8944 = vst [vmem:[#allocation117_spill] sm:$0xff] %v7208_v52  ;;  %v588_v8 = vld [vmem:[#allocation12 + $0x470] sm:$0xff]  ;;  %8946 = vst [vmem:[#allocation119_spill] sm:$0xff] %v7214_v28  ;;  %v7235_v3 = vpack.c.bf16 %v621_v31, %v613_v20  ;;  %v651_v20 = vld [vmem:[#allocation12 + $0x668] sm:$0xff] }
  0xc9   :  { %4262 = vmatprep.subr.bf16.mxu0 %v7193_v18  ;;  %4324 = vmatpush1.bf16.msra.mxu1 %v7196_v37  ;;  %v594_v18 = vld [vmem:[#allocation12 + $0x4a0] sm:$0xff]  ;;  %v596_v37 = vld [vmem:[#allocation12 + $0x4b0] sm:$0xff]  ;;  %8951 = vst [vmem:[#allocation124_spill] sm:$0xff] %v7229_v29 }
  0xca   :  { %4326 = vmatprep.subr.bf16.mxu1 %v7199_v1  ;;  %v7220_v1 = vpack.c.bf16 %v588_v8, %v580_v7  ;;  %v7226_v41 = vpack.c.bf16 %v602_v19, %v594_v18  ;;  %v618_v7 = vld [vmem:[#allocation12 + $0x560] sm:$0xff]  ;;  %v627_v8 = vld [vmem:[#allocation12 + $0x5a8] sm:$0xff]  ;;  %8953 = vst [vmem:[#allocation126_spill] sm:$0xff] %v7235_v3  ;;  %v629_v18 = vld [vmem:[#allocation12 + $0x5b8] sm:$0xff] }
  0xcb   :  { %v637_v19 = vld [vmem:[#allocation12 + $0x5f8] sm:$0xff]  ;;  %v7241_v5 = vpack.c.bf16 %v635_v9, %v627_v8 }
  0xcc   :  { %4264 = vmatpush1.bf16.msra.mxu0 %v7202_v44  ;;  %8948 = vst [vmem:[#allocation121_spill] sm:$0xff] %v7220_v1  ;;  %v604_v44 = vld [vmem:[#allocation12 + $0x4f0] sm:$0xff]  ;;  %8950 = vst [vmem:[#allocation123_spill] sm:$0xff] %v7226_v41  ;;  %v7247_v31 = vpack.c.bf16 %v637_v19, %v629_v18  ;;  %v667_v18 = vld [vmem:[#allocation12 + $0x6e8] sm:$0xff] }
  0xcd   :  { %4266 = vmatprep.subr.bf16.mxu0 %v7205_v47  ;;  %4328 = vmatpush1.bf16.msra.mxu1 %v7208_v52  ;;  %v610_v47 = vld [vmem:[#allocation12 + $0x520] sm:$0xff]  ;;  %v612_v52 = vld [vmem:[#allocation12 + $0x530] sm:$0xff]  ;;  %8955 = vst [vmem:[#allocation128_spill] sm:$0xff] %v7241_v5 }
  0xce   :  { %4330 = vmatprep.subr.bf16.mxu1 %v7211_v10  ;;  %v7232_v10 = vpack.c.bf16 %v604_v44, %v596_v37  ;;  %v7238_v53 = vpack.c.bf16 %v618_v7, %v610_v47  ;;  %v634_v37 = vld [vmem:[#allocation12 + $0x5e0] sm:$0xff]  ;;  %v643_v44 = vld [vmem:[#allocation12 + $0x628] sm:$0xff]  ;;  %8957 = vst [vmem:[#allocation130_spill] sm:$0xff] %v7247_v31  ;;  %v645_v47 = vld [vmem:[#allocation12 + $0x638] sm:$0xff] }
  0xcf   :  { %v653_v7 = vld [vmem:[#allocation12 + $0x678] sm:$0xff]  ;;  %v7253_v9 = vpack.c.bf16 %v651_v20, %v643_v44 }
  0xd0   :  { %4268 = vmatpush1.bf16.msra.mxu0 %v7214_v28  ;;  %8952 = vst [vmem:[#allocation125_spill] sm:$0xff] %v7232_v10  ;;  %v620_v28 = vld [vmem:[#allocation12 + $0x570] sm:$0xff]  ;;  %8954 = vst [vmem:[#allocation127_spill] sm:$0xff] %v7238_v53  ;;  %v7259_v19 = vpack.c.bf16 %v653_v7, %v645_v47  ;;  %v683_v47 = vld [vmem:[#allocation12 + $0x768] sm:$0xff] }
  0xd1   :  { %4270 = vmatprep.subr.bf16.mxu0 %v7217_v48  ;;  %4332 = vmatpush1.bf16.msra.mxu1 %v7220_v1  ;;  %v626_v48 = vld [vmem:[#allocation12 + $0x5a0] sm:$0xff]  ;;  %v628_v1 = vld [vmem:[#allocation12 + $0x5b0] sm:$0xff]  ;;  %8959 = vst [vmem:[#allocation132_spill] sm:$0xff] %v7253_v9 }
  0xd2   :  { %4334 = vmatprep.subr.bf16.mxu1 %v7223_v0  ;;  %v7244_v0 = vpack.c.bf16 %v620_v28, %v612_v52  ;;  %v7250_v8 = vpack.c.bf16 %v634_v37, %v626_v48  ;;  %v650_v52 = vld [vmem:[#allocation12 + $0x660] sm:$0xff]  ;;  %v659_v28 = vld [vmem:[#allocation12 + $0x6a8] sm:$0xff]  ;;  %8961 = vst [vmem:[#allocation134_spill] sm:$0xff] %v7259_v19  ;;  %v661_v48 = vld [vmem:[#allocation12 + $0x6b8] sm:$0xff] }
  0xd3   :  { %v669_v37 = vld [vmem:[#allocation12 + $0x6f8] sm:$0xff]  ;;  %v7265_v20 = vpack.c.bf16 %v667_v18, %v659_v28 }
  0xd4   :  { %4272 = vmatpush1.bf16.msra.mxu0 %v7226_v41  ;;  %8956 = vst [vmem:[#allocation129_spill] sm:$0xff] %v7244_v0  ;;  %v636_v41 = vld [vmem:[#allocation12 + $0x5f0] sm:$0xff]  ;;  %8958 = vst [vmem:[#allocation131_spill] sm:$0xff] %v7250_v8  ;;  %v7271_v7 = vpack.c.bf16 %v669_v37, %v661_v48  ;;  %v699_v48 = vld [vmem:[#allocation12 + $0x7e8] sm:$0xff] }
  0xd5   :  { %4274 = vmatprep.subr.bf16.mxu0 %v7229_v29  ;;  %4336 = vmatpush1.bf16.msra.mxu1 %v7232_v10  ;;  %v642_v29 = vld [vmem:[#allocation12 + $0x620] sm:$0xff]  ;;  %v644_v10 = vld [vmem:[#allocation12 + $0x630] sm:$0xff]  ;;  %8963 = vst [vmem:[#allocation136_spill] sm:$0xff] %v7265_v20 }
  0xd6   :  { %4338 = vmatprep.subr.bf16.mxu1 %v7235_v3  ;;  %v7256_v3 = vpack.c.bf16 %v636_v41, %v628_v1  ;;  %v7262_v44 = vpack.c.bf16 %v650_v52, %v642_v29  ;;  %v666_v1 = vld [vmem:[#allocation12 + $0x6e0] sm:$0xff]  ;;  %v675_v41 = vld [vmem:[#allocation12 + $0x728] sm:$0xff]  ;;  %8965 = vst [vmem:[#allocation138_spill] sm:$0xff] %v7271_v7  ;;  %v677_v29 = vld [vmem:[#allocation12 + $0x738] sm:$0xff] }
  0xd7   :  { %v685_v52 = vld [vmem:[#allocation12 + $0x778] sm:$0xff]  ;;  %v7277_v18 = vpack.c.bf16 %v683_v47, %v675_v41 }
  0xd8   :  { %4276 = vmatpush1.bf16.msra.mxu0 %v7238_v53  ;;  %8960 = vst [vmem:[#allocation133_spill] sm:$0xff] %v7256_v3  ;;  %v652_v53 = vld [vmem:[#allocation12 + $0x670] sm:$0xff]  ;;  %8962 = vst [vmem:[#allocation135_spill] sm:$0xff] %v7262_v44  ;;  %v7283_v37 = vpack.c.bf16 %v685_v52, %v677_v29 }
  0xd9   :  { %4278 = vmatprep.subr.bf16.mxu0 %v7241_v5  ;;  %4340 = vmatpush1.bf16.msra.mxu1 %v7244_v0  ;;  %v658_v5 = vld [vmem:[#allocation12 + $0x6a0] sm:$0xff]  ;;  %v660_v0 = vld [vmem:[#allocation12 + $0x6b0] sm:$0xff]  ;;  %8967 = vst [vmem:[#allocation140_spill] sm:$0xff] %v7277_v18 }
  0xda   :  { %4342 = vmatprep.subr.bf16.mxu1 %v7247_v31  ;;  %v7268_v31 = vpack.c.bf16 %v652_v53, %v644_v10  ;;  %v7274_v28 = vpack.c.bf16 %v666_v1, %v658_v5  ;;  %v682_v10 = vld [vmem:[#allocation12 + $0x760] sm:$0xff]  ;;  %v691_v53 = vld [vmem:[#allocation12 + $0x7a8] sm:$0xff]  ;;  %8969 = vst [vmem:[#allocation142_spill] sm:$0xff] %v7283_v37  ;;  %v693_v5 = vld [vmem:[#allocation12 + $0x7b8] sm:$0xff] }
  0xdb   :  { %v701_v1 = vld [vmem:[#allocation12 + $0x7f8] sm:$0xff]  ;;  %v7289_v47 = vpack.c.bf16 %v699_v48, %v691_v53  ;;  %v692_v52 = vld [vmem:[#allocation12 + $0x7b0] sm:$0xff]  ;;  %v8981_v48 = vld [vmem:[#allocation67_spill] sm:$0xff] }
  0xdc   :  { %4280 = vmatpush1.bf16.msra.mxu0 %v7250_v8  ;;  %8964 = vst [vmem:[#allocation137_spill] sm:$0xff] %v7268_v31  ;;  %v668_v8 = vld [vmem:[#allocation12 + $0x6f0] sm:$0xff]  ;;  %8966 = vst [vmem:[#allocation139_spill] sm:$0xff] %v7274_v28  ;;  %v7295_v29 = vpack.c.bf16 %v701_v1, %v693_v5  ;;  %v8980_v53 = vld [vmem:[#allocation66_spill] sm:$0xff] }
  0xdd   :  { %4282 = vmatprep.subr.bf16.mxu0 %v7253_v9  ;;  %4344 = vmatpush1.bf16.msra.mxu1 %v7256_v3  ;;  %v674_v9 = vld [vmem:[#allocation12 + $0x720] sm:$0xff]  ;;  %v676_v3 = vld [vmem:[#allocation12 + $0x730] sm:$0xff]  ;;  %8971 = vst [vmem:[#allocation144_spill] sm:$0xff] %v7289_v47  ;;  %v8982_v5 = vld [vmem:[#allocation68_spill] sm:$0xff] }
  0xde   :  { %4346 = vmatprep.subr.bf16.mxu1 %v7259_v19  ;;  %v7280_v19 = vpack.c.bf16 %v668_v8, %v660_v0  ;;  %v7286_v41 = vpack.c.bf16 %v682_v10, %v674_v9  ;;  %v698_v0 = vld [vmem:[#allocation12 + $0x7e0] sm:$0xff]  ;;  %8973 = vst [vmem:[#allocation146_spill] sm:$0xff] %v7295_v29  ;;  %v8983_v1 = vld [vmem:[#allocation69_spill] sm:$0xff] }
  0xe0   :  { %4284 = vmatpush1.bf16.msra.mxu0 %v7262_v44  ;;  %8968 = vst [vmem:[#allocation141_spill] sm:$0xff] %v7280_v19  ;;  %v684_v44 = vld [vmem:[#allocation12 + $0x770] sm:$0xff]  ;;  %8970 = vst [vmem:[#allocation143_spill] sm:$0xff] %v7286_v41 }
  0xe1   :  { %4286 = vmatprep.subr.bf16.mxu0 %v7265_v20  ;;  %4348 = vmatpush1.bf16.msra.mxu1 %v7268_v31  ;;  %v690_v20 = vld [vmem:[#allocation12 + $0x7a0] sm:$0xff]  ;;  %v7292_v8 = vpack.c.bf16 %v684_v44, %v676_v3  ;;  %v8976_v3 = vld [vmem:[#allocation62_spill] sm:$0xff] }
  0xe2   :  { %4350 = vmatprep.subr.bf16.mxu1 %v7271_v7  ;;  %v700_v7 = vld [vmem:[#allocation12 + $0x7f0] sm:$0xff]  ;;  %v7298_v9 = vpack.c.bf16 %v698_v0, %v690_v20  ;;  %v8977_v44 = vld [vmem:[#allocation63_spill] sm:$0xff]  ;;  %v8978_v20 = vld [vmem:[#allocation64_spill] sm:$0xff] }
  0xe3   :  { %8972 = vst [vmem:[#allocation145_spill] sm:$0xff] %v7292_v8  ;;  %v7302_v10 = vpack.c.bf16 %v700_v7, %v692_v52  ;;  %v8979_v7 = vld [vmem:[#allocation65_spill] sm:$0xff]  ;;  %v8984_v0 = vld [vmem:[#allocation70_spill] sm:$0xff]  ;;  %v8985_v52 = vld [vmem:[#allocation71_spill] sm:$0xff] }
  0xe4   :  { %4288 = vmatpush1.bf16.msra.mxu0 %v7274_v28  ;;  %8974 = vst [vmem:[#allocation147_spill] sm:$0xff] %v7298_v9 }
  0xe5   :  { %4290 = vmatprep.subr.bf16.mxu0 %v7277_v18  ;;  %4352 = vmatpush1.bf16.msra.mxu1 %v7280_v19  ;;  %8975 = vst [vmem:[#allocation148_spill] sm:$0xff] %v7302_v10 }
  0xe6   :  { %4354 = vmatprep.subr.bf16.mxu1 %v7283_v37 }
  0xe8   :  { %4292 = vmatpush1.bf16.msra.mxu0 %v7286_v41 }
  0xe9   :  { %4294 = vmatprep.subr.bf16.mxu0 %v7289_v47  ;;  %4356 = vmatpush1.bf16.msra.mxu1 %v7292_v8 }
  0xea   :  { %4358 = vmatprep.subr.bf16.mxu1 %v7295_v29 }
  0xec   :  { %4296 = vmatpush1.bf16.msra.mxu0 %v7298_v9 }
  0xed   :  { %4360 = vmatpush1.bf16.msra.mxu1 %v7302_v10  ;;  %4362 = vmatprep.subr.bf16.mxu0 %v6894_v38 }
  0xee   :  { %4426 = vmatprep.subr.bf16.mxu1 %v6896_v42 }
  0xef   :  { %914 = vmatmul.mubr.f32.vlgmr.msra.gmra.mrb[16].mxu0 %v8915_v46 }
  0xf0   :  { %985 = vmatmul.mubr.f32.vlgmr.msra.gmra.mrb[16].mxu1 %v8915_v46  ;;  %4364 = vmatpush1.bf16.msra.mxu0 %v6898_v49  ;;  %v8986_v46 = vld [vmem:[#allocation72_spill] sm:$0xff] }
  0xf1   :  { %4428 = vmatpush1.bf16.msra.mxu1 %v6901_v50  ;;  %4366 = vmatprep.subr.bf16.mxu0 %v6903_v51 }
  0xf2   :  { %4430 = vmatprep.subr.bf16.mxu1 %v6906_v55 }
  0xf4   :  { %4368 = vmatpush1.bf16.msra.mxu0 %v6909_v61 }
  0xf5   :  { %4432 = vmatpush1.bf16.msra.mxu1 %v6913_v62  ;;  %4370 = vmatprep.subr.bf16.mxu0 %v6915_v63 }
  0xf6   :  { %4434 = vmatprep.subr.bf16.mxu1 %v6918_v4 }
  0xf8   :  { %4372 = vmatpush1.bf16.msra.mxu0 %v6924_v11 }
  0xf9   :  { %4436 = vmatpush1.bf16.msra.mxu1 %v6929_v12  ;;  %4374 = vmatprep.subr.bf16.mxu0 %v6931_v13 }
  0xfa   :  { %4438 = vmatprep.subr.bf16.mxu1 %v6934_v17 }
  0xfc   :  { %4376 = vmatpush1.bf16.msra.mxu0 %v6937_v23 }
  0xfd   :  { %4440 = vmatpush1.bf16.msra.mxu1 %v6941_v25  ;;  %4378 = vmatprep.subr.bf16.mxu0 %v6943_v26 }
  0xfe   :  { %4442 = vmatprep.subr.bf16.mxu1 %v6946_v30 }
 0x100   :  { %4380 = vmatpush1.bf16.msra.mxu0 %v6950_v36 }
 0x101   :  { %4444 = vmatpush1.bf16.msra.mxu1 %v6955_v39  ;;  %4382 = vmatprep.subr.bf16.mxu0 %v6957_v40 }
 0x102   :  { %4446 = vmatprep.subr.bf16.mxu1 %v6960_v45 }
 0x104   :  { %4384 = vmatpush1.bf16.msra.mxu0 %v6964_v56 }
 0x105   :  { %4448 = vmatpush1.bf16.msra.mxu1 %v6969_v57  ;;  %4386 = vmatprep.subr.bf16.mxu0 %v6971_v58 }
 0x106   :  { %4450 = vmatprep.subr.bf16.mxu1 %v6974_v2 }
 0x108   :  { %4388 = vmatpush1.bf16.msra.mxu0 %v6978_v14 }
 0x109   :  { %4452 = vmatpush1.bf16.msra.mxu1 %v6983_v15  ;;  %4390 = vmatprep.subr.bf16.mxu0 %v6985_v16 }
 0x10a   :  { %4454 = vmatprep.subr.bf16.mxu1 %v6988_v21 }
 0x10c   :  { %4392 = vmatpush1.bf16.msra.mxu0 %v6992_v32 }
 0x10d   :  { %4456 = vmatpush1.bf16.msra.mxu1 %v6997_v33  ;;  %4394 = vmatprep.subr.bf16.mxu0 %v6999_v34 }
 0x10e   :  { %4458 = vmatprep.subr.bf16.mxu1 %v7002_v43 }
 0x110   :  { %4396 = vmatpush1.bf16.msra.mxu0 %v7006_v54 }
 0x111   :  { %4460 = vmatpush1.bf16.msra.mxu1 %v7011_v59  ;;  %4398 = vmatprep.subr.bf16.mxu0 %v7013_v60 }
 0x112   :  { %4462 = vmatprep.subr.bf16.mxu1 %v7016_v6 }
 0x114   :  { %4400 = vmatpush1.bf16.msra.mxu0 %v7020_v22 }
 0x115   :  { %4464 = vmatpush1.bf16.msra.mxu1 %v7025_v24  ;;  %4402 = vmatprep.subr.bf16.mxu0 %v7027_v27 }
 0x116   :  { %4466 = vmatprep.subr.bf16.mxu1 %v7030_v35 }
 0x118   :  { %4404 = vmatpush1.bf16.msra.mxu0 %v8976_v3  ;;  %v8987_v3 = vld [vmem:[#allocation73_spill] sm:$0xff] }
 0x119   :  { %4468 = vmatpush1.bf16.msra.mxu1 %v8977_v44  ;;  %4406 = vmatprep.subr.bf16.mxu0 %v8978_v20  ;;  %v8988_v44 = vld [vmem:[#allocation74_spill] sm:$0xff]  ;;  %v8989_v20 = vld [vmem:[#allocation75_spill] sm:$0xff] }
 0x11a   :  { %4470 = vmatprep.subr.bf16.mxu1 %v8979_v7  ;;  %v8990_v7 = vld [vmem:[#allocation76_spill] sm:$0xff] }
 0x11c   :  { %4408 = vmatpush1.bf16.msra.mxu0 %v8980_v53  ;;  %v8991_v53 = vld [vmem:[#allocation77_spill] sm:$0xff] }
 0x11d   :  { %4472 = vmatpush1.bf16.msra.mxu1 %v8981_v48  ;;  %4410 = vmatprep.subr.bf16.mxu0 %v8982_v5  ;;  %v8992_v48 = vld [vmem:[#allocation78_spill] sm:$0xff]  ;;  %v8993_v5 = vld [vmem:[#allocation79_spill] sm:$0xff] }
 0x11e   :  { %4474 = vmatprep.subr.bf16.mxu1 %v8983_v1  ;;  %v8994_v1 = vld [vmem:[#allocation80_spill] sm:$0xff] }
 0x120   :  { %4412 = vmatpush1.bf16.msra.mxu0 %v8984_v0  ;;  %v8995_v0 = vld [vmem:[#allocation81_spill] sm:$0xff] }
 0x121   :  { %4476 = vmatpush1.bf16.msra.mxu1 %v8985_v52  ;;  %4414 = vmatprep.subr.bf16.mxu0 %v8986_v46  ;;  %v8996_v52 = vld [vmem:[#allocation82_spill] sm:$0xff]  ;;  %v8997_v46 = vld [vmem:[#allocation83_spill] sm:$0xff] }
 0x122   :  { %4478 = vmatprep.subr.bf16.mxu1 %v8987_v3  ;;  %v8998_v3 = vld [vmem:[#allocation84_spill] sm:$0xff] }
 0x124   :  { %4416 = vmatpush1.bf16.msra.mxu0 %v8988_v44  ;;  %v8999_v44 = vld [vmem:[#allocation85_spill] sm:$0xff] }
 0x125   :  { %4480 = vmatpush1.bf16.msra.mxu1 %v8989_v20  ;;  %4418 = vmatprep.subr.bf16.mxu0 %v8990_v7  ;;  %v168_v20 = vlaneseq }
 0x126   :  { %4482 = vmatprep.subr.bf16.mxu1 %v8991_v53 }
 0x127   :  { %v169_v7 = vshrl.u32 %v168_v20, 7 }
 0x128   :  { %4420 = vmatpush1.bf16.msra.mxu0 %v8992_v48  ;;  %v166_v48 = vld [vmem:[%s8534_s3] sm:$0xf] }
 0x129   :  { %4484 = vmatpush1.bf16.msra.mxu1 %v8993_v5  ;;  %4422 = vmatprep.subr.bf16.mxu0 %v8994_v1  ;;  %v170_v35 = vsub.s32 0, %v169_v7  ;;  %v174_v5 = vsub.s32 1, %v169_v7  ;;  %v178_v22 = vsub.s32 2, %v169_v7 }
 0x12a   :  { %4486 = vmatprep.subr.bf16.mxu1 %v8995_v0 }
 0x12b   :  { %v7378_v53 = vrot.slane %v166_v48, %v170_v35  ;;  %v7380_v1 = vrot.slane %v166_v48, %v174_v5  ;;  %v7384_v6 = vrot.slane %v166_v48, %v178_v22 }
 0x12c   :  { %4424 = vmatpush1.bf16.msra.mxu0 %v8996_v52 }
 0x12d   :  { %4488 = vmatpush1.bf16.msra.mxu1 %v8997_v46  ;;  %4490 = vmatprep.subr.bf16.mxu0 %v8998_v3  ;;  %9000 = vst [vmem:[#allocation149_spill] sm:$0xff] %v7378_v53  ;;  %9001 = vst [vmem:[#allocation150_spill] sm:$0xff] %v7380_v1 }
 0x12e   :  { %4554 = vmatprep.subr.bf16.mxu1 %v8999_v44  ;;  %9002 = vst [vmem:[#allocation151_spill] sm:$0xff] %v7384_v6 }
 0x182   :  { %v773_v0 = vpop.f32.mrb[0].mxu0 }
 0x183   :  { %v6305_v52 = vadd.f32 %v773_v0, %v7378_v53  ;;  %v844_v46 = vpop.f32.mrb[0].mxu1  ;;  %v775_v27 = vpop.f32.mrb[1].mxu0 }
 0x184   :  { %v6306_v3 = vadd.f32 %v775_v27, %v7380_v1  ;;  %v846_v44 = vpop.f32.mrb[1].mxu1  ;;  %v6321_v60 = vadd.f32 %v844_v46, %v7384_v6 }
 0x185   :  { %v3937_v24 = vmul.f32 -1.442695, %v6305_v52 }
 0x186   :  { %v3938_v20 = vmul.f32 -1.442695, %v6306_v3 }
 0x187   :  { %6386 = vpow2.f32 %v3937_v24  ;;  %v9003_v24 = vld [vmem:[#allocation101_spill] sm:$0xff] }
 0x188   :  { %6388 = vpow2.f32 %v3938_v20  ;;  %vm1445_vm1 = vcmp.eq.s32.totalorder %v9003_v24, 0  ;;  %v9004_v20 = vmov 0  }
 0x189   :  { %6390 = vtanh.f32 %v6321_v60  ;;  %v1447_v33 = vsel %vm1445_vm1, 1, %v9004_v20  ;;  %vm6791_vm1 = vmmov 0  }
 0x18a   :  { %1449 = vperm.xlu0 %6384, %v1447_v33  }
 0x191   :  { %v6387_v59 = vpop.eup %6386 }
 0x192   :  { %v6389_v54 = vpop.eup %6388  ;;  %v1027_v43 = vadd.f32 1.0, %v6387_v59  ;;  %v702_v59 = vld [vmem:[%s8536_s5] sm:$0xf] }
 0x193   :  { %v1033_v34 = vadd.f32 1.0, %v6389_v54  ;;  %v6391_v0 = vpop.eup %6390  ;;  %v7394_v60 = vrot.slane %v702_v59, %v170_v35  ;;  %v182_v54 = vsub.s32 3, %v169_v7  ;;  %v7403_v24 = vrot.slane %v702_v59, %v178_v22 }
 0x194   :  { %6392 = vrcp.f32 %v1027_v43  ;;  %v7396_v43 = vrot.slane %v702_v59, %v174_v5 }
 0x195   :  { %6394 = vrcp.f32 %v1033_v34  ;;  %9005 = vst [vmem:[#allocation152_spill] sm:$0xff] %v7394_v60  ;;  %9008 = vst [vmem:[#allocation155_spill] sm:$0xff] %v7403_v24  ;;  %v7405_v5 = vrot.slane %v166_v48, %v182_v54 }
 0x196   :  { %9006 = vst [vmem:[#allocation153_spill] sm:$0xff] %v7396_v43 }
 0x197   :  { %9009 = vst [vmem:[#allocation156_spill] sm:$0xff] %v7405_v5 }
 0x19e   :  { %v6393_v53 = vpop.eup %6392 }
 0x19f   :  { %v6395_v27 = vpop.eup %6394  ;;  %v1045_v1 = vmul.f32 %v6393_v53, %v6391_v0 }
 0x1a0   :  { %v1044_v52 = vmul.f32 0.0, %v6395_v27 }
 0x1a2   :  { %v7387_v3 = vadd.f32 %v1045_v1, %v1044_v52  ;;  %v7400_v52 = vrot.slane %v702_v59, %v182_v54 }
 0x1a4   :  { %9007 = vst [vmem:[#allocation154_spill] sm:$0xff] %v7400_v52 }
 0x1c2   :  { %v915_v34 = vpop.f32.mrb[16].mxu0 }
 0x1c3   :  { %v1020_v46 = vadd.f32 %v7394_v60, %v915_v34  ;;  %v917_v53 = vpop.f32.mrb[17].mxu0  ;;  %v986_v1 = vpop.f32.mrb[16].mxu1  ;;  %v6322_v34 = vadd.f32 %v846_v44, %v7405_v5 }
 0x1c4   :  { %v1021_v0 = vadd.f32 %v7396_v43, %v917_v53  ;;  %v988_v27 = vpop.f32.mrb[17].mxu1  ;;  %v1022_v60 = vadd.f32 %v7403_v24, %v986_v1 }
 0x1c5   :  { %v3940_v33 = vmul.f32 -1.442695, %v1020_v46  ;;  %v1023_v35 = vadd.f32 %v7400_v52, %v988_v27  ;;  %v3939_v43 = vmul.f32 -1.442695, %v6322_v34 }
 0x1c6   :  { %v3941_v20 = vmul.f32 -1.442695, %v1021_v0 }
 0x1c7   :  { %6396 = vpow2.f32 %v3940_v33  ;;  %v3942_v7 = vmul.f32 -1.442695, %v1023_v35 }
 0x1c8   :  { %6398 = vpow2.f32 %v3941_v20 }
 0x1c9   :  { %6400 = vpow2.f32 %v3942_v7 }
 0x1ca   :  { %6402 = vtanh.f32 %v1022_v60 }
 0x1d1   :  { %v6397_v6 = vpop.eup %6396 }
 0x1d2   :  { %v6399_v53 = vpop.eup %6398  ;;  %v1052_v32 = vadd.f32 1.0, %v6397_v6 }
 0x1d3   :  { %v1058_v46 = vadd.f32 1.0, %v6399_v53  ;;  %v6401_v20 = vpop.eup %6400  ;;  %v9010_v53 = vld [vmem:[#allocation86_spill] sm:$0xff] }
 0x1d4   :  { %6404 = vrcp.f32 %v1052_v32  ;;  %v6403_v22 = vpop.eup %6402  ;;  %v1065_v48 = vadd.f32 1.0, %v6401_v20  ;;  %v9012_v20 = vld [vmem:[#allocation87_spill] sm:$0xff] }
 0x1d5   :  { %6406 = vrcp.f32 %v1058_v46  ;;  %v9011_v46 = vld [vmem:[#allocation88_spill] sm:$0xff] }
 0x1d6   :  { %6408 = vpow2.f32 %v3939_v43 }
 0x1d7   :  { %6410 = vrcp.f32 %v1065_v48  ;;  %v9015_v48 = vld [vmem:[#allocation92_spill] sm:$0xff] }
 0x1de   :  { %v6405_v59 = vpop.eup %6404 }
 0x1df   :  { %v6407_v54 = vpop.eup %6406  ;;  %v1070_v0 = vmul.f32 %v6405_v59, %v6403_v22  ;;  %v9013_v22 = vld [vmem:[#allocation89_spill] sm:$0xff]  ;;  %v9014_v59 = vld [vmem:[#allocation90_spill] sm:$0xff] }
 0x1e0   :  { %v6409_v27 = vpop.eup %6408  ;;  %v1069_v44 = vmul.f32 0.0, %v6407_v54  ;;  %v9016_v54 = vld [vmem:[#allocation91_spill] sm:$0xff] }
 0x1e1   :  { %v1040_v1 = vadd.f32 1.0, %v6409_v27  ;;  %v6411_v32 = vpop.eup %6410  ;;  %v9018_v27 = vld [vmem:[#allocation94_spill] sm:$0xff] }
 0x1e2   :  { %v7409_v33 = vadd.f32 %v1070_v0, %v1069_v44  ;;  %v9017_v0 = vld [vmem:[#allocation93_spill] sm:$0xff]  ;;  %v9019_v44 = vld [vmem:[#allocation96_spill] sm:$0xff] }
 0x1e4   :  { %6412 = vtanh.f32 %v7409_v33 }
 0x1e5   :  { %6414 = vtanh.f32 %v7387_v3 }
 0x1e6   :  { %6416 = vrcp.f32 %v1040_v1  ;;  %v9020_v1 = vld [vmem:[#allocation95_spill] sm:$0xff] }
 0x1ee   :  { %v6413_v6 = vpop.eup %6412 }
 0x1ef   :  { %v6415_v60 = vpop.eup %6414  ;;  %v1073_v43 = vmul.f32 %v6413_v6, %v6411_v32  ;;  %v9021_v32 = vld [vmem:[#allocation97_spill] sm:$0xff]  ;;  %v9022_v6 = vld [vmem:[#allocation98_spill] sm:$0xff] }
 0x1f0   :  { %v6417_v35 = vpop.eup %6416 }
 0x1f1   :  { %v7413_v7 = vmul.f32 0.0, %v1073_v43  ;;  %v7415_v34 = vmul.f32 %v6417_v35, %v6415_v60  ;;  %v9023_v60 = vld [vmem:[#allocation100_spill] sm:$0xff]  ;;  %v9024_v43 = vld [vmem:[#allocation99_spill] sm:$0xff]  ;;  %v9025_v35 = vld [vmem:[#allocation102_spill] sm:$0xff] }
 0x1f3   :  { %1161 = vmatprep.mubr.f32.mxu0 %v7413_v7  ;;  %1232 = vmatprep.mubr.f32.mxu1 %v7413_v7 }
 0x1f4   :  { %1162 = vmatmul.mubr.f32.vlgmr.msra.gmra.mrb[2].mxu0 %v7415_v34  ;;  %1233 = vmatmul.mubr.f32.vlgmr.msra.gmra.mrb[2].mxu1 %v7415_v34 }
 0x1f5   :  { %4492 = vmatpush1.bf16.msra.mxu0 %v9010_v53  ;;  %4556 = vmatpush1.bf16.msra.mxu1 %v9011_v46 }
 0x1f6   :  { %1303 = vmatprep.mubr.f32.mxu0 %v7413_v7  ;;  %1374 = vmatprep.mubr.f32.mxu1 %v7413_v7 }
 0x1f7   :  { %4494 = vmatprep.subr.bf16.mxu0 %v9012_v20  ;;  %4558 = vmatprep.subr.bf16.mxu1 %v9013_v22 }
 0x1f9   :  { %4496 = vmatpush1.bf16.msra.mxu0 %v9014_v59  ;;  %4560 = vmatpush1.bf16.msra.mxu1 %v9015_v48  ;;  %v9026_v48 = vld [vmem:[#allocation103_spill] sm:$0xff] }
 0x1fa   :  { %4498 = vmatprep.subr.bf16.mxu0 %v9016_v54  ;;  %4562 = vmatprep.subr.bf16.mxu1 %v9017_v0  ;;  %v9027_v54 = vld [vmem:[#allocation105_spill] sm:$0xff]  ;;  %v9028_v0 = vld [vmem:[#allocation104_spill] sm:$0xff] }
 0x1fd   :  { %4500 = vmatpush1.bf16.msra.mxu0 %v9018_v27  ;;  %4564 = vmatpush1.bf16.msra.mxu1 %v9019_v44  ;;  %v9029_v27 = vld [vmem:[#allocation106_spill] sm:$0xff]  ;;  %v9030_v44 = vld [vmem:[#allocation107_spill] sm:$0xff] }
 0x1fe   :  { %4502 = vmatprep.subr.bf16.mxu0 %v9020_v1  ;;  %4566 = vmatprep.subr.bf16.mxu1 %v9021_v32  ;;  %v9031_v1 = vld [vmem:[#allocation109_spill] sm:$0xff]  ;;  %v9032_v32 = vld [vmem:[#allocation108_spill] sm:$0xff] }
 0x201   :  { %4504 = vmatpush1.bf16.msra.mxu0 %v9022_v6  ;;  %4568 = vmatpush1.bf16.msra.mxu1 %v9023_v60  ;;  %v9033_v6 = vld [vmem:[#allocation110_spill] sm:$0xff]  ;;  %v9034_v60 = vld [vmem:[#allocation111_spill] sm:$0xff] }
 0x202   :  { %4506 = vmatprep.subr.bf16.mxu0 %v9024_v43  ;;  %4570 = vmatprep.subr.bf16.mxu1 %v9025_v35  ;;  %v9035_v43 = vld [vmem:[#allocation113_spill] sm:$0xff]  ;;  %v9036_v35 = vld [vmem:[#allocation112_spill] sm:$0xff] }
 0x205   :  { %4508 = vmatpush1.bf16.msra.mxu0 %v9026_v48  ;;  %4572 = vmatpush1.bf16.msra.mxu1 %v9027_v54  ;;  %v9037_v48 = vld [vmem:[#allocation114_spill] sm:$0xff]  ;;  %v9038_v54 = vld [vmem:[#allocation115_spill] sm:$0xff] }
 0x206   :  { %4510 = vmatprep.subr.bf16.mxu0 %v9028_v0  ;;  %4574 = vmatprep.subr.bf16.mxu1 %v9029_v27  ;;  %v9039_v0 = vld [vmem:[#allocation117_spill] sm:$0xff]  ;;  %v9040_v27 = vld [vmem:[#allocation116_spill] sm:$0xff] }
 0x209   :  { %4512 = vmatpush1.bf16.msra.mxu0 %v9030_v44  ;;  %4576 = vmatpush1.bf16.msra.mxu1 %v9031_v1  ;;  %v9041_v44 = vld [vmem:[#allocation118_spill] sm:$0xff]  ;;  %v9042_v1 = vld [vmem:[#allocation119_spill] sm:$0xff] }
 0x20a   :  { %4514 = vmatprep.subr.bf16.mxu0 %v9032_v32  ;;  %4578 = vmatprep.subr.bf16.mxu1 %v9033_v6  ;;  %v9043_v32 = vld [vmem:[#allocation121_spill] sm:$0xff]  ;;  %v9044_v6 = vld [vmem:[#allocation120_spill] sm:$0xff] }
 0x20d   :  { %4516 = vmatpush1.bf16.msra.mxu0 %v9034_v60  ;;  %4580 = vmatpush1.bf16.msra.mxu1 %v9035_v43  ;;  %v9045_v60 = vld [vmem:[#allocation122_spill] sm:$0xff]  ;;  %v9046_v43 = vld [vmem:[#allocation123_spill] sm:$0xff] }
 0x20e   :  { %4518 = vmatprep.subr.bf16.mxu0 %v9036_v35  ;;  %4582 = vmatprep.subr.bf16.mxu1 %v9037_v48  ;;  %v9047_v35 = vld [vmem:[#allocation125_spill] sm:$0xff]  ;;  %v9048_v48 = vld [vmem:[#allocation124_spill] sm:$0xff] }
 0x211   :  { %4520 = vmatpush1.bf16.msra.mxu0 %v9038_v54  ;;  %4584 = vmatpush1.bf16.msra.mxu1 %v9039_v0  ;;  %v9049_v54 = vld [vmem:[#allocation126_spill] sm:$0xff]  ;;  %v9050_v0 = vld [vmem:[#allocation127_spill] sm:$0xff] }
 0x212   :  { %4522 = vmatprep.subr.bf16.mxu0 %v9040_v27  ;;  %4586 = vmatprep.subr.bf16.mxu1 %v9041_v44  ;;  %v9051_v27 = vld [vmem:[#allocation129_spill] sm:$0xff]  ;;  %v9052_v44 = vld [vmem:[#allocation128_spill] sm:$0xff] }
 0x215   :  { %4524 = vmatpush1.bf16.msra.mxu0 %v9042_v1  ;;  %4588 = vmatpush1.bf16.msra.mxu1 %v9043_v32  ;;  %v9053_v1 = vld [vmem:[#allocation130_spill] sm:$0xff]  ;;  %v9054_v32 = vld [vmem:[#allocation131_spill] sm:$0xff] }
 0x216   :  { %4526 = vmatprep.subr.bf16.mxu0 %v9044_v6  ;;  %4590 = vmatprep.subr.bf16.mxu1 %v9045_v60  ;;  %v9055_v6 = vld [vmem:[#allocation133_spill] sm:$0xff]  ;;  %v9056_v60 = vld [vmem:[#allocation132_spill] sm:$0xff] }
 0x219   :  { %4528 = vmatpush1.bf16.msra.mxu0 %v9046_v43  ;;  %4592 = vmatpush1.bf16.msra.mxu1 %v9047_v35  ;;  %v9057_v43 = vld [vmem:[#allocation134_spill] sm:$0xff]  ;;  %v9058_v35 = vld [vmem:[#allocation135_spill] sm:$0xff] }
 0x21a   :  { %4530 = vmatprep.subr.bf16.mxu0 %v9048_v48  ;;  %4594 = vmatprep.subr.bf16.mxu1 %v9049_v54  ;;  %v9059_v54 = vld [vmem:[#allocation136_spill] sm:$0xff] }
 0x21d   :  { %4532 = vmatpush1.bf16.msra.mxu0 %v9050_v0  ;;  %4596 = vmatpush1.bf16.msra.mxu1 %v9051_v27  ;;  %v9060_v0 = vld [vmem:[#allocation138_spill] sm:$0xff] }
 0x21e   :  { %4534 = vmatprep.subr.bf16.mxu0 %v9052_v44  ;;  %4598 = vmatprep.subr.bf16.mxu1 %v9053_v1 }
 0x221   :  { %4536 = vmatpush1.bf16.msra.mxu0 %v9054_v32  ;;  %4600 = vmatpush1.bf16.msra.mxu1 %v9055_v6 }
 0x222   :  { %4538 = vmatprep.subr.bf16.mxu0 %v9056_v60  ;;  %4602 = vmatprep.subr.bf16.mxu1 %v9057_v43 }
 0x225   :  { %4540 = vmatpush1.bf16.msra.mxu0 %v9058_v35  ;;  %4604 = vmatpush1.bf16.msra.mxu1 %v7268_v31 }
 0x226   :  { %4542 = vmatprep.subr.bf16.mxu0 %v9059_v54  ;;  %4606 = vmatprep.subr.bf16.mxu1 %v9060_v0 }
 0x229   :  { %4544 = vmatpush1.bf16.msra.mxu0 %v7274_v28  ;;  %4608 = vmatpush1.bf16.msra.mxu1 %v7280_v19 }
 0x22a   :  { %4546 = vmatprep.subr.bf16.mxu0 %v7277_v18  ;;  %4610 = vmatprep.subr.bf16.mxu1 %v7283_v37 }
 0x22d   :  { %4548 = vmatpush1.bf16.msra.mxu0 %v7286_v41  ;;  %4612 = vmatpush1.bf16.msra.mxu1 %v7292_v8 }
 0x22e   :  { %4550 = vmatprep.subr.bf16.mxu0 %v7289_v47  ;;  %4614 = vmatprep.subr.bf16.mxu1 %v7295_v29 }
 0x231   :  { %4552 = vmatpush1.bf16.msra.mxu0 %v7298_v9  ;;  %4616 = vmatpush1.bf16.msra.mxu1 %v7302_v10 }
 0x232   :  { %4618 = vmatprep.subr.bf16.mxu0 %v6894_v38  ;;  %4682 = vmatprep.subr.bf16.mxu1 %v6896_v42 }
 0x234   :  { %1304 = vmatmul.mubr.f32.vlgmr.msra.gmra.mrb[18].mxu0 %v7415_v34  ;;  %1375 = vmatmul.mubr.f32.vlgmr.msra.gmra.mrb[18].mxu1 %v7415_v34  ;;  %v9061_v34 = vld [vmem:[#allocation50_spill] sm:$0xff] }
 0x235   :  { %4620 = vmatpush1.bf16.msra.mxu0 %v6898_v49  ;;  %4684 = vmatpush1.bf16.msra.mxu1 %v6901_v50 }
 0x236   :  { %4622 = vmatprep.subr.bf16.mxu0 %v6903_v51  ;;  %4686 = vmatprep.subr.bf16.mxu1 %v6906_v55 }
 0x239   :  { %4624 = vmatpush1.bf16.msra.mxu0 %v6909_v61  ;;  %4688 = vmatpush1.bf16.msra.mxu1 %v6913_v62 }
 0x23a   :  { %4626 = vmatprep.subr.bf16.mxu0 %v6915_v63  ;;  %4690 = vmatprep.subr.bf16.mxu1 %v6918_v4 }
 0x23d   :  { %4628 = vmatpush1.bf16.msra.mxu0 %v6924_v11  ;;  %4692 = vmatpush1.bf16.msra.mxu1 %v6929_v12 }
 0x23e   :  { %4630 = vmatprep.subr.bf16.mxu0 %v6931_v13  ;;  %4694 = vmatprep.subr.bf16.mxu1 %v6934_v17 }
 0x241   :  { %4632 = vmatpush1.bf16.msra.mxu0 %v6937_v23  ;;  %4696 = vmatpush1.bf16.msra.mxu1 %v6941_v25 }
 0x242   :  { %4634 = vmatprep.subr.bf16.mxu0 %v6943_v26  ;;  %4698 = vmatprep.subr.bf16.mxu1 %v6946_v30  ;;  %v9098_v30 = vld [vmem:[#allocation150_spill] sm:$0xff] }
 0x245   :  { %4636 = vmatpush1.bf16.msra.mxu0 %v6950_v36  ;;  %4700 = vmatpush1.bf16.msra.mxu1 %v6955_v39  ;;  %v9097_v39 = vld [vmem:[#allocation149_spill] sm:$0xff] }
 0x246   :  { %4638 = vmatprep.subr.bf16.mxu0 %v6957_v40  ;;  %4702 = vmatprep.subr.bf16.mxu1 %v6960_v45  ;;  %v9062_v40 = vld [vmem:[#allocation51_spill] sm:$0xff]  ;;  %v9063_v45 = vld [vmem:[#allocation52_spill] sm:$0xff] }
 0x249   :  { %4640 = vmatpush1.bf16.msra.mxu0 %v6964_v56  ;;  %4704 = vmatpush1.bf16.msra.mxu1 %v6969_v57  ;;  %v9064_v56 = vld [vmem:[#allocation53_spill] sm:$0xff]  ;;  %v9065_v57 = vld [vmem:[#allocation54_spill] sm:$0xff] }
 0x24a   :  { %4642 = vmatprep.subr.bf16.mxu0 %v6971_v58  ;;  %4706 = vmatprep.subr.bf16.mxu1 %v6974_v2  ;;  %v9066_v58 = vld [vmem:[#allocation55_spill] sm:$0xff]  ;;  %v9067_v2 = vld [vmem:[#allocation56_spill] sm:$0xff] }
 0x24d   :  { %4644 = vmatpush1.bf16.msra.mxu0 %v6978_v14  ;;  %4708 = vmatpush1.bf16.msra.mxu1 %v6983_v15  ;;  %v9068_v14 = vld [vmem:[#allocation57_spill] sm:$0xff]  ;;  %v9069_v15 = vld [vmem:[#allocation58_spill] sm:$0xff] }
 0x24e   :  { %4646 = vmatprep.subr.bf16.mxu0 %v6985_v16  ;;  %4710 = vmatprep.subr.bf16.mxu1 %v6988_v21  ;;  %v9070_v16 = vld [vmem:[#allocation59_spill] sm:$0xff]  ;;  %v9071_v21 = vld [vmem:[#allocation60_spill] sm:$0xff] }
 0x251   :  { %4648 = vmatpush1.bf16.msra.mxu0 %v9061_v34  ;;  %4712 = vmatpush1.bf16.msra.mxu1 %v9062_v40  ;;  %v9072_v34 = vld [vmem:[#allocation61_spill] sm:$0xff]  ;;  %v9073_v40 = vld [vmem:[#allocation62_spill] sm:$0xff] }
 0x252   :  { %4650 = vmatprep.subr.bf16.mxu0 %v9063_v45  ;;  %4714 = vmatprep.subr.bf16.mxu1 %v9064_v56  ;;  %v9074_v45 = vld [vmem:[#allocation63_spill] sm:$0xff]  ;;  %v9075_v56 = vld [vmem:[#allocation64_spill] sm:$0xff] }
 0x255   :  { %4652 = vmatpush1.bf16.msra.mxu0 %v9065_v57  ;;  %4716 = vmatpush1.bf16.msra.mxu1 %v9066_v58  ;;  %v9076_v57 = vld [vmem:[#allocation65_spill] sm:$0xff]  ;;  %v9077_v58 = vld [vmem:[#allocation66_spill] sm:$0xff] }
 0x256   :  { %4654 = vmatprep.subr.bf16.mxu0 %v9067_v2  ;;  %4718 = vmatprep.subr.bf16.mxu1 %v9068_v14  ;;  %v9078_v2 = vld [vmem:[#allocation67_spill] sm:$0xff]  ;;  %v9079_v14 = vld [vmem:[#allocation68_spill] sm:$0xff] }
 0x259   :  { %4656 = vmatpush1.bf16.msra.mxu0 %v9069_v15  ;;  %4720 = vmatpush1.bf16.msra.mxu1 %v9070_v16  ;;  %v9080_v15 = vld [vmem:[#allocation69_spill] sm:$0xff]  ;;  %v9081_v16 = vld [vmem:[#allocation70_spill] sm:$0xff] }
 0x25a   :  { %4658 = vmatprep.subr.bf16.mxu0 %v9071_v21  ;;  %4722 = vmatprep.subr.bf16.mxu1 %v9072_v34  ;;  %v9082_v21 = vld [vmem:[#allocation71_spill] sm:$0xff]  ;;  %v9083_v34 = vld [vmem:[#allocation72_spill] sm:$0xff] }
 0x25d   :  { %4660 = vmatpush1.bf16.msra.mxu0 %v9073_v40  ;;  %4724 = vmatpush1.bf16.msra.mxu1 %v9074_v45  ;;  %v9084_v40 = vld [vmem:[#allocation73_spill] sm:$0xff]  ;;  %v9085_v45 = vld [vmem:[#allocation74_spill] sm:$0xff] }
 0x25e   :  { %4662 = vmatprep.subr.bf16.mxu0 %v9075_v56  ;;  %4726 = vmatprep.subr.bf16.mxu1 %v9076_v57  ;;  %v9086_v56 = vld [vmem:[#allocation75_spill] sm:$0xff]  ;;  %v9087_v57 = vld [vmem:[#allocation76_spill] sm:$0xff] }
 0x261   :  { %4664 = vmatpush1.bf16.msra.mxu0 %v9077_v58  ;;  %4728 = vmatpush1.bf16.msra.mxu1 %v9078_v2  ;;  %v9088_v58 = vld [vmem:[#allocation77_spill] sm:$0xff]  ;;  %v9089_v2 = vld [vmem:[#allocation78_spill] sm:$0xff] }
 0x262   :  { %4666 = vmatprep.subr.bf16.mxu0 %v9079_v14  ;;  %4730 = vmatprep.subr.bf16.mxu1 %v9080_v15  ;;  %v9090_v14 = vld [vmem:[#allocation79_spill] sm:$0xff]  ;;  %v9091_v15 = vld [vmem:[#allocation80_spill] sm:$0xff] }
 0x265   :  { %4668 = vmatpush1.bf16.msra.mxu0 %v9081_v16  ;;  %4732 = vmatpush1.bf16.msra.mxu1 %v9082_v21  ;;  %v9092_v16 = vld [vmem:[#allocation81_spill] sm:$0xff]  ;;  %v9093_v21 = vld [vmem:[#allocation82_spill] sm:$0xff] }
 0x266   :  { %4670 = vmatprep.subr.bf16.mxu0 %v9083_v34  ;;  %4734 = vmatprep.subr.bf16.mxu1 %v9084_v40  ;;  %v9094_v34 = vld [vmem:[#allocation83_spill] sm:$0xff]  ;;  %v9095_v40 = vld [vmem:[#allocation84_spill] sm:$0xff] }
 0x269   :  { %4672 = vmatpush1.bf16.msra.mxu0 %v9085_v45  ;;  %4736 = vmatpush1.bf16.msra.mxu1 %v9086_v56  ;;  %v9096_v45 = vld [vmem:[#allocation85_spill] sm:$0xff] }
 0x26a   :  { %4674 = vmatprep.subr.bf16.mxu0 %v9087_v57  ;;  %4738 = vmatprep.subr.bf16.mxu1 %v9088_v58 }
 0x26d   :  { %4676 = vmatpush1.bf16.msra.mxu0 %v9089_v2  ;;  %4740 = vmatpush1.bf16.msra.mxu1 %v9090_v14 }
 0x26e   :  { %4678 = vmatprep.subr.bf16.mxu0 %v9091_v15  ;;  %4742 = vmatprep.subr.bf16.mxu1 %v9092_v16  ;;  %v9099_v16 = vld [vmem:[#allocation151_spill] sm:$0xff] }
 0x271   :  { %4680 = vmatpush1.bf16.msra.mxu0 %v9093_v21  ;;  %4744 = vmatpush1.bf16.msra.mxu1 %v9094_v34 }
 0x272   :  { %4746 = vmatprep.subr.bf16.mxu0 %v9095_v40  ;;  %4810 = vmatprep.subr.bf16.mxu1 %v9096_v45 }
 0x2c7   :  { %v1163_v56 = vpop.f32.mrb[2].mxu0  ;;  %v1234_v57 = vpop.f32.mrb[2].mxu1 }
 0x2c8   :  { %v6307_v58 = vadd.f32 %v1163_v56, %v9097_v39  ;;  %v1165_v36 = vpop.f32.mrb[3].mxu0  ;;  %v1236_v2 = vpop.f32.mrb[3].mxu1  ;;  %v6323_v21 = vadd.f32 %v1234_v57, %v9099_v16 }
 0x2c9   :  { %v6308_v14 = vadd.f32 %v1165_v36, %v9098_v30 }
 0x2ca   :  { %v3943_v26 = vmul.f32 -1.442695, %v6307_v58  ;;  %v9100_v58 = vld [vmem:[#allocation101_spill] sm:$0xff] }
 0x2cb   :  { %v3944_v15 = vmul.f32 -1.442695, %v6308_v14  ;;  %vm1809_vm2 = vcmp.eq.s32.totalorder %v9100_v58, 1 }
 0x2cc   :  { %6418 = vpow2.f32 %v3943_v26  ;;  %v9101_v26 = vmov 0  }
 0x2cd   :  { %6420 = vpow2.f32 %v3944_v15  ;;  %v1811_v14 = vsel %vm1809_vm2, 1, %v9101_v26 }
 0x2ce   :  { %6422 = vtanh.f32 %v6323_v21  ;;  %1813 = vperm.xlu1 %6385, %v1811_v14  }
 0x2d6   :  { %v6419_v25 = vpop.eup %6418 }
 0x2d7   :  { %v6421_v34 = vpop.eup %6420  ;;  %v1397_v23 = vadd.f32 1.0, %v6419_v25  ;;  %v9102_v25 = vld [vmem:[#allocation152_spill] sm:$0xff] }
 0x2d8   :  { %v1403_v40 = vadd.f32 1.0, %v6421_v34  ;;  %v6423_v45 = vpop.eup %6422 }
 0x2d9   :  { %6424 = vrcp.f32 %v1397_v23 }
 0x2da   :  { %6426 = vrcp.f32 %v1403_v40  ;;  %v9103_v40 = vld [vmem:[#allocation153_spill] sm:$0xff] }
 0x2e3   :  { %v6425_v17 = vpop.eup %6424 }
 0x2e4   :  { %v6427_v56 = vpop.eup %6426  ;;  %v1415_v39 = vmul.f32 %v6425_v17, %v6423_v45 }
 0x2e5   :  { %v1414_v13 = vmul.f32 %v6427_v56, %v7387_v3 }
 0x2e7   :  { %v7557_v36 = vadd.f32 %v1415_v39, %v1414_v13  ;;  %v6324_v13 = vadd.f32 %v1236_v2, %v7405_v5  ;;  %v1078_v2 = vmul.f32 0.0, %v7409_v33 }
 0x2e9   :  { %v3945_v39 = vmul.f32 -1.442695, %v6324_v13 }
 0x307   :  { %v1305_v57 = vpop.f32.mrb[18].mxu0  ;;  %v1376_v15 = vpop.f32.mrb[18].mxu1 }
 0x308   :  { %v1390_v21 = vadd.f32 %v1305_v57, %v9102_v25  ;;  %v1307_v34 = vpop.f32.mrb[19].mxu0  ;;  %v1378_v23 = vpop.f32.mrb[19].mxu1  ;;  %v1392_v3 = vadd.f32 %v1376_v15, %v7403_v24 }
 0x309   :  { %v1391_v16 = vadd.f32 %v1307_v34, %v9103_v40  ;;  %v1393_v17 = vadd.f32 %v1378_v23, %v7400_v52 }
 0x30a   :  { %v3946_v30 = vmul.f32 -1.442695, %v1390_v21 }
 0x30b   :  { %v3947_v12 = vmul.f32 -1.442695, %v1391_v16  ;;  %v3948_v45 = vmul.f32 -1.442695, %v1393_v17 }
 0x30c   :  { %6428 = vpow2.f32 %v3946_v30 }
 0x30d   :  { %6430 = vpow2.f32 %v3947_v12 }
 0x30e   :  { %6432 = vpow2.f32 %v3945_v39  ;;  %v1087_v39 = vpop.permute.xlu0 %1086 }
 0x30f   :  { %6434 = vpow2.f32 %v3948_v45  ;;  %vm1088_vm3 = vcmp.eq.s32.totalorder %v1087_v39, 1  ;;  %v9113_v39 = vld [vmem:[#allocation99_spill] sm:$0xff] }
 0x310   :  { %6436 = vtanh.f32 %v1392_v3 }
 0x312   :  { %v1450_v45 = vpop.permute.xlu0 %1449 }
 0x313   :  { %vm1451_vm4 = vcmp.eq.s32.totalorder %v1450_v45, 1  ;;  %v9114_v45 = vld [vmem:[#allocation102_spill] sm:$0xff] }
 0x316   :  { %v6429_v56 = vpop.eup %6428 }
 0x317   :  { %v6431_v58 = vpop.eup %6430  ;;  %v1422_v14 = vadd.f32 1.0, %v6429_v56 }
 0x318   :  { %v1428_v57 = vadd.f32 1.0, %v6431_v58  ;;  %v6433_v16 = vpop.eup %6432 }
 0x319   :  { %6438 = vrcp.f32 %v1422_v14  ;;  %v6435_v30 = vpop.eup %6434  ;;  %v1410_v15 = vadd.f32 1.0, %v6433_v16 }
 0x31a   :  { %6440 = vrcp.f32 %v1428_v57  ;;  %v6437_v12 = vpop.eup %6436  ;;  %v1435_v13 = vadd.f32 1.0, %v6435_v30  ;;  %v1089_v57 = vsel %vm1088_vm3, %v7413_v7, 0.0  ;;  %v9104_v7 = vld [vmem:[#allocation92_spill] sm:$0xff] }
 0x31b   :  { %6442 = vtanh.f32 %v7557_v36 }
 0x31c   :  { %6444 = vrcp.f32 %v1435_v13  ;;  %v9110_v13 = vld [vmem:[#allocation97_spill] sm:$0xff] }
 0x323   :  { %v6439_v21 = vpop.eup %6438 }
 0x324   :  { %v6441_v34 = vpop.eup %6440  ;;  %v1440_v23 = vmul.f32 %v6439_v21, %v6437_v12  ;;  %v9105_v12 = vld [vmem:[#allocation91_spill] sm:$0xff]  ;;  %v9106_v21 = vld [vmem:[#allocation93_spill] sm:$0xff] }
 0x325   :  { %v1439_v17 = vmul.f32 %v6441_v34, %v1078_v2  ;;  %v6443_v3 = vpop.eup %6442  ;;  %v9107_v2 = vld [vmem:[#allocation94_spill] sm:$0xff]  ;;  %v9108_v34 = vld [vmem:[#allocation96_spill] sm:$0xff] }
 0x326   :  { %v6445_v56 = vpop.eup %6444 }
 0x327   :  { %v7567_v24 = vadd.f32 %v1440_v23, %v1439_v17  ;;  %v9109_v23 = vld [vmem:[#allocation95_spill] sm:$0xff]  ;;  %v9111_v17 = vld [vmem:[#allocation98_spill] sm:$0xff] }
 0x329   :  { %6446 = vtanh.f32 %v7567_v24 }
 0x32a   :  { %6448 = vrcp.f32 %v1410_v15  ;;  %v9112_v15 = vld [vmem:[#allocation100_spill] sm:$0xff] }
 0x333   :  { %v6447_v58 = vpop.eup %6446 }
 0x334   :  { %v6449_v33 = vpop.eup %6448  ;;  %v1443_v14 = vmul.f32 %v6447_v58, %v6445_v56  ;;  %v9116_v56 = vld [vmem:[#allocation105_spill] sm:$0xff]  ;;  %v9117_v58 = vld [vmem:[#allocation104_spill] sm:$0xff] }
 0x335   :  { %v7572_v16 = vmul.f32 %v6449_v33, %v6443_v3  ;;  %v9115_v3 = vld [vmem:[#allocation103_spill] sm:$0xff]  ;;  %v9118_v33 = vld [vmem:[#allocation106_spill] sm:$0xff] }
 0x336   :  { %v7574_v30 = vsel %vm1451_vm4, %v1443_v14, %v1089_v57  ;;  %1524 = vmatprep.mubr.f32.mxu0 %v1443_v14  ;;  %1595 = vmatprep.mubr.f32.mxu1 %v1443_v14  ;;  %v9120_v57 = vld [vmem:[#allocation109_spill] sm:$0xff] }
 0x337   :  { %1525 = vmatmul.mubr.f32.vlgmr.msra.gmra.mrb[4].mxu0 %v7572_v16  ;;  %1596 = vmatmul.mubr.f32.vlgmr.msra.gmra.mrb[4].mxu1 %v7572_v16 }
 0x338   :  { %4748 = vmatpush1.bf16.msra.mxu0 %v9010_v53  ;;  %4812 = vmatpush1.bf16.msra.mxu1 %v9011_v46 }
 0x339   :  { %1666 = vmatprep.mubr.f32.mxu0 %v1443_v14  ;;  %1737 = vmatprep.mubr.f32.mxu1 %v1443_v14  ;;  %v9119_v14 = vld [vmem:[#allocation107_spill] sm:$0xff] }
 0x33a   :  { %4750 = vmatprep.subr.bf16.mxu0 %v9012_v20  ;;  %4814 = vmatprep.subr.bf16.mxu1 %v9013_v22 }
 0x33c   :  { %4752 = vmatpush1.bf16.msra.mxu0 %v9014_v59  ;;  %4816 = vmatpush1.bf16.msra.mxu1 %v9104_v7 }
 0x33d   :  { %4754 = vmatprep.subr.bf16.mxu0 %v9105_v12  ;;  %4818 = vmatprep.subr.bf16.mxu1 %v9106_v21 }
 0x340   :  { %4756 = vmatpush1.bf16.msra.mxu0 %v9107_v2  ;;  %4820 = vmatpush1.bf16.msra.mxu1 %v9108_v34 }
 0x341   :  { %4758 = vmatprep.subr.bf16.mxu0 %v9109_v23  ;;  %4822 = vmatprep.subr.bf16.mxu1 %v9110_v13  ;;  %v9121_v13 = vld [vmem:[#allocation108_spill] sm:$0xff] }
 0x344   :  { %4760 = vmatpush1.bf16.msra.mxu0 %v9111_v17  ;;  %4824 = vmatpush1.bf16.msra.mxu1 %v9112_v15  ;;  %v9122_v17 = vld [vmem:[#allocation110_spill] sm:$0xff]  ;;  %v9123_v15 = vld [vmem:[#allocation111_spill] sm:$0xff] }
 0x345   :  { %4762 = vmatprep.subr.bf16.mxu0 %v9113_v39  ;;  %4826 = vmatprep.subr.bf16.mxu1 %v9114_v45  ;;  %v9124_v39 = vld [vmem:[#allocation113_spill] sm:$0xff]  ;;  %v9125_v45 = vld [vmem:[#allocation112_spill] sm:$0xff] }
 0x348   :  { %4764 = vmatpush1.bf16.msra.mxu0 %v9115_v3  ;;  %4828 = vmatpush1.bf16.msra.mxu1 %v9116_v56  ;;  %v9126_v3 = vld [vmem:[#allocation114_spill] sm:$0xff]  ;;  %v9127_v56 = vld [vmem:[#allocation115_spill] sm:$0xff] }
 0x349   :  { %4766 = vmatprep.subr.bf16.mxu0 %v9117_v58  ;;  %4830 = vmatprep.subr.bf16.mxu1 %v9118_v33  ;;  %v9128_v58 = vld [vmem:[#allocation117_spill] sm:$0xff]  ;;  %v9129_v33 = vld [vmem:[#allocation116_spill] sm:$0xff] }
 0x34c   :  { %4768 = vmatpush1.bf16.msra.mxu0 %v9119_v14  ;;  %4832 = vmatpush1.bf16.msra.mxu1 %v9120_v57  ;;  %v9130_v14 = vld [vmem:[#allocation118_spill] sm:$0xff]  ;;  %v9131_v57 = vld [vmem:[#allocation119_spill] sm:$0xff] }
 0x34d   :  { %4770 = vmatprep.subr.bf16.mxu0 %v9121_v13  ;;  %4834 = vmatprep.subr.bf16.mxu1 %v9122_v17  ;;  %v9132_v13 = vld [vmem:[#allocation121_spill] sm:$0xff]  ;;  %v9133_v17 = vld [vmem:[#allocation120_spill] sm:$0xff] }
 0x350   :  { %4772 = vmatpush1.bf16.msra.mxu0 %v9123_v15  ;;  %4836 = vmatpush1.bf16.msra.mxu1 %v9124_v39  ;;  %v9134_v15 = vld [vmem:[#allocation122_spill] sm:$0xff]  ;;  %v9135_v39 = vld [vmem:[#allocation123_spill] sm:$0xff] }
 0x351   :  { %4774 = vmatprep.subr.bf16.mxu0 %v9125_v45  ;;  %4838 = vmatprep.subr.bf16.mxu1 %v9126_v3  ;;  %v9136_v45 = vld [vmem:[#allocation125_spill] sm:$0xff] }
 0x354   :  { %4776 = vmatpush1.bf16.msra.mxu0 %v9127_v56  ;;  %4840 = vmatpush1.bf16.msra.mxu1 %v9128_v58  ;;  %v9137_v56 = vld [vmem:[#allocation126_spill] sm:$0xff]  ;;  %v9138_v58 = vld [vmem:[#allocation127_spill] sm:$0xff] }
 0x355   :  { %4778 = vmatprep.subr.bf16.mxu0 %v9129_v33  ;;  %4842 = vmatprep.subr.bf16.mxu1 %v9130_v14 }
 0x358   :  { %4780 = vmatpush1.bf16.msra.mxu0 %v9131_v57  ;;  %4844 = vmatpush1.bf16.msra.mxu1 %v9132_v13 }
 0x359   :  { %4782 = vmatprep.subr.bf16.mxu0 %v9133_v17  ;;  %4846 = vmatprep.subr.bf16.mxu1 %v9134_v15 }
 0x35c   :  { %4784 = vmatpush1.bf16.msra.mxu0 %v9135_v39  ;;  %4848 = vmatpush1.bf16.msra.mxu1 %v9136_v45 }
 0x35d   :  { %4786 = vmatprep.subr.bf16.mxu0 %v9048_v48  ;;  %4850 = vmatprep.subr.bf16.mxu1 %v9137_v56 }
 0x360   :  { %4788 = vmatpush1.bf16.msra.mxu0 %v9138_v58  ;;  %4852 = vmatpush1.bf16.msra.mxu1 %v9051_v27 }
 0x361   :  { %4790 = vmatprep.subr.bf16.mxu0 %v9052_v44  ;;  %4854 = vmatprep.subr.bf16.mxu1 %v9053_v1 }
 0x364   :  { %4792 = vmatpush1.bf16.msra.mxu0 %v9054_v32  ;;  %4856 = vmatpush1.bf16.msra.mxu1 %v9055_v6 }
 0x365   :  { %4794 = vmatprep.subr.bf16.mxu0 %v9056_v60  ;;  %4858 = vmatprep.subr.bf16.mxu1 %v9057_v43 }
 0x368   :  { %4796 = vmatpush1.bf16.msra.mxu0 %v9058_v35  ;;  %4860 = vmatpush1.bf16.msra.mxu1 %v7268_v31 }
 0x369   :  { %4798 = vmatprep.subr.bf16.mxu0 %v9059_v54  ;;  %4862 = vmatprep.subr.bf16.mxu1 %v9060_v0 }
 0x36c   :  { %4800 = vmatpush1.bf16.msra.mxu0 %v7274_v28  ;;  %4864 = vmatpush1.bf16.msra.mxu1 %v7280_v19 }
 0x36d   :  { %4802 = vmatprep.subr.bf16.mxu0 %v7277_v18  ;;  %4866 = vmatprep.subr.bf16.mxu1 %v7283_v37 }
 0x370   :  { %4804 = vmatpush1.bf16.msra.mxu0 %v7286_v41  ;;  %4868 = vmatpush1.bf16.msra.mxu1 %v7292_v8 }
 0x371   :  { %4806 = vmatprep.subr.bf16.mxu0 %v7289_v47  ;;  %4870 = vmatprep.subr.bf16.mxu1 %v7295_v29 }
 0x374   :  { %4808 = vmatpush1.bf16.msra.mxu0 %v7298_v9  ;;  %4872 = vmatpush1.bf16.msra.mxu1 %v7302_v10  ;;  %v9195_v9 = vld [vmem:[#allocation150_spill] sm:$0xff] }
 0x375   :  { %4874 = vmatprep.subr.bf16.mxu0 %v6894_v38  ;;  %4938 = vmatprep.subr.bf16.mxu1 %v6896_v42  ;;  %v9139_v42 = vld [vmem:[#allocation31_spill] sm:$0xff]  ;;  %v9194_v38 = vld [vmem:[#allocation149_spill] sm:$0xff] }
 0x377   :  { %1667 = vmatmul.mubr.f32.vlgmr.msra.gmra.mrb[20].mxu0 %v7572_v16  ;;  %1738 = vmatmul.mubr.f32.vlgmr.msra.gmra.mrb[20].mxu1 %v7572_v16  ;;  %v9140_v16 = vld [vmem:[#allocation32_spill] sm:$0xff] }
 0x378   :  { %4876 = vmatpush1.bf16.msra.mxu0 %v6898_v49  ;;  %4940 = vmatpush1.bf16.msra.mxu1 %v6901_v50  ;;  %v9141_v49 = vld [vmem:[#allocation33_spill] sm:$0xff]  ;;  %v9142_v50 = vld [vmem:[#allocation34_spill] sm:$0xff] }
 0x379   :  { %4878 = vmatprep.subr.bf16.mxu0 %v6903_v51  ;;  %4942 = vmatprep.subr.bf16.mxu1 %v6906_v55  ;;  %v9143_v51 = vld [vmem:[#allocation35_spill] sm:$0xff]  ;;  %v9144_v55 = vld [vmem:[#allocation36_spill] sm:$0xff] }
 0x37c   :  { %4880 = vmatpush1.bf16.msra.mxu0 %v6909_v61  ;;  %4944 = vmatpush1.bf16.msra.mxu1 %v6913_v62  ;;  %v9145_v61 = vld [vmem:[#allocation37_spill] sm:$0xff]  ;;  %v9146_v62 = vld [vmem:[#allocation38_spill] sm:$0xff] }
 0x37d   :  { %4882 = vmatprep.subr.bf16.mxu0 %v6915_v63  ;;  %4946 = vmatprep.subr.bf16.mxu1 %v6918_v4  ;;  %v9147_v63 = vld [vmem:[#allocation39_spill] sm:$0xff]  ;;  %v9148_v4 = vld [vmem:[#allocation40_spill] sm:$0xff] }
 0x380   :  { %4884 = vmatpush1.bf16.msra.mxu0 %v6924_v11  ;;  %4948 = vmatpush1.bf16.msra.mxu1 %v9139_v42  ;;  %v9149_v11 = vld [vmem:[#allocation41_spill] sm:$0xff]  ;;  %v9150_v42 = vld [vmem:[#allocation42_spill] sm:$0xff] }
 0x381   :  { %4886 = vmatprep.subr.bf16.mxu0 %v9140_v16  ;;  %4950 = vmatprep.subr.bf16.mxu1 %v9141_v49  ;;  %v9151_v16 = vld [vmem:[#allocation43_spill] sm:$0xff]  ;;  %v9152_v49 = vld [vmem:[#allocation44_spill] sm:$0xff] }
 0x384   :  { %4888 = vmatpush1.bf16.msra.mxu0 %v9142_v50  ;;  %4952 = vmatpush1.bf16.msra.mxu1 %v9143_v51  ;;  %v9153_v50 = vld [vmem:[#allocation45_spill] sm:$0xff]  ;;  %v9154_v51 = vld [vmem:[#allocation46_spill] sm:$0xff] }
 0x385   :  { %4890 = vmatprep.subr.bf16.mxu0 %v9144_v55  ;;  %4954 = vmatprep.subr.bf16.mxu1 %v9145_v61  ;;  %v9155_v55 = vld [vmem:[#allocation47_spill] sm:$0xff]  ;;  %v9156_v61 = vld [vmem:[#allocation48_spill] sm:$0xff] }
 0x388   :  { %4892 = vmatpush1.bf16.msra.mxu0 %v9146_v62  ;;  %4956 = vmatpush1.bf16.msra.mxu1 %v9147_v63  ;;  %v9157_v62 = vld [vmem:[#allocation49_spill] sm:$0xff]  ;;  %v9158_v63 = vld [vmem:[#allocation50_spill] sm:$0xff] }
 0x389   :  { %4894 = vmatprep.subr.bf16.mxu0 %v9148_v4  ;;  %4958 = vmatprep.subr.bf16.mxu1 %v9149_v11  ;;  %v9159_v4 = vld [vmem:[#allocation51_spill] sm:$0xff]  ;;  %v9160_v11 = vld [vmem:[#allocation52_spill] sm:$0xff] }
 0x38c   :  { %4896 = vmatpush1.bf16.msra.mxu0 %v9150_v42  ;;  %4960 = vmatpush1.bf16.msra.mxu1 %v9151_v16  ;;  %v9161_v42 = vld [vmem:[#allocation53_spill] sm:$0xff]  ;;  %v9162_v16 = vld [vmem:[#allocation54_spill] sm:$0xff] }
 0x38d   :  { %4898 = vmatprep.subr.bf16.mxu0 %v9152_v49  ;;  %4962 = vmatprep.subr.bf16.mxu1 %v9153_v50  ;;  %v9163_v49 = vld [vmem:[#allocation55_spill] sm:$0xff]  ;;  %v9164_v50 = vld [vmem:[#allocation56_spill] sm:$0xff] }
 0x390   :  { %4900 = vmatpush1.bf16.msra.mxu0 %v9154_v51  ;;  %4964 = vmatpush1.bf16.msra.mxu1 %v9155_v55  ;;  %v9165_v51 = vld [vmem:[#allocation57_spill] sm:$0xff]  ;;  %v9166_v55 = vld [vmem:[#allocation58_spill] sm:$0xff] }
 0x391   :  { %4902 = vmatprep.subr.bf16.mxu0 %v9156_v61  ;;  %4966 = vmatprep.subr.bf16.mxu1 %v9157_v62  ;;  %v9167_v61 = vld [vmem:[#allocation59_spill] sm:$0xff]  ;;  %v9168_v62 = vld [vmem:[#allocation60_spill] sm:$0xff] }
 0x394   :  { %4904 = vmatpush1.bf16.msra.mxu0 %v9158_v63  ;;  %4968 = vmatpush1.bf16.msra.mxu1 %v9159_v4  ;;  %v9169_v63 = vld [vmem:[#allocation61_spill] sm:$0xff]  ;;  %v9170_v4 = vld [vmem:[#allocation62_spill] sm:$0xff] }
 0x395   :  { %4906 = vmatprep.subr.bf16.mxu0 %v9160_v11  ;;  %4970 = vmatprep.subr.bf16.mxu1 %v9161_v42  ;;  %v9171_v11 = vld [vmem:[#allocation63_spill] sm:$0xff]  ;;  %v9172_v42 = vld [vmem:[#allocation64_spill] sm:$0xff] }
 0x398   :  { %4908 = vmatpush1.bf16.msra.mxu0 %v9162_v16  ;;  %4972 = vmatpush1.bf16.msra.mxu1 %v9163_v49  ;;  %v9173_v16 = vld [vmem:[#allocation65_spill] sm:$0xff]  ;;  %v9174_v49 = vld [vmem:[#allocation66_spill] sm:$0xff] }
 0x399   :  { %4910 = vmatprep.subr.bf16.mxu0 %v9164_v50  ;;  %4974 = vmatprep.subr.bf16.mxu1 %v9165_v51  ;;  %v9175_v50 = vld [vmem:[#allocation67_spill] sm:$0xff]  ;;  %v9176_v51 = vld [vmem:[#allocation68_spill] sm:$0xff] }
 0x39c   :  { %4912 = vmatpush1.bf16.msra.mxu0 %v9166_v55  ;;  %4976 = vmatpush1.bf16.msra.mxu1 %v9167_v61  ;;  %v9177_v55 = vld [vmem:[#allocation69_spill] sm:$0xff]  ;;  %v9178_v61 = vld [vmem:[#allocation70_spill] sm:$0xff] }
 0x39d   :  { %4914 = vmatprep.subr.bf16.mxu0 %v9168_v62  ;;  %4978 = vmatprep.subr.bf16.mxu1 %v9169_v63  ;;  %v9179_v62 = vld [vmem:[#allocation71_spill] sm:$0xff]  ;;  %v9180_v63 = vld [vmem:[#allocation72_spill] sm:$0xff] }
 0x3a0   :  { %4916 = vmatpush1.bf16.msra.mxu0 %v9170_v4  ;;  %4980 = vmatpush1.bf16.msra.mxu1 %v9171_v11  ;;  %v9181_v4 = vld [vmem:[#allocation73_spill] sm:$0xff]  ;;  %v9182_v11 = vld [vmem:[#allocation74_spill] sm:$0xff] }
 0x3a1   :  { %4918 = vmatprep.subr.bf16.mxu0 %v9172_v42  ;;  %4982 = vmatprep.subr.bf16.mxu1 %v9173_v16  ;;  %v9183_v42 = vld [vmem:[#allocation75_spill] sm:$0xff]  ;;  %v9184_v16 = vld [vmem:[#allocation76_spill] sm:$0xff] }
 0x3a4   :  { %4920 = vmatpush1.bf16.msra.mxu0 %v9174_v49  ;;  %4984 = vmatpush1.bf16.msra.mxu1 %v9175_v50  ;;  %v9185_v49 = vld [vmem:[#allocation77_spill] sm:$0xff]  ;;  %v9186_v50 = vld [vmem:[#allocation78_spill] sm:$0xff] }
 0x3a5   :  { %4922 = vmatprep.subr.bf16.mxu0 %v9176_v51  ;;  %4986 = vmatprep.subr.bf16.mxu1 %v9177_v55  ;;  %v9187_v51 = vld [vmem:[#allocation79_spill] sm:$0xff]  ;;  %v9188_v55 = vld [vmem:[#allocation80_spill] sm:$0xff] }
 0x3a8   :  { %4924 = vmatpush1.bf16.msra.mxu0 %v9178_v61  ;;  %4988 = vmatpush1.bf16.msra.mxu1 %v9179_v62  ;;  %v9189_v61 = vld [vmem:[#allocation81_spill] sm:$0xff]  ;;  %v9190_v62 = vld [vmem:[#allocation82_spill] sm:$0xff] }
 0x3a9   :  { %4926 = vmatprep.subr.bf16.mxu0 %v9180_v63  ;;  %4990 = vmatprep.subr.bf16.mxu1 %v9181_v4  ;;  %v9191_v63 = vld [vmem:[#allocation83_spill] sm:$0xff]  ;;  %v9192_v4 = vld [vmem:[#allocation84_spill] sm:$0xff] }
 0x3ac   :  { %4928 = vmatpush1.bf16.msra.mxu0 %v9182_v11  ;;  %4992 = vmatpush1.bf16.msra.mxu1 %v9183_v42  ;;  %v9193_v11 = vld [vmem:[#allocation85_spill] sm:$0xff] }
 0x3ad   :  { %4930 = vmatprep.subr.bf16.mxu0 %v9184_v16  ;;  %4994 = vmatprep.subr.bf16.mxu1 %v9185_v49 }
 0x3b0   :  { %4932 = vmatpush1.bf16.msra.mxu0 %v9186_v50  ;;  %4996 = vmatpush1.bf16.msra.mxu1 %v9187_v51 }
 0x3b1   :  { %4934 = vmatprep.subr.bf16.mxu0 %v9188_v55  ;;  %4998 = vmatprep.subr.bf16.mxu1 %v9189_v61  ;;  %v9196_v61 = vld [vmem:[#allocation151_spill] sm:$0xff] }
 0x3b4   :  { %4936 = vmatpush1.bf16.msra.mxu0 %v9190_v62  ;;  %5000 = vmatpush1.bf16.msra.mxu1 %v9191_v63 }
 0x3b5   :  { %5002 = vmatprep.subr.bf16.mxu0 %v9192_v4  ;;  %5066 = vmatprep.subr.bf16.mxu1 %v9193_v11 }
 0x40a   :  { %v1526_v42 = vpop.f32.mrb[4].mxu0  ;;  %v1597_v16 = vpop.f32.mrb[4].mxu1 }
 0x40b   :  { %v6309_v49 = vadd.f32 %v1526_v42, %v9194_v38  ;;  %v1528_v10 = vpop.f32.mrb[5].mxu0  ;;  %v1599_v50 = vpop.f32.mrb[5].mxu1  ;;  %v6325_v62 = vadd.f32 %v1597_v16, %v9196_v61  ;;  %v9197_v16 = vld [vmem:[#allocation155_spill] sm:$0xff] }
 0x40c   :  { %v6310_v51 = vadd.f32 %v1528_v10, %v9195_v9 }
 0x40d   :  { %v3949_v29 = vmul.f32 -1.442695, %v6309_v49  ;;  %v7717_v49 = vld [vmem:[%s8532_s1] sm:$0xff] }
 0x40e   :  { %v3950_v55 = vmul.f32 -1.442695, %v6310_v51  ;;  %vm2173_vm5 = vcmp.eq.s32.totalorder %v7717_v49, 2  ;;  %vm2537_vm7 = vcmp.eq.s32.totalorder %v7717_v49, 3  ;;  %vm2901_vm9 = vcmp.eq.s32.totalorder %v7717_v49, 4 }
 0x40f   :  { %6450 = vpow2.f32 %v3949_v29  ;;  %v2175_v51 = vsel %vm2173_vm5, 1, %v9101_v26 }
 0x410   :  { %6452 = vpow2.f32 %v3950_v55  ;;  %2177 = vperm.xlu1 %6385, %v2175_v51  }
 0x411   :  { %6454 = vtanh.f32 %v6325_v62 }
 0x419   :  { %v6451_v47 = vpop.eup %6450 }
 0x41a   :  { %v6453_v63 = vpop.eup %6452  ;;  %v1760_v8 = vadd.f32 1.0, %v6451_v47  ;;  %v6326_v47 = vadd.f32 %v1599_v50, %v7405_v5 }
 0x41b   :  { %v1766_v4 = vadd.f32 1.0, %v6453_v63  ;;  %v6455_v11 = vpop.eup %6454 }
 0x41c   :  { %6456 = vrcp.f32 %v1760_v8  ;;  %v3951_v29 = vmul.f32 -1.442695, %v6326_v47 }
 0x41d   :  { %6458 = vrcp.f32 %v1766_v4 }
 0x426   :  { %v6457_v41 = vpop.eup %6456 }
 0x427   :  { %v6459_v42 = vpop.eup %6458  ;;  %v1778_v38 = vmul.f32 %v6457_v41, %v6455_v11 }
 0x428   :  { %v1777_v37 = vmul.f32 %v6459_v42, %v7557_v36 }
 0x42a   :  { %v7712_v10 = vadd.f32 %v1778_v38, %v1777_v37 }
 0x44a   :  { %v1668_v55 = vpop.f32.mrb[20].mxu0  ;;  %v1739_v62 = vpop.f32.mrb[20].mxu1 }
 0x44b   :  { %v1753_v63 = vadd.f32 %v1668_v55, %v9102_v25  ;;  %v1670_v4 = vpop.f32.mrb[21].mxu0  ;;  %v1741_v11 = vpop.f32.mrb[21].mxu1  ;;  %v1755_v42 = vadd.f32 %v1739_v62, %v9197_v16 }
 0x44c   :  { %v1754_v41 = vadd.f32 %v1670_v4, %v9103_v40  ;;  %v1756_v8 = vadd.f32 %v1741_v11, %v7400_v52 }
 0x44d   :  { %v3952_v38 = vmul.f32 -1.442695, %v1753_v63 }
 0x44e   :  { %v3953_v37 = vmul.f32 -1.442695, %v1754_v41  ;;  %v3954_v36 = vmul.f32 -1.442695, %v1756_v8 }
 0x44f   :  { %6460 = vpow2.f32 %v3952_v38 }
 0x450   :  { %6462 = vpow2.f32 %v3953_v37 }
 0x451   :  { %6464 = vpow2.f32 %v3951_v29 }
 0x452   :  { %6466 = vpow2.f32 %v3954_v36 }
 0x453   :  { %6468 = vtanh.f32 %v1755_v42 }
 0x459   :  { %v6461_v51 = vpop.eup %6460 }
 0x45a   :  { %v6463_v26 = vpop.eup %6462  ;;  %v1785_v55 = vadd.f32 1.0, %v6461_v51 }
 0x45b   :  { %v1791_v25 = vadd.f32 1.0, %v6463_v26  ;;  %v6465_v63 = vpop.eup %6464  ;;  %v1814_v26 = vpop.permute.xlu1 %1813 }
 0x45c   :  { %6470 = vrcp.f32 %v1785_v55  ;;  %v6467_v4 = vpop.eup %6466  ;;  %v1773_v8 = vadd.f32 1.0, %v6465_v63  ;;  %vm1815_vm6 = vcmp.eq.s32.totalorder %v1814_v26, 1  ;;  %v9199_v63 = vld [vmem:[#allocation98_spill] sm:$0xff]  ;;  %v9208_v26 = vld [vmem:[#allocation109_spill] sm:$0xff] }
 0x45d   :  { %6472 = vrcp.f32 %v1791_v25  ;;  %v6469_v41 = vpop.eup %6468  ;;  %v1798_v11 = vadd.f32 1.0, %v6467_v4  ;;  %v9200_v4 = vld [vmem:[#allocation100_spill] sm:$0xff] }
 0x45e   :  { %6474 = vtanh.f32 %v7712_v10 }
 0x45f   :  { %6476 = vrcp.f32 %v1798_v11  ;;  %v9205_v11 = vld [vmem:[#allocation104_spill] sm:$0xff] }
 0x466   :  { %v6471_v38 = vpop.eup %6470 }
 0x467   :  { %v6473_v50 = vpop.eup %6472  ;;  %v1803_v37 = vmul.f32 %v6471_v38, %v6469_v41  ;;  %v9201_v41 = vld [vmem:[#allocation99_spill] sm:$0xff]  ;;  %v9202_v38 = vld [vmem:[#allocation102_spill] sm:$0xff] }
 0x468   :  { %v1802_v47 = vmul.f32 %v6473_v50, %v7567_v24  ;;  %v6475_v25 = vpop.eup %6474  ;;  %v9203_v50 = vld [vmem:[#allocation103_spill] sm:$0xff] }
 0x469   :  { %v6477_v29 = vpop.eup %6476 }
 0x46a   :  { %v7727_v62 = vadd.f32 %v1803_v37, %v1802_v47  ;;  %v9204_v37 = vld [vmem:[#allocation105_spill] sm:$0xff]  ;;  %v9206_v47 = vld [vmem:[#allocation106_spill] sm:$0xff] }
 0x46c   :  { %6478 = vtanh.f32 %v7727_v62 }
 0x46d   :  { %6480 = vrcp.f32 %v1773_v8  ;;  %v9207_v8 = vld [vmem:[#allocation107_spill] sm:$0xff] }
 0x476   :  { %v6479_v36 = vpop.eup %6478 }
 0x477   :  { %v6481_v42 = vpop.eup %6480  ;;  %v1806_v51 = vmul.f32 %v6479_v36, %v6477_v29  ;;  %v9210_v29 = vld [vmem:[#allocation110_spill] sm:$0xff]  ;;  %v9211_v36 = vld [vmem:[#allocation111_spill] sm:$0xff] }
 0x478   :  { %v7731_v55 = vmul.f32 %v6481_v42, %v6475_v25  ;;  %v9209_v25 = vld [vmem:[#allocation108_spill] sm:$0xff]  ;;  %v9212_v42 = vld [vmem:[#allocation113_spill] sm:$0xff] }
 0x479   :  { %v7734_v24 = vsel %vm1815_vm6, %v1806_v51, %v7574_v30  ;;  %1888 = vmatprep.mubr.f32.mxu0 %v1806_v51  ;;  %1959 = vmatprep.mubr.f32.mxu1 %v1806_v51  ;;  %v9198_v30 = vld [vmem:[#allocation97_spill] sm:$0xff] }
 0x47a   :  { %1889 = vmatmul.mubr.f32.vlgmr.msra.gmra.mrb[6].mxu0 %v7731_v55  ;;  %1960 = vmatmul.mubr.f32.vlgmr.msra.gmra.mrb[6].mxu1 %v7731_v55 }
 0x47b   :  { %5004 = vmatpush1.bf16.msra.mxu0 %v9010_v53  ;;  %5068 = vmatpush1.bf16.msra.mxu1 %v9011_v46 }
 0x47c   :  { %2030 = vmatprep.mubr.f32.mxu0 %v1806_v51  ;;  %2101 = vmatprep.mubr.f32.mxu1 %v1806_v51  ;;  %v9213_v51 = vld [vmem:[#allocation112_spill] sm:$0xff] }
 0x47d   :  { %5006 = vmatprep.subr.bf16.mxu0 %v9012_v20  ;;  %5070 = vmatprep.subr.bf16.mxu1 %v9013_v22 }
 0x47f   :  { %5008 = vmatpush1.bf16.msra.mxu0 %v9014_v59  ;;  %5072 = vmatpush1.bf16.msra.mxu1 %v9104_v7 }
 0x480   :  { %5010 = vmatprep.subr.bf16.mxu0 %v9105_v12  ;;  %5074 = vmatprep.subr.bf16.mxu1 %v9106_v21 }
 0x483   :  { %5012 = vmatpush1.bf16.msra.mxu0 %v9107_v2  ;;  %5076 = vmatpush1.bf16.msra.mxu1 %v9108_v34 }
 0x484   :  { %5014 = vmatprep.subr.bf16.mxu0 %v9109_v23  ;;  %5078 = vmatprep.subr.bf16.mxu1 %v9198_v30 }
 0x487   :  { %5016 = vmatpush1.bf16.msra.mxu0 %v9199_v63  ;;  %5080 = vmatpush1.bf16.msra.mxu1 %v9200_v4 }
 0x488   :  { %5018 = vmatprep.subr.bf16.mxu0 %v9201_v41  ;;  %5082 = vmatprep.subr.bf16.mxu1 %v9202_v38 }
 0x48b   :  { %5020 = vmatpush1.bf16.msra.mxu0 %v9203_v50  ;;  %5084 = vmatpush1.bf16.msra.mxu1 %v9204_v37  ;;  %v9214_v37 = vld [vmem:[#allocation115_spill] sm:$0xff] }
 0x48c   :  { %5022 = vmatprep.subr.bf16.mxu0 %v9205_v11  ;;  %5086 = vmatprep.subr.bf16.mxu1 %v9206_v47  ;;  %v9215_v11 = vld [vmem:[#allocation117_spill] sm:$0xff] }
 0x48f   :  { %5024 = vmatpush1.bf16.msra.mxu0 %v9207_v8  ;;  %5088 = vmatpush1.bf16.msra.mxu1 %v9208_v26 }
 0x490   :  { %5026 = vmatprep.subr.bf16.mxu0 %v9209_v25  ;;  %5090 = vmatprep.subr.bf16.mxu1 %v9210_v29 }
 0x493   :  { %5028 = vmatpush1.bf16.msra.mxu0 %v9211_v36  ;;  %5092 = vmatpush1.bf16.msra.mxu1 %v9212_v42 }
 0x494   :  { %5030 = vmatprep.subr.bf16.mxu0 %v9213_v51  ;;  %5094 = vmatprep.subr.bf16.mxu1 %v9126_v3 }
 0x497   :  { %5032 = vmatpush1.bf16.msra.mxu0 %v9214_v37  ;;  %5096 = vmatpush1.bf16.msra.mxu1 %v9215_v11 }
 0x498   :  { %5034 = vmatprep.subr.bf16.mxu0 %v9129_v33  ;;  %5098 = vmatprep.subr.bf16.mxu1 %v9130_v14 }
 0x49b   :  { %5036 = vmatpush1.bf16.msra.mxu0 %v9131_v57  ;;  %5100 = vmatpush1.bf16.msra.mxu1 %v9132_v13 }
 0x49c   :  { %5038 = vmatprep.subr.bf16.mxu0 %v9133_v17  ;;  %5102 = vmatprep.subr.bf16.mxu1 %v9134_v15 }
 0x49f   :  { %5040 = vmatpush1.bf16.msra.mxu0 %v9135_v39  ;;  %5104 = vmatpush1.bf16.msra.mxu1 %v9136_v45 }
 0x4a0   :  { %5042 = vmatprep.subr.bf16.mxu0 %v9048_v48  ;;  %5106 = vmatprep.subr.bf16.mxu1 %v9137_v56 }
 0x4a3   :  { %5044 = vmatpush1.bf16.msra.mxu0 %v9138_v58  ;;  %5108 = vmatpush1.bf16.msra.mxu1 %v9051_v27 }
 0x4a4   :  { %5046 = vmatprep.subr.bf16.mxu0 %v9052_v44  ;;  %5110 = vmatprep.subr.bf16.mxu1 %v9053_v1 }
 0x4a7   :  { %5048 = vmatpush1.bf16.msra.mxu0 %v9054_v32  ;;  %5112 = vmatpush1.bf16.msra.mxu1 %v9055_v6  ;;  %v9216_v32 = vld [vmem:[#allocation142_spill] sm:$0xff]  ;;  %v9217_v6 = vld [vmem:[#allocation143_spill] sm:$0xff] }
 0x4a8   :  { %5050 = vmatprep.subr.bf16.mxu0 %v9056_v60  ;;  %5114 = vmatprep.subr.bf16.mxu1 %v9057_v43  ;;  %v9218_v60 = vld [vmem:[#allocation145_spill] sm:$0xff]  ;;  %v9219_v43 = vld [vmem:[#allocation144_spill] sm:$0xff] }
 0x4ab   :  { %5052 = vmatpush1.bf16.msra.mxu0 %v9058_v35  ;;  %5116 = vmatpush1.bf16.msra.mxu1 %v7268_v31  ;;  %v9220_v35 = vld [vmem:[#allocation146_spill] sm:$0xff]  ;;  %v9221_v31 = vld [vmem:[#allocation147_spill] sm:$0xff] }
 0x4ac   :  { %5054 = vmatprep.subr.bf16.mxu0 %v9059_v54  ;;  %5118 = vmatprep.subr.bf16.mxu1 %v9060_v0  ;;  %v9222_v54 = vld [vmem:[#allocation148_spill] sm:$0xff] }
 0x4ad   :  { %v9223_v0 = vld [vmem:[#allocation20_spill] sm:$0xff] }
 0x4af   :  { %5056 = vmatpush1.bf16.msra.mxu0 %v7274_v28  ;;  %5120 = vmatpush1.bf16.msra.mxu1 %v7280_v19  ;;  %v9224_v28 = vld [vmem:[#allocation21_spill] sm:$0xff] }
 0x4b0   :  { %5058 = vmatprep.subr.bf16.mxu0 %v7277_v18  ;;  %5122 = vmatprep.subr.bf16.mxu1 %v9216_v32  ;;  %v9225_v32 = vld [vmem:[#allocation22_spill] sm:$0xff]  ;;  %v9234_v18 = vld [vmem:[#allocation31_spill] sm:$0xff]  ;;  %v9289_v19 = vld [vmem:[#allocation149_spill] sm:$0xff] }
 0x4b3   :  { %5060 = vmatpush1.bf16.msra.mxu0 %v9217_v6  ;;  %5124 = vmatpush1.bf16.msra.mxu1 %v9218_v60  ;;  %v9226_v6 = vld [vmem:[#allocation23_spill] sm:$0xff]  ;;  %v9227_v60 = vld [vmem:[#allocation24_spill] sm:$0xff] }
 0x4b4   :  { %5062 = vmatprep.subr.bf16.mxu0 %v9219_v43  ;;  %5126 = vmatprep.subr.bf16.mxu1 %v9220_v35  ;;  %v9228_v43 = vld [vmem:[#allocation25_spill] sm:$0xff]  ;;  %v9229_v35 = vld [vmem:[#allocation26_spill] sm:$0xff] }
 0x4b7   :  { %5064 = vmatpush1.bf16.msra.mxu0 %v9221_v31  ;;  %5128 = vmatpush1.bf16.msra.mxu1 %v9222_v54  ;;  %v9230_v31 = vld [vmem:[#allocation27_spill] sm:$0xff]  ;;  %v9231_v54 = vld [vmem:[#allocation28_spill] sm:$0xff] }
 0x4b8   :  { %5130 = vmatprep.subr.bf16.mxu0 %v9223_v0  ;;  %5194 = vmatprep.subr.bf16.mxu1 %v9224_v28  ;;  %v9232_v0 = vld [vmem:[#allocation29_spill] sm:$0xff]  ;;  %v9233_v28 = vld [vmem:[#allocation30_spill] sm:$0xff] }
 0x4ba   :  { %2031 = vmatmul.mubr.f32.vlgmr.msra.gmra.mrb[22].mxu0 %v7731_v55  ;;  %2102 = vmatmul.mubr.f32.vlgmr.msra.gmra.mrb[22].mxu1 %v7731_v55  ;;  %v9235_v55 = vld [vmem:[#allocation32_spill] sm:$0xff] }
 0x4bb   :  { %5132 = vmatpush1.bf16.msra.mxu0 %v9225_v32  ;;  %5196 = vmatpush1.bf16.msra.mxu1 %v9226_v6  ;;  %v9236_v32 = vld [vmem:[#allocation33_spill] sm:$0xff]  ;;  %v9237_v6 = vld [vmem:[#allocation34_spill] sm:$0xff] }
 0x4bc   :  { %5134 = vmatprep.subr.bf16.mxu0 %v9227_v60  ;;  %5198 = vmatprep.subr.bf16.mxu1 %v9228_v43  ;;  %v9238_v60 = vld [vmem:[#allocation35_spill] sm:$0xff]  ;;  %v9239_v43 = vld [vmem:[#allocation36_spill] sm:$0xff] }
 0x4bf   :  { %5136 = vmatpush1.bf16.msra.mxu0 %v9229_v35  ;;  %5200 = vmatpush1.bf16.msra.mxu1 %v9230_v31  ;;  %v9240_v35 = vld [vmem:[#allocation37_spill] sm:$0xff]  ;;  %v9241_v31 = vld [vmem:[#allocation38_spill] sm:$0xff] }
 0x4c0   :  { %5138 = vmatprep.subr.bf16.mxu0 %v9231_v54  ;;  %5202 = vmatprep.subr.bf16.mxu1 %v9232_v0  ;;  %v9242_v54 = vld [vmem:[#allocation39_spill] sm:$0xff]  ;;  %v9243_v0 = vld [vmem:[#allocation40_spill] sm:$0xff] }
 0x4c3   :  { %5140 = vmatpush1.bf16.msra.mxu0 %v9233_v28  ;;  %5204 = vmatpush1.bf16.msra.mxu1 %v9234_v18  ;;  %v9244_v28 = vld [vmem:[#allocation41_spill] sm:$0xff]  ;;  %v9245_v18 = vld [vmem:[#allocation42_spill] sm:$0xff] }
 0x4c4   :  { %5142 = vmatprep.subr.bf16.mxu0 %v9235_v55  ;;  %5206 = vmatprep.subr.bf16.mxu1 %v9236_v32  ;;  %v9246_v55 = vld [vmem:[#allocation43_spill] sm:$0xff]  ;;  %v9247_v32 = vld [vmem:[#allocation44_spill] sm:$0xff] }
 0x4c7   :  { %5144 = vmatpush1.bf16.msra.mxu0 %v9237_v6  ;;  %5208 = vmatpush1.bf16.msra.mxu1 %v9238_v60  ;;  %v9248_v6 = vld [vmem:[#allocation45_spill] sm:$0xff]  ;;  %v9249_v60 = vld [vmem:[#allocation46_spill] sm:$0xff] }
 0x4c8   :  { %5146 = vmatprep.subr.bf16.mxu0 %v9239_v43  ;;  %5210 = vmatprep.subr.bf16.mxu1 %v9240_v35  ;;  %v9250_v43 = vld [vmem:[#allocation47_spill] sm:$0xff]  ;;  %v9251_v35 = vld [vmem:[#allocation48_spill] sm:$0xff] }
 0x4cb   :  { %5148 = vmatpush1.bf16.msra.mxu0 %v9241_v31  ;;  %5212 = vmatpush1.bf16.msra.mxu1 %v9242_v54  ;;  %v9252_v31 = vld [vmem:[#allocation49_spill] sm:$0xff]  ;;  %v9253_v54 = vld [vmem:[#allocation50_spill] sm:$0xff] }
 0x4cc   :  { %5150 = vmatprep.subr.bf16.mxu0 %v9243_v0  ;;  %5214 = vmatprep.subr.bf16.mxu1 %v9244_v28  ;;  %v9254_v0 = vld [vmem:[#allocation51_spill] sm:$0xff]  ;;  %v9255_v28 = vld [vmem:[#allocation52_spill] sm:$0xff] }
 0x4cf   :  { %5152 = vmatpush1.bf16.msra.mxu0 %v9245_v18  ;;  %5216 = vmatpush1.bf16.msra.mxu1 %v9246_v55  ;;  %v9256_v18 = vld [vmem:[#allocation53_spill] sm:$0xff]  ;;  %v9257_v55 = vld [vmem:[#allocation54_spill] sm:$0xff] }
 0x4d0   :  { %5154 = vmatprep.subr.bf16.mxu0 %v9247_v32  ;;  %5218 = vmatprep.subr.bf16.mxu1 %v9248_v6  ;;  %v9258_v32 = vld [vmem:[#allocation55_spill] sm:$0xff]  ;;  %v9259_v6 = vld [vmem:[#allocation56_spill] sm:$0xff] }
 0x4d3   :  { %5156 = vmatpush1.bf16.msra.mxu0 %v9249_v60  ;;  %5220 = vmatpush1.bf16.msra.mxu1 %v9250_v43  ;;  %v9260_v60 = vld [vmem:[#allocation57_spill] sm:$0xff]  ;;  %v9261_v43 = vld [vmem:[#allocation58_spill] sm:$0xff] }
 0x4d4   :  { %5158 = vmatprep.subr.bf16.mxu0 %v9251_v35  ;;  %5222 = vmatprep.subr.bf16.mxu1 %v9252_v31  ;;  %v9262_v35 = vld [vmem:[#allocation59_spill] sm:$0xff]  ;;  %v9263_v31 = vld [vmem:[#allocation60_spill] sm:$0xff] }
 0x4d7   :  { %5160 = vmatpush1.bf16.msra.mxu0 %v9253_v54  ;;  %5224 = vmatpush1.bf16.msra.mxu1 %v9254_v0  ;;  %v9264_v54 = vld [vmem:[#allocation61_spill] sm:$0xff]  ;;  %v9265_v0 = vld [vmem:[#allocation62_spill] sm:$0xff] }
 0x4d8   :  { %5162 = vmatprep.subr.bf16.mxu0 %v9255_v28  ;;  %5226 = vmatprep.subr.bf16.mxu1 %v9256_v18  ;;  %v9266_v28 = vld [vmem:[#allocation63_spill] sm:$0xff]  ;;  %v9267_v18 = vld [vmem:[#allocation64_spill] sm:$0xff] }
 0x4db   :  { %5164 = vmatpush1.bf16.msra.mxu0 %v9257_v55  ;;  %5228 = vmatpush1.bf16.msra.mxu1 %v9258_v32  ;;  %v9268_v55 = vld [vmem:[#allocation65_spill] sm:$0xff]  ;;  %v9269_v32 = vld [vmem:[#allocation66_spill] sm:$0xff] }
 0x4dc   :  { %5166 = vmatprep.subr.bf16.mxu0 %v9259_v6  ;;  %5230 = vmatprep.subr.bf16.mxu1 %v9260_v60  ;;  %v9270_v6 = vld [vmem:[#allocation67_spill] sm:$0xff]  ;;  %v9271_v60 = vld [vmem:[#allocation68_spill] sm:$0xff] }
 0x4df   :  { %5168 = vmatpush1.bf16.msra.mxu0 %v9261_v43  ;;  %5232 = vmatpush1.bf16.msra.mxu1 %v9262_v35  ;;  %v9272_v43 = vld [vmem:[#allocation69_spill] sm:$0xff]  ;;  %v9273_v35 = vld [vmem:[#allocation70_spill] sm:$0xff] }
 0x4e0   :  { %5170 = vmatprep.subr.bf16.mxu0 %v9263_v31  ;;  %5234 = vmatprep.subr.bf16.mxu1 %v9264_v54  ;;  %v9274_v31 = vld [vmem:[#allocation71_spill] sm:$0xff]  ;;  %v9275_v54 = vld [vmem:[#allocation72_spill] sm:$0xff] }
 0x4e3   :  { %5172 = vmatpush1.bf16.msra.mxu0 %v9265_v0  ;;  %5236 = vmatpush1.bf16.msra.mxu1 %v9266_v28  ;;  %v9276_v0 = vld [vmem:[#allocation73_spill] sm:$0xff]  ;;  %v9277_v28 = vld [vmem:[#allocation74_spill] sm:$0xff] }
 0x4e4   :  { %5174 = vmatprep.subr.bf16.mxu0 %v9267_v18  ;;  %5238 = vmatprep.subr.bf16.mxu1 %v9268_v55  ;;  %v9278_v18 = vld [vmem:[#allocation75_spill] sm:$0xff]  ;;  %v9279_v55 = vld [vmem:[#allocation76_spill] sm:$0xff] }
 0x4e7   :  { %5176 = vmatpush1.bf16.msra.mxu0 %v9269_v32  ;;  %5240 = vmatpush1.bf16.msra.mxu1 %v9270_v6  ;;  %v9280_v32 = vld [vmem:[#allocation77_spill] sm:$0xff]  ;;  %v9281_v6 = vld [vmem:[#allocation78_spill] sm:$0xff] }
 0x4e8   :  { %5178 = vmatprep.subr.bf16.mxu0 %v9271_v60  ;;  %5242 = vmatprep.subr.bf16.mxu1 %v9272_v43  ;;  %v9282_v60 = vld [vmem:[#allocation79_spill] sm:$0xff]  ;;  %v9283_v43 = vld [vmem:[#allocation80_spill] sm:$0xff] }
 0x4eb   :  { %5180 = vmatpush1.bf16.msra.mxu0 %v9273_v35  ;;  %5244 = vmatpush1.bf16.msra.mxu1 %v9274_v31  ;;  %v9284_v35 = vld [vmem:[#allocation81_spill] sm:$0xff]  ;;  %v9285_v31 = vld [vmem:[#allocation82_spill] sm:$0xff] }
 0x4ec   :  { %5182 = vmatprep.subr.bf16.mxu0 %v9275_v54  ;;  %5246 = vmatprep.subr.bf16.mxu1 %v9276_v0  ;;  %v9286_v54 = vld [vmem:[#allocation83_spill] sm:$0xff]  ;;  %v9287_v0 = vld [vmem:[#allocation84_spill] sm:$0xff] }
 0x4ef   :  { %5184 = vmatpush1.bf16.msra.mxu0 %v9277_v28  ;;  %5248 = vmatpush1.bf16.msra.mxu1 %v9278_v18  ;;  %v9288_v28 = vld [vmem:[#allocation85_spill] sm:$0xff] }
 0x4f0   :  { %5186 = vmatprep.subr.bf16.mxu0 %v9279_v55  ;;  %5250 = vmatprep.subr.bf16.mxu1 %v9280_v32 }
 0x4f3   :  { %5188 = vmatpush1.bf16.msra.mxu0 %v9281_v6  ;;  %5252 = vmatpush1.bf16.msra.mxu1 %v9282_v60 }
 0x4f4   :  { %5190 = vmatprep.subr.bf16.mxu0 %v9283_v43  ;;  %5254 = vmatprep.subr.bf16.mxu1 %v9284_v35 }
 0x4f7   :  { %5192 = vmatpush1.bf16.msra.mxu0 %v9285_v31  ;;  %5256 = vmatpush1.bf16.msra.mxu1 %v9286_v54 }
 0x4f8   :  { %5258 = vmatprep.subr.bf16.mxu0 %v9287_v0  ;;  %5322 = vmatprep.subr.bf16.mxu1 %v9288_v28 }
 0x54d   :  { %v1890_v18 = vpop.f32.mrb[6].mxu0  ;;  %v1961_v55 = vpop.f32.mrb[6].mxu1 }
 0x54e   :  { %v6311_v32 = vadd.f32 %v1890_v18, %v9289_v19  ;;  %v1892_v1 = vpop.f32.mrb[7].mxu0  ;;  %v1963_v6 = vpop.f32.mrb[7].mxu1  ;;  %v6327_v31 = vadd.f32 %v1961_v55, %v9196_v61 }
 0x54f   :  { %v6312_v60 = vadd.f32 %v1892_v1, %v9195_v9 }
 0x550   :  { %v3955_v44 = vmul.f32 -1.442695, %v6311_v32 }
 0x551   :  { %v3956_v43 = vmul.f32 -1.442695, %v6312_v60 }
 0x552   :  { %6482 = vpow2.f32 %v3955_v44  ;;  %v9290_v44 = vmov 0  }
 0x553   :  { %6484 = vpow2.f32 %v3956_v43  ;;  %v2539_v32 = vsel %vm2537_vm7, 1, %v9290_v44 }
 0x554   :  { %6486 = vtanh.f32 %v6327_v31  ;;  %2541 = vperm.xlu0 %6384, %v2539_v32  }
 0x55c   :  { %v6483_v35 = vpop.eup %6482 }
 0x55d   :  { %v6485_v54 = vpop.eup %6484  ;;  %v2124_v27 = vadd.f32 1.0, %v6483_v35  ;;  %v9291_v35 = vld [vmem:[#allocation152_spill] sm:$0xff] }
 0x55e   :  { %v2130_v0 = vadd.f32 1.0, %v6485_v54  ;;  %v6487_v28 = vpop.eup %6486 }
 0x55f   :  { %6488 = vrcp.f32 %v2124_v27 }
 0x560   :  { %6490 = vrcp.f32 %v2130_v0 }
 0x569   :  { %v6489_v58 = vpop.eup %6488 }
 0x56a   :  { %v6491_v18 = vpop.eup %6490  ;;  %v2142_v19 = vmul.f32 %v6489_v58, %v6487_v28 }
 0x56b   :  { %v2141_v56 = vmul.f32 %v6491_v18, %v7712_v10 }
 0x56d   :  { %v7872_v1 = vadd.f32 %v2142_v19, %v2141_v56  ;;  %v6328_v19 = vadd.f32 %v1963_v6, %v7405_v5 }
 0x56f   :  { %v3957_v56 = vmul.f32 -1.442695, %v6328_v19 }
 0x58d   :  { %v2032_v60 = vpop.f32.mrb[22].mxu0  ;;  %v2103_v43 = vpop.f32.mrb[22].mxu1 }
 0x58e   :  { %v2117_v31 = vadd.f32 %v2032_v60, %v9291_v35  ;;  %v2034_v54 = vpop.f32.mrb[23].mxu0  ;;  %v2105_v27 = vpop.f32.mrb[23].mxu1  ;;  %v2119_v10 = vadd.f32 %v2103_v43, %v9197_v16 }
 0x58f   :  { %v2118_v0 = vadd.f32 %v2034_v54, %v9103_v40  ;;  %v2120_v28 = vadd.f32 %v2105_v27, %v7400_v52 }
 0x590   :  { %v3958_v55 = vmul.f32 -1.442695, %v2117_v31 }
 0x591   :  { %v3959_v61 = vmul.f32 -1.442695, %v2118_v0  ;;  %v3960_v58 = vmul.f32 -1.442695, %v2120_v28 }
 0x592   :  { %6492 = vpow2.f32 %v3958_v55 }
 0x593   :  { %6494 = vpow2.f32 %v3959_v61 }
 0x594   :  { %6496 = vpow2.f32 %v3957_v56  ;;  %v2178_v56 = vpop.permute.xlu1 %2177 }
 0x595   :  { %6498 = vpow2.f32 %v3960_v58  ;;  %vm2179_vm8 = vcmp.eq.s32.totalorder %v2178_v56, 1  ;;  %v9302_v56 = vld [vmem:[#allocation134_spill] sm:$0xff] }
 0x596   :  { %6500 = vtanh.f32 %v2119_v10 }
 0x59c   :  { %v6493_v18 = vpop.eup %6492 }
 0x59d   :  { %v6495_v32 = vpop.eup %6494  ;;  %v2149_v60 = vadd.f32 1.0, %v6493_v18 }
 0x59e   :  { %v2155_v35 = vadd.f32 1.0, %v6495_v32  ;;  %v6497_v31 = vpop.eup %6496 }
 0x59f   :  { %6502 = vrcp.f32 %v2149_v60  ;;  %v6499_v54 = vpop.eup %6498  ;;  %v2137_v28 = vadd.f32 1.0, %v6497_v31  ;;  %v9293_v31 = vld [vmem:[#allocation104_spill] sm:$0xff] }
 0x5a0   :  { %6504 = vrcp.f32 %v2155_v35  ;;  %v6501_v61 = vpop.eup %6500  ;;  %v2162_v27 = vadd.f32 1.0, %v6499_v54  ;;  %v9294_v54 = vld [vmem:[#allocation126_spill] sm:$0xff] }
 0x5a1   :  { %6506 = vtanh.f32 %v7872_v1 }
 0x5a2   :  { %6508 = vrcp.f32 %v2162_v27  ;;  %v9299_v27 = vld [vmem:[#allocation131_spill] sm:$0xff] }
 0x5a9   :  { %v6503_v0 = vpop.eup %6502 }
 0x5aa   :  { %v6505_v6 = vpop.eup %6504  ;;  %v2167_v55 = vmul.f32 %v6503_v0, %v6501_v61  ;;  %v9295_v61 = vld [vmem:[#allocation127_spill] sm:$0xff]  ;;  %v9296_v0 = vld [vmem:[#allocation129_spill] sm:$0xff] }
 0x5ab   :  { %v2166_v19 = vmul.f32 %v6505_v6, %v7727_v62  ;;  %v6507_v35 = vpop.eup %6506  ;;  %v9297_v6 = vld [vmem:[#allocation128_spill] sm:$0xff] }
 0x5ac   :  { %v6509_v58 = vpop.eup %6508 }
 0x5ad   :  { %v7882_v43 = vadd.f32 %v2167_v55, %v2166_v19  ;;  %v9298_v55 = vld [vmem:[#allocation130_spill] sm:$0xff]  ;;  %v9300_v19 = vld [vmem:[#allocation133_spill] sm:$0xff] }
 0x5af   :  { %6510 = vtanh.f32 %v7882_v43 }
 0x5b0   :  { %6512 = vrcp.f32 %v2137_v28  ;;  %v9301_v28 = vld [vmem:[#allocation132_spill] sm:$0xff] }
 0x5b9   :  { %v6511_v10 = vpop.eup %6510 }
 0x5ba   :  { %v6513_v18 = vpop.eup %6512  ;;  %v2170_v32 = vmul.f32 %v6511_v10, %v6509_v58  ;;  %v9304_v58 = vld [vmem:[#allocation137_spill] sm:$0xff]  ;;  %v9305_v10 = vld [vmem:[#allocation136_spill] sm:$0xff] }
 0x5bb   :  { %v7886_v60 = vmul.f32 %v6513_v18, %v6507_v35  ;;  %v9303_v35 = vld [vmem:[#allocation135_spill] sm:$0xff]  ;;  %v9306_v18 = vld [vmem:[#allocation138_spill] sm:$0xff] }
 0x5bc   :  { %v7889_v62 = vsel %vm2179_vm8, %v2170_v32, %v7734_v24  ;;  %2252 = vmatprep.mubr.f32.mxu0 %v2170_v32  ;;  %2323 = vmatprep.mubr.f32.mxu1 %v2170_v32  ;;  %v9292_v24 = vld [vmem:[#allocation105_spill] sm:$0xff] }
 0x5bd   :  { %2253 = vmatmul.mubr.f32.vlgmr.msra.gmra.mrb[8].mxu0 %v7886_v60  ;;  %2324 = vmatmul.mubr.f32.vlgmr.msra.gmra.mrb[8].mxu1 %v7886_v60 }
 0x5be   :  { %5260 = vmatpush1.bf16.msra.mxu0 %v9010_v53  ;;  %5324 = vmatpush1.bf16.msra.mxu1 %v9011_v46 }
 0x5bf   :  { %2394 = vmatprep.mubr.f32.mxu0 %v2170_v32  ;;  %2465 = vmatprep.mubr.f32.mxu1 %v2170_v32  ;;  %v9307_v32 = vld [vmem:[#allocation139_spill] sm:$0xff] }
 0x5c0   :  { %5262 = vmatprep.subr.bf16.mxu0 %v9012_v20  ;;  %5326 = vmatprep.subr.bf16.mxu1 %v9013_v22 }
 0x5c2   :  { %5264 = vmatpush1.bf16.msra.mxu0 %v9014_v59  ;;  %5328 = vmatpush1.bf16.msra.mxu1 %v9104_v7 }
 0x5c3   :  { %5266 = vmatprep.subr.bf16.mxu0 %v9105_v12  ;;  %5330 = vmatprep.subr.bf16.mxu1 %v9106_v21 }
 0x5c6   :  { %5268 = vmatpush1.bf16.msra.mxu0 %v9107_v2  ;;  %5332 = vmatpush1.bf16.msra.mxu1 %v9108_v34 }
 0x5c7   :  { %5270 = vmatprep.subr.bf16.mxu0 %v9109_v23  ;;  %5334 = vmatprep.subr.bf16.mxu1 %v9198_v30 }
 0x5ca   :  { %5272 = vmatpush1.bf16.msra.mxu0 %v9199_v63  ;;  %5336 = vmatpush1.bf16.msra.mxu1 %v9200_v4 }
 0x5cb   :  { %5274 = vmatprep.subr.bf16.mxu0 %v9201_v41  ;;  %5338 = vmatprep.subr.bf16.mxu1 %v9202_v38 }
 0x5ce   :  { %5276 = vmatpush1.bf16.msra.mxu0 %v9203_v50  ;;  %5340 = vmatpush1.bf16.msra.mxu1 %v9292_v24 }
 0x5cf   :  { %5278 = vmatprep.subr.bf16.mxu0 %v9293_v31  ;;  %5342 = vmatprep.subr.bf16.mxu1 %v9206_v47 }
 0x5d2   :  { %5280 = vmatpush1.bf16.msra.mxu0 %v9207_v8  ;;  %5344 = vmatpush1.bf16.msra.mxu1 %v9208_v26 }
 0x5d3   :  { %5282 = vmatprep.subr.bf16.mxu0 %v9209_v25  ;;  %5346 = vmatprep.subr.bf16.mxu1 %v9210_v29 }
 0x5d6   :  { %5284 = vmatpush1.bf16.msra.mxu0 %v9211_v36  ;;  %5348 = vmatpush1.bf16.msra.mxu1 %v9212_v42 }
 0x5d7   :  { %5286 = vmatprep.subr.bf16.mxu0 %v9213_v51  ;;  %5350 = vmatprep.subr.bf16.mxu1 %v9126_v3 }
 0x5da   :  { %5288 = vmatpush1.bf16.msra.mxu0 %v9214_v37  ;;  %5352 = vmatpush1.bf16.msra.mxu1 %v9215_v11 }
 0x5db   :  { %5290 = vmatprep.subr.bf16.mxu0 %v9129_v33  ;;  %5354 = vmatprep.subr.bf16.mxu1 %v9130_v14 }
 0x5de   :  { %5292 = vmatpush1.bf16.msra.mxu0 %v9131_v57  ;;  %5356 = vmatpush1.bf16.msra.mxu1 %v9132_v13 }
 0x5df   :  { %5294 = vmatprep.subr.bf16.mxu0 %v9133_v17  ;;  %5358 = vmatprep.subr.bf16.mxu1 %v9134_v15 }
 0x5e2   :  { %5296 = vmatpush1.bf16.msra.mxu0 %v9135_v39  ;;  %5360 = vmatpush1.bf16.msra.mxu1 %v9136_v45 }
 0x5e3   :  { %5298 = vmatprep.subr.bf16.mxu0 %v9048_v48  ;;  %5362 = vmatprep.subr.bf16.mxu1 %v9294_v54 }
 0x5e6   :  { %5300 = vmatpush1.bf16.msra.mxu0 %v9295_v61  ;;  %5364 = vmatpush1.bf16.msra.mxu1 %v9296_v0 }
 0x5e7   :  { %5302 = vmatprep.subr.bf16.mxu0 %v9297_v6  ;;  %5366 = vmatprep.subr.bf16.mxu1 %v9298_v55  ;;  %v9308_v6 = vld [vmem:[#allocation141_spill] sm:$0xff]  ;;  %v9309_v55 = vld [vmem:[#allocation140_spill] sm:$0xff] }
 0x5ea   :  { %5304 = vmatpush1.bf16.msra.mxu0 %v9299_v27  ;;  %5368 = vmatpush1.bf16.msra.mxu1 %v9300_v19  ;;  %v9310_v27 = vld [vmem:[#allocation142_spill] sm:$0xff]  ;;  %v9311_v19 = vld [vmem:[#allocation143_spill] sm:$0xff] }
 0x5eb   :  { %5306 = vmatprep.subr.bf16.mxu0 %v9301_v28  ;;  %5370 = vmatprep.subr.bf16.mxu1 %v9302_v56  ;;  %v9312_v28 = vld [vmem:[#allocation145_spill] sm:$0xff]  ;;  %v9313_v56 = vld [vmem:[#allocation144_spill] sm:$0xff] }
 0x5ee   :  { %5308 = vmatpush1.bf16.msra.mxu0 %v9303_v35  ;;  %5372 = vmatpush1.bf16.msra.mxu1 %v9304_v58  ;;  %v9314_v35 = vld [vmem:[#allocation146_spill] sm:$0xff]  ;;  %v9315_v58 = vld [vmem:[#allocation147_spill] sm:$0xff] }
 0x5ef   :  { %5310 = vmatprep.subr.bf16.mxu0 %v9305_v10  ;;  %5374 = vmatprep.subr.bf16.mxu1 %v9306_v18  ;;  %v9316_v10 = vld [vmem:[#allocation148_spill] sm:$0xff] }
 0x5f0   :  { %v9317_v18 = vld [vmem:[#allocation20_spill] sm:$0xff] }
 0x5f2   :  { %5312 = vmatpush1.bf16.msra.mxu0 %v9307_v32  ;;  %5376 = vmatpush1.bf16.msra.mxu1 %v9308_v6  ;;  %v9318_v32 = vld [vmem:[#allocation21_spill] sm:$0xff] }
 0x5f3   :  { %5314 = vmatprep.subr.bf16.mxu0 %v9309_v55  ;;  %5378 = vmatprep.subr.bf16.mxu1 %v9310_v27  ;;  %v9319_v27 = vld [vmem:[#allocation22_spill] sm:$0xff]  ;;  %v9328_v55 = vld [vmem:[#allocation31_spill] sm:$0xff]  ;;  %v9383_v6 = vld [vmem:[#allocation149_spill] sm:$0xff] }
 0x5f6   :  { %5316 = vmatpush1.bf16.msra.mxu0 %v9311_v19  ;;  %5380 = vmatpush1.bf16.msra.mxu1 %v9312_v28  ;;  %v9320_v19 = vld [vmem:[#allocation23_spill] sm:$0xff]  ;;  %v9321_v28 = vld [vmem:[#allocation24_spill] sm:$0xff] }
 0x5f7   :  { %5318 = vmatprep.subr.bf16.mxu0 %v9313_v56  ;;  %5382 = vmatprep.subr.bf16.mxu1 %v9314_v35  ;;  %v9322_v56 = vld [vmem:[#allocation25_spill] sm:$0xff]  ;;  %v9323_v35 = vld [vmem:[#allocation26_spill] sm:$0xff] }
 0x5fa   :  { %5320 = vmatpush1.bf16.msra.mxu0 %v9315_v58  ;;  %5384 = vmatpush1.bf16.msra.mxu1 %v9316_v10  ;;  %v9324_v58 = vld [vmem:[#allocation27_spill] sm:$0xff]  ;;  %v9325_v10 = vld [vmem:[#allocation28_spill] sm:$0xff] }
 0x5fb   :  { %5386 = vmatprep.subr.bf16.mxu0 %v9317_v18  ;;  %5450 = vmatprep.subr.bf16.mxu1 %v9318_v32  ;;  %v9326_v18 = vld [vmem:[#allocation29_spill] sm:$0xff]  ;;  %v9327_v32 = vld [vmem:[#allocation30_spill] sm:$0xff] }
 0x5fd   :  { %2395 = vmatmul.mubr.f32.vlgmr.msra.gmra.mrb[24].mxu0 %v7886_v60  ;;  %2466 = vmatmul.mubr.f32.vlgmr.msra.gmra.mrb[24].mxu1 %v7886_v60  ;;  %v9329_v60 = vld [vmem:[#allocation32_spill] sm:$0xff] }
 0x5fe   :  { %5388 = vmatpush1.bf16.msra.mxu0 %v9319_v27  ;;  %5452 = vmatpush1.bf16.msra.mxu1 %v9320_v19  ;;  %v9330_v27 = vld [vmem:[#allocation33_spill] sm:$0xff]  ;;  %v9331_v19 = vld [vmem:[#allocation34_spill] sm:$0xff] }
 0x5ff   :  { %5390 = vmatprep.subr.bf16.mxu0 %v9321_v28  ;;  %5454 = vmatprep.subr.bf16.mxu1 %v9322_v56  ;;  %v9332_v28 = vld [vmem:[#allocation35_spill] sm:$0xff]  ;;  %v9333_v56 = vld [vmem:[#allocation36_spill] sm:$0xff] }
 0x602   :  { %5392 = vmatpush1.bf16.msra.mxu0 %v9323_v35  ;;  %5456 = vmatpush1.bf16.msra.mxu1 %v9324_v58  ;;  %v9334_v35 = vld [vmem:[#allocation37_spill] sm:$0xff]  ;;  %v9335_v58 = vld [vmem:[#allocation38_spill] sm:$0xff] }
 0x603   :  { %5394 = vmatprep.subr.bf16.mxu0 %v9325_v10  ;;  %5458 = vmatprep.subr.bf16.mxu1 %v9326_v18  ;;  %v9336_v10 = vld [vmem:[#allocation39_spill] sm:$0xff]  ;;  %v9337_v18 = vld [vmem:[#allocation40_spill] sm:$0xff] }
 0x606   :  { %5396 = vmatpush1.bf16.msra.mxu0 %v9327_v32  ;;  %5460 = vmatpush1.bf16.msra.mxu1 %v9328_v55  ;;  %v9338_v32 = vld [vmem:[#allocation41_spill] sm:$0xff]  ;;  %v9339_v55 = vld [vmem:[#allocation42_spill] sm:$0xff] }
 0x607   :  { %5398 = vmatprep.subr.bf16.mxu0 %v9329_v60  ;;  %5462 = vmatprep.subr.bf16.mxu1 %v9330_v27  ;;  %v9340_v60 = vld [vmem:[#allocation43_spill] sm:$0xff]  ;;  %v9341_v27 = vld [vmem:[#allocation44_spill] sm:$0xff] }
 0x60a   :  { %5400 = vmatpush1.bf16.msra.mxu0 %v9331_v19  ;;  %5464 = vmatpush1.bf16.msra.mxu1 %v9332_v28  ;;  %v9342_v19 = vld [vmem:[#allocation45_spill] sm:$0xff]  ;;  %v9343_v28 = vld [vmem:[#allocation46_spill] sm:$0xff] }
 0x60b   :  { %5402 = vmatprep.subr.bf16.mxu0 %v9333_v56  ;;  %5466 = vmatprep.subr.bf16.mxu1 %v9334_v35  ;;  %v9344_v56 = vld [vmem:[#allocation47_spill] sm:$0xff]  ;;  %v9345_v35 = vld [vmem:[#allocation48_spill] sm:$0xff] }
 0x60e   :  { %5404 = vmatpush1.bf16.msra.mxu0 %v9335_v58  ;;  %5468 = vmatpush1.bf16.msra.mxu1 %v9336_v10  ;;  %v9346_v58 = vld [vmem:[#allocation49_spill] sm:$0xff]  ;;  %v9347_v10 = vld [vmem:[#allocation50_spill] sm:$0xff] }
 0x60f   :  { %5406 = vmatprep.subr.bf16.mxu0 %v9337_v18  ;;  %5470 = vmatprep.subr.bf16.mxu1 %v9338_v32  ;;  %v9348_v18 = vld [vmem:[#allocation51_spill] sm:$0xff]  ;;  %v9349_v32 = vld [vmem:[#allocation52_spill] sm:$0xff] }
 0x612   :  { %5408 = vmatpush1.bf16.msra.mxu0 %v9339_v55  ;;  %5472 = vmatpush1.bf16.msra.mxu1 %v9340_v60  ;;  %v9350_v55 = vld [vmem:[#allocation53_spill] sm:$0xff]  ;;  %v9351_v60 = vld [vmem:[#allocation54_spill] sm:$0xff] }
 0x613   :  { %5410 = vmatprep.subr.bf16.mxu0 %v9341_v27  ;;  %5474 = vmatprep.subr.bf16.mxu1 %v9342_v19  ;;  %v9352_v27 = vld [vmem:[#allocation55_spill] sm:$0xff]  ;;  %v9353_v19 = vld [vmem:[#allocation56_spill] sm:$0xff] }
 0x616   :  { %5412 = vmatpush1.bf16.msra.mxu0 %v9343_v28  ;;  %5476 = vmatpush1.bf16.msra.mxu1 %v9344_v56  ;;  %v9354_v28 = vld [vmem:[#allocation57_spill] sm:$0xff]  ;;  %v9355_v56 = vld [vmem:[#allocation58_spill] sm:$0xff] }
 0x617   :  { %5414 = vmatprep.subr.bf16.mxu0 %v9345_v35  ;;  %5478 = vmatprep.subr.bf16.mxu1 %v9346_v58  ;;  %v9356_v35 = vld [vmem:[#allocation59_spill] sm:$0xff]  ;;  %v9357_v58 = vld [vmem:[#allocation60_spill] sm:$0xff] }
 0x61a   :  { %5416 = vmatpush1.bf16.msra.mxu0 %v9347_v10  ;;  %5480 = vmatpush1.bf16.msra.mxu1 %v9348_v18  ;;  %v9358_v10 = vld [vmem:[#allocation61_spill] sm:$0xff]  ;;  %v9359_v18 = vld [vmem:[#allocation62_spill] sm:$0xff] }
 0x61b   :  { %5418 = vmatprep.subr.bf16.mxu0 %v9349_v32  ;;  %5482 = vmatprep.subr.bf16.mxu1 %v9350_v55  ;;  %v9360_v32 = vld [vmem:[#allocation63_spill] sm:$0xff]  ;;  %v9361_v55 = vld [vmem:[#allocation64_spill] sm:$0xff] }
 0x61e   :  { %5420 = vmatpush1.bf16.msra.mxu0 %v9351_v60  ;;  %5484 = vmatpush1.bf16.msra.mxu1 %v9352_v27  ;;  %v9362_v60 = vld [vmem:[#allocation65_spill] sm:$0xff]  ;;  %v9363_v27 = vld [vmem:[#allocation66_spill] sm:$0xff] }
 0x61f   :  { %5422 = vmatprep.subr.bf16.mxu0 %v9353_v19  ;;  %5486 = vmatprep.subr.bf16.mxu1 %v9354_v28  ;;  %v9364_v19 = vld [vmem:[#allocation67_spill] sm:$0xff]  ;;  %v9365_v28 = vld [vmem:[#allocation68_spill] sm:$0xff] }
 0x622   :  { %5424 = vmatpush1.bf16.msra.mxu0 %v9355_v56  ;;  %5488 = vmatpush1.bf16.msra.mxu1 %v9356_v35  ;;  %v9366_v56 = vld [vmem:[#allocation69_spill] sm:$0xff]  ;;  %v9367_v35 = vld [vmem:[#allocation70_spill] sm:$0xff] }
 0x623   :  { %5426 = vmatprep.subr.bf16.mxu0 %v9357_v58  ;;  %5490 = vmatprep.subr.bf16.mxu1 %v9358_v10  ;;  %v9368_v58 = vld [vmem:[#allocation71_spill] sm:$0xff]  ;;  %v9369_v10 = vld [vmem:[#allocation72_spill] sm:$0xff] }
 0x626   :  { %5428 = vmatpush1.bf16.msra.mxu0 %v9359_v18  ;;  %5492 = vmatpush1.bf16.msra.mxu1 %v9360_v32  ;;  %v9370_v18 = vld [vmem:[#allocation73_spill] sm:$0xff]  ;;  %v9371_v32 = vld [vmem:[#allocation74_spill] sm:$0xff] }
 0x627   :  { %5430 = vmatprep.subr.bf16.mxu0 %v9361_v55  ;;  %5494 = vmatprep.subr.bf16.mxu1 %v9362_v60  ;;  %v9372_v55 = vld [vmem:[#allocation75_spill] sm:$0xff]  ;;  %v9373_v60 = vld [vmem:[#allocation76_spill] sm:$0xff] }
 0x62a   :  { %5432 = vmatpush1.bf16.msra.mxu0 %v9363_v27  ;;  %5496 = vmatpush1.bf16.msra.mxu1 %v9364_v19  ;;  %v9374_v27 = vld [vmem:[#allocation77_spill] sm:$0xff]  ;;  %v9375_v19 = vld [vmem:[#allocation78_spill] sm:$0xff] }
 0x62b   :  { %5434 = vmatprep.subr.bf16.mxu0 %v9365_v28  ;;  %5498 = vmatprep.subr.bf16.mxu1 %v9366_v56  ;;  %v9376_v28 = vld [vmem:[#allocation79_spill] sm:$0xff]  ;;  %v9377_v56 = vld [vmem:[#allocation80_spill] sm:$0xff] }
 0x62e   :  { %5436 = vmatpush1.bf16.msra.mxu0 %v9367_v35  ;;  %5500 = vmatpush1.bf16.msra.mxu1 %v9368_v58  ;;  %v9378_v35 = vld [vmem:[#allocation81_spill] sm:$0xff]  ;;  %v9379_v58 = vld [vmem:[#allocation82_spill] sm:$0xff] }
 0x62f   :  { %5438 = vmatprep.subr.bf16.mxu0 %v9369_v10  ;;  %5502 = vmatprep.subr.bf16.mxu1 %v9370_v18  ;;  %v9380_v10 = vld [vmem:[#allocation83_spill] sm:$0xff]  ;;  %v9381_v18 = vld [vmem:[#allocation84_spill] sm:$0xff] }
 0x632   :  { %5440 = vmatpush1.bf16.msra.mxu0 %v9371_v32  ;;  %5504 = vmatpush1.bf16.msra.mxu1 %v9372_v55  ;;  %v9382_v32 = vld [vmem:[#allocation85_spill] sm:$0xff] }
 0x633   :  { %5442 = vmatprep.subr.bf16.mxu0 %v9373_v60  ;;  %5506 = vmatprep.subr.bf16.mxu1 %v9374_v27 }
 0x636   :  { %5444 = vmatpush1.bf16.msra.mxu0 %v9375_v19  ;;  %5508 = vmatpush1.bf16.msra.mxu1 %v9376_v28 }
 0x637   :  { %5446 = vmatprep.subr.bf16.mxu0 %v9377_v56  ;;  %5510 = vmatprep.subr.bf16.mxu1 %v9378_v35  ;;  %v9384_v35 = vld [vmem:[#allocation151_spill] sm:$0xff] }
 0x63a   :  { %5448 = vmatpush1.bf16.msra.mxu0 %v9379_v58  ;;  %5512 = vmatpush1.bf16.msra.mxu1 %v9380_v10 }
 0x63b   :  { %5514 = vmatprep.subr.bf16.mxu0 %v9381_v18  ;;  %5578 = vmatprep.subr.bf16.mxu1 %v9382_v32 }
 0x690   :  { %v2254_v55 = vpop.f32.mrb[8].mxu0  ;;  %v2325_v60 = vpop.f32.mrb[8].mxu1 }
 0x691   :  { %v6313_v27 = vadd.f32 %v2254_v55, %v9383_v6  ;;  %v2256_v0 = vpop.f32.mrb[9].mxu0  ;;  %v2327_v19 = vpop.f32.mrb[9].mxu1  ;;  %v6329_v58 = vadd.f32 %v2325_v60, %v9384_v35 }
 0x692   :  { %v6314_v28 = vadd.f32 %v2256_v0, %v9195_v9 }
 0x693   :  { %v3961_v61 = vmul.f32 -1.442695, %v6313_v27 }
 0x694   :  { %v3962_v56 = vmul.f32 -1.442695, %v6314_v28 }
 0x695   :  { %6514 = vpow2.f32 %v3961_v61  ;;  %v2903_v61 = vsel %vm2901_vm9, 1, %v9290_v44 }
 0x696   :  { %6516 = vpow2.f32 %v3962_v56  ;;  %2905 = vperm.xlu1 %6385, %v2903_v61  }
 0x697   :  { %6518 = vtanh.f32 %v6329_v58 }
 0x69f   :  { %v6515_v54 = vpop.eup %6514 }
 0x6a0   :  { %v6517_v10 = vpop.eup %6516  ;;  %v2488_v48 = vadd.f32 1.0, %v6515_v54  ;;  %v9385_v54 = vld [vmem:[#allocation152_spill] sm:$0xff] }
 0x6a1   :  { %v2494_v18 = vadd.f32 1.0, %v6517_v10  ;;  %v6519_v32 = vpop.eup %6518 }
 0x6a2   :  { %6520 = vrcp.f32 %v2488_v48 }
 0x6a3   :  { %6522 = vrcp.f32 %v2494_v18 }
 0x6ac   :  { %v6521_v45 = vpop.eup %6520 }
 0x6ad   :  { %v6523_v55 = vpop.eup %6522  ;;  %v2506_v6 = vmul.f32 %v6521_v45, %v6519_v32 }
 0x6ae   :  { %v2505_v39 = vmul.f32 %v6523_v55, %v7872_v1 }
 0x6b0   :  { %v8027_v0 = vadd.f32 %v2506_v6, %v2505_v39  ;;  %v6330_v39 = vadd.f32 %v2327_v19, %v7405_v5 }
 0x6b2   :  { %v3963_v49 = vmul.f32 -1.442695, %v6330_v39 }
 0x6d0   :  { %v2396_v27 = vpop.f32.mrb[24].mxu0  ;;  %v2467_v28 = vpop.f32.mrb[24].mxu1 }
 0x6d1   :  { %v2481_v56 = vadd.f32 %v2396_v27, %v9385_v54  ;;  %v2398_v58 = vpop.f32.mrb[25].mxu0  ;;  %v2469_v48 = vpop.f32.mrb[25].mxu1  ;;  %v2483_v6 = vadd.f32 %v2467_v28, %v9197_v16 }
 0x6d2   :  { %v2482_v10 = vadd.f32 %v2398_v58, %v9103_v40  ;;  %v2484_v45 = vadd.f32 %v2469_v48, %v7400_v52 }
 0x6d3   :  { %v3964_v18 = vmul.f32 -1.442695, %v2481_v56 }
 0x6d4   :  { %v3965_v60 = vmul.f32 -1.442695, %v2482_v10  ;;  %v3966_v1 = vmul.f32 -1.442695, %v2484_v45 }
 0x6d5   :  { %6524 = vpow2.f32 %v3964_v18 }
 0x6d6   :  { %6526 = vpow2.f32 %v3965_v60 }
 0x6d7   :  { %6528 = vpow2.f32 %v3963_v49  ;;  %v2542_v49 = vpop.permute.xlu0 %2541 }
 0x6d8   :  { %6530 = vpow2.f32 %v3966_v1  ;;  %vm2543_vm10 = vcmp.eq.s32.totalorder %v2542_v49, 1  ;;  %v9396_v49 = vld [vmem:[#allocation132_spill] sm:$0xff] }
 0x6d9   :  { %6532 = vtanh.f32 %v2483_v6 }
 0x6df   :  { %v6525_v32 = vpop.eup %6524 }
 0x6e0   :  { %v6527_v55 = vpop.eup %6526  ;;  %v2513_v61 = vadd.f32 1.0, %v6525_v32 }
 0x6e1   :  { %v2519_v27 = vadd.f32 1.0, %v6527_v55  ;;  %v6529_v56 = vpop.eup %6528 }
 0x6e2   :  { %6534 = vrcp.f32 %v2513_v61  ;;  %v6531_v58 = vpop.eup %6530  ;;  %v2501_v45 = vadd.f32 1.0, %v6529_v56  ;;  %v9387_v56 = vld [vmem:[#allocation125_spill] sm:$0xff] }
 0x6e3   :  { %6536 = vrcp.f32 %v2519_v27  ;;  %v6533_v10 = vpop.eup %6532  ;;  %v2526_v48 = vadd.f32 1.0, %v6531_v58  ;;  %v9388_v58 = vld [vmem:[#allocation124_spill] sm:$0xff] }
 0x6e4   :  { %6538 = vtanh.f32 %v8027_v0 }
 0x6e5   :  { %6540 = vrcp.f32 %v2526_v48  ;;  %v9393_v48 = vld [vmem:[#allocation130_spill] sm:$0xff] }
 0x6ec   :  { %v6535_v18 = vpop.eup %6534 }
 0x6ed   :  { %v6537_v19 = vpop.eup %6536  ;;  %v2531_v60 = vmul.f32 %v6535_v18, %v6533_v10  ;;  %v9389_v10 = vld [vmem:[#allocation126_spill] sm:$0xff]  ;;  %v9390_v18 = vld [vmem:[#allocation127_spill] sm:$0xff] }
 0x6ee   :  { %v2530_v39 = vmul.f32 %v6537_v19, %v7882_v43  ;;  %v6539_v1 = vpop.eup %6538  ;;  %v9391_v19 = vld [vmem:[#allocation129_spill] sm:$0xff] }
 0x6ef   :  { %v6541_v6 = vpop.eup %6540 }
 0x6f0   :  { %v8037_v28 = vadd.f32 %v2531_v60, %v2530_v39  ;;  %v9392_v60 = vld [vmem:[#allocation128_spill] sm:$0xff]  ;;  %v9394_v39 = vld [vmem:[#allocation131_spill] sm:$0xff] }
 0x6f2   :  { %6542 = vtanh.f32 %v8037_v28 }
 0x6f3   :  { %6544 = vrcp.f32 %v2501_v45  ;;  %v9395_v45 = vld [vmem:[#allocation133_spill] sm:$0xff] }
 0x6fc   :  { %v6543_v32 = vpop.eup %6542 }
 0x6fd   :  { %v6545_v55 = vpop.eup %6544  ;;  %v2534_v61 = vmul.f32 %v6543_v32, %v6541_v6  ;;  %v9398_v6 = vld [vmem:[#allocation135_spill] sm:$0xff]  ;;  %v9399_v32 = vld [vmem:[#allocation137_spill] sm:$0xff] }
 0x6fe   :  { %v8041_v27 = vmul.f32 %v6545_v55, %v6539_v1  ;;  %v9397_v1 = vld [vmem:[#allocation134_spill] sm:$0xff]  ;;  %v9400_v55 = vld [vmem:[#allocation136_spill] sm:$0xff] }
 0x6ff   :  { %v8044_v43 = vsel %vm2543_vm10, %v2534_v61, %v7889_v62  ;;  %2616 = vmatprep.mubr.f32.mxu0 %v2534_v61  ;;  %2687 = vmatprep.mubr.f32.mxu1 %v2534_v61  ;;  %v9386_v62 = vld [vmem:[#allocation123_spill] sm:$0xff] }
 0x700   :  { %2617 = vmatmul.mubr.f32.vlgmr.msra.gmra.mrb[10].mxu0 %v8041_v27  ;;  %2688 = vmatmul.mubr.f32.vlgmr.msra.gmra.mrb[10].mxu1 %v8041_v27 }
 0x701   :  { %5516 = vmatpush1.bf16.msra.mxu0 %v9010_v53  ;;  %5580 = vmatpush1.bf16.msra.mxu1 %v9011_v46 }
 0x702   :  { %2758 = vmatprep.mubr.f32.mxu0 %v2534_v61  ;;  %2829 = vmatprep.mubr.f32.mxu1 %v2534_v61  ;;  %v9401_v61 = vld [vmem:[#allocation138_spill] sm:$0xff] }
 0x703   :  { %5518 = vmatprep.subr.bf16.mxu0 %v9012_v20  ;;  %5582 = vmatprep.subr.bf16.mxu1 %v9013_v22 }
 0x705   :  { %5520 = vmatpush1.bf16.msra.mxu0 %v9014_v59  ;;  %5584 = vmatpush1.bf16.msra.mxu1 %v9104_v7 }
 0x706   :  { %5522 = vmatprep.subr.bf16.mxu0 %v9105_v12  ;;  %5586 = vmatprep.subr.bf16.mxu1 %v9106_v21 }
 0x709   :  { %5524 = vmatpush1.bf16.msra.mxu0 %v9107_v2  ;;  %5588 = vmatpush1.bf16.msra.mxu1 %v9108_v34 }
 0x70a   :  { %5526 = vmatprep.subr.bf16.mxu0 %v9109_v23  ;;  %5590 = vmatprep.subr.bf16.mxu1 %v9198_v30 }
 0x70d   :  { %5528 = vmatpush1.bf16.msra.mxu0 %v9199_v63  ;;  %5592 = vmatpush1.bf16.msra.mxu1 %v9200_v4 }
 0x70e   :  { %5530 = vmatprep.subr.bf16.mxu0 %v9201_v41  ;;  %5594 = vmatprep.subr.bf16.mxu1 %v9202_v38 }
 0x711   :  { %5532 = vmatpush1.bf16.msra.mxu0 %v9203_v50  ;;  %5596 = vmatpush1.bf16.msra.mxu1 %v9292_v24 }
 0x712   :  { %5534 = vmatprep.subr.bf16.mxu0 %v9293_v31  ;;  %5598 = vmatprep.subr.bf16.mxu1 %v9206_v47 }
 0x715   :  { %5536 = vmatpush1.bf16.msra.mxu0 %v9207_v8  ;;  %5600 = vmatpush1.bf16.msra.mxu1 %v9208_v26 }
 0x716   :  { %5538 = vmatprep.subr.bf16.mxu0 %v9209_v25  ;;  %5602 = vmatprep.subr.bf16.mxu1 %v9210_v29 }
 0x719   :  { %5540 = vmatpush1.bf16.msra.mxu0 %v9211_v36  ;;  %5604 = vmatpush1.bf16.msra.mxu1 %v9212_v42 }
 0x71a   :  { %5542 = vmatprep.subr.bf16.mxu0 %v9213_v51  ;;  %5606 = vmatprep.subr.bf16.mxu1 %v9126_v3 }
 0x71d   :  { %5544 = vmatpush1.bf16.msra.mxu0 %v9214_v37  ;;  %5608 = vmatpush1.bf16.msra.mxu1 %v9215_v11 }
 0x71e   :  { %5546 = vmatprep.subr.bf16.mxu0 %v9129_v33  ;;  %5610 = vmatprep.subr.bf16.mxu1 %v9130_v14 }
 0x721   :  { %5548 = vmatpush1.bf16.msra.mxu0 %v9131_v57  ;;  %5612 = vmatpush1.bf16.msra.mxu1 %v9132_v13 }
 0x722   :  { %5550 = vmatprep.subr.bf16.mxu0 %v9133_v17  ;;  %5614 = vmatprep.subr.bf16.mxu1 %v9134_v15 }
 0x725   :  { %5552 = vmatpush1.bf16.msra.mxu0 %v9386_v62  ;;  %5616 = vmatpush1.bf16.msra.mxu1 %v9387_v56 }
 0x726   :  { %5554 = vmatprep.subr.bf16.mxu0 %v9388_v58  ;;  %5618 = vmatprep.subr.bf16.mxu1 %v9389_v10 }
 0x729   :  { %5556 = vmatpush1.bf16.msra.mxu0 %v9390_v18  ;;  %5620 = vmatpush1.bf16.msra.mxu1 %v9391_v19  ;;  %v9402_v19 = vld [vmem:[#allocation139_spill] sm:$0xff] }
 0x72a   :  { %5558 = vmatprep.subr.bf16.mxu0 %v9392_v60  ;;  %5622 = vmatprep.subr.bf16.mxu1 %v9393_v48  ;;  %v9403_v60 = vld [vmem:[#allocation141_spill] sm:$0xff]  ;;  %v9404_v48 = vld [vmem:[#allocation140_spill] sm:$0xff] }
 0x72d   :  { %5560 = vmatpush1.bf16.msra.mxu0 %v9394_v39  ;;  %5624 = vmatpush1.bf16.msra.mxu1 %v9395_v45  ;;  %v9405_v39 = vld [vmem:[#allocation142_spill] sm:$0xff]  ;;  %v9406_v45 = vld [vmem:[#allocation143_spill] sm:$0xff] }
 0x72e   :  { %5562 = vmatprep.subr.bf16.mxu0 %v9396_v49  ;;  %5626 = vmatprep.subr.bf16.mxu1 %v9397_v1  ;;  %v9407_v49 = vld [vmem:[#allocation145_spill] sm:$0xff]  ;;  %v9408_v1 = vld [vmem:[#allocation144_spill] sm:$0xff] }
 0x731   :  { %5564 = vmatpush1.bf16.msra.mxu0 %v9398_v6  ;;  %5628 = vmatpush1.bf16.msra.mxu1 %v9399_v32  ;;  %v9409_v6 = vld [vmem:[#allocation146_spill] sm:$0xff]  ;;  %v9410_v32 = vld [vmem:[#allocation147_spill] sm:$0xff] }
 0x732   :  { %5566 = vmatprep.subr.bf16.mxu0 %v9400_v55  ;;  %5630 = vmatprep.subr.bf16.mxu1 %v9401_v61  ;;  %v9411_v55 = vld [vmem:[#allocation148_spill] sm:$0xff] }
 0x733   :  { %v9412_v61 = vld [vmem:[#allocation20_spill] sm:$0xff] }
 0x735   :  { %5568 = vmatpush1.bf16.msra.mxu0 %v9402_v19  ;;  %5632 = vmatpush1.bf16.msra.mxu1 %v9403_v60  ;;  %v9413_v19 = vld [vmem:[#allocation21_spill] sm:$0xff] }
 0x736   :  { %5570 = vmatprep.subr.bf16.mxu0 %v9404_v48  ;;  %5634 = vmatprep.subr.bf16.mxu1 %v9405_v39  ;;  %v9414_v39 = vld [vmem:[#allocation22_spill] sm:$0xff]  ;;  %v9423_v48 = vld [vmem:[#allocation31_spill] sm:$0xff]  ;;  %v9478_v60 = vld [vmem:[#allocation149_spill] sm:$0xff] }
 0x739   :  { %5572 = vmatpush1.bf16.msra.mxu0 %v9406_v45  ;;  %5636 = vmatpush1.bf16.msra.mxu1 %v9407_v49  ;;  %v9415_v45 = vld [vmem:[#allocation23_spill] sm:$0xff]  ;;  %v9416_v49 = vld [vmem:[#allocation24_spill] sm:$0xff] }
 0x73a   :  { %5574 = vmatprep.subr.bf16.mxu0 %v9408_v1  ;;  %5638 = vmatprep.subr.bf16.mxu1 %v9409_v6  ;;  %v9417_v1 = vld [vmem:[#allocation25_spill] sm:$0xff]  ;;  %v9418_v6 = vld [vmem:[#allocation26_spill] sm:$0xff] }
 0x73d   :  { %5576 = vmatpush1.bf16.msra.mxu0 %v9410_v32  ;;  %5640 = vmatpush1.bf16.msra.mxu1 %v9411_v55  ;;  %v9419_v32 = vld [vmem:[#allocation27_spill] sm:$0xff]  ;;  %v9420_v55 = vld [vmem:[#allocation28_spill] sm:$0xff] }
 0x73e   :  { %5642 = vmatprep.subr.bf16.mxu0 %v9412_v61  ;;  %5706 = vmatprep.subr.bf16.mxu1 %v9413_v19  ;;  %v9421_v61 = vld [vmem:[#allocation29_spill] sm:$0xff]  ;;  %v9422_v19 = vld [vmem:[#allocation30_spill] sm:$0xff] }
 0x740   :  { %2759 = vmatmul.mubr.f32.vlgmr.msra.gmra.mrb[26].mxu0 %v8041_v27  ;;  %2830 = vmatmul.mubr.f32.vlgmr.msra.gmra.mrb[26].mxu1 %v8041_v27  ;;  %v9424_v27 = vld [vmem:[#allocation32_spill] sm:$0xff] }
 0x741   :  { %5644 = vmatpush1.bf16.msra.mxu0 %v9414_v39  ;;  %5708 = vmatpush1.bf16.msra.mxu1 %v9415_v45  ;;  %v9425_v39 = vld [vmem:[#allocation33_spill] sm:$0xff]  ;;  %v9426_v45 = vld [vmem:[#allocation34_spill] sm:$0xff] }
 0x742   :  { %5646 = vmatprep.subr.bf16.mxu0 %v9416_v49  ;;  %5710 = vmatprep.subr.bf16.mxu1 %v9417_v1  ;;  %v9427_v49 = vld [vmem:[#allocation35_spill] sm:$0xff]  ;;  %v9428_v1 = vld [vmem:[#allocation36_spill] sm:$0xff] }
 0x745   :  { %5648 = vmatpush1.bf16.msra.mxu0 %v9418_v6  ;;  %5712 = vmatpush1.bf16.msra.mxu1 %v9419_v32  ;;  %v9429_v6 = vld [vmem:[#allocation37_spill] sm:$0xff]  ;;  %v9430_v32 = vld [vmem:[#allocation38_spill] sm:$0xff] }
 0x746   :  { %5650 = vmatprep.subr.bf16.mxu0 %v9420_v55  ;;  %5714 = vmatprep.subr.bf16.mxu1 %v9421_v61  ;;  %v9431_v55 = vld [vmem:[#allocation39_spill] sm:$0xff]  ;;  %v9432_v61 = vld [vmem:[#allocation40_spill] sm:$0xff] }
 0x749   :  { %5652 = vmatpush1.bf16.msra.mxu0 %v9422_v19  ;;  %5716 = vmatpush1.bf16.msra.mxu1 %v9423_v48  ;;  %v9433_v19 = vld [vmem:[#allocation41_spill] sm:$0xff]  ;;  %v9434_v48 = vld [vmem:[#allocation42_spill] sm:$0xff] }
 0x74a   :  { %5654 = vmatprep.subr.bf16.mxu0 %v9424_v27  ;;  %5718 = vmatprep.subr.bf16.mxu1 %v9425_v39  ;;  %v9435_v27 = vld [vmem:[#allocation43_spill] sm:$0xff]  ;;  %v9436_v39 = vld [vmem:[#allocation44_spill] sm:$0xff] }
 0x74d   :  { %5656 = vmatpush1.bf16.msra.mxu0 %v9426_v45  ;;  %5720 = vmatpush1.bf16.msra.mxu1 %v9427_v49  ;;  %v9437_v45 = vld [vmem:[#allocation45_spill] sm:$0xff]  ;;  %v9438_v49 = vld [vmem:[#allocation46_spill] sm:$0xff] }
 0x74e   :  { %5658 = vmatprep.subr.bf16.mxu0 %v9428_v1  ;;  %5722 = vmatprep.subr.bf16.mxu1 %v9429_v6  ;;  %v9439_v1 = vld [vmem:[#allocation47_spill] sm:$0xff]  ;;  %v9440_v6 = vld [vmem:[#allocation48_spill] sm:$0xff] }
 0x751   :  { %5660 = vmatpush1.bf16.msra.mxu0 %v9430_v32  ;;  %5724 = vmatpush1.bf16.msra.mxu1 %v9431_v55  ;;  %v9441_v32 = vld [vmem:[#allocation49_spill] sm:$0xff]  ;;  %v9442_v55 = vld [vmem:[#allocation50_spill] sm:$0xff] }
 0x752   :  { %5662 = vmatprep.subr.bf16.mxu0 %v9432_v61  ;;  %5726 = vmatprep.subr.bf16.mxu1 %v9433_v19  ;;  %v9443_v61 = vld [vmem:[#allocation51_spill] sm:$0xff]  ;;  %v9444_v19 = vld [vmem:[#allocation52_spill] sm:$0xff] }
 0x755   :  { %5664 = vmatpush1.bf16.msra.mxu0 %v9434_v48  ;;  %5728 = vmatpush1.bf16.msra.mxu1 %v9435_v27  ;;  %v9445_v48 = vld [vmem:[#allocation53_spill] sm:$0xff]  ;;  %v9446_v27 = vld [vmem:[#allocation54_spill] sm:$0xff] }
 0x756   :  { %5666 = vmatprep.subr.bf16.mxu0 %v9436_v39  ;;  %5730 = vmatprep.subr.bf16.mxu1 %v9437_v45  ;;  %v9447_v39 = vld [vmem:[#allocation55_spill] sm:$0xff]  ;;  %v9448_v45 = vld [vmem:[#allocation56_spill] sm:$0xff] }
 0x759   :  { %5668 = vmatpush1.bf16.msra.mxu0 %v9438_v49  ;;  %5732 = vmatpush1.bf16.msra.mxu1 %v9439_v1  ;;  %v9449_v49 = vld [vmem:[#allocation57_spill] sm:$0xff]  ;;  %v9450_v1 = vld [vmem:[#allocation58_spill] sm:$0xff] }
 0x75a   :  { %5670 = vmatprep.subr.bf16.mxu0 %v9440_v6  ;;  %5734 = vmatprep.subr.bf16.mxu1 %v9441_v32  ;;  %v9451_v6 = vld [vmem:[#allocation59_spill] sm:$0xff]  ;;  %v9452_v32 = vld [vmem:[#allocation60_spill] sm:$0xff] }
 0x75d   :  { %5672 = vmatpush1.bf16.msra.mxu0 %v9442_v55  ;;  %5736 = vmatpush1.bf16.msra.mxu1 %v9443_v61  ;;  %v9453_v55 = vld [vmem:[#allocation61_spill] sm:$0xff]  ;;  %v9454_v61 = vld [vmem:[#allocation62_spill] sm:$0xff] }
 0x75e   :  { %5674 = vmatprep.subr.bf16.mxu0 %v9444_v19  ;;  %5738 = vmatprep.subr.bf16.mxu1 %v9445_v48  ;;  %v9455_v19 = vld [vmem:[#allocation63_spill] sm:$0xff]  ;;  %v9456_v48 = vld [vmem:[#allocation64_spill] sm:$0xff] }
 0x761   :  { %5676 = vmatpush1.bf16.msra.mxu0 %v9446_v27  ;;  %5740 = vmatpush1.bf16.msra.mxu1 %v9447_v39  ;;  %v9457_v27 = vld [vmem:[#allocation65_spill] sm:$0xff]  ;;  %v9458_v39 = vld [vmem:[#allocation66_spill] sm:$0xff] }
 0x762   :  { %5678 = vmatprep.subr.bf16.mxu0 %v9448_v45  ;;  %5742 = vmatprep.subr.bf16.mxu1 %v9449_v49  ;;  %v9459_v45 = vld [vmem:[#allocation67_spill] sm:$0xff]  ;;  %v9460_v49 = vld [vmem:[#allocation68_spill] sm:$0xff] }
 0x765   :  { %5680 = vmatpush1.bf16.msra.mxu0 %v9450_v1  ;;  %5744 = vmatpush1.bf16.msra.mxu1 %v9451_v6  ;;  %v9461_v1 = vld [vmem:[#allocation69_spill] sm:$0xff]  ;;  %v9462_v6 = vld [vmem:[#allocation70_spill] sm:$0xff] }
 0x766   :  { %5682 = vmatprep.subr.bf16.mxu0 %v9452_v32  ;;  %5746 = vmatprep.subr.bf16.mxu1 %v9453_v55  ;;  %v9463_v32 = vld [vmem:[#allocation71_spill] sm:$0xff]  ;;  %v9464_v55 = vld [vmem:[#allocation72_spill] sm:$0xff] }
 0x769   :  { %5684 = vmatpush1.bf16.msra.mxu0 %v9454_v61  ;;  %5748 = vmatpush1.bf16.msra.mxu1 %v9455_v19  ;;  %v9465_v61 = vld [vmem:[#allocation73_spill] sm:$0xff]  ;;  %v9466_v19 = vld [vmem:[#allocation74_spill] sm:$0xff] }
 0x76a   :  { %5686 = vmatprep.subr.bf16.mxu0 %v9456_v48  ;;  %5750 = vmatprep.subr.bf16.mxu1 %v9457_v27  ;;  %v9467_v48 = vld [vmem:[#allocation75_spill] sm:$0xff]  ;;  %v9468_v27 = vld [vmem:[#allocation76_spill] sm:$0xff] }
 0x76d   :  { %5688 = vmatpush1.bf16.msra.mxu0 %v9458_v39  ;;  %5752 = vmatpush1.bf16.msra.mxu1 %v9459_v45  ;;  %v9469_v39 = vld [vmem:[#allocation77_spill] sm:$0xff]  ;;  %v9470_v45 = vld [vmem:[#allocation78_spill] sm:$0xff] }
 0x76e   :  { %5690 = vmatprep.subr.bf16.mxu0 %v9460_v49  ;;  %5754 = vmatprep.subr.bf16.mxu1 %v9461_v1  ;;  %v9471_v49 = vld [vmem:[#allocation79_spill] sm:$0xff]  ;;  %v9472_v1 = vld [vmem:[#allocation80_spill] sm:$0xff] }
 0x771   :  { %5692 = vmatpush1.bf16.msra.mxu0 %v9462_v6  ;;  %5756 = vmatpush1.bf16.msra.mxu1 %v9463_v32  ;;  %v9473_v6 = vld [vmem:[#allocation81_spill] sm:$0xff]  ;;  %v9474_v32 = vld [vmem:[#allocation82_spill] sm:$0xff] }
 0x772   :  { %5694 = vmatprep.subr.bf16.mxu0 %v9464_v55  ;;  %5758 = vmatprep.subr.bf16.mxu1 %v9465_v61  ;;  %v9475_v55 = vld [vmem:[#allocation83_spill] sm:$0xff]  ;;  %v9476_v61 = vld [vmem:[#allocation84_spill] sm:$0xff] }
 0x775   :  { %5696 = vmatpush1.bf16.msra.mxu0 %v9466_v19  ;;  %5760 = vmatpush1.bf16.msra.mxu1 %v9467_v48  ;;  %v9477_v19 = vld [vmem:[#allocation85_spill] sm:$0xff] }
 0x776   :  { %5698 = vmatprep.subr.bf16.mxu0 %v9468_v27  ;;  %5762 = vmatprep.subr.bf16.mxu1 %v9469_v39 }
 0x779   :  { %5700 = vmatpush1.bf16.msra.mxu0 %v9470_v45  ;;  %5764 = vmatpush1.bf16.msra.mxu1 %v9471_v49 }
 0x77a   :  { %5702 = vmatprep.subr.bf16.mxu0 %v9472_v1  ;;  %5766 = vmatprep.subr.bf16.mxu1 %v9473_v6 }
 0x77d   :  { %5704 = vmatpush1.bf16.msra.mxu0 %v9474_v32  ;;  %5768 = vmatpush1.bf16.msra.mxu1 %v9475_v55 }
 0x77e   :  { %5770 = vmatprep.subr.bf16.mxu0 %v9476_v61  ;;  %5834 = vmatprep.subr.bf16.mxu1 %v9477_v19 }
 0x7d3   :  { %v2618_v48 = vpop.f32.mrb[10].mxu0  ;;  %v2689_v27 = vpop.f32.mrb[10].mxu1 }
 0x7d4   :  { %v6315_v39 = vadd.f32 %v2618_v48, %v9478_v60  ;;  %v2620_v18 = vpop.f32.mrb[11].mxu0  ;;  %v2691_v45 = vpop.f32.mrb[11].mxu1  ;;  %v6331_v32 = vadd.f32 %v2689_v27, %v9384_v35 }
 0x7d5   :  { %v6316_v49 = vadd.f32 %v2620_v18, %v9195_v9 }
 0x7d6   :  { %v3967_v10 = vmul.f32 -1.442695, %v6315_v39 }
 0x7d7   :  { %v3968_v1 = vmul.f32 -1.442695, %v6316_v49 }
 0x7d8   :  { %6546 = vpow2.f32 %v3967_v10  ;;  %v8187_v10 = vld [vmem:[%s8532_s1] sm:$0xff] }
 0x7d9   :  { %6548 = vpow2.f32 %v3968_v1  ;;  %9479 = vst [vmem:[#allocation86_spill] sm:$0xff] %v8187_v10  ;;  %vm3265_vm11 = vcmp.eq.s32.totalorder %v8187_v10, 5  ;;  %vm3629_vm13 = vcmp.eq.s32.totalorder %v8187_v10, 6  ;;  %v9603_v10 = vld [vmem:[#allocation84_spill] sm:$0xff] }
 0x7da   :  { %6550 = vtanh.f32 %v6331_v32  ;;  %v3267_v39 = vsel %vm3265_vm11, 1, %v9290_v44 }
 0x7db   :  { %3269 = vperm.xlu0 %6384, %v3267_v39  }
 0x7e2   :  { %v6547_v6 = vpop.eup %6546 }
 0x7e3   :  { %v6549_v55 = vpop.eup %6548  ;;  %v2852_v58 = vadd.f32 1.0, %v6547_v6 }
 0x7e4   :  { %v2858_v61 = vadd.f32 1.0, %v6549_v55  ;;  %v6551_v19 = vpop.eup %6550 }
 0x7e5   :  { %6552 = vrcp.f32 %v2852_v58 }
 0x7e6   :  { %6554 = vrcp.f32 %v2858_v61 }
 0x7ef   :  { %v6553_v56 = vpop.eup %6552 }
 0x7f0   :  { %v6555_v48 = vpop.eup %6554  ;;  %v2870_v60 = vmul.f32 %v6553_v56, %v6551_v19 }
 0x7f1   :  { %v2869_v62 = vmul.f32 %v6555_v48, %v8027_v0 }
 0x7f3   :  { %v8182_v18 = vadd.f32 %v2870_v60, %v2869_v62  ;;  %v6332_v60 = vadd.f32 %v2691_v45, %v7405_v5 }
 0x7f5   :  { %v3969_v55 = vmul.f32 -1.442695, %v6332_v60 }
 0x813   :  { %v2760_v58 = vpop.f32.mrb[26].mxu0  ;;  %v2831_v49 = vpop.f32.mrb[26].mxu1 }
 0x814   :  { %v2845_v1 = vadd.f32 %v2760_v58, %v9385_v54  ;;  %v2762_v6 = vpop.f32.mrb[27].mxu0  ;;  %v2833_v56 = vpop.f32.mrb[27].mxu1  ;;  %v2847_v27 = vadd.f32 %v2831_v49, %v9197_v16 }
 0x815   :  { %v2846_v0 = vadd.f32 %v2762_v6, %v9103_v40  ;;  %v2848_v32 = vadd.f32 %v2833_v56, %v7400_v52 }
 0x816   :  { %v3970_v62 = vmul.f32 -1.442695, %v2845_v1 }
 0x817   :  { %v3971_v19 = vmul.f32 -1.442695, %v2846_v0  ;;  %v3972_v61 = vmul.f32 -1.442695, %v2848_v32 }
 0x818   :  { %6556 = vpow2.f32 %v3970_v62 }
 0x819   :  { %6558 = vpow2.f32 %v3971_v19 }
 0x81a   :  { %6560 = vpow2.f32 %v3969_v55  ;;  %v2906_v55 = vpop.permute.xlu1 %2905 }
 0x81b   :  { %6562 = vpow2.f32 %v3972_v61  ;;  %vm2907_vm12 = vcmp.eq.s32.totalorder %v2906_v55, 1  ;;  %v9490_v55 = vld [vmem:[#allocation132_spill] sm:$0xff] }
 0x81c   :  { %6564 = vtanh.f32 %v2847_v27 }
 0x822   :  { %v6557_v48 = vpop.eup %6556 }
 0x823   :  { %v6559_v39 = vpop.eup %6558  ;;  %v2877_v58 = vadd.f32 1.0, %v6557_v48 }
 0x824   :  { %v2883_v54 = vadd.f32 1.0, %v6559_v39  ;;  %v6561_v1 = vpop.eup %6560 }
 0x825   :  { %6566 = vrcp.f32 %v2877_v58  ;;  %v6563_v6 = vpop.eup %6562  ;;  %v2865_v32 = vadd.f32 1.0, %v6561_v1  ;;  %v9481_v1 = vld [vmem:[#allocation125_spill] sm:$0xff] }
 0x826   :  { %6568 = vrcp.f32 %v2883_v54  ;;  %v6565_v0 = vpop.eup %6564  ;;  %v2890_v56 = vadd.f32 1.0, %v6563_v6  ;;  %v9482_v6 = vld [vmem:[#allocation124_spill] sm:$0xff] }
 0x827   :  { %6570 = vtanh.f32 %v8182_v18 }
 0x828   :  { %6572 = vrcp.f32 %v2890_v56  ;;  %v9487_v56 = vld [vmem:[#allocation130_spill] sm:$0xff] }
 0x82f   :  { %v6567_v62 = vpop.eup %6566 }
 0x830   :  { %v6569_v45 = vpop.eup %6568  ;;  %v2895_v19 = vmul.f32 %v6567_v62, %v6565_v0  ;;  %v9483_v0 = vld [vmem:[#allocation126_spill] sm:$0xff]  ;;  %v9484_v62 = vld [vmem:[#allocation127_spill] sm:$0xff] }
 0x831   :  { %v2894_v60 = vmul.f32 %v6569_v45, %v8037_v28  ;;  %v6571_v54 = vpop.eup %6570  ;;  %v9485_v45 = vld [vmem:[#allocation129_spill] sm:$0xff] }
 0x832   :  { %v6573_v61 = vpop.eup %6572 }
 0x833   :  { %v8197_v49 = vadd.f32 %v2895_v19, %v2894_v60  ;;  %v9486_v19 = vld [vmem:[#allocation128_spill] sm:$0xff]  ;;  %v9488_v60 = vld [vmem:[#allocation131_spill] sm:$0xff] }
 0x835   :  { %6574 = vtanh.f32 %v8197_v49 }
 0x836   :  { %6576 = vrcp.f32 %v2865_v32  ;;  %v9489_v32 = vld [vmem:[#allocation133_spill] sm:$0xff] }
 0x83f   :  { %v6575_v27 = vpop.eup %6574 }
 0x840   :  { %v6577_v48 = vpop.eup %6576  ;;  %v2898_v39 = vmul.f32 %v6575_v27, %v6573_v61  ;;  %v9492_v61 = vld [vmem:[#allocation135_spill] sm:$0xff]  ;;  %v9493_v27 = vld [vmem:[#allocation137_spill] sm:$0xff] }
 0x841   :  { %v8201_v58 = vmul.f32 %v6577_v48, %v6571_v54  ;;  %v9491_v54 = vld [vmem:[#allocation134_spill] sm:$0xff]  ;;  %v9494_v48 = vld [vmem:[#allocation136_spill] sm:$0xff] }
 0x842   :  { %v8204_v28 = vsel %vm2907_vm12, %v2898_v39, %v8044_v43  ;;  %2980 = vmatprep.mubr.f32.mxu0 %v2898_v39  ;;  %3051 = vmatprep.mubr.f32.mxu1 %v2898_v39  ;;  %v9480_v43 = vld [vmem:[#allocation123_spill] sm:$0xff] }
 0x843   :  { %2981 = vmatmul.mubr.f32.vlgmr.msra.gmra.mrb[12].mxu0 %v8201_v58  ;;  %3052 = vmatmul.mubr.f32.vlgmr.msra.gmra.mrb[12].mxu1 %v8201_v58 }
 0x844   :  { %5772 = vmatpush1.bf16.msra.mxu0 %v9010_v53  ;;  %5836 = vmatpush1.bf16.msra.mxu1 %v9011_v46 }
 0x845   :  { %3122 = vmatprep.mubr.f32.mxu0 %v2898_v39  ;;  %3193 = vmatprep.mubr.f32.mxu1 %v2898_v39  ;;  %v9495_v39 = vld [vmem:[#allocation138_spill] sm:$0xff] }
 0x846   :  { %5774 = vmatprep.subr.bf16.mxu0 %v9012_v20  ;;  %5838 = vmatprep.subr.bf16.mxu1 %v9013_v22 }
 0x848   :  { %5776 = vmatpush1.bf16.msra.mxu0 %v9014_v59  ;;  %5840 = vmatpush1.bf16.msra.mxu1 %v9104_v7 }
 0x849   :  { %5778 = vmatprep.subr.bf16.mxu0 %v9105_v12  ;;  %5842 = vmatprep.subr.bf16.mxu1 %v9106_v21 }
 0x84c   :  { %5780 = vmatpush1.bf16.msra.mxu0 %v9107_v2  ;;  %5844 = vmatpush1.bf16.msra.mxu1 %v9108_v34 }
 0x84d   :  { %5782 = vmatprep.subr.bf16.mxu0 %v9109_v23  ;;  %5846 = vmatprep.subr.bf16.mxu1 %v9198_v30 }
 0x850   :  { %5784 = vmatpush1.bf16.msra.mxu0 %v9199_v63  ;;  %5848 = vmatpush1.bf16.msra.mxu1 %v9200_v4 }
 0x851   :  { %5786 = vmatprep.subr.bf16.mxu0 %v9201_v41  ;;  %5850 = vmatprep.subr.bf16.mxu1 %v9202_v38 }
 0x854   :  { %5788 = vmatpush1.bf16.msra.mxu0 %v9203_v50  ;;  %5852 = vmatpush1.bf16.msra.mxu1 %v9292_v24 }
 0x855   :  { %5790 = vmatprep.subr.bf16.mxu0 %v9293_v31  ;;  %5854 = vmatprep.subr.bf16.mxu1 %v9206_v47 }
 0x858   :  { %5792 = vmatpush1.bf16.msra.mxu0 %v9207_v8  ;;  %5856 = vmatpush1.bf16.msra.mxu1 %v9208_v26 }
 0x859   :  { %5794 = vmatprep.subr.bf16.mxu0 %v9209_v25  ;;  %5858 = vmatprep.subr.bf16.mxu1 %v9210_v29 }
 0x85c   :  { %5796 = vmatpush1.bf16.msra.mxu0 %v9211_v36  ;;  %5860 = vmatpush1.bf16.msra.mxu1 %v9212_v42 }
 0x85d   :  { %5798 = vmatprep.subr.bf16.mxu0 %v9213_v51  ;;  %5862 = vmatprep.subr.bf16.mxu1 %v9126_v3 }
 0x860   :  { %5800 = vmatpush1.bf16.msra.mxu0 %v9214_v37  ;;  %5864 = vmatpush1.bf16.msra.mxu1 %v9215_v11 }
 0x861   :  { %5802 = vmatprep.subr.bf16.mxu0 %v9129_v33  ;;  %5866 = vmatprep.subr.bf16.mxu1 %v9130_v14 }
 0x864   :  { %5804 = vmatpush1.bf16.msra.mxu0 %v9131_v57  ;;  %5868 = vmatpush1.bf16.msra.mxu1 %v9132_v13 }
 0x865   :  { %5806 = vmatprep.subr.bf16.mxu0 %v9133_v17  ;;  %5870 = vmatprep.subr.bf16.mxu1 %v9134_v15 }
 0x868   :  { %5808 = vmatpush1.bf16.msra.mxu0 %v9480_v43  ;;  %5872 = vmatpush1.bf16.msra.mxu1 %v9481_v1 }
 0x869   :  { %5810 = vmatprep.subr.bf16.mxu0 %v9482_v6  ;;  %5874 = vmatprep.subr.bf16.mxu1 %v9483_v0 }
 0x86c   :  { %5812 = vmatpush1.bf16.msra.mxu0 %v9484_v62  ;;  %5876 = vmatpush1.bf16.msra.mxu1 %v9485_v45  ;;  %v9496_v45 = vld [vmem:[#allocation139_spill] sm:$0xff] }
 0x86d   :  { %5814 = vmatprep.subr.bf16.mxu0 %v9486_v19  ;;  %5878 = vmatprep.subr.bf16.mxu1 %v9487_v56  ;;  %v9497_v19 = vld [vmem:[#allocation141_spill] sm:$0xff]  ;;  %v9498_v56 = vld [vmem:[#allocation140_spill] sm:$0xff] }
 0x870   :  { %5816 = vmatpush1.bf16.msra.mxu0 %v9488_v60  ;;  %5880 = vmatpush1.bf16.msra.mxu1 %v9489_v32  ;;  %v9499_v60 = vld [vmem:[#allocation142_spill] sm:$0xff]  ;;  %v9500_v32 = vld [vmem:[#allocation143_spill] sm:$0xff] }
 0x871   :  { %5818 = vmatprep.subr.bf16.mxu0 %v9490_v55  ;;  %5882 = vmatprep.subr.bf16.mxu1 %v9491_v54  ;;  %v9501_v55 = vld [vmem:[#allocation145_spill] sm:$0xff]  ;;  %v9502_v54 = vld [vmem:[#allocation144_spill] sm:$0xff] }
 0x874   :  { %5820 = vmatpush1.bf16.msra.mxu0 %v9492_v61  ;;  %5884 = vmatpush1.bf16.msra.mxu1 %v9493_v27  ;;  %v9503_v61 = vld [vmem:[#allocation146_spill] sm:$0xff]  ;;  %v9504_v27 = vld [vmem:[#allocation147_spill] sm:$0xff] }
 0x875   :  { %5822 = vmatprep.subr.bf16.mxu0 %v9494_v48  ;;  %5886 = vmatprep.subr.bf16.mxu1 %v9495_v39  ;;  %v9505_v48 = vld [vmem:[#allocation148_spill] sm:$0xff] }
 0x876   :  { %v9506_v39 = vld [vmem:[#allocation20_spill] sm:$0xff] }
 0x878   :  { %5824 = vmatpush1.bf16.msra.mxu0 %v9496_v45  ;;  %5888 = vmatpush1.bf16.msra.mxu1 %v9497_v19  ;;  %v9507_v45 = vld [vmem:[#allocation21_spill] sm:$0xff] }
 0x879   :  { %5826 = vmatprep.subr.bf16.mxu0 %v9498_v56  ;;  %5890 = vmatprep.subr.bf16.mxu1 %v9499_v60  ;;  %v9508_v60 = vld [vmem:[#allocation22_spill] sm:$0xff]  ;;  %v9517_v56 = vld [vmem:[#allocation31_spill] sm:$0xff]  ;;  %v9572_v19 = vld [vmem:[#allocation149_spill] sm:$0xff] }
 0x87c   :  { %5828 = vmatpush1.bf16.msra.mxu0 %v9500_v32  ;;  %5892 = vmatpush1.bf16.msra.mxu1 %v9501_v55  ;;  %v9509_v32 = vld [vmem:[#allocation23_spill] sm:$0xff]  ;;  %v9510_v55 = vld [vmem:[#allocation24_spill] sm:$0xff] }
 0x87d   :  { %5830 = vmatprep.subr.bf16.mxu0 %v9502_v54  ;;  %5894 = vmatprep.subr.bf16.mxu1 %v9503_v61  ;;  %v9511_v54 = vld [vmem:[#allocation25_spill] sm:$0xff]  ;;  %v9512_v61 = vld [vmem:[#allocation26_spill] sm:$0xff] }
 0x880   :  { %5832 = vmatpush1.bf16.msra.mxu0 %v9504_v27  ;;  %5896 = vmatpush1.bf16.msra.mxu1 %v9505_v48  ;;  %v9513_v27 = vld [vmem:[#allocation27_spill] sm:$0xff]  ;;  %v9514_v48 = vld [vmem:[#allocation28_spill] sm:$0xff] }
 0x881   :  { %5898 = vmatprep.subr.bf16.mxu0 %v9506_v39  ;;  %5962 = vmatprep.subr.bf16.mxu1 %v9507_v45  ;;  %v9515_v39 = vld [vmem:[#allocation29_spill] sm:$0xff]  ;;  %v9516_v45 = vld [vmem:[#allocation30_spill] sm:$0xff] }
 0x883   :  { %3123 = vmatmul.mubr.f32.vlgmr.msra.gmra.mrb[28].mxu0 %v8201_v58  ;;  %3194 = vmatmul.mubr.f32.vlgmr.msra.gmra.mrb[28].mxu1 %v8201_v58  ;;  %v9518_v58 = vld [vmem:[#allocation32_spill] sm:$0xff] }
 0x884   :  { %5900 = vmatpush1.bf16.msra.mxu0 %v9508_v60  ;;  %5964 = vmatpush1.bf16.msra.mxu1 %v9509_v32  ;;  %v9519_v60 = vld [vmem:[#allocation33_spill] sm:$0xff]  ;;  %v9520_v32 = vld [vmem:[#allocation34_spill] sm:$0xff] }
 0x885   :  { %5902 = vmatprep.subr.bf16.mxu0 %v9510_v55  ;;  %5966 = vmatprep.subr.bf16.mxu1 %v9511_v54  ;;  %v9521_v55 = vld [vmem:[#allocation35_spill] sm:$0xff]  ;;  %v9522_v54 = vld [vmem:[#allocation36_spill] sm:$0xff] }
 0x888   :  { %5904 = vmatpush1.bf16.msra.mxu0 %v9512_v61  ;;  %5968 = vmatpush1.bf16.msra.mxu1 %v9513_v27  ;;  %v9523_v61 = vld [vmem:[#allocation37_spill] sm:$0xff]  ;;  %v9524_v27 = vld [vmem:[#allocation38_spill] sm:$0xff] }
 0x889   :  { %5906 = vmatprep.subr.bf16.mxu0 %v9514_v48  ;;  %5970 = vmatprep.subr.bf16.mxu1 %v9515_v39  ;;  %v9525_v48 = vld [vmem:[#allocation39_spill] sm:$0xff]  ;;  %v9526_v39 = vld [vmem:[#allocation40_spill] sm:$0xff] }
 0x88c   :  { %5908 = vmatpush1.bf16.msra.mxu0 %v9516_v45  ;;  %5972 = vmatpush1.bf16.msra.mxu1 %v9517_v56  ;;  %v9527_v45 = vld [vmem:[#allocation41_spill] sm:$0xff]  ;;  %v9528_v56 = vld [vmem:[#allocation42_spill] sm:$0xff] }
 0x88d   :  { %5910 = vmatprep.subr.bf16.mxu0 %v9518_v58  ;;  %5974 = vmatprep.subr.bf16.mxu1 %v9519_v60  ;;  %v9529_v58 = vld [vmem:[#allocation43_spill] sm:$0xff]  ;;  %v9530_v60 = vld [vmem:[#allocation44_spill] sm:$0xff] }
 0x890   :  { %5912 = vmatpush1.bf16.msra.mxu0 %v9520_v32  ;;  %5976 = vmatpush1.bf16.msra.mxu1 %v9521_v55  ;;  %v9531_v32 = vld [vmem:[#allocation45_spill] sm:$0xff]  ;;  %v9532_v55 = vld [vmem:[#allocation46_spill] sm:$0xff] }
 0x891   :  { %5914 = vmatprep.subr.bf16.mxu0 %v9522_v54  ;;  %5978 = vmatprep.subr.bf16.mxu1 %v9523_v61  ;;  %v9533_v54 = vld [vmem:[#allocation47_spill] sm:$0xff]  ;;  %v9534_v61 = vld [vmem:[#allocation48_spill] sm:$0xff] }
 0x894   :  { %5916 = vmatpush1.bf16.msra.mxu0 %v9524_v27  ;;  %5980 = vmatpush1.bf16.msra.mxu1 %v9525_v48  ;;  %v9535_v27 = vld [vmem:[#allocation49_spill] sm:$0xff]  ;;  %v9536_v48 = vld [vmem:[#allocation50_spill] sm:$0xff] }
 0x895   :  { %5918 = vmatprep.subr.bf16.mxu0 %v9526_v39  ;;  %5982 = vmatprep.subr.bf16.mxu1 %v9527_v45  ;;  %v9537_v39 = vld [vmem:[#allocation51_spill] sm:$0xff]  ;;  %v9538_v45 = vld [vmem:[#allocation52_spill] sm:$0xff] }
 0x898   :  { %5920 = vmatpush1.bf16.msra.mxu0 %v9528_v56  ;;  %5984 = vmatpush1.bf16.msra.mxu1 %v9529_v58  ;;  %v9539_v56 = vld [vmem:[#allocation53_spill] sm:$0xff]  ;;  %v9540_v58 = vld [vmem:[#allocation54_spill] sm:$0xff] }
 0x899   :  { %5922 = vmatprep.subr.bf16.mxu0 %v9530_v60  ;;  %5986 = vmatprep.subr.bf16.mxu1 %v9531_v32  ;;  %v9541_v60 = vld [vmem:[#allocation55_spill] sm:$0xff]  ;;  %v9542_v32 = vld [vmem:[#allocation56_spill] sm:$0xff] }
 0x89c   :  { %5924 = vmatpush1.bf16.msra.mxu0 %v9532_v55  ;;  %5988 = vmatpush1.bf16.msra.mxu1 %v9533_v54  ;;  %v9543_v55 = vld [vmem:[#allocation57_spill] sm:$0xff]  ;;  %v9544_v54 = vld [vmem:[#allocation58_spill] sm:$0xff] }
 0x89d   :  { %5926 = vmatprep.subr.bf16.mxu0 %v9534_v61  ;;  %5990 = vmatprep.subr.bf16.mxu1 %v9535_v27  ;;  %v9545_v61 = vld [vmem:[#allocation59_spill] sm:$0xff]  ;;  %v9546_v27 = vld [vmem:[#allocation60_spill] sm:$0xff] }
 0x8a0   :  { %5928 = vmatpush1.bf16.msra.mxu0 %v9536_v48  ;;  %5992 = vmatpush1.bf16.msra.mxu1 %v9537_v39  ;;  %v9547_v48 = vld [vmem:[#allocation61_spill] sm:$0xff]  ;;  %v9548_v39 = vld [vmem:[#allocation62_spill] sm:$0xff] }
 0x8a1   :  { %5930 = vmatprep.subr.bf16.mxu0 %v9538_v45  ;;  %5994 = vmatprep.subr.bf16.mxu1 %v9539_v56  ;;  %v9549_v45 = vld [vmem:[#allocation63_spill] sm:$0xff]  ;;  %v9550_v56 = vld [vmem:[#allocation64_spill] sm:$0xff] }
 0x8a4   :  { %5932 = vmatpush1.bf16.msra.mxu0 %v9540_v58  ;;  %5996 = vmatpush1.bf16.msra.mxu1 %v9541_v60  ;;  %v9551_v58 = vld [vmem:[#allocation65_spill] sm:$0xff]  ;;  %v9552_v60 = vld [vmem:[#allocation66_spill] sm:$0xff] }
 0x8a5   :  { %5934 = vmatprep.subr.bf16.mxu0 %v9542_v32  ;;  %5998 = vmatprep.subr.bf16.mxu1 %v9543_v55  ;;  %v9553_v32 = vld [vmem:[#allocation67_spill] sm:$0xff]  ;;  %v9554_v55 = vld [vmem:[#allocation68_spill] sm:$0xff] }
 0x8a8   :  { %5936 = vmatpush1.bf16.msra.mxu0 %v9544_v54  ;;  %6000 = vmatpush1.bf16.msra.mxu1 %v9545_v61  ;;  %v9555_v54 = vld [vmem:[#allocation69_spill] sm:$0xff]  ;;  %v9556_v61 = vld [vmem:[#allocation70_spill] sm:$0xff] }
 0x8a9   :  { %5938 = vmatprep.subr.bf16.mxu0 %v9546_v27  ;;  %6002 = vmatprep.subr.bf16.mxu1 %v9547_v48  ;;  %v9557_v27 = vld [vmem:[#allocation71_spill] sm:$0xff]  ;;  %v9558_v48 = vld [vmem:[#allocation72_spill] sm:$0xff] }
 0x8ac   :  { %5940 = vmatpush1.bf16.msra.mxu0 %v9548_v39  ;;  %6004 = vmatpush1.bf16.msra.mxu1 %v9549_v45  ;;  %v9559_v39 = vld [vmem:[#allocation73_spill] sm:$0xff]  ;;  %v9560_v45 = vld [vmem:[#allocation74_spill] sm:$0xff] }
 0x8ad   :  { %5942 = vmatprep.subr.bf16.mxu0 %v9550_v56  ;;  %6006 = vmatprep.subr.bf16.mxu1 %v9551_v58  ;;  %v9561_v56 = vld [vmem:[#allocation75_spill] sm:$0xff]  ;;  %v9562_v58 = vld [vmem:[#allocation76_spill] sm:$0xff] }
 0x8b0   :  { %5944 = vmatpush1.bf16.msra.mxu0 %v9552_v60  ;;  %6008 = vmatpush1.bf16.msra.mxu1 %v9553_v32  ;;  %v9563_v60 = vld [vmem:[#allocation77_spill] sm:$0xff]  ;;  %v9564_v32 = vld [vmem:[#allocation78_spill] sm:$0xff] }
 0x8b1   :  { %5946 = vmatprep.subr.bf16.mxu0 %v9554_v55  ;;  %6010 = vmatprep.subr.bf16.mxu1 %v9555_v54  ;;  %v9565_v55 = vld [vmem:[#allocation79_spill] sm:$0xff]  ;;  %v9566_v54 = vld [vmem:[#allocation80_spill] sm:$0xff] }
 0x8b4   :  { %5948 = vmatpush1.bf16.msra.mxu0 %v9556_v61  ;;  %6012 = vmatpush1.bf16.msra.mxu1 %v9557_v27  ;;  %v9567_v61 = vld [vmem:[#allocation81_spill] sm:$0xff]  ;;  %v9568_v27 = vld [vmem:[#allocation82_spill] sm:$0xff] }
 0x8b5   :  { %5950 = vmatprep.subr.bf16.mxu0 %v9558_v48  ;;  %6014 = vmatprep.subr.bf16.mxu1 %v9559_v39  ;;  %v9569_v48 = vld [vmem:[#allocation83_spill] sm:$0xff]  ;;  %v9570_v39 = vld [vmem:[#allocation84_spill] sm:$0xff] }
 0x8b8   :  { %5952 = vmatpush1.bf16.msra.mxu0 %v9560_v45  ;;  %6016 = vmatpush1.bf16.msra.mxu1 %v9561_v56  ;;  %v9571_v45 = vld [vmem:[#allocation85_spill] sm:$0xff] }
 0x8b9   :  { %5954 = vmatprep.subr.bf16.mxu0 %v9562_v58  ;;  %6018 = vmatprep.subr.bf16.mxu1 %v9563_v60 }
 0x8bc   :  { %5956 = vmatpush1.bf16.msra.mxu0 %v9564_v32  ;;  %6020 = vmatpush1.bf16.msra.mxu1 %v9565_v55 }
 0x8bd   :  { %5958 = vmatprep.subr.bf16.mxu0 %v9566_v54  ;;  %6022 = vmatprep.subr.bf16.mxu1 %v9567_v61 }
 0x8c0   :  { %5960 = vmatpush1.bf16.msra.mxu0 %v9568_v27  ;;  %6024 = vmatpush1.bf16.msra.mxu1 %v9569_v48 }
 0x8c1   :  { %6026 = vmatprep.subr.bf16.mxu0 %v9570_v39  ;;  %6090 = vmatprep.subr.bf16.mxu1 %v9571_v45 }
 0x916   :  { %v2982_v56 = vpop.f32.mrb[12].mxu0  ;;  %v3053_v58 = vpop.f32.mrb[12].mxu1 }
 0x917   :  { %v6317_v60 = vadd.f32 %v2982_v56, %v9572_v19  ;;  %v2984_v62 = vpop.f32.mrb[13].mxu0  ;;  %v3055_v32 = vpop.f32.mrb[13].mxu1  ;;  %v6333_v61 = vadd.f32 %v3053_v58, %v9384_v35  ;;  %v9599_v35 = vld [vmem:[#allocation144_spill] sm:$0xff] }
 0x918   :  { %v6318_v55 = vadd.f32 %v2984_v62, %v9195_v9  ;;  %v9601_v9 = vld [vmem:[#allocation147_spill] sm:$0xff] }
 0x919   :  { %v3973_v0 = vmul.f32 -1.442695, %v6317_v60 }
 0x91a   :  { %v3974_v54 = vmul.f32 -1.442695, %v6318_v55  ;;  %v9574_v55 = vld [vmem:[#allocation152_spill] sm:$0xff] }
 0x91b   :  { %6578 = vpow2.f32 %v3973_v0  ;;  %v3631_v0 = vsel %vm3629_vm13, 1, %v9290_v44  ;;  %v9602_v44 = vld [vmem:[#allocation148_spill] sm:$0xff] }
 0x91c   :  { %6580 = vpow2.f32 %v3974_v54  ;;  %3633 = vperm.xlu1 %6385, %v3631_v0  }
 0x91d   :  { %6582 = vtanh.f32 %v6333_v61 }
 0x925   :  { %v6579_v27 = vpop.eup %6578 }
 0x926   :  { %v6581_v48 = vpop.eup %6580  ;;  %v3216_v6 = vadd.f32 1.0, %v6579_v27 }
 0x927   :  { %v3222_v39 = vadd.f32 1.0, %v6581_v48  ;;  %v6583_v45 = vpop.eup %6582 }
 0x928   :  { %6584 = vrcp.f32 %v3216_v6 }
 0x929   :  { %6586 = vrcp.f32 %v3222_v39 }
 0x932   :  { %v6585_v1 = vpop.eup %6584 }
 0x933   :  { %v6587_v56 = vpop.eup %6586  ;;  %v3234_v19 = vmul.f32 %v6585_v1, %v6583_v45 }
 0x934   :  { %v3233_v43 = vmul.f32 %v6587_v56, %v8182_v18  ;;  %v6334_v18 = vadd.f32 %v3055_v32, %v7405_v5  ;;  %v9600_v5 = vld [vmem:[#allocation146_spill] sm:$0xff] }
 0x936   :  { %v8342_v62 = vadd.f32 %v3234_v19, %v3233_v43  ;;  %v3975_v1 = vmul.f32 -1.442695, %v6334_v18 }
 0x938   :  { %9573 = vst [vmem:[#allocation88_spill] sm:$0xff] %v8342_v62 }
 0x956   :  { %v3124_v58 = vpop.f32.mrb[28].mxu0  ;;  %v3195_v60 = vpop.f32.mrb[28].mxu1 }
 0x957   :  { %v3209_v54 = vadd.f32 %v3124_v58, %v9574_v55  ;;  %v3126_v61 = vpop.f32.mrb[29].mxu0  ;;  %v3197_v6 = vpop.f32.mrb[29].mxu1  ;;  %v3211_v45 = vadd.f32 %v3195_v60, %v9197_v16  ;;  %v9595_v16 = vld [vmem:[#allocation140_spill] sm:$0xff] }
 0x958   :  { %v3210_v39 = vadd.f32 %v3126_v61, %v9103_v40  ;;  %v3212_v43 = vadd.f32 %v3197_v6, %v7400_v52  ;;  %v9596_v52 = vld [vmem:[#allocation142_spill] sm:$0xff]  ;;  %v9597_v40 = vld [vmem:[#allocation143_spill] sm:$0xff] }
 0x959   :  { %v3976_v27 = vmul.f32 -1.442695, %v3209_v54 }
 0x95a   :  { %v3977_v48 = vmul.f32 -1.442695, %v3210_v39  ;;  %v3978_v19 = vmul.f32 -1.442695, %v3212_v43 }
 0x95b   :  { %6588 = vpow2.f32 %v3976_v27 }
 0x95c   :  { %6590 = vpow2.f32 %v3977_v48 }
 0x95d   :  { %6592 = vpow2.f32 %v3975_v1  ;;  %v3270_v1 = vpop.permute.xlu0 %3269 }
 0x95e   :  { %6594 = vpow2.f32 %v3978_v19  ;;  %vm3271_vm14 = vcmp.eq.s32.totalorder %v3270_v1, 1  ;;  %v9587_v1 = vld [vmem:[#allocation132_spill] sm:$0xff] }
 0x95f   :  { %6596 = vtanh.f32 %v3211_v45 }
 0x965   :  { %v6589_v56 = vpop.eup %6588 }
 0x966   :  { %v6591_v0 = vpop.eup %6590  ;;  %v3241_v58 = vadd.f32 1.0, %v6589_v56 }
 0x967   :  { %v3247_v55 = vadd.f32 1.0, %v6591_v0  ;;  %v6593_v54 = vpop.eup %6592 }
 0x968   :  { %6598 = vrcp.f32 %v3241_v58  ;;  %v6595_v61 = vpop.eup %6594  ;;  %v3229_v43 = vadd.f32 1.0, %v6593_v54  ;;  %v9578_v54 = vld [vmem:[#allocation125_spill] sm:$0xff] }
 0x969   :  { %6600 = vrcp.f32 %v3247_v55  ;;  %v6597_v39 = vpop.eup %6596  ;;  %v3254_v6 = vadd.f32 1.0, %v6595_v61  ;;  %v9579_v61 = vld [vmem:[#allocation124_spill] sm:$0xff] }
 0x96a   :  { %6602 = vtanh.f32 %v8342_v62  ;;  %v9598_v62 = vld [vmem:[#allocation145_spill] sm:$0xff] }
 0x96b   :  { %6604 = vrcp.f32 %v3254_v6  ;;  %v9584_v6 = vld [vmem:[#allocation130_spill] sm:$0xff] }
 0x972   :  { %v6599_v27 = vpop.eup %6598 }
 0x973   :  { %v6601_v32 = vpop.eup %6600  ;;  %v3259_v48 = vmul.f32 %v6599_v27, %v6597_v39  ;;  %v9580_v39 = vld [vmem:[#allocation126_spill] sm:$0xff]  ;;  %v9581_v27 = vld [vmem:[#allocation127_spill] sm:$0xff] }
 0x974   :  { %v3258_v18 = vmul.f32 %v6601_v32, %v8197_v49  ;;  %v6603_v55 = vpop.eup %6602  ;;  %v9582_v32 = vld [vmem:[#allocation129_spill] sm:$0xff] }
 0x975   :  { %v6605_v19 = vpop.eup %6604 }
 0x976   :  { %v8352_v60 = vadd.f32 %v3259_v48, %v3258_v18  ;;  %v9583_v48 = vld [vmem:[#allocation128_spill] sm:$0xff]  ;;  %v9585_v18 = vld [vmem:[#allocation131_spill] sm:$0xff] }
 0x978   :  { %9575 = vst [vmem:[#allocation87_spill] sm:$0xff] %v8352_v60  ;;  %6606 = vtanh.f32 %v8352_v60  ;;  %v9594_v60 = vld [vmem:[#allocation141_spill] sm:$0xff] }
 0x979   :  { %6608 = vrcp.f32 %v3229_v43  ;;  %v9586_v43 = vld [vmem:[#allocation133_spill] sm:$0xff] }
 0x982   :  { %v6607_v45 = vpop.eup %6606 }
 0x983   :  { %v6609_v56 = vpop.eup %6608  ;;  %v3262_v0 = vmul.f32 %v6607_v45, %v6605_v19  ;;  %v9589_v19 = vld [vmem:[#allocation135_spill] sm:$0xff]  ;;  %v9590_v45 = vld [vmem:[#allocation137_spill] sm:$0xff] }
 0x984   :  { %v8356_v58 = vmul.f32 %v6609_v56, %v6603_v55  ;;  %v9588_v55 = vld [vmem:[#allocation134_spill] sm:$0xff]  ;;  %v9591_v56 = vld [vmem:[#allocation136_spill] sm:$0xff] }
 0x985   :  { %v8359_v49 = vsel %vm3271_vm14, %v3262_v0, %v8204_v28  ;;  %3344 = vmatprep.mubr.f32.mxu0 %v3262_v0  ;;  %3415 = vmatprep.mubr.f32.mxu1 %v3262_v0  ;;  %v9577_v28 = vld [vmem:[#allocation123_spill] sm:$0xff] }
 0x986   :  { %9576 = vst [vmem:[#allocation89_spill] sm:$0xff] %v8359_v49  ;;  %3345 = vmatmul.mubr.f32.vlgmr.msra.gmra.mrb[14].mxu0 %v8356_v58  ;;  %3416 = vmatmul.mubr.f32.vlgmr.msra.gmra.mrb[14].mxu1 %v8356_v58  ;;  %v9593_v49 = vld [vmem:[#allocation139_spill] sm:$0xff] }
 0x987   :  { %6028 = vmatpush1.bf16.msra.mxu0 %v9010_v53  ;;  %6092 = vmatpush1.bf16.msra.mxu1 %v9011_v46 }
 0x988   :  { %3486 = vmatprep.mubr.f32.mxu0 %v3262_v0  ;;  %3557 = vmatprep.mubr.f32.mxu1 %v3262_v0  ;;  %v9592_v0 = vld [vmem:[#allocation138_spill] sm:$0xff] }
 0x989   :  { %6030 = vmatprep.subr.bf16.mxu0 %v9012_v20  ;;  %6094 = vmatprep.subr.bf16.mxu1 %v9013_v22 }
 0x98b   :  { %6032 = vmatpush1.bf16.msra.mxu0 %v9014_v59  ;;  %6096 = vmatpush1.bf16.msra.mxu1 %v9104_v7 }
 0x98c   :  { %6034 = vmatprep.subr.bf16.mxu0 %v9105_v12  ;;  %6098 = vmatprep.subr.bf16.mxu1 %v9106_v21 }
 0x98f   :  { %6036 = vmatpush1.bf16.msra.mxu0 %v9107_v2  ;;  %6100 = vmatpush1.bf16.msra.mxu1 %v9108_v34 }
 0x990   :  { %6038 = vmatprep.subr.bf16.mxu0 %v9109_v23  ;;  %6102 = vmatprep.subr.bf16.mxu1 %v9198_v30 }
 0x993   :  { %6040 = vmatpush1.bf16.msra.mxu0 %v9199_v63  ;;  %6104 = vmatpush1.bf16.msra.mxu1 %v9200_v4 }
 0x994   :  { %6042 = vmatprep.subr.bf16.mxu0 %v9201_v41  ;;  %6106 = vmatprep.subr.bf16.mxu1 %v9202_v38 }
 0x997   :  { %6044 = vmatpush1.bf16.msra.mxu0 %v9203_v50  ;;  %6108 = vmatpush1.bf16.msra.mxu1 %v9292_v24 }
 0x998   :  { %6046 = vmatprep.subr.bf16.mxu0 %v9293_v31  ;;  %6110 = vmatprep.subr.bf16.mxu1 %v9206_v47 }
 0x99b   :  { %6048 = vmatpush1.bf16.msra.mxu0 %v9207_v8  ;;  %6112 = vmatpush1.bf16.msra.mxu1 %v9208_v26 }
 0x99c   :  { %6050 = vmatprep.subr.bf16.mxu0 %v9209_v25  ;;  %6114 = vmatprep.subr.bf16.mxu1 %v9210_v29 }
 0x99f   :  { %6052 = vmatpush1.bf16.msra.mxu0 %v9211_v36  ;;  %6116 = vmatpush1.bf16.msra.mxu1 %v9212_v42 }
 0x9a0   :  { %6054 = vmatprep.subr.bf16.mxu0 %v9213_v51  ;;  %6118 = vmatprep.subr.bf16.mxu1 %v9126_v3 }
 0x9a3   :  { %6056 = vmatpush1.bf16.msra.mxu0 %v9214_v37  ;;  %6120 = vmatpush1.bf16.msra.mxu1 %v9215_v11 }
 0x9a4   :  { %6058 = vmatprep.subr.bf16.mxu0 %v9129_v33  ;;  %6122 = vmatprep.subr.bf16.mxu1 %v9130_v14 }
 0x9a7   :  { %6060 = vmatpush1.bf16.msra.mxu0 %v9131_v57  ;;  %6124 = vmatpush1.bf16.msra.mxu1 %v9132_v13 }
 0x9a8   :  { %6062 = vmatprep.subr.bf16.mxu0 %v9133_v17  ;;  %6126 = vmatprep.subr.bf16.mxu1 %v9134_v15 }
 0x9ab   :  { %6064 = vmatpush1.bf16.msra.mxu0 %v9577_v28  ;;  %6128 = vmatpush1.bf16.msra.mxu1 %v9578_v54 }
 0x9ac   :  { %6066 = vmatprep.subr.bf16.mxu0 %v9579_v61  ;;  %6130 = vmatprep.subr.bf16.mxu1 %v9580_v39 }
 0x9af   :  { %6068 = vmatpush1.bf16.msra.mxu0 %v9581_v27  ;;  %6132 = vmatpush1.bf16.msra.mxu1 %v9582_v32 }
 0x9b0   :  { %6070 = vmatprep.subr.bf16.mxu0 %v9583_v48  ;;  %6134 = vmatprep.subr.bf16.mxu1 %v9584_v6 }
 0x9b3   :  { %6072 = vmatpush1.bf16.msra.mxu0 %v9585_v18  ;;  %6136 = vmatpush1.bf16.msra.mxu1 %v9586_v43 }
 0x9b4   :  { %6074 = vmatprep.subr.bf16.mxu0 %v9587_v1  ;;  %6138 = vmatprep.subr.bf16.mxu1 %v9588_v55 }
 0x9b7   :  { %6076 = vmatpush1.bf16.msra.mxu0 %v9589_v19  ;;  %6140 = vmatpush1.bf16.msra.mxu1 %v9590_v45 }
 0x9b8   :  { %6078 = vmatprep.subr.bf16.mxu0 %v9591_v56  ;;  %6142 = vmatprep.subr.bf16.mxu1 %v9592_v0 }
 0x9bb   :  { %6080 = vmatpush1.bf16.msra.mxu0 %v9593_v49  ;;  %6144 = vmatpush1.bf16.msra.mxu1 %v9594_v60  ;;  %v9604_v49 = vld [vmem:[#allocation85_spill] sm:$0xff] }
 0x9bc   :  { %6082 = vmatprep.subr.bf16.mxu0 %v9595_v16  ;;  %6146 = vmatprep.subr.bf16.mxu1 %v9596_v52 }
 0x9bf   :  { %6084 = vmatpush1.bf16.msra.mxu0 %v9597_v40  ;;  %6148 = vmatpush1.bf16.msra.mxu1 %v9598_v62 }
 0x9c0   :  { %6086 = vmatprep.subr.bf16.mxu0 %v9599_v35  ;;  %6150 = vmatprep.subr.bf16.mxu1 %v9600_v5 }
 0x9c3   :  { %6088 = vmatpush1.bf16.msra.mxu0 %v9601_v9  ;;  %6152 = vmatpush1.bf16.msra.mxu1 %v9602_v44 }
 0x9c4   :  { %6154 = vmatprep.subr.bf16.mxu0 %v9603_v10  ;;  %6218 = vmatprep.subr.bf16.mxu1 %v9604_v49 }
 0x9c6   :  { %3487 = vmatmul.mubr.f32.vlgmr.msra.gmra.mrb[30].mxu0 %v8356_v58  ;;  %3558 = vmatmul.mubr.f32.vlgmr.msra.gmra.mrb[30].mxu1 %v8356_v58 }
 0x9c7   :  { %6156 = vmatpush1.bf16.msra.mxu0 %v9010_v53  ;;  %6220 = vmatpush1.bf16.msra.mxu1 %v9011_v46  ;;  %v9605_v53 = vld [vmem:[#allocation139_spill] sm:$0xff]  ;;  %v9606_v46 = vld [vmem:[#allocation86_spill] sm:$0xff] }
 0x9c8   :  { %6158 = vmatprep.subr.bf16.mxu0 %v9012_v20  ;;  %6222 = vmatprep.subr.bf16.mxu1 %v9013_v22  ;;  %vm3818_vm15 = vcmp.eq.s32.totalorder %v9606_v46, 7  ;;  %v9607_v20 = vmov 0  }
 0x9c9   :  { %v3820_v22 = vsel %vm3818_vm15, 1, %v9607_v20 }
 0x9ca   :  { %3822 = vperm.xlu0 %6384, %v3820_v22   ;;  %v9618_v22 = vld [vmem:[#allocation89_spill] sm:$0xff] }
 0x9cb   :  { %6160 = vmatpush1.bf16.msra.mxu0 %v9014_v59  ;;  %6224 = vmatpush1.bf16.msra.mxu1 %v9104_v7 }
 0x9cc   :  { %6162 = vmatprep.subr.bf16.mxu0 %v9105_v12  ;;  %6226 = vmatprep.subr.bf16.mxu1 %v9106_v21 }
 0x9cf   :  { %6164 = vmatpush1.bf16.msra.mxu0 %v9107_v2  ;;  %6228 = vmatpush1.bf16.msra.mxu1 %v9108_v34  ;;  %v9609_v2 = vld [vmem:[#allocation150_spill] sm:$0xff] }
 0x9d0   :  { %6166 = vmatprep.subr.bf16.mxu0 %v9109_v23  ;;  %6230 = vmatprep.subr.bf16.mxu1 %v9198_v30 }
 0x9d3   :  { %6168 = vmatpush1.bf16.msra.mxu0 %v9199_v63  ;;  %6232 = vmatpush1.bf16.msra.mxu1 %v9200_v4 }
 0x9d4   :  { %6170 = vmatprep.subr.bf16.mxu0 %v9201_v41  ;;  %6234 = vmatprep.subr.bf16.mxu1 %v9202_v38 }
 0x9d7   :  { %6172 = vmatpush1.bf16.msra.mxu0 %v9203_v50  ;;  %6236 = vmatpush1.bf16.msra.mxu1 %v9292_v24 }
 0x9d8   :  { %6174 = vmatprep.subr.bf16.mxu0 %v9293_v31  ;;  %6238 = vmatprep.subr.bf16.mxu1 %v9206_v47  ;;  %v9614_v31 = vld [vmem:[#allocation153_spill] sm:$0xff] }
 0x9db   :  { %6176 = vmatpush1.bf16.msra.mxu0 %v9207_v8  ;;  %6240 = vmatpush1.bf16.msra.mxu1 %v9208_v26 }
 0x9dc   :  { %6178 = vmatprep.subr.bf16.mxu0 %v9209_v25  ;;  %6242 = vmatprep.subr.bf16.mxu1 %v9210_v29 }
 0x9df   :  { %6180 = vmatpush1.bf16.msra.mxu0 %v9211_v36  ;;  %6244 = vmatpush1.bf16.msra.mxu1 %v9212_v42  ;;  %v9613_v42 = vld [vmem:[#allocation152_spill] sm:$0xff] }
 0x9e0   :  { %6182 = vmatprep.subr.bf16.mxu0 %v9213_v51  ;;  %6246 = vmatprep.subr.bf16.mxu1 %v9126_v3 }
 0x9e3   :  { %6184 = vmatpush1.bf16.msra.mxu0 %v9214_v37  ;;  %6248 = vmatpush1.bf16.msra.mxu1 %v9215_v11  ;;  %v9612_v37 = vld [vmem:[#allocation88_spill] sm:$0xff] }
 0x9e4   :  { %6186 = vmatprep.subr.bf16.mxu0 %v9129_v33  ;;  %6250 = vmatprep.subr.bf16.mxu1 %v9130_v14 }
 0x9e7   :  { %6188 = vmatpush1.bf16.msra.mxu0 %v9131_v57  ;;  %6252 = vmatpush1.bf16.msra.mxu1 %v9132_v13 }
 0x9e8   :  { %6190 = vmatprep.subr.bf16.mxu0 %v9133_v17  ;;  %6254 = vmatprep.subr.bf16.mxu1 %v9134_v15  ;;  %v9611_v15 = vld [vmem:[#allocation151_spill] sm:$0xff] }
 0x9eb   :  { %6192 = vmatpush1.bf16.msra.mxu0 %v9577_v28  ;;  %6256 = vmatpush1.bf16.msra.mxu1 %v9578_v54  ;;  %v9616_v28 = vld [vmem:[#allocation155_spill] sm:$0xff] }
 0x9ec   :  { %6194 = vmatprep.subr.bf16.mxu0 %v9579_v61  ;;  %6258 = vmatprep.subr.bf16.mxu1 %v9580_v39 }
 0x9ef   :  { %6196 = vmatpush1.bf16.msra.mxu0 %v9581_v27  ;;  %6260 = vmatpush1.bf16.msra.mxu1 %v9582_v32 }
 0x9f0   :  { %6198 = vmatprep.subr.bf16.mxu0 %v9583_v48  ;;  %6262 = vmatprep.subr.bf16.mxu1 %v9584_v6 }
 0x9f3   :  { %6200 = vmatpush1.bf16.msra.mxu0 %v9585_v18  ;;  %6264 = vmatpush1.bf16.msra.mxu1 %v9586_v43 }
 0x9f4   :  { %6202 = vmatprep.subr.bf16.mxu0 %v9587_v1  ;;  %6266 = vmatprep.subr.bf16.mxu1 %v9588_v55 }
 0x9f7   :  { %6204 = vmatpush1.bf16.msra.mxu0 %v9589_v19  ;;  %6268 = vmatpush1.bf16.msra.mxu1 %v9590_v45  ;;  %v9617_v19 = vld [vmem:[#allocation87_spill] sm:$0xff] }
 0x9f8   :  { %6206 = vmatprep.subr.bf16.mxu0 %v9591_v56  ;;  %6270 = vmatprep.subr.bf16.mxu1 %v9592_v0  ;;  %v3634_v0 = vpop.permute.xlu1 %3633 }
 0x9f9   :  { %vm3635_vm0 = vcmp.eq.s32.totalorder %v3634_v0, 1 }
 0x9fb   :  { %6208 = vmatpush1.bf16.msra.mxu0 %v9605_v53  ;;  %6272 = vmatpush1.bf16.msra.mxu1 %v9594_v60  ;;  %v9615_v60 = vld [vmem:[#allocation154_spill] sm:$0xff] }
 0x9fc   :  { %6210 = vmatprep.subr.bf16.mxu0 %v9595_v16  ;;  %6274 = vmatprep.subr.bf16.mxu1 %v9596_v52  ;;  %v9608_v52 = vld [vmem:[#allocation149_spill] sm:$0xff] }
 0x9ff   :  { %6212 = vmatpush1.bf16.msra.mxu0 %v9597_v40  ;;  %6276 = vmatpush1.bf16.msra.mxu1 %v9598_v62 }
 0xa00   :  { %6214 = vmatprep.subr.bf16.mxu0 %v9599_v35  ;;  %6278 = vmatprep.subr.bf16.mxu1 %v9600_v5 }
 0xa03   :  { %6216 = vmatpush1.bf16.msra.mxu0 %v9601_v9  ;;  %6280 = vmatpush1.bf16.msra.mxu1 %v9602_v44  ;;  %v9610_v9 = vld [vmem:[#allocation156_spill] sm:$0xff] }
 0xa59   :  { %v3346_v59 = vpop.f32.mrb[14].mxu0  ;;  %v3417_v7 = vpop.f32.mrb[14].mxu1 }
 0xa5a   :  { %v6319_v12 = vadd.f32 %v3346_v59, %v9608_v52  ;;  %v3348_v40 = vpop.f32.mrb[15].mxu0  ;;  %v3419_v21 = vpop.f32.mrb[15].mxu1  ;;  %v6335_v3 = vadd.f32 %v3417_v7, %v9611_v15  ;;  %v3826_v7 = vld [vmem:[#allocation13] sm:$0xff]  ;;  %v3827_v52 = vld [vmem:[#allocation13 + $0x8] sm:$0xff] }
 0xa5b   :  { %v6320_v34 = vadd.f32 %v3348_v40, %v9609_v2  ;;  %v6336_v5 = vadd.f32 %v3419_v21, %v9610_v9  ;;  %v6790_v40 = vmov 0.0|0.0   ;;  %v3828_v21 = vld [vmem:[#allocation13 + $0x10] sm:$0xff]  ;;  %v3829_v2 = vld [vmem:[#allocation13 + $0x18] sm:$0xff] }
 0xa5c   :  { %v3979_v23 = vmul.f32 -1.442695, %v6319_v12  ;;  %v6282_v12 = vpack.c.bf16 %v3827_v52, %v3826_v7  ;;  %6281 = vmatprep.subr.bf16.mxu0 %v6790_v40 }
 0xa5d   :  { %v3980_v13 = vmul.f32 -1.442695, %v6320_v34  ;;  %v3981_v17 = vmul.f32 -1.442695, %v6336_v5  ;;  %v6285_v34 = vpack.c.bf16 %v3829_v2, %v3828_v21  ;;  %v3832_v5 = vld [vmem:[#allocation13 + $0x30] sm:$0xff] }
 0xa5e   :  { %6610 = vpow2.f32 %v3979_v23  ;;  %v3830_v23 = vld [vmem:[#allocation13 + $0x20] sm:$0xff] }
 0xa5f   :  { %6612 = vpow2.f32 %v3980_v13  ;;  %v3831_v13 = vld [vmem:[#allocation13 + $0x28] sm:$0xff] }
 0xa60   :  { %6614 = vpow2.f32 %v3981_v17  ;;  %v6288_v9 = vpack.c.bf16 %v3831_v13, %v3830_v23  ;;  %v3833_v17 = vld [vmem:[#allocation13 + $0x38] sm:$0xff] }
 0xa61   :  { %6616 = vtanh.f32 %v6335_v3  ;;  %v6291_v15 = vpack.c.bf16 %v3833_v17, %v3832_v5  ;;  %v3834_v3 = vld [vmem:[#allocation13 + $0x40] sm:$0xff] }
 0xa68   :  { %v6611_v33 = vpop.eup %6610 }
 0xa69   :  { %v6613_v14 = vpop.eup %6612  ;;  %v3580_v57 = vadd.f32 1.0, %v6611_v33  ;;  %v3835_v33 = vld [vmem:[#allocation13 + $0x48] sm:$0xff] }
 0xa6a   :  { %v3586_v16 = vadd.f32 1.0, %v6613_v14  ;;  %v6615_v30 = vpop.eup %6614  ;;  %v6294_v14 = vpack.c.bf16 %v3835_v33, %v3834_v3 }
 0xa6b   :  { %6618 = vrcp.f32 %v3580_v57  ;;  %v6617_v63 = vpop.eup %6616  ;;  %v3593_v50 = vadd.f32 1.0, %v6615_v30  ;;  %v3836_v57 = vld [vmem:[#allocation13 + $0x50] sm:$0xff] }
 0xa6c   :  { %6620 = vrcp.f32 %v3586_v16  ;;  %v3837_v16 = vld [vmem:[#allocation13 + $0x58] sm:$0xff] }
 0xa6d   :  { %6622 = vrcp.f32 %v3593_v50  ;;  %v6297_v30 = vpack.c.bf16 %v3837_v16, %v3836_v57  ;;  %v3841_v50 = vld [vmem:[#allocation13 + $0x78] sm:$0xff] }
 0xa75   :  { %v6619_v4 = vpop.eup %6618 }
 0xa76   :  { %v6621_v41 = vpop.eup %6620  ;;  %v3598_v38 = vmul.f32 %v6619_v4, %v6617_v63  ;;  %v3838_v63 = vld [vmem:[#allocation13 + $0x60] sm:$0xff]  ;;  %v3839_v4 = vld [vmem:[#allocation13 + $0x68] sm:$0xff] }
 0xa77   :  { %v3597_v11 = vmul.f32 %v6621_v41, %v9612_v37  ;;  %v6623_v8 = vpop.eup %6622  ;;  %v6300_v41 = vpack.c.bf16 %v3839_v4, %v3838_v63 }
 0xa79   :  { %v3599_v47 = vadd.f32 %v3598_v38, %v3597_v11  ;;  %v3840_v38 = vld [vmem:[#allocation13 + $0x70] sm:$0xff]  ;;  %v9619_v11 = vmov 0.0  }
 0xa7a   :  { %v6303_v37 = vpack.c.bf16 %v3841_v50, %v3840_v38 }
 0xa7b   :  { %6624 = vtanh.f32 %v3599_v47 }
 0xa85   :  { %v6625_v26 = vpop.eup %6624 }
 0xa86   :  { %v3601_v25 = vmul.f32 %v6625_v26, %v6623_v8 }
 0xa99   :  { %v3488_v29 = vpop.f32.mrb[30].mxu0  ;;  %v3559_v36 = vpop.f32.mrb[30].mxu1 }
 0xa9a   :  { %v3573_v51 = vadd.f32 %v3488_v29, %v9613_v42  ;;  %v3490_v44 = vpop.f32.mrb[31].mxu0  ;;  %v3561_v24 = vpop.f32.mrb[31].mxu1  ;;  %v3575_v54 = vadd.f32 %v3559_v36, %v9616_v28 }
 0xa9b   :  { %v3574_v35 = vadd.f32 %v3490_v44, %v9614_v31  ;;  %v3576_v58 = vadd.f32 %v3561_v24, %v9615_v60 }
 0xa9c   :  { %v3982_v10 = vmul.f32 -1.442695, %v3573_v51 }
 0xa9d   :  { %v3983_v62 = vmul.f32 -1.442695, %v3574_v35  ;;  %v3984_v49 = vmul.f32 -1.442695, %v3576_v58 }
 0xa9e   :  { %6626 = vpow2.f32 %v3982_v10 }
 0xa9f   :  { %6628 = vpow2.f32 %v3983_v62 }
 0xaa0   :  { %6630 = vpow2.f32 %v3984_v49 }
 0xaa1   :  { %6632 = vtanh.f32 %v3575_v54 }
 0xaa8   :  { %v6627_v61 = vpop.eup %6626 }
 0xaa9   :  { %v6629_v39 = vpop.eup %6628  ;;  %v3605_v27 = vadd.f32 1.0, %v6627_v61 }
 0xaaa   :  { %v3611_v32 = vadd.f32 1.0, %v6629_v39  ;;  %v6631_v48 = vpop.eup %6630 }
 0xaab   :  { %6634 = vrcp.f32 %v3605_v27  ;;  %v6633_v6 = vpop.eup %6632  ;;  %v3618_v55 = vadd.f32 1.0, %v6631_v48 }
 0xaac   :  { %6636 = vrcp.f32 %v3611_v32 }
 0xaad   :  { %6638 = vrcp.f32 %v3618_v55  ;;  %v3988_v55 = vld [vmem:[%s8538_s7] ss:$0 sm:$0xff] }
 0xab5   :  { %v6635_v18 = vpop.eup %6634 }
 0xab6   :  { %v6637_v43 = vpop.eup %6636  ;;  %v3623_v1 = vmul.f32 %v6635_v18, %v6633_v6  ;;  %v3823_v6 = vpop.permute.xlu0 %3822 }
 0xab7   :  { %v3622_v45 = vmul.f32 %v6637_v43, %v9617_v19  ;;  %v6639_v53 = vpop.eup %6638  ;;  %vm3824_vm2 = vcmp.eq.s32.totalorder %v3823_v6, 1 }
 0xab9   :  { %v8503_v56 = vadd.f32 %v3623_v1, %v3622_v45 }
 0xabb   :  { %6640 = vtanh.f32 %v8503_v56 }
 0xac5   :  { %v6641_v46 = vpop.eup %6640 }
 0xac6   :  { %v3626_v20 = vmul.f32 %v6641_v46, %v6639_v53 }
 0xac8   :  { %v8507_v59 = vsel %vm3635_vm0, %v3626_v20, %v9618_v22  ;;  %3711 = vmatprep.mubr.f32.mxu0 %v3626_v20  ;;  %3782 = vmatprep.mubr.f32.mxu1 %v3626_v20 }
 0xac9   :  { %3712 = vmatmul.mubr.f32.vlgmr.msra.gmra.mrb[32].mxu0 %v3601_v25  ;;  %3783 = vmatmul.mubr.f32.vlgmr.msra.gmra.mrb[32].mxu1 %v3601_v25 }
 0xaca   :  { %6283 = vmatpush3.bf16.msra.mxu0 %v6282_v12  ;;  %4038 = vmatprep.mubr.msk.f32.mxu0 %vm6791_vm1, %v9619_v11 }
 0xacb   :  { %6284 = vmatprep.subr.bf16.mxu0 %v6790_v40 }
 0xace   :  { %6286 = vmatpush3.bf16.msra.mxu0 %v6285_v34 }
 0xacf   :  { %6287 = vmatprep.subr.bf16.mxu0 %v6790_v40 }
 0xad2   :  { %6289 = vmatpush3.bf16.msra.mxu0 %v6288_v9 }
 0xad3   :  { %6290 = vmatprep.subr.bf16.mxu0 %v6790_v40 }
 0xad6   :  { %6292 = vmatpush3.bf16.msra.mxu0 %v6291_v15 }
 0xad7   :  { %6293 = vmatprep.subr.bf16.mxu0 %v6790_v40 }
 0xada   :  { %6295 = vmatpush3.bf16.msra.mxu0 %v6294_v14 }
 0xadb   :  { %6296 = vmatprep.subr.bf16.mxu0 %v6790_v40 }
 0xade   :  { %6298 = vmatpush3.bf16.msra.mxu0 %v6297_v30 }
 0xadf   :  { %6299 = vmatprep.subr.bf16.mxu0 %v6790_v40 }
 0xae2   :  { %6301 = vmatpush3.bf16.msra.mxu0 %v6300_v41 }
 0xae3   :  { %6302 = vmatprep.subr.bf16.mxu0 %v6790_v40 }
 0xae6   :  { %6304 = vmatpush3.bf16.msra.mxu0 %v6303_v37 }
 0xb9c   :  { %v3713_v47 = vpop.f32.mrb[32].mxu0  ;;  %v3784_v8 = vpop.f32.mrb[32].mxu1 }
 0xb9d   :  { %v3789_v26 = vadd.f32 %v3713_v47, %v9613_v42  ;;  %v3715_v25 = vpop.f32.mrb[33].mxu0  ;;  %v3786_v29 = vpop.f32.mrb[33].mxu1  ;;  %v3791_v10 = vadd.f32 %v3784_v8, %v9616_v28 }
 0xb9e   :  { %v3790_v36 = vadd.f32 %v3715_v25, %v9614_v31  ;;  %v3792_v24 = vadd.f32 %v3786_v29, %v9615_v60 }
 0xb9f   :  { %v3985_v51 = vmul.f32 -1.442695, %v3789_v26 }
 0xba0   :  { %v3986_v44 = vmul.f32 -1.442695, %v3790_v36  ;;  %v3987_v35 = vmul.f32 -1.442695, %v3792_v24 }
 0xba1   :  { %6642 = vpow2.f32 %v3985_v51 }
 0xba2   :  { %6644 = vpow2.f32 %v3986_v44 }
 0xba3   :  { %6646 = vpow2.f32 %v3987_v35 }
 0xba4   :  { %6648 = vtanh.f32 %v3791_v10 }
 0xbab   :  { %v6643_v62 = vpop.eup %6642 }
 0xbac   :  { %v6645_v58 = vpop.eup %6644  ;;  %v3796_v49 = vadd.f32 1.0, %v6643_v62 }
 0xbad   :  { %v3802_v54 = vadd.f32 1.0, %v6645_v58  ;;  %v6647_v42 = vpop.eup %6646 }
 0xbae   :  { %6650 = vrcp.f32 %v3796_v49  ;;  %v6649_v61 = vpop.eup %6648  ;;  %v3809_v32 = vadd.f32 1.0, %v6647_v42 }
 0xbaf   :  { %6652 = vrcp.f32 %v3802_v54 }
 0xbb0   :  { %6654 = vrcp.f32 %v3809_v32 }
 0xbb8   :  { %v6651_v31 = vpop.eup %6650 }
 0xbb9   :  { %v6653_v39 = vpop.eup %6652  ;;  %v3814_v27 = vmul.f32 %v6651_v31, %v6649_v61 }
 0xbba   :  { %v3813_v48 = vmul.f32 %v6653_v39, %v8503_v56  ;;  %v6655_v28 = vpop.eup %6654 }
 0xbbc   :  { %v3815_v60 = vadd.f32 %v3814_v27, %v3813_v48 }
 0xbbe   :  { %6656 = vtanh.f32 %v3815_v60 }
 0xbc8   :  { %v6657_v18 = vpop.eup %6656 }
 0xbc9   :  { %v3817_v43 = vmul.f32 %v6657_v18, %v6655_v28 }
 0xbcb   :  { %v3825_v1 = vsel %vm3824_vm2, %v3817_v43, %v8507_v59 }
 0xbcc   :  { %4039 = vmatmul.mubr.f32.vlgmr.msra.gmra.mrb[34].mxu0 %v3825_v1 }
 0xc9f   :  { %v3915_v19 = vpop.f32.mrb[34].mxu0 }
 0xca0   :  { %v3916_v45 = vadd.f32 %v3988_v55, %v3915_v19  ;;  %v4040_v56 = vpop.f32.mrb[35].mxu0 }
 0xca2   :  { %3919 = vst [vmem:[#allocation15] sm:$0xff] %v3916_v45 }
 0xca3   :  { %6759 = shalt.err (!%p6756_p8)
}
 0xca4   :  { %s6760_s23 = scalar_lea.hbm %s8539_s8, 128 }
 0xca5   :  { %p6761_p9 = scmp.ne.s32.totalorder %s8539_s8, %s6760_s23  ;;  %p6764_p10 = scmp.lt.u32.totalorder %s6760_s23, %s8539_s8 }
 0xca7   :  { %p6766_p11 = pnand %p6764_p10, %p6761_p9 }
 0xca9   :  { %6769 = shalt.err (!%p6766_p11)
}
 0xcaa   :  { %3929 = dma.vmem_to_hbm [thread:$0]  %s3927_s0, 128, %s8539_s8, [#allocation9]  }
 0xcab   :  { %6776 = dma.done.wait [#allocation9], 128  }
 0xcac   :  { %6777 = vsyncadd [#allocation9], 4294967168 }
 0xcad   :  { %3933 = vsyncpa [#allocation8], 1 }
 0xcae   :  { %3934 = vsyncpa [#allocation11], 1 }
 0xcaf   :  { %3935 = vsyncpa [#allocation14], 1 }
 0xcb0   :  { %3936 = vsyncpa [#allocation9], 1 }

</bundles_post_ra>
